<compile_context>
chip_gen: v7x
topology: tpu7x:2x2x1
jax: 0.10.0
libtpu: 0.0.40
codegen_flags: <defaults>
</compile_context>

<pallas_src>
import math

import numpy as np

import jax
import jax.numpy as jnp
from jax.experimental import pallas as pl
from jax.experimental.pallas import tpu as pltpu

L = 16          # RNA sequence length
LL = L * L      # flattened pairwise map size (lane-dense: 256 = 2 * 128)
D = 32          # hidden channels in model_att
T_STEPS = 4     # unrolled post-processing steps (len(map_list))
G = 16          # batch elements per grid step


def _build_constants():
    """0/1 matrices expressing per-element broadcast / reduce / transpose of
    an L x L map stored as 256 lanes, via the MXU (bf16: values exact)."""
    ii = np.arange(LL) // L          # i index of lane n = i*L + j
    jj = np.arange(LL) % L           # j index of lane n
    bc = (np.arange(L)[:, None] == ii[None, :]).astype(np.float32)   # [L, LL]: x[i] -> lane (i,j)
    br = (np.arange(L)[:, None] == jj[None, :]).astype(np.float32)   # [L, LL]: x[j] -> lane (i,j)
    sr = np.ascontiguousarray(bc.T)                                  # [LL, L]: row sums
    sigma = jj * L + ii                                              # lane permutation for transpose
    perm = (np.arange(LL)[:, None] == sigma[None, :]).astype(np.float32)  # [LL, LL]
    # Block-diagonal broadcast constants: ONE K = G*L matmul covers all G maps.
    bc_blk = np.zeros((G * L, G * LL), np.float32)
    br_blk = np.zeros((G * L, G * LL), np.float32)
    for g in range(G):
        bc_blk[g * L:(g + 1) * L, g * LL:(g + 1) * LL] = bc
        br_blk[g * L:(g + 1) * L, g * LL:(g + 1) * LL] = br
    to_bf16 = lambda x: jnp.asarray(x, dtype=jnp.bfloat16)           # 0/1/2 values exact in bf16
    return (to_bf16(bc_blk), to_bf16(br_blk), to_bf16(sr), to_bf16(perm),
            to_bf16(bc + br))


_BC_BLK, _BR_BLK, _SR, _PERM, _BCR = _build_constants()


# --------------------------------------------------------------------------
# Fused kernel: model_att + model_pp for G batch elements per grid step.
# --------------------------------------------------------------------------
def _fused_kernel(prior_ref, seqcm_ref, m_ref, wmat_ref, wcol_ref, small_ref,
                  bcblk_ref, brblk_ref, sr_ref, perm_ref, bcr_ref,
                  u_ref, maps_ref):
    f32, bf16 = jnp.float32, jnp.bfloat16

    wmat = wmat_ref[...]                                 # [D, 4+3D] bf16 (transposed weights)
    w1t = wmat[:, 0:4]                                   # [D, 4]
    wit = wmat[:, 4:4 + D]                               # [D, D]
    wjt = wmat[:, 4 + D:4 + 2 * D]                       # [D, D]
    wc2t = wmat[:, 4 + 2 * D:4 + 3 * D]                  # [D, D]
    wcol = wcol_ref[...]                                 # [D, 4] f32 bias / prior-scale columns
    b1c, wpc, bc1c, bc2c = (wcol[:, k:k + 1] for k in range(4))
    wc3r = small_ref[0:1, :].astype(bf16)                # [1, D]
    bc3 = small_ref[1:2, 0:1]                            # [1, 1]

    # ---------------- model_att (channels on sublanes, (g,i,j) on lanes) ----
    seq_cm = seqcm_ref[...].astype(bf16)                 # [4, G*L] one-hot, exact in bf16
    featT = jnp.maximum(
        jnp.dot(w1t, seq_cm, preferred_element_type=f32) + b1c, 0.0)        # [D, G*L]
    featb = featT.astype(bf16)
    aiT = jnp.dot(wit, featb, preferred_element_type=f32).astype(bf16)      # [D, G*L]
    ajT = jnp.dot(wjt, featb, preferred_element_type=f32).astype(bf16)      # [D, G*L]

    # Pairwise stack for ALL G maps at once: two K=256 matmuls against the
    # block-diagonal constants (replaces G per-element K=16 pushes + concat).
    prior_flat = prior_ref[...]                          # [1, G*LL] lane-flat
    pre = (jnp.dot(aiT, bcblk_ref[...], preferred_element_type=f32)
           + jnp.dot(ajT, brblk_ref[...], preferred_element_type=f32)
           + wpc * prior_flat)                           # [D, G*LL]
    h1 = jnp.maximum(pre + bc1c, 0.0)                    # [D, G*LL]
    h2 = jnp.maximum(
        jnp.dot(wc2t, h1.astype(bf16), preferred_element_type=f32) + bc2c, 0.0)
    c_row = jnp.dot(wc3r, h2.astype(bf16), preferred_element_type=f32)      # [1, G*LL]

    # Regather [1, G*LL] -> [G, LL] with a small mask-accumulate (O(G) vreg
    # ops at G=16; switch to a relayout copy only if G is pushed past ~32).
    row_ids = jax.lax.broadcasted_iota(jnp.int32, (G, 1), 0)
    c = jnp.zeros((G, LL), dtype=f32)
    for g in range(G):
        mask_g = jnp.where(row_ids == g, 1.0, 0.0)                          # [G, 1]
        c = c + mask_g * c_row[:, g * LL:(g + 1) * LL]                      # [G, LL]

    # Symmetrize via the lane-permutation matmul. cb is used for BOTH terms
    # and PERM is 0/1, so u is EXACTLY symmetric (the pp shortcut relies on it).
    cb = c.astype(bf16)
    u = 0.5 * (cb.astype(f32)
               + jnp.dot(cb, perm_ref[...], preferred_element_type=f32)) + bc3
    u_ref[...] = u                                       # att output (lane-dense)

    # ---------------- model_pp (Lag_PP_zero), batched flat [G, LL] ----------
    s_const = math.log(9.0)
    rho, alpha, beta = 1.0, 0.01, 0.1

    def soft_sign(x):                       # e2efold utils.soft_sign (k = 1)
        return jax.nn.sigmoid(2.0 * x)

    m = m_ref[...]                                       # [G, LL] host-precomputed constraint matrix
    SR = sr_ref[...]                                     # [LL, L]
    BCR = bcr_ref[...]                                   # [L, LL]  (BC + BR)

    u_pp = soft_sign(u - s_const) * u
    a_hat = jax.nn.sigmoid(u_pp) * soft_sign(u_pp - s_const)
    # u_pp, m, a_hat are exactly symmetric by construction, so contact_a's
    # 0.5*(a + a^T) is the identity and no map transposes are needed below.
    a = a_hat * a_hat * m                                # [G, LL]
    rs = jnp.dot(a.astype(bf16), SR, preferred_element_type=f32)            # [G, L] row sums
    lmbd = jnp.maximum(rs - 1.0, 0.0)

    for t in range(T_STEPS):                 # unrolled Lagrangian gradient steps
        v = lmbd * soft_sign(rs - 1.0)                                      # [G, L]
        # grad_a + grad_a^T == -u + v_i + v_j   (u symmetric); one merged dot.
        sym = -u_pp + jnp.dot(v.astype(bf16), BCR, preferred_element_type=f32)
        grad = a_hat * m * sym
        a_hat = a_hat - alpha * grad
        alpha *= 0.99
        a_hat = jnp.maximum(jnp.abs(a_hat) - rho * alpha, 0.0)
        a_hat = jnp.clip(a_hat, -1.0, 1.0)
        a = a_hat * a_hat * m
        rs = jnp.dot(a.astype(bf16), SR, preferred_element_type=f32)
        lmbd = lmbd + beta * jnp.maximum(rs - 1.0, 0.0)
        beta *= 0.99
        maps_ref[t] = a                                                     # lane-dense store


# --------------------------------------------------------------------------
# RNA_SS_e2e.forward
# --------------------------------------------------------------------------
def rna_ss_e2e_forward(params, prior, seq, state):
    # `state` is unused by the ContactAttention_simple-style model_att.
    del state
    B = seq.shape[0]
    assert B % G == 0, "batch must be a multiple of G (pad on the host otherwise)"
    nblk = B // G

    # Host-side layout plumbing (tiny; everything the kernel reads is lane-dense).
    prior_flat = prior.reshape(1, B * LL)                       # [1, B*256]
    seq_cm = jnp.transpose(seq, (2, 0, 1)).reshape(4, B * L)    # [4, B*L] channel-major

    # constraint_matrix_batch (AU/CG/UG pairings, symmetric) depends on seq only:
    # precompute in XLA (fuses / overlaps with the kernel) and stream lane-dense.
    base = [seq[:, :, p] for p in range(4)]                     # A, U, C, G  [B, L]
    outer = lambda x, y: x[:, :, None] * y[:, None, :]
    m = (outer(base[0], base[1]) + outer(base[1], base[0])      # AU + UA
         + outer(base[2], base[3]) + outer(base[3], base[2])    # CG + GC
         + outer(base[1], base[3]) + outer(base[3], base[1]))   # UG + GU
    m_flat = m.reshape(B, LL)

    # Packed transposed weights (bf16 -> single-pass MXU) and f32 bias columns.
    wmat = jnp.concatenate(
        [params["w1"].T, params["wi"].T, params["wj"].T, params["wc2"].T],
        axis=1).astype(jnp.bfloat16)                            # [D, 4 + 3D]
    wcol = jnp.concatenate(
        [params["b1"].T, params["wp"].T, params["bc1"].T, params["bc2"].T],
        axis=1)                                                 # [D, 4] f32
    small = jnp.concatenate(
        [params["wc3"], jnp.broadcast_to(params["bc3"], (1, D))], axis=0)   # [2, D] f32

    u_flat, maps = pl.pallas_call(
        _fused_kernel,
        out_shape=(jax.ShapeDtypeStruct((B, LL), jnp.float32),
                   jax.ShapeDtypeStruct((T_STEPS, B, LL), jnp.float32)),
        grid=(nblk,),
        in_specs=[
            pl.BlockSpec((1, G * LL), lambda b: (0, b)),            # prior, lane-flat
            pl.BlockSpec((4, G * L), lambda b: (0, b)),             # seq, channel-major
            pl.BlockSpec((G, LL), lambda b: (b, 0)),                # constraint matrix m
            pl.BlockSpec((D, 4 + 3 * D), lambda b: (0, 0)),         # packed bf16 weights
            pl.BlockSpec((D, 4), lambda b: (0, 0)),                 # bias / prior-scale cols
            pl.BlockSpec((2, D), lambda b: (0, 0)),                 # wc3 / bc3
            pl.BlockSpec((G * L, G * LL), lambda b: (0, 0)),        # BC_blk
            pl.BlockSpec((G * L, G * LL), lambda b: (0, 0)),        # BR_blk
            pl.BlockSpec((LL, L), lambda b: (0, 0)),                # SR
            pl.BlockSpec((LL, LL), lambda b: (0, 0)),               # PERM
            pl.BlockSpec((L, LL), lambda b: (0, 0)),                # BCR = BC + BR
        ],
        out_specs=(
            pl.BlockSpec((G, LL), lambda b: (b, 0)),                # u    (lane-dense)
            pl.BlockSpec((T_STEPS, G, LL), lambda b: (0, b, 0)),    # maps (lane-dense)
        ),
        compiler_params=pltpu.CompilerParams(
            dimension_semantics=("parallel",)),                     # shard steps across v7x TCs
    )(prior_flat, seq_cm, m_flat, wmat, wcol, small,
      _BC_BLK, _BR_BLK, _SR, _PERM, _BCR)

    u = u_flat.reshape(B, L, L)
    map_list = [maps[t].reshape(B, L, L) for t in range(T_STEPS)]
    return u, map_list


def init_params(key):
    keys = jax.random.split(key, 10)
    rnd = lambda k, shape, s=0.1: s * jax.random.normal(k, shape, dtype=jnp.float32)
    return dict(
        w1=rnd(keys[0], (4, D)),
        b1=rnd(keys[1], (1, D)),
        wi=rnd(keys[2], (D, D)),
        wj=rnd(keys[3], (D, D)),
        wp=rnd(keys[4], (1, D)),
        bc1=rnd(keys[5], (1, D)),
        wc2=rnd(keys[6], (D, D)),
        bc2=rnd(keys[7], (1, D)),
        wc3=rnd(keys[8], (1, D)),
        bc3=rnd(keys[9], (1, 1)),
    )


if __name__ == "__main__":
    key = jax.random.PRNGKey(0)
    kp, k1, k2 = jax.random.split(key, 3)
    params = init_params(kp)

    B = 2 * G   # 32: two grid blocks of G=16 -> both v7x TensorCores busy
    # one-hot RNA bases [B, L, 4], prior / state pairwise maps [B, L, L]
    seq = jax.nn.one_hot(
        jnp.argmax(jax.random.normal(k1, (B, L, 4)), axis=-1), 4,
        dtype=jnp.float32)
    prior = jax.random.uniform(k2, (B, L, L), dtype=jnp.float32)
    state = jnp.zeros((B, L, L), dtype=jnp.float32)

    fwd = jax.jit(rna_ss_e2e_forward)
    u, map_list = fwd(params, prior, seq, state)

    jax.block_until_ready(u)
    for a in map_list:
        jax.block_until_ready(a)

    assert u.shape == (B, L, L)
    assert len(map_list) == T_STEPS and map_list[0].shape == (B, L, L)
    assert bool(jnp.all(jnp.isfinite(u)))
    assert all(bool(jnp.all(jnp.isfinite(a))) for a in map_list)
    print("KERNEL_OK")
</pallas_src>

<mosaic_0001>
module attributes {stable_mosaic.version = 11 : i64} {
  func.func @_fused_kernel(%arg0: i32, %arg1: memref<1x4096xf32, #tpu.memory_space<vmem>>, %arg2: memref<4x256xf32, #tpu.memory_space<vmem>>, %arg3: memref<16x256xf32, #tpu.memory_space<vmem>>, %arg4: memref<32x100xbf16, #tpu.memory_space<vmem>>, %arg5: memref<32x4xf32, #tpu.memory_space<vmem>>, %arg6: memref<2x32xf32, #tpu.memory_space<vmem>>, %arg7: memref<256x4096xbf16, #tpu.memory_space<vmem>>, %arg8: memref<256x4096xbf16, #tpu.memory_space<vmem>>, %arg9: memref<256x16xbf16, #tpu.memory_space<vmem>>, %arg10: memref<256x256xbf16, #tpu.memory_space<vmem>>, %arg11: memref<16x256xbf16, #tpu.memory_space<vmem>>, %arg12: memref<16x256xf32, #tpu.memory_space<vmem>>, %arg13: memref<4x16x256xf32, #tpu.memory_space<vmem>>) attributes {dimension_semantics = [#tpu.dimension_semantics<parallel>], iteration_bounds = array<i64: 2>, scalar_prefetch = 0 : i64, scratch_operands = 0 : i64, tpu.core_type = #tpu.core_type<tc>, window_params = [{transform_indices = @transform_0, window_bounds = array<i64: 1, 4096>}, {transform_indices = @transform_1, window_bounds = array<i64: 4, 256>}, {transform_indices = @transform_2, window_bounds = array<i64: 16, 256>}, {pipeline_mode = #tpu.pipeline_mode<synchronous>, transform_indices = @transform_3, window_bounds = array<i64: 32, 100>}, {pipeline_mode = #tpu.pipeline_mode<synchronous>, transform_indices = @transform_4, window_bounds = array<i64: 32, 4>}, {pipeline_mode = #tpu.pipeline_mode<synchronous>, transform_indices = @transform_5, window_bounds = array<i64: 2, 32>}, {pipeline_mode = #tpu.pipeline_mode<synchronous>, transform_indices = @transform_6, window_bounds = array<i64: 256, 4096>}, {pipeline_mode = #tpu.pipeline_mode<synchronous>, transform_indices = @transform_7, window_bounds = array<i64: 256, 4096>}, {pipeline_mode = #tpu.pipeline_mode<synchronous>, transform_indices = @transform_8, window_bounds = array<i64: 256, 16>}, {pipeline_mode = #tpu.pipeline_mode<synchronous>, transform_indices = @transform_9, window_bounds = array<i64: 256, 256>}, {pipeline_mode = #tpu.pipeline_mode<synchronous>, transform_indices = @transform_10, window_bounds = array<i64: 16, 256>}, {transform_indices = @transform_11, window_bounds = array<i64: 16, 256>}, {transform_indices = @transform_12, window_bounds = array<i64: 4, 16, 256>}]} {
    %c0 = arith.constant 0 : index
    %c0_0 = arith.constant 0 : index
    %0 = vector.load %arg4[%c0, %c0_0] : memref<32x100xbf16, #tpu.memory_space<vmem>>, vector<32x100xbf16>
    %1 = vector.extract_strided_slice %0 {offsets = [0, 0], sizes = [32, 4], strides = [1, 1]} : vector<32x100xbf16> to vector<32x4xbf16>
    %2 = vector.extract_strided_slice %0 {offsets = [0, 4], sizes = [32, 32], strides = [1, 1]} : vector<32x100xbf16> to vector<32x32xbf16>
    %3 = vector.extract_strided_slice %0 {offsets = [0, 36], sizes = [32, 32], strides = [1, 1]} : vector<32x100xbf16> to vector<32x32xbf16>
    %4 = vector.extract_strided_slice %0 {offsets = [0, 68], sizes = [32, 32], strides = [1, 1]} : vector<32x100xbf16> to vector<32x32xbf16>
    %c0_1 = arith.constant 0 : index
    %c0_2 = arith.constant 0 : index
    %5 = vector.load %arg5[%c0_1, %c0_2] : memref<32x4xf32, #tpu.memory_space<vmem>>, vector<32x4xf32>
    %6 = vector.extract_strided_slice %5 {offsets = [0, 0], sizes = [32, 1], strides = [1, 1]} : vector<32x4xf32> to vector<32x1xf32>
    %7 = vector.extract_strided_slice %5 {offsets = [0, 1], sizes = [32, 1], strides = [1, 1]} : vector<32x4xf32> to vector<32x1xf32>
    %8 = vector.extract_strided_slice %5 {offsets = [0, 2], sizes = [32, 1], strides = [1, 1]} : vector<32x4xf32> to vector<32x1xf32>
    %9 = vector.extract_strided_slice %5 {offsets = [0, 3], sizes = [32, 1], strides = [1, 1]} : vector<32x4xf32> to vector<32x1xf32>
    %c0_3 = arith.constant 0 : index
    %c0_4 = arith.constant 0 : index
    %10 = vector.load %arg6[%c0_3, %c0_4] : memref<2x32xf32, #tpu.memory_space<vmem>>, vector<1x32xf32>
    %11 = arith.truncf %10 : vector<1x32xf32> to vector<1x32xbf16>
    %c1 = arith.constant 1 : index
    %c0_5 = arith.constant 0 : index
    %12 = vector.load %arg6[%c1, %c0_5] : memref<2x32xf32, #tpu.memory_space<vmem>>, vector<1x1xf32>
    %c0_6 = arith.constant 0 : index
    %c0_7 = arith.constant 0 : index
    %13 = vector.load %arg2[%c0_6, %c0_7] : memref<4x256xf32, #tpu.memory_space<vmem>>, vector<4x256xf32>
    %14 = arith.truncf %13 : vector<4x256xf32> to vector<4x256xbf16>
    %cst = arith.constant dense<0.000000e+00> : vector<32x256xf32>
    %15 = tpu.matmul %1, %14, %cst {dimension_numbers = #tpu.dot_dimension_numbers<[1], [0], [0], [1], [0, 0, 1, 1], [], []>} : vector<32x4xbf16>, vector<4x256xbf16>, vector<32x256xf32> -> vector<32x256xf32>
    %16 = vector.broadcast %6 : vector<32x1xf32> to vector<32x256xf32>
    %17 = arith.addf %15, %16 : vector<32x256xf32>
    %cst_8 = arith.constant 0.000000e+00 : f32
    %18 = vector.broadcast %cst_8 : f32 to vector<32x256xf32>
    %19 = arith.maximumf %17, %18 : vector<32x256xf32>
    %20 = arith.truncf %19 : vector<32x256xf32> to vector<32x256xbf16>
    %cst_9 = arith.constant dense<0.000000e+00> : vector<32x256xf32>
    %21 = tpu.matmul %2, %20, %cst_9 {dimension_numbers = #tpu.dot_dimension_numbers<[1], [0], [0], [1], [0, 0, 1, 1], [], []>} : vector<32x32xbf16>, vector<32x256xbf16>, vector<32x256xf32> -> vector<32x256xf32>
    %22 = arith.truncf %21 : vector<32x256xf32> to vector<32x256xbf16>
    %cst_10 = arith.constant dense<0.000000e+00> : vector<32x256xf32>
    %23 = tpu.matmul %3, %20, %cst_10 {dimension_numbers = #tpu.dot_dimension_numbers<[1], [0], [0], [1], [0, 0, 1, 1], [], []>} : vector<32x32xbf16>, vector<32x256xbf16>, vector<32x256xf32> -> vector<32x256xf32>
    %24 = arith.truncf %23 : vector<32x256xf32> to vector<32x256xbf16>
    %c0_11 = arith.constant 0 : index
    %c0_12 = arith.constant 0 : index
    %25 = vector.load %arg1[%c0_11, %c0_12] : memref<1x4096xf32, #tpu.memory_space<vmem>>, vector<1x4096xf32>
    %c0_13 = arith.constant 0 : index
    %c0_14 = arith.constant 0 : index
    %26 = vector.load %arg7[%c0_13, %c0_14] : memref<256x4096xbf16, #tpu.memory_space<vmem>>, vector<256x4096xbf16>
    %cst_15 = arith.constant dense<0.000000e+00> : vector<32x4096xf32>
    %27 = tpu.matmul %22, %26, %cst_15 {dimension_numbers = #tpu.dot_dimension_numbers<[1], [0], [0], [1], [0, 0, 1, 1], [], []>} : vector<32x256xbf16>, vector<256x4096xbf16>, vector<32x4096xf32> -> vector<32x4096xf32>
    %c0_16 = arith.constant 0 : index
    %c0_17 = arith.constant 0 : index
    %28 = vector.load %arg8[%c0_16, %c0_17] : memref<256x4096xbf16, #tpu.memory_space<vmem>>, vector<256x4096xbf16>
    %cst_18 = arith.constant dense<0.000000e+00> : vector<32x4096xf32>
    %29 = tpu.matmul %24, %28, %cst_18 {dimension_numbers = #tpu.dot_dimension_numbers<[1], [0], [0], [1], [0, 0, 1, 1], [], []>} : vector<32x256xbf16>, vector<256x4096xbf16>, vector<32x4096xf32> -> vector<32x4096xf32>
    %30 = arith.addf %27, %29 : vector<32x4096xf32>
    %31 = vector.broadcast %7 : vector<32x1xf32> to vector<32x4096xf32>
    %32 = vector.broadcast %25 : vector<1x4096xf32> to vector<32x4096xf32>
    %33 = arith.mulf %31, %32 : vector<32x4096xf32>
    %34 = arith.addf %30, %33 : vector<32x4096xf32>
    %35 = vector.broadcast %8 : vector<32x1xf32> to vector<32x4096xf32>
    %36 = arith.addf %34, %35 : vector<32x4096xf32>
    %cst_19 = arith.constant 0.000000e+00 : f32
    %37 = vector.broadcast %cst_19 : f32 to vector<32x4096xf32>
    %38 = arith.maximumf %36, %37 : vector<32x4096xf32>
    %39 = arith.truncf %38 : vector<32x4096xf32> to vector<32x4096xbf16>
    %cst_20 = arith.constant dense<0.000000e+00> : vector<32x4096xf32>
    %40 = tpu.matmul %4, %39, %cst_20 {dimension_numbers = #tpu.dot_dimension_numbers<[1], [0], [0], [1], [0, 0, 1, 1], [], []>} : vector<32x32xbf16>, vector<32x4096xbf16>, vector<32x4096xf32> -> vector<32x4096xf32>
    %41 = vector.broadcast %9 : vector<32x1xf32> to vector<32x4096xf32>
    %42 = arith.addf %40, %41 : vector<32x4096xf32>
    %cst_21 = arith.constant 0.000000e+00 : f32
    %43 = vector.broadcast %cst_21 : f32 to vector<32x4096xf32>
    %44 = arith.maximumf %42, %43 : vector<32x4096xf32>
    %45 = arith.truncf %44 : vector<32x4096xf32> to vector<32x4096xbf16>
    %cst_22 = arith.constant dense<0.000000e+00> : vector<1x4096xf32>
    %46 = tpu.matmul %11, %45, %cst_22 {dimension_numbers = #tpu.dot_dimension_numbers<[1], [0], [0], [1], [0, 0, 1, 1], [], []>} : vector<1x32xbf16>, vector<32x4096xbf16>, vector<1x4096xf32> -> vector<1x4096xf32>
    %47 = tpu.iota {dimensions = array<i32: 0>} : vector<16x1xi32>
    %cst_23 = arith.constant 0.000000e+00 : f32
    %48 = vector.broadcast %cst_23 : f32 to vector<16x256xf32>
    %c0_i32 = arith.constant 0 : i32
    %49 = vector.broadcast %c0_i32 : i32 to vector<16x1xi32>
    %50 = arith.cmpi eq, %47, %49 : vector<16x1xi32>
    %cst_24 = arith.constant 1.000000e+00 : f32
    %cst_25 = arith.constant 0.000000e+00 : f32
    %51 = vector.broadcast %cst_24 : f32 to vector<16x1xf32>
    %52 = vector.broadcast %cst_25 : f32 to vector<16x1xf32>
    %53 = arith.select %50, %51, %52 : vector<16x1xi1>, vector<16x1xf32>
    %54 = vector.extract_strided_slice %46 {offsets = [0, 0], sizes = [1, 256], strides = [1, 1]} : vector<1x4096xf32> to vector<1x256xf32>
    %55 = vector.broadcast %53 : vector<16x1xf32> to vector<16x256xf32>
    %56 = vector.broadcast %54 : vector<1x256xf32> to vector<16x256xf32>
    %57 = arith.mulf %55, %56 : vector<16x256xf32>
    %58 = arith.addf %48, %57 : vector<16x256xf32>
    %c1_i32 = arith.constant 1 : i32
    %59 = vector.broadcast %c1_i32 : i32 to vector<16x1xi32>
    %60 = arith.cmpi eq, %47, %59 : vector<16x1xi32>
    %cst_26 = arith.constant 1.000000e+00 : f32
    %cst_27 = arith.constant 0.000000e+00 : f32
    %61 = vector.broadcast %cst_26 : f32 to vector<16x1xf32>
    %62 = vector.broadcast %cst_27 : f32 to vector<16x1xf32>
    %63 = arith.select %60, %61, %62 : vector<16x1xi1>, vector<16x1xf32>
    %64 = vector.extract_strided_slice %46 {offsets = [0, 256], sizes = [1, 256], strides = [1, 1]} : vector<1x4096xf32> to vector<1x256xf32>
    %65 = vector.broadcast %63 : vector<16x1xf32> to vector<16x256xf32>
    %66 = vector.broadcast %64 : vector<1x256xf32> to vector<16x256xf32>
    %67 = arith.mulf %65, %66 : vector<16x256xf32>
    %68 = arith.addf %58, %67 : vector<16x256xf32>
    %c2_i32 = arith.constant 2 : i32
    %69 = vector.broadcast %c2_i32 : i32 to vector<16x1xi32>
    %70 = arith.cmpi eq, %47, %69 : vector<16x1xi32>
    %cst_28 = arith.constant 1.000000e+00 : f32
    %cst_29 = arith.constant 0.000000e+00 : f32
    %71 = vector.broadcast %cst_28 : f32 to vector<16x1xf32>
    %72 = vector.broadcast %cst_29 : f32 to vector<16x1xf32>
    %73 = arith.select %70, %71, %72 : vector<16x1xi1>, vector<16x1xf32>
    %74 = vector.extract_strided_slice %46 {offsets = [0, 512], sizes = [1, 256], strides = [1, 1]} : vector<1x4096xf32> to vector<1x256xf32>
    %75 = vector.broadcast %73 : vector<16x1xf32> to vector<16x256xf32>
    %76 = vector.broadcast %74 : vector<1x256xf32> to vector<16x256xf32>
    %77 = arith.mulf %75, %76 : vector<16x256xf32>
    %78 = arith.addf %68, %77 : vector<16x256xf32>
    %c3_i32 = arith.constant 3 : i32
    %79 = vector.broadcast %c3_i32 : i32 to vector<16x1xi32>
    %80 = arith.cmpi eq, %47, %79 : vector<16x1xi32>
    %cst_30 = arith.constant 1.000000e+00 : f32
    %cst_31 = arith.constant 0.000000e+00 : f32
    %81 = vector.broadcast %cst_30 : f32 to vector<16x1xf32>
    %82 = vector.broadcast %cst_31 : f32 to vector<16x1xf32>
    %83 = arith.select %80, %81, %82 : vector<16x1xi1>, vector<16x1xf32>
    %84 = vector.extract_strided_slice %46 {offsets = [0, 768], sizes = [1, 256], strides = [1, 1]} : vector<1x4096xf32> to vector<1x256xf32>
    %85 = vector.broadcast %83 : vector<16x1xf32> to vector<16x256xf32>
    %86 = vector.broadcast %84 : vector<1x256xf32> to vector<16x256xf32>
    %87 = arith.mulf %85, %86 : vector<16x256xf32>
    %88 = arith.addf %78, %87 : vector<16x256xf32>
    %c4_i32 = arith.constant 4 : i32
    %89 = vector.broadcast %c4_i32 : i32 to vector<16x1xi32>
    %90 = arith.cmpi eq, %47, %89 : vector<16x1xi32>
    %cst_32 = arith.constant 1.000000e+00 : f32
    %cst_33 = arith.constant 0.000000e+00 : f32
    %91 = vector.broadcast %cst_32 : f32 to vector<16x1xf32>
    %92 = vector.broadcast %cst_33 : f32 to vector<16x1xf32>
    %93 = arith.select %90, %91, %92 : vector<16x1xi1>, vector<16x1xf32>
    %94 = vector.extract_strided_slice %46 {offsets = [0, 1024], sizes = [1, 256], strides = [1, 1]} : vector<1x4096xf32> to vector<1x256xf32>
    %95 = vector.broadcast %93 : vector<16x1xf32> to vector<16x256xf32>
    %96 = vector.broadcast %94 : vector<1x256xf32> to vector<16x256xf32>
    %97 = arith.mulf %95, %96 : vector<16x256xf32>
    %98 = arith.addf %88, %97 : vector<16x256xf32>
    %c5_i32 = arith.constant 5 : i32
    %99 = vector.broadcast %c5_i32 : i32 to vector<16x1xi32>
    %100 = arith.cmpi eq, %47, %99 : vector<16x1xi32>
    %cst_34 = arith.constant 1.000000e+00 : f32
    %cst_35 = arith.constant 0.000000e+00 : f32
    %101 = vector.broadcast %cst_34 : f32 to vector<16x1xf32>
    %102 = vector.broadcast %cst_35 : f32 to vector<16x1xf32>
    %103 = arith.select %100, %101, %102 : vector<16x1xi1>, vector<16x1xf32>
    %104 = vector.extract_strided_slice %46 {offsets = [0, 1280], sizes = [1, 256], strides = [1, 1]} : vector<1x4096xf32> to vector<1x256xf32>
    %105 = vector.broadcast %103 : vector<16x1xf32> to vector<16x256xf32>
    %106 = vector.broadcast %104 : vector<1x256xf32> to vector<16x256xf32>
    %107 = arith.mulf %105, %106 : vector<16x256xf32>
    %108 = arith.addf %98, %107 : vector<16x256xf32>
    %c6_i32 = arith.constant 6 : i32
    %109 = vector.broadcast %c6_i32 : i32 to vector<16x1xi32>
    %110 = arith.cmpi eq, %47, %109 : vector<16x1xi32>
    %cst_36 = arith.constant 1.000000e+00 : f32
    %cst_37 = arith.constant 0.000000e+00 : f32
    %111 = vector.broadcast %cst_36 : f32 to vector<16x1xf32>
    %112 = vector.broadcast %cst_37 : f32 to vector<16x1xf32>
    %113 = arith.select %110, %111, %112 : vector<16x1xi1>, vector<16x1xf32>
    %114 = vector.extract_strided_slice %46 {offsets = [0, 1536], sizes = [1, 256], strides = [1, 1]} : vector<1x4096xf32> to vector<1x256xf32>
    %115 = vector.broadcast %113 : vector<16x1xf32> to vector<16x256xf32>
    %116 = vector.broadcast %114 : vector<1x256xf32> to vector<16x256xf32>
    %117 = arith.mulf %115, %116 : vector<16x256xf32>
    %118 = arith.addf %108, %117 : vector<16x256xf32>
    %c7_i32 = arith.constant 7 : i32
    %119 = vector.broadcast %c7_i32 : i32 to vector<16x1xi32>
    %120 = arith.cmpi eq, %47, %119 : vector<16x1xi32>
    %cst_38 = arith.constant 1.000000e+00 : f32
    %cst_39 = arith.constant 0.000000e+00 : f32
    %121 = vector.broadcast %cst_38 : f32 to vector<16x1xf32>
    %122 = vector.broadcast %cst_39 : f32 to vector<16x1xf32>
    %123 = arith.select %120, %121, %122 : vector<16x1xi1>, vector<16x1xf32>
    %124 = vector.extract_strided_slice %46 {offsets = [0, 1792], sizes = [1, 256], strides = [1, 1]} : vector<1x4096xf32> to vector<1x256xf32>
    %125 = vector.broadcast %123 : vector<16x1xf32> to vector<16x256xf32>
    %126 = vector.broadcast %124 : vector<1x256xf32> to vector<16x256xf32>
    %127 = arith.mulf %125, %126 : vector<16x256xf32>
    %128 = arith.addf %118, %127 : vector<16x256xf32>
    %c8_i32 = arith.constant 8 : i32
    %129 = vector.broadcast %c8_i32 : i32 to vector<16x1xi32>
    %130 = arith.cmpi eq, %47, %129 : vector<16x1xi32>
    %cst_40 = arith.constant 1.000000e+00 : f32
    %cst_41 = arith.constant 0.000000e+00 : f32
    %131 = vector.broadcast %cst_40 : f32 to vector<16x1xf32>
    %132 = vector.broadcast %cst_41 : f32 to vector<16x1xf32>
    %133 = arith.select %130, %131, %132 : vector<16x1xi1>, vector<16x1xf32>
    %134 = vector.extract_strided_slice %46 {offsets = [0, 2048], sizes = [1, 256], strides = [1, 1]} : vector<1x4096xf32> to vector<1x256xf32>
    %135 = vector.broadcast %133 : vector<16x1xf32> to vector<16x256xf32>
    %136 = vector.broadcast %134 : vector<1x256xf32> to vector<16x256xf32>
    %137 = arith.mulf %135, %136 : vector<16x256xf32>
    %138 = arith.addf %128, %137 : vector<16x256xf32>
    %c9_i32 = arith.constant 9 : i32
    %139 = vector.broadcast %c9_i32 : i32 to vector<16x1xi32>
    %140 = arith.cmpi eq, %47, %139 : vector<16x1xi32>
    %cst_42 = arith.constant 1.000000e+00 : f32
    %cst_43 = arith.constant 0.000000e+00 : f32
    %141 = vector.broadcast %cst_42 : f32 to vector<16x1xf32>
    %142 = vector.broadcast %cst_43 : f32 to vector<16x1xf32>
    %143 = arith.select %140, %141, %142 : vector<16x1xi1>, vector<16x1xf32>
    %144 = vector.extract_strided_slice %46 {offsets = [0, 2304], sizes = [1, 256], strides = [1, 1]} : vector<1x4096xf32> to vector<1x256xf32>
    %145 = vector.broadcast %143 : vector<16x1xf32> to vector<16x256xf32>
    %146 = vector.broadcast %144 : vector<1x256xf32> to vector<16x256xf32>
    %147 = arith.mulf %145, %146 : vector<16x256xf32>
    %148 = arith.addf %138, %147 : vector<16x256xf32>
    %c10_i32 = arith.constant 10 : i32
    %149 = vector.broadcast %c10_i32 : i32 to vector<16x1xi32>
    %150 = arith.cmpi eq, %47, %149 : vector<16x1xi32>
    %cst_44 = arith.constant 1.000000e+00 : f32
    %cst_45 = arith.constant 0.000000e+00 : f32
    %151 = vector.broadcast %cst_44 : f32 to vector<16x1xf32>
    %152 = vector.broadcast %cst_45 : f32 to vector<16x1xf32>
    %153 = arith.select %150, %151, %152 : vector<16x1xi1>, vector<16x1xf32>
    %154 = vector.extract_strided_slice %46 {offsets = [0, 2560], sizes = [1, 256], strides = [1, 1]} : vector<1x4096xf32> to vector<1x256xf32>
    %155 = vector.broadcast %153 : vector<16x1xf32> to vector<16x256xf32>
    %156 = vector.broadcast %154 : vector<1x256xf32> to vector<16x256xf32>
    %157 = arith.mulf %155, %156 : vector<16x256xf32>
    %158 = arith.addf %148, %157 : vector<16x256xf32>
    %c11_i32 = arith.constant 11 : i32
    %159 = vector.broadcast %c11_i32 : i32 to vector<16x1xi32>
    %160 = arith.cmpi eq, %47, %159 : vector<16x1xi32>
    %cst_46 = arith.constant 1.000000e+00 : f32
    %cst_47 = arith.constant 0.000000e+00 : f32
    %161 = vector.broadcast %cst_46 : f32 to vector<16x1xf32>
    %162 = vector.broadcast %cst_47 : f32 to vector<16x1xf32>
    %163 = arith.select %160, %161, %162 : vector<16x1xi1>, vector<16x1xf32>
    %164 = vector.extract_strided_slice %46 {offsets = [0, 2816], sizes = [1, 256], strides = [1, 1]} : vector<1x4096xf32> to vector<1x256xf32>
    %165 = vector.broadcast %163 : vector<16x1xf32> to vector<16x256xf32>
    %166 = vector.broadcast %164 : vector<1x256xf32> to vector<16x256xf32>
    %167 = arith.mulf %165, %166 : vector<16x256xf32>
    %168 = arith.addf %158, %167 : vector<16x256xf32>
    %c12_i32 = arith.constant 12 : i32
    %169 = vector.broadcast %c12_i32 : i32 to vector<16x1xi32>
    %170 = arith.cmpi eq, %47, %169 : vector<16x1xi32>
    %cst_48 = arith.constant 1.000000e+00 : f32
    %cst_49 = arith.constant 0.000000e+00 : f32
    %171 = vector.broadcast %cst_48 : f32 to vector<16x1xf32>
    %172 = vector.broadcast %cst_49 : f32 to vector<16x1xf32>
    %173 = arith.select %170, %171, %172 : vector<16x1xi1>, vector<16x1xf32>
    %174 = vector.extract_strided_slice %46 {offsets = [0, 3072], sizes = [1, 256], strides = [1, 1]} : vector<1x4096xf32> to vector<1x256xf32>
    %175 = vector.broadcast %173 : vector<16x1xf32> to vector<16x256xf32>
    %176 = vector.broadcast %174 : vector<1x256xf32> to vector<16x256xf32>
    %177 = arith.mulf %175, %176 : vector<16x256xf32>
    %178 = arith.addf %168, %177 : vector<16x256xf32>
    %c13_i32 = arith.constant 13 : i32
    %179 = vector.broadcast %c13_i32 : i32 to vector<16x1xi32>
    %180 = arith.cmpi eq, %47, %179 : vector<16x1xi32>
    %cst_50 = arith.constant 1.000000e+00 : f32
    %cst_51 = arith.constant 0.000000e+00 : f32
    %181 = vector.broadcast %cst_50 : f32 to vector<16x1xf32>
    %182 = vector.broadcast %cst_51 : f32 to vector<16x1xf32>
    %183 = arith.select %180, %181, %182 : vector<16x1xi1>, vector<16x1xf32>
    %184 = vector.extract_strided_slice %46 {offsets = [0, 3328], sizes = [1, 256], strides = [1, 1]} : vector<1x4096xf32> to vector<1x256xf32>
    %185 = vector.broadcast %183 : vector<16x1xf32> to vector<16x256xf32>
    %186 = vector.broadcast %184 : vector<1x256xf32> to vector<16x256xf32>
    %187 = arith.mulf %185, %186 : vector<16x256xf32>
    %188 = arith.addf %178, %187 : vector<16x256xf32>
    %c14_i32 = arith.constant 14 : i32
    %189 = vector.broadcast %c14_i32 : i32 to vector<16x1xi32>
    %190 = arith.cmpi eq, %47, %189 : vector<16x1xi32>
    %cst_52 = arith.constant 1.000000e+00 : f32
    %cst_53 = arith.constant 0.000000e+00 : f32
    %191 = vector.broadcast %cst_52 : f32 to vector<16x1xf32>
    %192 = vector.broadcast %cst_53 : f32 to vector<16x1xf32>
    %193 = arith.select %190, %191, %192 : vector<16x1xi1>, vector<16x1xf32>
    %194 = vector.extract_strided_slice %46 {offsets = [0, 3584], sizes = [1, 256], strides = [1, 1]} : vector<1x4096xf32> to vector<1x256xf32>
    %195 = vector.broadcast %193 : vector<16x1xf32> to vector<16x256xf32>
    %196 = vector.broadcast %194 : vector<1x256xf32> to vector<16x256xf32>
    %197 = arith.mulf %195, %196 : vector<16x256xf32>
    %198 = arith.addf %188, %197 : vector<16x256xf32>
    %c15_i32 = arith.constant 15 : i32
    %199 = vector.broadcast %c15_i32 : i32 to vector<16x1xi32>
    %200 = arith.cmpi eq, %47, %199 : vector<16x1xi32>
    %cst_54 = arith.constant 1.000000e+00 : f32
    %cst_55 = arith.constant 0.000000e+00 : f32
    %201 = vector.broadcast %cst_54 : f32 to vector<16x1xf32>
    %202 = vector.broadcast %cst_55 : f32 to vector<16x1xf32>
    %203 = arith.select %200, %201, %202 : vector<16x1xi1>, vector<16x1xf32>
    %204 = vector.extract_strided_slice %46 {offsets = [0, 3840], sizes = [1, 256], strides = [1, 1]} : vector<1x4096xf32> to vector<1x256xf32>
    %205 = vector.broadcast %203 : vector<16x1xf32> to vector<16x256xf32>
    %206 = vector.broadcast %204 : vector<1x256xf32> to vector<16x256xf32>
    %207 = arith.mulf %205, %206 : vector<16x256xf32>
    %208 = arith.addf %198, %207 : vector<16x256xf32>
    %209 = arith.truncf %208 : vector<16x256xf32> to vector<16x256xbf16>
    %210 = arith.extf %209 : vector<16x256xbf16> to vector<16x256xf32>
    %c0_56 = arith.constant 0 : index
    %c0_57 = arith.constant 0 : index
    %211 = vector.load %arg10[%c0_56, %c0_57] : memref<256x256xbf16, #tpu.memory_space<vmem>>, vector<256x256xbf16>
    %cst_58 = arith.constant dense<0.000000e+00> : vector<16x256xf32>
    %212 = tpu.matmul %209, %211, %cst_58 {dimension_numbers = #tpu.dot_dimension_numbers<[1], [0], [0], [1], [0, 0, 1, 1], [], []>} : vector<16x256xbf16>, vector<256x256xbf16>, vector<16x256xf32> -> vector<16x256xf32>
    %213 = arith.addf %210, %212 : vector<16x256xf32>
    %cst_59 = arith.constant 5.000000e-01 : f32
    %214 = vector.broadcast %cst_59 : f32 to vector<16x256xf32>
    %215 = arith.mulf %214, %213 : vector<16x256xf32>
    %216 = vector.broadcast %12 : vector<1x1xf32> to vector<16x256xf32>
    %217 = arith.addf %215, %216 : vector<16x256xf32>
    %c0_60 = arith.constant 0 : index
    %c0_61 = arith.constant 0 : index
    %218 = vector.load %arg12[%c0_60, %c0_61] : memref<16x256xf32, #tpu.memory_space<vmem>>, vector<16x256xf32>
    tpu.vector_store %arg12[%c0_60, %c0_61], %217 {strides = array<i32>} : memref<16x256xf32, #tpu.memory_space<vmem>>, vector<16x256xf32>,
    %c0_62 = arith.constant 0 : index
    %c0_63 = arith.constant 0 : index
    %219 = vector.load %arg3[%c0_62, %c0_63] : memref<16x256xf32, #tpu.memory_space<vmem>>, vector<16x256xf32>
    %c0_64 = arith.constant 0 : index
    %c0_65 = arith.constant 0 : index
    %220 = vector.load %arg9[%c0_64, %c0_65] : memref<256x16xbf16, #tpu.memory_space<vmem>>, vector<256x16xbf16>
    %c0_66 = arith.constant 0 : index
    %c0_67 = arith.constant 0 : index
    %221 = vector.load %arg11[%c0_66, %c0_67] : memref<16x256xbf16, #tpu.memory_space<vmem>>, vector<16x256xbf16>
    %cst_68 = arith.constant 2.19722462 : f32
    %222 = vector.broadcast %cst_68 : f32 to vector<16x256xf32>
    %223 = arith.subf %217, %222 : vector<16x256xf32>
    %cst_69 = arith.constant 2.000000e+00 : f32
    %224 = vector.broadcast %cst_69 : f32 to vector<16x256xf32>
    %225 = arith.mulf %224, %223 : vector<16x256xf32>
    %226 = arith.negf %225 : vector<16x256xf32>
    %227 = math.exp %226 : vector<16x256xf32>
    %cst_70 = arith.constant 1.000000e+00 : f32
    %228 = vector.broadcast %cst_70 : f32 to vector<16x256xf32>
    %229 = arith.addf %228, %227 : vector<16x256xf32>
    %230 = arith.divf %228, %229 : vector<16x256xf32>
    %231 = arith.mulf %230, %217 : vector<16x256xf32>
    %232 = arith.negf %231 : vector<16x256xf32>
    %233 = math.exp %232 : vector<16x256xf32>
    %cst_71 = arith.constant 1.000000e+00 : f32
    %234 = vector.broadcast %cst_71 : f32 to vector<16x256xf32>
    %235 = arith.addf %234, %233 : vector<16x256xf32>
    %236 = arith.divf %234, %235 : vector<16x256xf32>
    %cst_72 = arith.constant 2.19722462 : f32
    %237 = vector.broadcast %cst_72 : f32 to vector<16x256xf32>
    %238 = arith.subf %231, %237 : vector<16x256xf32>
    %cst_73 = arith.constant 2.000000e+00 : f32
    %239 = vector.broadcast %cst_73 : f32 to vector<16x256xf32>
    %240 = arith.mulf %239, %238 : vector<16x256xf32>
    %241 = arith.negf %240 : vector<16x256xf32>
    %242 = math.exp %241 : vector<16x256xf32>
    %cst_74 = arith.constant 1.000000e+00 : f32
    %243 = vector.broadcast %cst_74 : f32 to vector<16x256xf32>
    %244 = arith.addf %243, %242 : vector<16x256xf32>
    %245 = arith.divf %243, %244 : vector<16x256xf32>
    %246 = arith.mulf %236, %245 : vector<16x256xf32>
    %247 = arith.mulf %246, %246 : vector<16x256xf32>
    %248 = arith.mulf %247, %219 : vector<16x256xf32>
    %249 = arith.truncf %248 : vector<16x256xf32> to vector<16x256xbf16>
    %cst_75 = arith.constant dense<0.000000e+00> : vector<16x16xf32>
    %250 = tpu.matmul %249, %220, %cst_75 {dimension_numbers = #tpu.dot_dimension_numbers<[1], [0], [0], [1], [0, 0, 1, 1], [], []>} : vector<16x256xbf16>, vector<256x16xbf16>, vector<16x16xf32> -> vector<16x16xf32>
    %cst_76 = arith.constant 1.000000e+00 : f32
    %251 = vector.broadcast %cst_76 : f32 to vector<16x16xf32>
    %252 = arith.subf %250, %251 : vector<16x16xf32>
    %cst_77 = arith.constant 0.000000e+00 : f32
    %253 = vector.broadcast %cst_77 : f32 to vector<16x16xf32>
    %254 = arith.maximumf %252, %253 : vector<16x16xf32>
    %cst_78 = arith.constant 1.000000e+00 : f32
    %255 = vector.broadcast %cst_78 : f32 to vector<16x16xf32>
    %256 = arith.subf %250, %255 : vector<16x16xf32>
    %cst_79 = arith.constant 2.000000e+00 : f32
    %257 = vector.broadcast %cst_79 : f32 to vector<16x16xf32>
    %258 = arith.mulf %257, %256 : vector<16x16xf32>
    %259 = arith.negf %258 : vector<16x16xf32>
    %260 = math.exp %259 : vector<16x16xf32>
    %cst_80 = arith.constant 1.000000e+00 : f32
    %261 = vector.broadcast %cst_80 : f32 to vector<16x16xf32>
    %262 = arith.addf %261, %260 : vector<16x16xf32>
    %263 = arith.divf %261, %262 : vector<16x16xf32>
    %264 = arith.mulf %254, %263 : vector<16x16xf32>
    %cst_81 = arith.constant 0.000000e+00 : f32
    %265 = vector.broadcast %cst_81 : f32 to vector<16x256xf32>
    %266 = arith.subf %265, %231 : vector<16x256xf32>
    %267 = arith.truncf %264 : vector<16x16xf32> to vector<16x16xbf16>
    %cst_82 = arith.constant dense<0.000000e+00> : vector<16x256xf32>
    %268 = tpu.matmul %267, %221, %cst_82 {dimension_numbers = #tpu.dot_dimension_numbers<[1], [0], [0], [1], [0, 0, 1, 1], [], []>} : vector<16x16xbf16>, vector<16x256xbf16>, vector<16x256xf32> -> vector<16x256xf32>
    %269 = arith.addf %266, %268 : vector<16x256xf32>
    %270 = arith.mulf %246, %219 : vector<16x256xf32>
    %271 = arith.mulf %270, %269 : vector<16x256xf32>
    %cst_83 = arith.constant 0.00999999977 : f32
    %272 = vector.broadcast %cst_83 : f32 to vector<16x256xf32>
    %273 = arith.mulf %272, %271 : vector<16x256xf32>
    %274 = arith.subf %246, %273 : vector<16x256xf32>
    %275 = math.absf %274 : vector<16x256xf32>
    %cst_84 = arith.constant 0.00989999994 : f32
    %276 = vector.broadcast %cst_84 : f32 to vector<16x256xf32>
    %277 = arith.subf %275, %276 : vector<16x256xf32>
    %cst_85 = arith.constant 0.000000e+00 : f32
    %278 = vector.broadcast %cst_85 : f32 to vector<16x256xf32>
    %279 = arith.maximumf %277, %278 : vector<16x256xf32>
    %cst_86 = arith.constant -1.000000e+00 : f32
    %cst_87 = arith.constant 1.000000e+00 : f32
    %280 = vector.broadcast %cst_86 : f32 to vector<16x256xf32>
    %281 = arith.maximumf %280, %279 : vector<16x256xf32>
    %282 = vector.broadcast %cst_87 : f32 to vector<16x256xf32>
    %283 = arith.minimumf %282, %281 : vector<16x256xf32>
    %284 = arith.mulf %283, %283 : vector<16x256xf32>
    %285 = arith.mulf %284, %219 : vector<16x256xf32>
    %286 = arith.truncf %285 : vector<16x256xf32> to vector<16x256xbf16>
    %cst_88 = arith.constant dense<0.000000e+00> : vector<16x16xf32>
    %287 = tpu.matmul %286, %220, %cst_88 {dimension_numbers = #tpu.dot_dimension_numbers<[1], [0], [0], [1], [0, 0, 1, 1], [], []>} : vector<16x256xbf16>, vector<256x16xbf16>, vector<16x16xf32> -> vector<16x16xf32>
    %cst_89 = arith.constant 1.000000e+00 : f32
    %288 = vector.broadcast %cst_89 : f32 to vector<16x16xf32>
    %289 = arith.subf %287, %288 : vector<16x16xf32>
    %cst_90 = arith.constant 0.000000e+00 : f32
    %290 = vector.broadcast %cst_90 : f32 to vector<16x16xf32>
    %291 = arith.maximumf %289, %290 : vector<16x16xf32>
    %cst_91 = arith.constant 1.000000e-01 : f32
    %292 = vector.broadcast %cst_91 : f32 to vector<16x16xf32>
    %293 = arith.mulf %292, %291 : vector<16x16xf32>
    %294 = arith.addf %254, %293 : vector<16x16xf32>
    %c0_92 = arith.constant 0 : index
    %c0_93 = arith.constant 0 : index
    %c0_94 = arith.constant 0 : index
    %295 = vector.load %arg13[%c0_92, %c0_93, %c0_94] : memref<4x16x256xf32, #tpu.memory_space<vmem>>, vector<1x16x256xf32>
    %296 = vector.shape_cast %295 : vector<1x16x256xf32> to vector<16x256xf32>
    %297 = vector.shape_cast %285 : vector<16x256xf32> to vector<1x16x256xf32>
    tpu.vector_store %arg13[%c0_92, %c0_93, %c0_94], %297 {strides = array<i32>} : memref<4x16x256xf32, #tpu.memory_space<vmem>>, vector<1x16x256xf32>,
    %cst_95 = arith.constant 1.000000e+00 : f32
    %298 = vector.broadcast %cst_95 : f32 to vector<16x16xf32>
    %299 = arith.subf %287, %298 : vector<16x16xf32>
    %cst_96 = arith.constant 2.000000e+00 : f32
    %300 = vector.broadcast %cst_96 : f32 to vector<16x16xf32>
    %301 = arith.mulf %300, %299 : vector<16x16xf32>
    %302 = arith.negf %301 : vector<16x16xf32>
    %303 = math.exp %302 : vector<16x16xf32>
    %cst_97 = arith.constant 1.000000e+00 : f32
    %304 = vector.broadcast %cst_97 : f32 to vector<16x16xf32>
    %305 = arith.addf %304, %303 : vector<16x16xf32>
    %306 = arith.divf %304, %305 : vector<16x16xf32>
    %307 = arith.mulf %294, %306 : vector<16x16xf32>
    %cst_98 = arith.constant 0.000000e+00 : f32
    %308 = vector.broadcast %cst_98 : f32 to vector<16x256xf32>
    %309 = arith.subf %308, %231 : vector<16x256xf32>
    %310 = arith.truncf %307 : vector<16x16xf32> to vector<16x16xbf16>
    %cst_99 = arith.constant dense<0.000000e+00> : vector<16x256xf32>
    %311 = tpu.matmul %310, %221, %cst_99 {dimension_numbers = #tpu.dot_dimension_numbers<[1], [0], [0], [1], [0, 0, 1, 1], [], []>} : vector<16x16xbf16>, vector<16x256xbf16>, vector<16x256xf32> -> vector<16x256xf32>
    %312 = arith.addf %309, %311 : vector<16x256xf32>
    %313 = arith.mulf %283, %219 : vector<16x256xf32>
    %314 = arith.mulf %313, %312 : vector<16x256xf32>
    %cst_100 = arith.constant 0.00989999994 : f32
    %315 = vector.broadcast %cst_100 : f32 to vector<16x256xf32>
    %316 = arith.mulf %315, %314 : vector<16x256xf32>
    %317 = arith.subf %283, %316 : vector<16x256xf32>
    %318 = math.absf %317 : vector<16x256xf32>
    %cst_101 = arith.constant 9.801000e-03 : f32
    %319 = vector.broadcast %cst_101 : f32 to vector<16x256xf32>
    %320 = arith.subf %318, %319 : vector<16x256xf32>
    %cst_102 = arith.constant 0.000000e+00 : f32
    %321 = vector.broadcast %cst_102 : f32 to vector<16x256xf32>
    %322 = arith.maximumf %320, %321 : vector<16x256xf32>
    %cst_103 = arith.constant -1.000000e+00 : f32
    %cst_104 = arith.constant 1.000000e+00 : f32
    %323 = vector.broadcast %cst_103 : f32 to vector<16x256xf32>
    %324 = arith.maximumf %323, %322 : vector<16x256xf32>
    %325 = vector.broadcast %cst_104 : f32 to vector<16x256xf32>
    %326 = arith.minimumf %325, %324 : vector<16x256xf32>
    %327 = arith.mulf %326, %326 : vector<16x256xf32>
    %328 = arith.mulf %327, %219 : vector<16x256xf32>
    %329 = arith.truncf %328 : vector<16x256xf32> to vector<16x256xbf16>
    %cst_105 = arith.constant dense<0.000000e+00> : vector<16x16xf32>
    %330 = tpu.matmul %329, %220, %cst_105 {dimension_numbers = #tpu.dot_dimension_numbers<[1], [0], [0], [1], [0, 0, 1, 1], [], []>} : vector<16x256xbf16>, vector<256x16xbf16>, vector<16x16xf32> -> vector<16x16xf32>
    %cst_106 = arith.constant 1.000000e+00 : f32
    %331 = vector.broadcast %cst_106 : f32 to vector<16x16xf32>
    %332 = arith.subf %330, %331 : vector<16x16xf32>
    %cst_107 = arith.constant 0.000000e+00 : f32
    %333 = vector.broadcast %cst_107 : f32 to vector<16x16xf32>
    %334 = arith.maximumf %332, %333 : vector<16x16xf32>
    %cst_108 = arith.constant 0.0989999994 : f32
    %335 = vector.broadcast %cst_108 : f32 to vector<16x16xf32>
    %336 = arith.mulf %335, %334 : vector<16x16xf32>
    %337 = arith.addf %294, %336 : vector<16x16xf32>
    %c1_109 = arith.constant 1 : index
    %c0_110 = arith.constant 0 : index
    %c0_111 = arith.constant 0 : index
    %338 = vector.load %arg13[%c1_109, %c0_110, %c0_111] : memref<4x16x256xf32, #tpu.memory_space<vmem>>, vector<1x16x256xf32>
    %339 = vector.shape_cast %338 : vector<1x16x256xf32> to vector<16x256xf32>
    %340 = vector.shape_cast %328 : vector<16x256xf32> to vector<1x16x256xf32>
    tpu.vector_store %arg13[%c1_109, %c0_110, %c0_111], %340 {strides = array<i32>} : memref<4x16x256xf32, #tpu.memory_space<vmem>>, vector<1x16x256xf32>,
    %cst_112 = arith.constant 1.000000e+00 : f32
    %341 = vector.broadcast %cst_112 : f32 to vector<16x16xf32>
    %342 = arith.subf %330, %341 : vector<16x16xf32>
    %cst_113 = arith.constant 2.000000e+00 : f32
    %343 = vector.broadcast %cst_113 : f32 to vector<16x16xf32>
    %344 = arith.mulf %343, %342 : vector<16x16xf32>
    %345 = arith.negf %344 : vector<16x16xf32>
    %346 = math.exp %345 : vector<16x16xf32>
    %cst_114 = arith.constant 1.000000e+00 : f32
    %347 = vector.broadcast %cst_114 : f32 to vector<16x16xf32>
    %348 = arith.addf %347, %346 : vector<16x16xf32>
    %349 = arith.divf %347, %348 : vector<16x16xf32>
    %350 = arith.mulf %337, %349 : vector<16x16xf32>
    %cst_115 = arith.constant 0.000000e+00 : f32
    %351 = vector.broadcast %cst_115 : f32 to vector<16x256xf32>
    %352 = arith.subf %351, %231 : vector<16x256xf32>
    %353 = arith.truncf %350 : vector<16x16xf32> to vector<16x16xbf16>
    %cst_116 = arith.constant dense<0.000000e+00> : vector<16x256xf32>
    %354 = tpu.matmul %353, %221, %cst_116 {dimension_numbers = #tpu.dot_dimension_numbers<[1], [0], [0], [1], [0, 0, 1, 1], [], []>} : vector<16x16xbf16>, vector<16x256xbf16>, vector<16x256xf32> -> vector<16x256xf32>
    %355 = arith.addf %352, %354 : vector<16x256xf32>
    %356 = arith.mulf %326, %219 : vector<16x256xf32>
    %357 = arith.mulf %356, %355 : vector<16x256xf32>
    %cst_117 = arith.constant 9.801000e-03 : f32
    %358 = vector.broadcast %cst_117 : f32 to vector<16x256xf32>
    %359 = arith.mulf %358, %357 : vector<16x256xf32>
    %360 = arith.subf %326, %359 : vector<16x256xf32>
    %361 = math.absf %360 : vector<16x256xf32>
    %cst_118 = arith.constant 0.00970298983 : f32
    %362 = vector.broadcast %cst_118 : f32 to vector<16x256xf32>
    %363 = arith.subf %361, %362 : vector<16x256xf32>
    %cst_119 = arith.constant 0.000000e+00 : f32
    %364 = vector.broadcast %cst_119 : f32 to vector<16x256xf32>
    %365 = arith.maximumf %363, %364 : vector<16x256xf32>
    %cst_120 = arith.constant -1.000000e+00 : f32
    %cst_121 = arith.constant 1.000000e+00 : f32
    %366 = vector.broadcast %cst_120 : f32 to vector<16x256xf32>
    %367 = arith.maximumf %366, %365 : vector<16x256xf32>
    %368 = vector.broadcast %cst_121 : f32 to vector<16x256xf32>
    %369 = arith.minimumf %368, %367 : vector<16x256xf32>
    %370 = arith.mulf %369, %369 : vector<16x256xf32>
    %371 = arith.mulf %370, %219 : vector<16x256xf32>
    %372 = arith.truncf %371 : vector<16x256xf32> to vector<16x256xbf16>
    %cst_122 = arith.constant dense<0.000000e+00> : vector<16x16xf32>
    %373 = tpu.matmul %372, %220, %cst_122 {dimension_numbers = #tpu.dot_dimension_numbers<[1], [0], [0], [1], [0, 0, 1, 1], [], []>} : vector<16x256xbf16>, vector<256x16xbf16>, vector<16x16xf32> -> vector<16x16xf32>
    %cst_123 = arith.constant 1.000000e+00 : f32
    %374 = vector.broadcast %cst_123 : f32 to vector<16x16xf32>
    %375 = arith.subf %373, %374 : vector<16x16xf32>
    %cst_124 = arith.constant 0.000000e+00 : f32
    %376 = vector.broadcast %cst_124 : f32 to vector<16x16xf32>
    %377 = arith.maximumf %375, %376 : vector<16x16xf32>
    %cst_125 = arith.constant 9.801000e-02 : f32
    %378 = vector.broadcast %cst_125 : f32 to vector<16x16xf32>
    %379 = arith.mulf %378, %377 : vector<16x16xf32>
    %380 = arith.addf %337, %379 : vector<16x16xf32>
    %c2 = arith.constant 2 : index
    %c0_126 = arith.constant 0 : index
    %c0_127 = arith.constant 0 : index
    %381 = vector.load %arg13[%c2, %c0_126, %c0_127] : memref<4x16x256xf32, #tpu.memory_space<vmem>>, vector<1x16x256xf32>
    %382 = vector.shape_cast %381 : vector<1x16x256xf32> to vector<16x256xf32>
    %383 = vector.shape_cast %371 : vector<16x256xf32> to vector<1x16x256xf32>
    tpu.vector_store %arg13[%c2, %c0_126, %c0_127], %383 {strides = array<i32>} : memref<4x16x256xf32, #tpu.memory_space<vmem>>, vector<1x16x256xf32>,
    %cst_128 = arith.constant 1.000000e+00 : f32
    %384 = vector.broadcast %cst_128 : f32 to vector<16x16xf32>
    %385 = arith.subf %373, %384 : vector<16x16xf32>
    %cst_129 = arith.constant 2.000000e+00 : f32
    %386 = vector.broadcast %cst_129 : f32 to vector<16x16xf32>
    %387 = arith.mulf %386, %385 : vector<16x16xf32>
    %388 = arith.negf %387 : vector<16x16xf32>
    %389 = math.exp %388 : vector<16x16xf32>
    %cst_130 = arith.constant 1.000000e+00 : f32
    %390 = vector.broadcast %cst_130 : f32 to vector<16x16xf32>
    %391 = arith.addf %390, %389 : vector<16x16xf32>
    %392 = arith.divf %390, %391 : vector<16x16xf32>
    %393 = arith.mulf %380, %392 : vector<16x16xf32>
    %cst_131 = arith.constant 0.000000e+00 : f32
    %394 = vector.broadcast %cst_131 : f32 to vector<16x256xf32>
    %395 = arith.subf %394, %231 : vector<16x256xf32>
    %396 = arith.truncf %393 : vector<16x16xf32> to vector<16x16xbf16>
    %cst_132 = arith.constant dense<0.000000e+00> : vector<16x256xf32>
    %397 = tpu.matmul %396, %221, %cst_132 {dimension_numbers = #tpu.dot_dimension_numbers<[1], [0], [0], [1], [0, 0, 1, 1], [], []>} : vector<16x16xbf16>, vector<16x256xbf16>, vector<16x256xf32> -> vector<16x256xf32>
    %398 = arith.addf %395, %397 : vector<16x256xf32>
    %399 = arith.mulf %369, %219 : vector<16x256xf32>
    %400 = arith.mulf %399, %398 : vector<16x256xf32>
    %cst_133 = arith.constant 0.00970298983 : f32
    %401 = vector.broadcast %cst_133 : f32 to vector<16x256xf32>
    %402 = arith.mulf %401, %400 : vector<16x256xf32>
    %403 = arith.subf %369, %402 : vector<16x256xf32>
    %404 = math.absf %403 : vector<16x256xf32>
    %cst_134 = arith.constant 9.605960e-03 : f32
    %405 = vector.broadcast %cst_134 : f32 to vector<16x256xf32>
    %406 = arith.subf %404, %405 : vector<16x256xf32>
    %cst_135 = arith.constant 0.000000e+00 : f32
    %407 = vector.broadcast %cst_135 : f32 to vector<16x256xf32>
    %408 = arith.maximumf %406, %407 : vector<16x256xf32>
    %cst_136 = arith.constant -1.000000e+00 : f32
    %cst_137 = arith.constant 1.000000e+00 : f32
    %409 = vector.broadcast %cst_136 : f32 to vector<16x256xf32>
    %410 = arith.maximumf %409, %408 : vector<16x256xf32>
    %411 = vector.broadcast %cst_137 : f32 to vector<16x256xf32>
    %412 = arith.minimumf %411, %410 : vector<16x256xf32>
    %413 = arith.mulf %412, %412 : vector<16x256xf32>
    %414 = arith.mulf %413, %219 : vector<16x256xf32>
    %c3 = arith.constant 3 : index
    %c0_138 = arith.constant 0 : index
    %c0_139 = arith.constant 0 : index
    %415 = vector.load %arg13[%c3, %c0_138, %c0_139] : memref<4x16x256xf32, #tpu.memory_space<vmem>>, vector<1x16x256xf32>
    %416 = vector.shape_cast %415 : vector<1x16x256xf32> to vector<16x256xf32>
    %417 = vector.shape_cast %414 : vector<16x256xf32> to vector<1x16x256xf32>
    tpu.vector_store %arg13[%c3, %c0_138, %c0_139], %417 {strides = array<i32>} : memref<4x16x256xf32, #tpu.memory_space<vmem>>, vector<1x16x256xf32>,
    return
  }
  func.func @transform_0(%arg0: i32) -> (i32, i32) {
    %c0_i32 = arith.constant 0 : i32
    %c0_i32_0 = arith.constant 0 : i32
    return %c0_i32, %arg0 : i32, i32
  }
  func.func @transform_1(%arg0: i32) -> (i32, i32) {
    %c0_i32 = arith.constant 0 : i32
    %c0_i32_0 = arith.constant 0 : i32
    return %c0_i32, %arg0 : i32, i32
  }
  func.func @transform_2(%arg0: i32) -> (i32, i32) {
    %c0_i32 = arith.constant 0 : i32
    %c0_i32_0 = arith.constant 0 : i32
    return %arg0, %c0_i32 : i32, i32
  }
  func.func @transform_3(%arg0: i32) -> (i32, i32) {
    %c0_i32 = arith.constant 0 : i32
    %c0_i32_0 = arith.constant 0 : i32
    %c0_i32_1 = arith.constant 0 : i32
    return %c0_i32, %c0_i32_0 : i32, i32
  }
  func.func @transform_4(%arg0: i32) -> (i32, i32) {
    %c0_i32 = arith.constant 0 : i32
    %c0_i32_0 = arith.constant 0 : i32
    %c0_i32_1 = arith.constant 0 : i32
    return %c0_i32, %c0_i32_0 : i32, i32
  }
  func.func @transform_5(%arg0: i32) -> (i32, i32) {
    %c0_i32 = arith.constant 0 : i32
    %c0_i32_0 = arith.constant 0 : i32
    %c0_i32_1 = arith.constant 0 : i32
    return %c0_i32, %c0_i32_0 : i32, i32
  }
  func.func @transform_6(%arg0: i32) -> (i32, i32) {
    %c0_i32 = arith.constant 0 : i32
    %c0_i32_0 = arith.constant 0 : i32
    %c0_i32_1 = arith.constant 0 : i32
    return %c0_i32, %c0_i32_0 : i32, i32
  }
  func.func @transform_7(%arg0: i32) -> (i32, i32) {
    %c0_i32 = arith.constant 0 : i32
    %c0_i32_0 = arith.constant 0 : i32
    %c0_i32_1 = arith.constant 0 : i32
    return %c0_i32, %c0_i32_0 : i32, i32
  }
  func.func @transform_8(%arg0: i32) -> (i32, i32) {
    %c0_i32 = arith.constant 0 : i32
    %c0_i32_0 = arith.constant 0 : i32
    %c0_i32_1 = arith.constant 0 : i32
    return %c0_i32, %c0_i32_0 : i32, i32
  }
  func.func @transform_9(%arg0: i32) -> (i32, i32) {
    %c0_i32 = arith.constant 0 : i32
    %c0_i32_0 = arith.constant 0 : i32
    %c0_i32_1 = arith.constant 0 : i32
    return %c0_i32, %c0_i32_0 : i32, i32
  }
  func.func @transform_10(%arg0: i32) -> (i32, i32) {
    %c0_i32 = arith.constant 0 : i32
    %c0_i32_0 = arith.constant 0 : i32
    %c0_i32_1 = arith.constant 0 : i32
    return %c0_i32, %c0_i32_0 : i32, i32
  }
  func.func @transform_11(%arg0: i32) -> (i32, i32) {
    %c0_i32 = arith.constant 0 : i32
    %c0_i32_0 = arith.constant 0 : i32
    return %arg0, %c0_i32 : i32, i32
  }
  func.func @transform_12(%arg0: i32) -> (i32, i32, i32) {
    %c0_i32 = arith.constant 0 : i32
    %c0_i32_0 = arith.constant 0 : i32
    %c0_i32_1 = arith.constant 0 : i32
    return %c0_i32, %arg0, %c0_i32_0 : i32, i32, i32
  }
}

</mosaic_0001>

<bundles_post_ra>
// kernel: rna_ss_e2e_forward.1
= control target key start
LH: loop header
LB: loop body
LE: loop exit
PB: predicated region body
PF: predicated region fallthrough
CT: control target
= control target key end

     0   :  { %s14494_s21 = smov 0   ;;  %s14496_s22 = smov 0   ;;  %s19828_s0 = inlined_call_operand.vmem [shape: f32[1,8192], index: 0, kind: input, shape index: {}]   ;;  %s19829_s1 = inlined_call_operand.vmem [shape: f32[4,512], index: 1, kind: input, shape index: {}]   ;;  %s19830_s2 = inlined_call_operand.vmem [shape: f32[32,256], index: 2, kind: input, shape index: {}]   ;;  %s19831_s3 = inlined_call_operand.vmem [shape: bf16[32,100], index: 3, kind: input, shape index: {}]   ;;  %s19832_s4 = inlined_call_operand.vmem [shape: f32[32,4], index: 4, kind: input, shape index: {}]   ;;  %s19833_s5 = inlined_call_operand.vmem [shape: f32[2,32], index: 5, kind: input, shape index: {}]   ;;  %s19834_s6 = inlined_call_operand.vmem [shape: bf16[256,4096], index: 6, kind: input, shape index: {}]   ;;  %s19835_s7 = inlined_call_operand.vmem [shape: bf16[256,4096], index: 7, kind: input, shape index: {}]   ;;  %s19836_s8 = inlined_call_operand.vmem [shape: bf16[256,16], index: 8, kind: input, shape index: {}]   ;;  %s19837_s9 = inlined_call_operand.vmem [shape: bf16[256,256], index: 9, kind: input, shape index: {}]   ;;  %s19838_s10 = inlined_call_operand.vmem [shape: bf16[16,256], index: 10, kind: input, shape index: {}]   ;;  %s19839_s11 = inlined_call_operand.vmem [shape: f32[32,256], index: 11, kind: output, shape index: {0}]   ;;  %s19840_s12 = inlined_call_operand.vmem [shape: f32[4,32,256], index: 12, kind: output, shape index: {1}]  }
   0x1   :  { %s14498_s23 = smov 0  }
   0x2 LB: > { %s14507_s24 = sadd.s32 4294967295, %s14419_s23   ;;  %s14509_s25 = sadd.s32 1, %s14419_s23   ;;  %s14419_s23 = sphi %s14498_s23, %s19980_s23   ;;  %s14415_s22 = sphi %s14496_s22, %s19979_s22   ;;  %s14411_s21 = sphi %s14494_s21, %s19978_s21  }
   0x3   : > { %s299_s26 = ssub.s32 %s14419_s23, %s14509_s25  ;;  %s302_s27 = sadd.s32 1, %s14415_s22 }
   0x4   : > { %p300_p0 = scmp.eq.s32.totalorder %s299_s26, 0  ;;  %p312_p1 = scmp.ne.s32.totalorder %s14415_s22, %s14411_s21 }
   0x5   : > { %p313_p2 = scmp.eq.s32.totalorder %s14507_s24, 1  ;;  %p12743_p3 = scmp.ge.s32.totalorder %s14419_s23, 1 }
   0x6   : > { %s14517_s28 = scalar_select %p300_p0, %s14415_s22, %s302_s27  }
   0x7   : > { %p14519_p4 = por %p313_p2, %p312_p1  ;;  %p388_p5 = scmp.lt.s32.totalorder %s14419_s23, 3 }
   0x9   : > { %p389_p6 = pnand %p12743_p3, %p388_p5 }
   0xb   : > { %392 = sbr.rel (%p389_p6) target bundleno = 4407 (0x1137), region = 64 }
  0x12   : > { %s12746_s30 = sshll.u32 %s14507_s24, 1  ;;  %v19841_v0 = vmov 0   ;;  %v476_v1 = vld [vmem:[%s19832_s4] sm:$0xff]  ;;  %v477_v2 = vld [vmem:[%s19832_s4 + $0x8] sm:$0xff]  ;;  %v478_v3 = vld [vmem:[%s19832_s4 + $0x10] sm:$0xff]  ;;  %vm526_vm0 = vcmask 1041408  }
  0x13   : > { %p451_p7 = scmp.lt.s32.totalorder %s12746_s30, 3  ;;  %565 = vmatprep.mubr.bf16.mxu0 %v19841_v0  ;;  %14229 = vset.pattern.permute.xlu0 %v19841_v0  ;;  %v479_v4 = vld [vmem:[%s19832_s4 + $0x18] sm:$0xff]  ;;  %v14238_v8 = vld [vmem:[%s19831_s3] sm:$0xff]   ;;  %v14239_v9 = vld [vmem:[%s19831_s3 + $0x8] sm:$0xff]   ;;  %s14422_s18 = smov 92   ;;  %vm519_vm1 = vcmask 31744  }
  0x14   : > { %14230 = vset.pattern.permute.xlu1 %v19841_v0  ;;  %641 = vmatprep.mubr.bf16.mxu1 %v19841_v0  ;;  %s14423_s19 = smov 124   ;;  %v1249_v38 = vld [vmem:[%s19835_s7] sm:$0xff]  ;;  %v1250_v42 = vld [vmem:[%s19835_s7 + $0x8] sm:$0xff]  ;;  %vm602_vm2 = vcmask 261120   ;;  %s14426_s20 = smov 60  }
  0x15   : > { %s19982_s30 = smov (!%p451_p7, %s12746_s30), 3  ;;  %491 = vperm.xlu0 %14229, %v476_v1   ;;  %501 = vperm.xlu1 %14230, %v478_v3   ;;  %v1265_v41 = vld [vmem:[%s19835_s7 + $0x80] sm:$0xff]  ;;  %v1266_v43 = vld [vmem:[%s19835_s7 + $0x88] sm:$0xff] }
  0x16   : > { %s12747_s23 = sshll.u32 %s19982_s30, 2  ;;  %v12764_v49 = vcombine.high %v1249_v38, %v1265_v41  ;;  %v12766_v50 = vcombine.high %v1250_v42, %v1266_v43  ;;  %v1281_v51 = vld [vmem:[%s19835_s7 + $0x100] sm:$0xff]  ;;  %v1282_v53 = vld [vmem:[%s19835_s7 + $0x108] sm:$0xff]  ;;  %v12763_v56 = vcombine.low %v1249_v38, %v1265_v41  ;;  %v12765_v57 = vcombine.low %v1250_v42, %v1266_v43 }
  0x17   : > { %s454_s13 = scalar_lea.vmem %s19829_s1, %s12747_s23  ;;  %v1297_v52 = vld [vmem:[%s19835_s7 + $0x180] sm:$0xff]  ;;  %v1298_v54 = vld [vmem:[%s19835_s7 + $0x188] sm:$0xff] }
  0x18   : > { %v483_v5 = vld [vmem:[%s454_s13] sm:$0xff]  ;;  %v12796_v58 = vcombine.high %v1281_v51, %v1297_v52  ;;  %v12798_v59 = vcombine.high %v1282_v53, %v1298_v54  ;;  %v1314_v62 = vld [vmem:[%s19835_s7 + $0x208] sm:$0xff]  ;;  %v12797_v3 = vcombine.low %v1282_v53, %v1298_v54 }
  0x19   : > { %496 = vperm.xlu0 %14229, %v477_v2   ;;  %v485_v6 = vcombine.high %v483_v5, %v483_v5  ;;  %v487_v7 = vpack.c.bf16 %v483_v5, %v483_v5  ;;  %506 = vperm.xlu1 %14230, %v479_v4   ;;  %v1313_v60 = vld [vmem:[%s19835_s7 + $0x200] sm:$0xff]  ;;  %v1330_v63 = vld [vmem:[%s19835_s7 + $0x288] sm:$0xff]  ;;  %v12795_v2 = vcombine.low %v1281_v51, %v1297_v52 }
  0x1a   : > { %v1329_v61 = vld [vmem:[%s19835_s7 + $0x280] sm:$0xff]  ;;  %v12830_v5 = vcombine.high %v1314_v62, %v1330_v63  ;;  %v1474_v41 = vld [vmem:[%s19835_s7 + $0x708] sm:$0xff] }
  0x1b   : > { %v488_v10 = vpack.c.bf16 %v485_v6, %v485_v6  ;;  %v528_v11 = vsel %vm526_vm0, %v487_v7, 0  ;;  %v12828_v4 = vcombine.high %v1313_v60, %v1329_v61  ;;  %v1345_v6 = vld [vmem:[%s19835_s7 + $0x300] sm:$0xff]  ;;  %v1490_v42 = vld [vmem:[%s19835_s7 + $0x788] sm:$0xff] }
  0x1c   : > { %v1361_v7 = vld [vmem:[%s19835_s7 + $0x380] sm:$0xff]  ;;  %v12989_v52 = vcombine.low %v1474_v41, %v1490_v42 }
  0x1d   : > { %666 = vrot.lane.b32.xlu0 %v14238_v8, %s14422_s18  ;;  %12756 = vmatprep.subr.msk.bf16.mxu0 %vm526_vm0, %v488_v10  ;;  %v12827_v10 = vcombine.low %v1313_v60, %v1329_v61 }
  0x1e   : > { %668 = vrot.lane.b32.xlu1 %v14239_v9, %s14422_s18  ;;  %534 = vmatpush1.bf16.msra.mxu0 %v528_v11  ;;  %s17007_s18 = sshll.u32 %s14507_s24, 5 }
  0x1f   : > { %p446_p8 = scmp.lt.s32.totalorder %s17007_s18, 63 }
  0x21   : > { %12757 = vmatmul.mubr.msk.bf16.vlgmr.msra.gmra.mrb[0].mxu0 %vm519_vm1, %v14238_v8  ;;  %598 = vrot.lane.b32.xlu0 %v14238_v8, %s14423_s19  ;;  %v1346_v8 = vld [vmem:[%s19835_s7 + $0x308] sm:$0xff]  ;;  %s447_s27 = scalar_select %p446_p8, %s17007_s18, 63 }
  0x22   : > { %575 = vmatprep.mubr.bf16.mxu0 %v19841_v0  ;;  %600 = vrot.lane.b32.xlu1 %v14239_v9, %s14423_s19 }
  0x23   : > { %s17060_s13 = scalar_lea.vmem %s19828_s0, %s447_s27 }
  0x29   : > { %12758 = vmatmul.mubr.msk.bf16.gmra.mrb[4].mxu0 %vm519_vm1, %v14239_v9  ;;  %v1362_v9 = vld [vmem:[%s19835_s7 + $0x388] sm:$0xff] }
  0x2a   : > { %708 = vmatprep.mubr.bf16.mxu0 %v19841_v0 }
  0x94   : > { %v492_v12 = vpop.permute.xlu0 %491  ;;  %v502_v21 = vpop.permute.xlu1 %501 }
  0x98   : > { %v497_v13 = vpop.permute.xlu0 %496  ;;  %v507_v32 = vpop.permute.xlu1 %506 }
  0x9c   : > { %v667_v47 = vpop.permute.xlu0 %666  ;;  %v669_v1 = vpop.permute.xlu1 %668 }
  0xa0   : > { %v599_v55 = vpop.permute.xlu0 %598  ;;  %v601_v11 = vpop.permute.xlu1 %600 }
  0xf4   : > { %v567_v14 = vpop.f32.mrb[0].mxu0 }
  0xf5   : > { %v568_v15 = vadd.f32 %v567_v14, %v492_v12  ;;  %v569_v16 = vpop.f32.mrb[1].mxu0  ;;  %v12862_v14 = vcombine.high %v1346_v8, %v1362_v9 }
  0xf6   : > { %v570_v17 = vadd.f32 %v569_v16, %v492_v12  ;;  %v571_v18 = vpop.f32.mrb[2].mxu0  ;;  %v12829_v12 = vcombine.low %v1314_v62, %v1330_v63  ;;  %v1393_v16 = vld [vmem:[%s19835_s7 + $0x480] sm:$0xff] }
  0xf7   : > { %v572_v19 = vadd.f32 %v571_v18, %v497_v13  ;;  %v573_v20 = vpop.f32.mrb[3].mxu0  ;;  %v586_v23 = vmax.f32 %v568_v15, 0.0  ;;  %v1377_v15 = vld [vmem:[%s19835_s7 + $0x400] sm:$0xff]  ;;  %v1394_v18 = vld [vmem:[%s19835_s7 + $0x488] sm:$0xff] }
  0xf8   : > { %v574_v22 = vadd.f32 %v573_v20, %v497_v13  ;;  %v587_v25 = vmax.f32 %v570_v17, 0.0  ;;  %v12860_v13 = vcombine.high %v1345_v6, %v1361_v7  ;;  %v1378_v17 = vld [vmem:[%s19835_s7 + $0x408] sm:$0xff]  ;;  %v12861_v20 = vcombine.low %v1346_v8, %v1362_v9  ;;  %v1569_v63 = vld [vmem:[%s19835_s7 + $0xa00] sm:$0xff] }
  0xf9   : > { %v588_v24 = vmax.f32 %v572_v19, 0.0  ;;  %v12859_v19 = vcombine.low %v1345_v6, %v1361_v7  ;;  %v1601_v8 = vld [vmem:[%s19835_s7 + $0xb00] sm:$0xff] }
  0xfa   : > { %v589_v26 = vmax.f32 %v574_v22, 0.0  ;;  %v12894_v22 = vcombine.high %v1378_v17, %v1394_v18  ;;  %v1617_v9 = vld [vmem:[%s19835_s7 + $0xb80] sm:$0xff] }
  0xfb   : > { %v594_v27 = vpack.c.bf16 %v588_v24, %v586_v23  ;;  %v1409_v23 = vld [vmem:[%s19835_s7 + $0x500] sm:$0xff] }
  0xfc   : > { %v577_v28 = vpop.f32.mrb[4].mxu0  ;;  %v595_v29 = vpack.c.bf16 %v589_v26, %v587_v25  ;;  %v1425_v24 = vld [vmem:[%s19835_s7 + $0x580] sm:$0xff]  ;;  %v1410_v25 = vld [vmem:[%s19835_s7 + $0x508] sm:$0xff] }
  0xfd   : > { %v578_v30 = vadd.f32 %v577_v28, %v502_v21  ;;  %v579_v31 = vpop.f32.mrb[5].mxu0  ;;  %v1426_v26 = vld [vmem:[%s19835_s7 + $0x588] sm:$0xff]  ;;  %v12893_v28 = vcombine.low %v1378_v17, %v1394_v18  ;;  %v1649_v17 = vld [vmem:[%s19835_s7 + $0xc80] sm:$0xff] }
  0xfe   : > { %v580_v33 = vadd.f32 %v579_v31, %v502_v21  ;;  %v581_v34 = vpop.f32.mrb[6].mxu0  ;;  %609 = vmatprep.subr.bf16.mxu1 %v595_v29  ;;  %676 = vmatprep.subr.bf16.mxu0 %v595_v29  ;;  %v12892_v21 = vcombine.high %v1377_v15, %v1393_v16  ;;  %v12924_v29 = vcombine.high %v1409_v23, %v1425_v24  ;;  %v1441_v31 = vld [vmem:[%s19835_s7 + $0x600] sm:$0xff]  ;;  %v1634_v18 = vld [vmem:[%s19835_s7 + $0xc08] sm:$0xff] }
  0xff   : > { %v582_v35 = vadd.f32 %v581_v34, %v507_v32  ;;  %v583_v36 = vpop.f32.mrb[7].mxu0  ;;  %610 = vmatpush1.bf16.msra.mxu1 %v594_v27  ;;  %677 = vmatpush1.bf16.msra.mxu0 %v594_v27  ;;  %v590_v39 = vmax.f32 %v578_v30, 0.0  ;;  %v12891_v27 = vcombine.low %v1377_v15, %v1393_v16  ;;  %v12926_v30 = vcombine.high %v1410_v25, %v1426_v26  ;;  %v1458_v34 = vld [vmem:[%s19835_s7 + $0x688] sm:$0xff]  ;;  %v1633_v16 = vld [vmem:[%s19835_s7 + $0xc00] sm:$0xff] }
 0x100   : > { %v584_v37 = vadd.f32 %v583_v36, %v507_v32  ;;  %v591_v44 = vmax.f32 %v580_v33, 0.0  ;;  %v1457_v32 = vld [vmem:[%s19835_s7 + $0x680] sm:$0xff]  ;;  %v1442_v33 = vld [vmem:[%s19835_s7 + $0x608] sm:$0xff]  ;;  %v12925_v36 = vcombine.low %v1410_v25, %v1426_v26 }
 0x101   : > { %v592_v40 = vmax.f32 %v582_v35, 0.0  ;;  %v12923_v35 = vcombine.low %v1409_v23, %v1425_v24  ;;  %v12958_v38 = vcombine.high %v1442_v33, %v1458_v34  ;;  %v12955_v43 = vcombine.low %v1441_v31, %v1457_v32  ;;  %v1665_v24 = vld [vmem:[%s19835_s7 + $0xd00] sm:$0xff]  ;;  %v1666_v26 = vld [vmem:[%s19835_s7 + $0xd08] sm:$0xff] }
 0x102   : > { %v593_v45 = vmax.f32 %v584_v37, 0.0  ;;  %v12956_v37 = vcombine.high %v1441_v31, %v1457_v32  ;;  %v1681_v25 = vld [vmem:[%s19835_s7 + $0xd80] sm:$0xff] }
 0x103   : > { %v596_v46 = vpack.c.bf16 %v592_v40, %v590_v39  ;;  %v1473_v39 = vld [vmem:[%s19835_s7 + $0x700] sm:$0xff] }
 0x104   : > { %v597_v48 = vpack.c.bf16 %v593_v45, %v591_v44  ;;  %v1489_v40 = vld [vmem:[%s19835_s7 + $0x780] sm:$0xff]  ;;  %v12957_v44 = vcombine.low %v1442_v33, %v1458_v34  ;;  %v1698_v34 = vld [vmem:[%s19835_s7 + $0xe08] sm:$0xff] }
 0x105   : > { %v12988_v45 = vcombine.high %v1473_v39, %v1489_v40  ;;  %v12987_v51 = vcombine.low %v1473_v39, %v1489_v40  ;;  %v1697_v32 = vld [vmem:[%s19835_s7 + $0xe00] sm:$0xff] }
 0x106   : > { %611 = vmatprep.subr.bf16.mxu1 %v597_v48  ;;  %678 = vmatprep.subr.bf16.mxu0 %v597_v48  ;;  %v1521_v48 = vld [vmem:[%s19835_s7 + $0x880] sm:$0xff] }
 0x107   : > { %612 = vmatpush1.bf16.msra.mxu1 %v596_v46  ;;  %679 = vmatpush1.bf16.msra.mxu0 %v596_v46  ;;  %v12990_v46 = vcombine.high %v1474_v41, %v1490_v42  ;;  %v1713_v33 = vld [vmem:[%s19835_s7 + $0xe80] sm:$0xff] }
 0x108   : > { %4321 = vmatprep.subr.bf16.mxu1 %v12764_v49  ;;  %4374 = vmatprep.subr.bf16.mxu0 %v12766_v50  ;;  %v1506_v49 = vld [vmem:[%s19835_s7 + $0x808] sm:$0xff]  ;;  %v13211_v40 = vcombine.low %v1697_v32, %v1713_v33  ;;  %v1729_v42 = vld [vmem:[%s19835_s7 + $0xf00] sm:$0xff] }
 0x109   : > { %v1522_v50 = vld [vmem:[%s19835_s7 + $0x888] sm:$0xff] }
 0x10a   : > { %12761 = vmatmul.mubr.msk.bf16.vlgmr.msra.gmra.mrb[8].mxu0 %vm602_vm2, %v667_v47  ;;  %12759 = vmatmul.mubr.msk.bf16.vlgmr.msra.gmra.mrb[0].mxu1 %vm602_vm2, %v599_v55  ;;  %v1505_v47 = vld [vmem:[%s19835_s7 + $0x800] sm:$0xff]  ;;  %v13022_v54 = vcombine.high %v1506_v49, %v1522_v50  ;;  %v13021_v60 = vcombine.low %v1506_v49, %v1522_v50  ;;  %v1251_v50 = vld [vmem:[%s19835_s7 + $0x10] sm:$0xff] }
 0x10b   : > { %718 = vmatprep.mubr.bf16.mxu0 %v19841_v0  ;;  %4322 = vmatpush1.bf16.msra.mxu1 %v12763_v56  ;;  %v13020_v53 = vcombine.high %v1505_v47, %v1521_v48  ;;  %v1537_v55 = vld [vmem:[%s19835_s7 + $0x900] sm:$0xff] }
 0x10c   : > { %4375 = vmatpush1.bf16.msra.mxu0 %v12765_v57  ;;  %4323 = vmatprep.subr.bf16.mxu1 %v12796_v58  ;;  %v1553_v56 = vld [vmem:[%s19835_s7 + $0x980] sm:$0xff]  ;;  %v1538_v57 = vld [vmem:[%s19835_s7 + $0x908] sm:$0xff] }
 0x10d   : > { %4376 = vmatprep.subr.bf16.mxu0 %v12798_v59  ;;  %651 = vmatprep.mubr.bf16.mxu1 %v19841_v0  ;;  %v1554_v58 = vld [vmem:[%s19835_s7 + $0x988] sm:$0xff]  ;;  %v13019_v59 = vcombine.low %v1505_v47, %v1521_v48  ;;  %v13052_v61 = vcombine.high %v1537_v55, %v1553_v56 }
 0x10e   : > { %v13054_v62 = vcombine.high %v1538_v57, %v1554_v58  ;;  %v17288_v0 = vld [vmem:[%s19834_s6 + $0xa48] sm:$0xff] }
 0x10f   : > { %4324 = vmatpush1.bf16.msra.mxu1 %v12795_v2  ;;  %v1570_v2 = vld [vmem:[%s19835_s7 + $0xa08] sm:$0xff] }
 0x110   : > { %4377 = vmatpush1.bf16.msra.mxu0 %v12797_v3  ;;  %4325 = vmatprep.subr.bf16.mxu1 %v12828_v4  ;;  %v1586_v3 = vld [vmem:[%s19835_s7 + $0xa88] sm:$0xff]  ;;  %v13051_v4 = vcombine.low %v1537_v55, %v1553_v56 }
 0x111   : > { %4378 = vmatprep.subr.bf16.mxu0 %v12830_v5  ;;  %v13053_v5 = vcombine.low %v1538_v57, %v1554_v58  ;;  %v13086_v7 = vcombine.high %v1570_v2, %v1586_v3 }
 0x112   : > { %12762 = vmatmul.mubr.msk.bf16.gmra.mrb[12].mxu0 %vm602_vm2, %v669_v1  ;;  %12760 = vmatmul.mubr.msk.bf16.gmra.mrb[4].mxu1 %vm602_vm2, %v601_v11  ;;  %v1585_v1 = vld [vmem:[%s19835_s7 + $0xa80] sm:$0xff]  ;;  %v1618_v11 = vld [vmem:[%s19835_s7 + $0xb88] sm:$0xff] }
 0x113   : > { %4326 = vmatpush1.bf16.msra.mxu1 %v12827_v10  ;;  %v13084_v6 = vcombine.high %v1569_v63, %v1585_v1  ;;  %v1602_v10 = vld [vmem:[%s19835_s7 + $0xb08] sm:$0xff] }
 0x114   : > { %4379 = vmatpush1.bf16.msra.mxu0 %v12829_v12  ;;  %4327 = vmatprep.subr.bf16.mxu1 %v12860_v13  ;;  %v13083_v12 = vcombine.low %v1569_v63, %v1585_v1  ;;  %v13085_v13 = vcombine.low %v1570_v2, %v1586_v3  ;;  %v13118_v15 = vcombine.high %v1602_v10, %v1618_v11  ;;  %v1284_v63 = vld [vmem:[%s19835_s7 + $0x118] sm:$0xff] }
 0x115   : > { %4380 = vmatprep.subr.bf16.mxu0 %v12862_v14  ;;  %v13116_v14 = vcombine.high %v1601_v8, %v1617_v9  ;;  %v1300_v1 = vld [vmem:[%s19835_s7 + $0x198] sm:$0xff] }
 0x117   : > { %4328 = vmatpush1.bf16.msra.mxu1 %v12859_v19  ;;  %v1650_v19 = vld [vmem:[%s19835_s7 + $0xc88] sm:$0xff] }
 0x118   : > { %4381 = vmatpush1.bf16.msra.mxu0 %v12861_v20  ;;  %4329 = vmatprep.subr.bf16.mxu1 %v12892_v21  ;;  %v13115_v20 = vcombine.low %v1601_v8, %v1617_v9  ;;  %v13117_v21 = vcombine.low %v1602_v10, %v1618_v11  ;;  %v13150_v23 = vcombine.high %v1634_v18, %v1650_v19  ;;  %v1331_v8 = vld [vmem:[%s19835_s7 + $0x290] sm:$0xff]  ;;  %v1316_v9 = vld [vmem:[%s19835_s7 + $0x218] sm:$0xff] }
 0x119   : > { %4382 = vmatprep.subr.bf16.mxu0 %v12894_v22  ;;  %v13148_v22 = vcombine.high %v1633_v16, %v1649_v17  ;;  %v1332_v10 = vld [vmem:[%s19835_s7 + $0x298] sm:$0xff] }
 0x11b   : > { %4330 = vmatpush1.bf16.msra.mxu1 %v12891_v27  ;;  %v1682_v27 = vld [vmem:[%s19835_s7 + $0xd88] sm:$0xff] }
 0x11c   : > { %4383 = vmatpush1.bf16.msra.mxu0 %v12893_v28  ;;  %4331 = vmatprep.subr.bf16.mxu1 %v12924_v29  ;;  %v13147_v28 = vcombine.low %v1633_v16, %v1649_v17  ;;  %v13149_v29 = vcombine.low %v1634_v18, %v1650_v19  ;;  %v13182_v31 = vcombine.high %v1666_v26, %v1682_v27  ;;  %v1347_v18 = vld [vmem:[%s19835_s7 + $0x310] sm:$0xff] }
 0x11d   : > { %4384 = vmatprep.subr.bf16.mxu0 %v12926_v30  ;;  %v13180_v30 = vcombine.high %v1665_v24, %v1681_v25  ;;  %v12834_v16 = vcombine.high %v1316_v9, %v1332_v10 }
 0x11f   : > { %4332 = vmatpush1.bf16.msra.mxu1 %v12923_v35  ;;  %v1714_v35 = vld [vmem:[%s19835_s7 + $0xe88] sm:$0xff] }
 0x120   : > { %4385 = vmatpush1.bf16.msra.mxu0 %v12925_v36  ;;  %4333 = vmatprep.subr.bf16.mxu1 %v12956_v37  ;;  %v13179_v36 = vcombine.low %v1665_v24, %v1681_v25  ;;  %v13181_v37 = vcombine.low %v1666_v26, %v1682_v27  ;;  %v13214_v39 = vcombine.high %v1698_v34, %v1714_v35  ;;  %v1379_v27 = vld [vmem:[%s19835_s7 + $0x410] sm:$0xff] }
 0x121   : > { %4386 = vmatprep.subr.bf16.mxu0 %v12958_v38  ;;  %v13212_v38 = vcombine.high %v1697_v32, %v1713_v33  ;;  %v13213_v41 = vcombine.low %v1698_v34, %v1714_v35  ;;  %v12833_v26 = vcombine.low %v1316_v9, %v1332_v10  ;;  %v1396_v32 = vld [vmem:[%s19835_s7 + $0x498] sm:$0xff] }
 0x122   : > { %v1524_v9 = vld [vmem:[%s19835_s7 + $0x898] sm:$0xff] }
 0x123   : > { %4334 = vmatpush1.bf16.msra.mxu1 %v12955_v43  ;;  %v1745_v43 = vld [vmem:[%s19835_s7 + $0xf80] sm:$0xff] }
 0x124   : > { %4387 = vmatpush1.bf16.msra.mxu0 %v12957_v44  ;;  %4335 = vmatprep.subr.bf16.mxu1 %v12988_v45  ;;  %v1730_v44 = vld [vmem:[%s19835_s7 + $0xf08] sm:$0xff]  ;;  %v13244_v45 = vcombine.high %v1729_v42, %v1745_v43  ;;  %v13243_v47 = vcombine.low %v1729_v42, %v1745_v43 }
 0x125   : > { %4388 = vmatprep.subr.bf16.mxu0 %v12990_v46  ;;  %v1746_v46 = vld [vmem:[%s19835_s7 + $0xf88] sm:$0xff] }
 0x126   : > { %v13245_v48 = vcombine.low %v1730_v44, %v1746_v46  ;;  %v13246_v49 = vcombine.high %v1730_v44, %v1746_v46  ;;  %v1459_v46 = vld [vmem:[%s19835_s7 + $0x690] sm:$0xff] }
 0x127   : > { %4336 = vmatpush1.bf16.msra.mxu1 %v12987_v51  ;;  %v1267_v51 = vld [vmem:[%s19835_s7 + $0x90] sm:$0xff] }
 0x128   : > { %4389 = vmatpush1.bf16.msra.mxu0 %v12989_v52  ;;  %4337 = vmatprep.subr.bf16.mxu1 %v13020_v53  ;;  %v1252_v52 = vld [vmem:[%s19835_s7 + $0x18] sm:$0xff]  ;;  %v12768_v53 = vcombine.high %v1251_v50, %v1267_v51  ;;  %v12767_v55 = vcombine.low %v1251_v50, %v1267_v51 }
 0x129   : > { %4390 = vmatprep.subr.bf16.mxu0 %v13022_v54  ;;  %v1268_v54 = vld [vmem:[%s19835_s7 + $0x98] sm:$0xff] }
 0x12a   : > { %v12769_v56 = vcombine.low %v1252_v52, %v1268_v54  ;;  %v12770_v57 = vcombine.high %v1252_v52, %v1268_v54  ;;  %v1475_v54 = vld [vmem:[%s19835_s7 + $0x710] sm:$0xff] }
 0x12b   : > { %4338 = vmatpush1.bf16.msra.mxu1 %v13019_v59 }
 0x12c   : > { %4391 = vmatpush1.bf16.msra.mxu0 %v13021_v60  ;;  %4339 = vmatprep.subr.bf16.mxu1 %v13052_v61  ;;  %v1283_v60 = vld [vmem:[%s19835_s7 + $0x110] sm:$0xff] }
 0x12d   : > { %4392 = vmatprep.subr.bf16.mxu0 %v13054_v62  ;;  %v1299_v62 = vld [vmem:[%s19835_s7 + $0x190] sm:$0xff] }
 0x12f   : > { %4340 = vmatpush1.bf16.msra.mxu1 %v13051_v4 }
 0x130   : > { %4393 = vmatpush1.bf16.msra.mxu0 %v13053_v5  ;;  %4341 = vmatprep.subr.bf16.mxu1 %v13084_v6  ;;  %v12800_v5 = vcombine.high %v1283_v60, %v1299_v62  ;;  %v12802_v6 = vcombine.high %v1284_v63, %v1300_v1 }
 0x131   : > { %4394 = vmatprep.subr.bf16.mxu0 %v13086_v7  ;;  %v1315_v7 = vld [vmem:[%s19835_s7 + $0x210] sm:$0xff] }
 0x132   : > { %v12831_v25 = vcombine.low %v1315_v7, %v1331_v8 }
 0x133   : > { %4342 = vmatpush1.bf16.msra.mxu1 %v13083_v12  ;;  %v12799_v12 = vcombine.low %v1283_v60, %v1299_v62 }
 0x134   : > { %4395 = vmatpush1.bf16.msra.mxu0 %v13085_v13  ;;  %4343 = vmatprep.subr.bf16.mxu1 %v13116_v14  ;;  %v12801_v13 = vcombine.low %v1284_v63, %v1300_v1 }
 0x135   : > { %4396 = vmatprep.subr.bf16.mxu0 %v13118_v15  ;;  %v12832_v15 = vcombine.high %v1315_v7, %v1331_v8  ;;  %v1523_v7 = vld [vmem:[%s19835_s7 + $0x890] sm:$0xff]  ;;  %v1508_v8 = vld [vmem:[%s19835_s7 + $0x818] sm:$0xff] }
 0x137   : > { %4344 = vmatpush1.bf16.msra.mxu1 %v13115_v20 }
 0x138   : > { %4397 = vmatpush1.bf16.msra.mxu0 %v13117_v21  ;;  %4345 = vmatprep.subr.bf16.mxu1 %v13148_v22  ;;  %v1363_v21 = vld [vmem:[%s19835_s7 + $0x390] sm:$0xff]  ;;  %v1348_v22 = vld [vmem:[%s19835_s7 + $0x318] sm:$0xff] }
 0x139   : > { %4398 = vmatprep.subr.bf16.mxu0 %v13150_v23  ;;  %v1364_v23 = vld [vmem:[%s19835_s7 + $0x398] sm:$0xff]  ;;  %v12863_v33 = vcombine.low %v1347_v18, %v1363_v21 }
 0x13a   : > { %v12865_v34 = vcombine.low %v1348_v22, %v1364_v23 }
 0x13b   : > { %4346 = vmatpush1.bf16.msra.mxu1 %v13147_v28  ;;  %v12864_v28 = vcombine.high %v1347_v18, %v1363_v21 }
 0x13c   : > { %4399 = vmatpush1.bf16.msra.mxu0 %v13149_v29  ;;  %4347 = vmatprep.subr.bf16.mxu1 %v13180_v30  ;;  %v12866_v29 = vcombine.high %v1348_v22, %v1364_v23  ;;  %v1395_v30 = vld [vmem:[%s19835_s7 + $0x490] sm:$0xff] }
 0x13d   : > { %4400 = vmatprep.subr.bf16.mxu0 %v13182_v31  ;;  %v1380_v31 = vld [vmem:[%s19835_s7 + $0x418] sm:$0xff]  ;;  %v12896_v35 = vcombine.high %v1379_v27, %v1395_v30  ;;  %v1571_v23 = vld [vmem:[%s19835_s7 + $0xa10] sm:$0xff] }
 0x13e   : > { %v12897_v42 = vcombine.low %v1380_v31, %v1396_v32 }
 0x13f   : > { %4348 = vmatpush1.bf16.msra.mxu1 %v13179_v36  ;;  %v12898_v36 = vcombine.high %v1380_v31, %v1396_v32  ;;  %v1603_v32 = vld [vmem:[%s19835_s7 + $0xb10] sm:$0xff] }
 0x140   : > { %4401 = vmatpush1.bf16.msra.mxu0 %v13181_v37  ;;  %4349 = vmatprep.subr.bf16.mxu1 %v13212_v38  ;;  %v1411_v37 = vld [vmem:[%s19835_s7 + $0x510] sm:$0xff] }
 0x141   : > { %4402 = vmatprep.subr.bf16.mxu0 %v13214_v39  ;;  %v1427_v38 = vld [vmem:[%s19835_s7 + $0x590] sm:$0xff]  ;;  %v1412_v39 = vld [vmem:[%s19835_s7 + $0x518] sm:$0xff] }
 0x142   : > { %v12928_v43 = vcombine.high %v1411_v37, %v1427_v38  ;;  %v12927_v50 = vcombine.low %v1411_v37, %v1427_v38 }
 0x143   : > { %4350 = vmatpush1.bf16.msra.mxu1 %v13211_v40  ;;  %v1428_v40 = vld [vmem:[%s19835_s7 + $0x598] sm:$0xff] }
 0x144   : > { %4403 = vmatpush1.bf16.msra.mxu0 %v13213_v41  ;;  %4351 = vmatprep.subr.bf16.mxu1 %v13244_v45  ;;  %v12895_v41 = vcombine.low %v1379_v27, %v1395_v30  ;;  %v12930_v44 = vcombine.high %v1412_v39, %v1428_v40  ;;  %v1443_v45 = vld [vmem:[%s19835_s7 + $0x610] sm:$0xff]  ;;  %v12929_v51 = vcombine.low %v1412_v39, %v1428_v40  ;;  %v1588_v27 = vld [vmem:[%s19835_s7 + $0xa98] sm:$0xff] }
 0x145   : > { %4404 = vmatprep.subr.bf16.mxu0 %v13246_v49  ;;  %v12960_v52 = vcombine.high %v1443_v45, %v1459_v46  ;;  %v12959_v60 = vcombine.low %v1443_v45, %v1459_v46  ;;  %v1635_v40 = vld [vmem:[%s19835_s7 + $0xc10] sm:$0xff] }
 0x147   : > { %4352 = vmatpush1.bf16.msra.mxu1 %v13243_v47  ;;  %v1444_v47 = vld [vmem:[%s19835_s7 + $0x618] sm:$0xff] }
 0x148   : > { %4405 = vmatpush1.bf16.msra.mxu0 %v13245_v48  ;;  %4427 = vmatprep.subr.bf16.mxu1 %v12768_v53  ;;  %v1460_v48 = vld [vmem:[%s19835_s7 + $0x698] sm:$0xff] }
 0x149   : > { %4480 = vmatprep.subr.bf16.mxu0 %v12770_v57  ;;  %v12962_v53 = vcombine.high %v1444_v47, %v1460_v48  ;;  %v1492_v57 = vld [vmem:[%s19835_s7 + $0x798] sm:$0xff] }
 0x1dd   : > { %v710_v58 = vpop.f32.mrb[8].mxu0  ;;  %v643_v49 = vpop.f32.mrb[0].mxu1 }
 0x1de   : > { %v712_v59 = vpop.f32.mrb[9].mxu0 }
 0x1df   : > { %v714_v61 = vpop.f32.mrb[10].mxu0 }
 0x1e0   : > { %v14776_v2 = vpack.c.bf16 %v714_v61, %v710_v58  ;;  %v716_v3 = vpop.f32.mrb[11].mxu0  ;;  %v645_v58 = vpop.f32.mrb[1].mxu1  ;;  %v12961_v61 = vcombine.low %v1444_v47, %v1460_v48  ;;  %v1667_v48 = vld [vmem:[%s19835_s7 + $0xd10] sm:$0xff] }
 0x1e1   : > { %v14778_v4 = vpack.c.bf16 %v716_v3, %v712_v59  ;;  %v647_v59 = vpop.f32.mrb[2].mxu1 }
 0x1e2   : > { %v14866_v62 = vpack.c.bf16 %v647_v59, %v643_v49  ;;  %v649_v63 = vpop.f32.mrb[3].mxu1  ;;  %v1683_v49 = vld [vmem:[%s19835_s7 + $0xd90] sm:$0xff]  ;;  %v1716_v59 = vld [vmem:[%s19835_s7 + $0xe98] sm:$0xff] }
 0x1e3   : > { %4353 = vmatprep.mubr.bf16.mxu1 %v14778_v4  ;;  %4406 = vmatprep.mubr.bf16.mxu0 %v14778_v4 }
 0x1e4   : > { %4354 = vmatmul.mubr.bf16.vlgmr.msra.gmra.mrb[8].mxu1 %v14776_v2  ;;  %4407 = vmatmul.mubr.bf16.vlgmr.msra.gmra.mrb[16].mxu0 %v14776_v2 }
 0x1e5   : > { %4428 = vmatpush1.bf16.msra.mxu1 %v12767_v55  ;;  %4481 = vmatpush1.bf16.msra.mxu0 %v12769_v56  ;;  %v720_v11 = vpop.f32.mrb[12].mxu0  ;;  %v1491_v55 = vld [vmem:[%s19835_s7 + $0x790] sm:$0xff]  ;;  %v1476_v56 = vld [vmem:[%s19835_s7 + $0x718] sm:$0xff] }
 0x1e6   : > { %v722_v14 = vpop.f32.mrb[13].mxu0  ;;  %4429 = vmatprep.subr.bf16.mxu1 %v12800_v5  ;;  %4482 = vmatprep.subr.bf16.mxu0 %v12802_v6  ;;  %v12992_v1 = vcombine.high %v1475_v54, %v1491_v55  ;;  %v12994_v3 = vcombine.high %v1476_v56, %v1492_v57  ;;  %v1507_v5 = vld [vmem:[%s19835_s7 + $0x810] sm:$0xff]  ;;  %v14871_v6 = vpack.c.bf16 %v649_v63, %v645_v58  ;;  %v1700_v58 = vld [vmem:[%s19835_s7 + $0xe18] sm:$0xff] }
 0x1e7   : > { %v724_v17 = vpop.f32.mrb[14].mxu0  ;;  %v12991_v10 = vcombine.low %v1475_v54, %v1491_v55  ;;  %v13023_v18 = vcombine.low %v1507_v5, %v1523_v7  ;;  %v13184_v54 = vcombine.high %v1667_v48, %v1683_v49 }
 0x1e8   : > { %v14799_v19 = vpack.c.bf16 %v724_v17, %v720_v11  ;;  %v726_v20 = vpop.f32.mrb[15].mxu0  ;;  %19879 = vst [vmem:[#allocation3_spill] sm:$0xff] %v14871_v6  ;;  %v12993_v11 = vcombine.low %v1476_v56, %v1492_v57  ;;  %v1556_v17 = vld [vmem:[%s19835_s7 + $0x998] sm:$0xff]  ;;  %v1699_v56 = vld [vmem:[%s19835_s7 + $0xe10] sm:$0xff] }
 0x1e9   : > { %v14810_v24 = vpack.c.bf16 %v726_v20, %v722_v14  ;;  %4430 = vmatpush1.bf16.msra.mxu1 %v12799_v12  ;;  %4483 = vmatpush1.bf16.msra.mxu0 %v12801_v13  ;;  %v13024_v12 = vcombine.high %v1507_v5, %v1523_v7  ;;  %v13026_v13 = vcombine.high %v1508_v8, %v1524_v9  ;;  %v1539_v14 = vld [vmem:[%s19835_s7 + $0x910] sm:$0xff]  ;;  %v1732_v7 = vld [vmem:[%s19835_s7 + $0xf18] sm:$0xff] }
 0x1ea   : > { %4431 = vmatprep.subr.bf16.mxu1 %v12832_v15  ;;  %4484 = vmatprep.subr.bf16.mxu0 %v12834_v16  ;;  %v1555_v15 = vld [vmem:[%s19835_s7 + $0x990] sm:$0xff]  ;;  %v1540_v16 = vld [vmem:[%s19835_s7 + $0x918] sm:$0xff]  ;;  %v13025_v20 = vcombine.low %v1508_v8, %v1524_v9 }
 0x1eb   : > { %4363 = vmatprep.mubr.bf16.mxu1 %v14810_v24  ;;  %4416 = vmatprep.mubr.bf16.mxu0 %v14810_v24  ;;  %v13056_v21 = vcombine.high %v1539_v14, %v1555_v15  ;;  %v13058_v22 = vcombine.high %v1540_v16, %v1556_v17  ;;  %v1715_v57 = vld [vmem:[%s19835_s7 + $0xe90] sm:$0xff]  ;;  %v1748_v8 = vld [vmem:[%s19835_s7 + $0xf98] sm:$0xff] }
 0x1ec   : > { %4364 = vmatmul.mubr.bf16.gmra.mrb[12].mxu1 %v14799_v19  ;;  %4417 = vmatmul.mubr.bf16.gmra.mrb[20].mxu0 %v14799_v19  ;;  %v13216_v63 = vcombine.high %v1699_v56, %v1715_v57  ;;  %v1747_v5 = vld [vmem:[%s19835_s7 + $0xf90] sm:$0xff]  ;;  %v13215_v9 = vcombine.low %v1699_v56, %v1715_v57  ;;  %v1413_v56 = vld [vmem:[%s19835_s7 + $0x520] sm:$0xff] }
 0x1ed   : > { %4432 = vmatpush1.bf16.msra.mxu1 %v12831_v25  ;;  %4485 = vmatpush1.bf16.msra.mxu0 %v12833_v26  ;;  %v1587_v25 = vld [vmem:[%s19835_s7 + $0xa90] sm:$0xff]  ;;  %v1572_v26 = vld [vmem:[%s19835_s7 + $0xa18] sm:$0xff]  ;;  %v1429_v57 = vld [vmem:[%s19835_s7 + $0x5a0] sm:$0xff] }
 0x1ee   : > { %4459 = vmatprep.mubr.bf16.mxu1 %v14778_v4  ;;  %4512 = vmatprep.mubr.bf16.mxu0 %v14778_v4  ;;  %v13088_v30 = vcombine.high %v1571_v23, %v1587_v25  ;;  %v13090_v31 = vcombine.high %v1572_v26, %v1588_v27  ;;  %v13089_v37 = vcombine.low %v1572_v26, %v1588_v27  ;;  %v1302_v26 = vld [vmem:[%s19835_s7 + $0x1a8] sm:$0xff] }
 0x1ef   : > { %4433 = vmatprep.subr.bf16.mxu1 %v12864_v28  ;;  %4486 = vmatprep.subr.bf16.mxu0 %v12866_v29  ;;  %v13055_v28 = vcombine.low %v1539_v14, %v1555_v15  ;;  %v13057_v29 = vcombine.low %v1540_v16, %v1556_v17  ;;  %v1269_v14 = vld [vmem:[%s19835_s7 + $0xa0] sm:$0xff]  ;;  %v1254_v15 = vld [vmem:[%s19835_s7 + $0x28] sm:$0xff] }
 0x1f0   : > { %v1270_v16 = vld [vmem:[%s19835_s7 + $0xa8] sm:$0xff] }
 0x1f1   : > { %4434 = vmatpush1.bf16.msra.mxu1 %v12863_v33  ;;  %4487 = vmatpush1.bf16.msra.mxu0 %v12865_v34  ;;  %v1619_v33 = vld [vmem:[%s19835_s7 + $0xb90] sm:$0xff]  ;;  %v1604_v34 = vld [vmem:[%s19835_s7 + $0xb18] sm:$0xff] }
 0x1f2   : > { %4435 = vmatprep.subr.bf16.mxu1 %v12896_v35  ;;  %4488 = vmatprep.subr.bf16.mxu0 %v12898_v36  ;;  %v1620_v35 = vld [vmem:[%s19835_s7 + $0xb98] sm:$0xff]  ;;  %v13087_v36 = vcombine.low %v1571_v23, %v1587_v25  ;;  %v13120_v38 = vcombine.high %v1603_v32, %v1619_v33  ;;  %v1301_v23 = vld [vmem:[%s19835_s7 + $0x1a0] sm:$0xff]  ;;  %v1286_v25 = vld [vmem:[%s19835_s7 + $0x128] sm:$0xff] }
 0x1f3   : > { %v13122_v39 = vcombine.high %v1604_v34, %v1620_v35  ;;  %v13121_v45 = vcombine.low %v1604_v34, %v1620_v35  ;;  %v1334_v34 = vld [vmem:[%s19835_s7 + $0x2a8] sm:$0xff] }
 0x1f5   : > { %4436 = vmatpush1.bf16.msra.mxu1 %v12895_v41  ;;  %4489 = vmatpush1.bf16.msra.mxu0 %v12897_v42  ;;  %v1651_v41 = vld [vmem:[%s19835_s7 + $0xc90] sm:$0xff]  ;;  %v1636_v42 = vld [vmem:[%s19835_s7 + $0xc18] sm:$0xff] }
 0x1f6   : > { %4437 = vmatprep.subr.bf16.mxu1 %v12928_v43  ;;  %4490 = vmatprep.subr.bf16.mxu0 %v12930_v44  ;;  %v1652_v43 = vld [vmem:[%s19835_s7 + $0xc98] sm:$0xff]  ;;  %v13119_v44 = vcombine.low %v1603_v32, %v1619_v33  ;;  %v13152_v46 = vcombine.high %v1635_v40, %v1651_v41  ;;  %v1333_v32 = vld [vmem:[%s19835_s7 + $0x2a0] sm:$0xff]  ;;  %v1318_v33 = vld [vmem:[%s19835_s7 + $0x228] sm:$0xff] }
 0x1f7   : > { %v13154_v47 = vcombine.high %v1636_v42, %v1652_v43 }
 0x1f9   : > { %4438 = vmatpush1.bf16.msra.mxu1 %v12927_v50  ;;  %4491 = vmatpush1.bf16.msra.mxu0 %v12929_v51  ;;  %v1668_v50 = vld [vmem:[%s19835_s7 + $0xd18] sm:$0xff] }
 0x1fa   : > { %4439 = vmatprep.subr.bf16.mxu1 %v12960_v52  ;;  %4492 = vmatprep.subr.bf16.mxu0 %v12962_v53  ;;  %v1684_v51 = vld [vmem:[%s19835_s7 + $0xd98] sm:$0xff]  ;;  %v13151_v52 = vcombine.low %v1635_v40, %v1651_v41  ;;  %v13153_v53 = vcombine.low %v1636_v42, %v1652_v43  ;;  %v1365_v40 = vld [vmem:[%s19835_s7 + $0x3a0] sm:$0xff]  ;;  %v1350_v41 = vld [vmem:[%s19835_s7 + $0x328] sm:$0xff] }
 0x1fb   : > { %v13186_v55 = vcombine.high %v1668_v50, %v1684_v51  ;;  %v1366_v42 = vld [vmem:[%s19835_s7 + $0x3a8] sm:$0xff] }
 0x1fd   : > { %4440 = vmatpush1.bf16.msra.mxu1 %v12959_v60  ;;  %4493 = vmatpush1.bf16.msra.mxu0 %v12961_v61  ;;  %v13183_v60 = vcombine.low %v1667_v48, %v1683_v49  ;;  %v13185_v61 = vcombine.low %v1668_v50, %v1684_v51  ;;  %v1397_v48 = vld [vmem:[%s19835_s7 + $0x4a0] sm:$0xff]  ;;  %v1382_v49 = vld [vmem:[%s19835_s7 + $0x428] sm:$0xff] }
 0x1fe   : > { %4441 = vmatprep.subr.bf16.mxu1 %v12992_v1  ;;  %4494 = vmatprep.subr.bf16.mxu0 %v12994_v3  ;;  %v13218_v1 = vcombine.high %v1700_v58, %v1716_v59  ;;  %v1731_v3 = vld [vmem:[%s19835_s7 + $0xf10] sm:$0xff]  ;;  %v1398_v50 = vld [vmem:[%s19835_s7 + $0x4a8] sm:$0xff] }
 0x1ff   : > { %v13247_v17 = vcombine.low %v1731_v3, %v1747_v5 }
 0x201   : > { %4442 = vmatpush1.bf16.msra.mxu1 %v12991_v10  ;;  %4495 = vmatpush1.bf16.msra.mxu0 %v12993_v11  ;;  %v13217_v10 = vcombine.low %v1700_v58, %v1716_v59  ;;  %v13248_v11 = vcombine.high %v1731_v3, %v1747_v5  ;;  %v1414_v58 = vld [vmem:[%s19835_s7 + $0x528] sm:$0xff] }
 0x202   : > { %4443 = vmatprep.subr.bf16.mxu1 %v13024_v12  ;;  %4496 = vmatprep.subr.bf16.mxu0 %v13026_v13  ;;  %v13250_v12 = vcombine.high %v1732_v7, %v1748_v8  ;;  %v1253_v13 = vld [vmem:[%s19835_s7 + $0x20] sm:$0xff]  ;;  %v1430_v59 = vld [vmem:[%s19835_s7 + $0x5a8] sm:$0xff] }
 0x203   : > { %v12771_v27 = vcombine.low %v1253_v13, %v1269_v14 }
 0x205   : > { %4444 = vmatpush1.bf16.msra.mxu1 %v13023_v18  ;;  %4497 = vmatpush1.bf16.msra.mxu0 %v13025_v20  ;;  %v13249_v18 = vcombine.low %v1732_v7, %v1748_v8  ;;  %v12772_v20 = vcombine.high %v1253_v13, %v1269_v14  ;;  %v12932_v7 = vcombine.high %v1413_v56, %v1429_v57  ;;  %v1462_v13 = vld [vmem:[%s19835_s7 + $0x6a8] sm:$0xff] }
 0x206   : > { %4445 = vmatprep.subr.bf16.mxu1 %v13056_v21  ;;  %4498 = vmatprep.subr.bf16.mxu0 %v13058_v22  ;;  %v12774_v21 = vcombine.high %v1254_v15, %v1270_v16  ;;  %v1285_v22 = vld [vmem:[%s19835_s7 + $0x120] sm:$0xff]  ;;  %v12934_v8 = vcombine.high %v1414_v58, %v1430_v59  ;;  %v12931_v14 = vcombine.low %v1413_v56, %v1429_v57 }
 0x207   : > { %v12803_v35 = vcombine.low %v1285_v22, %v1301_v23 }
 0x209   : > { %4446 = vmatpush1.bf16.msra.mxu1 %v13055_v28  ;;  %4499 = vmatpush1.bf16.msra.mxu0 %v13057_v29  ;;  %v12773_v28 = vcombine.low %v1254_v15, %v1270_v16  ;;  %v12804_v29 = vcombine.high %v1285_v22, %v1301_v23  ;;  %v12933_v15 = vcombine.low %v1414_v58, %v1430_v59  ;;  %v1494_v22 = vld [vmem:[%s19835_s7 + $0x7a8] sm:$0xff] }
 0x20a   : > { %4447 = vmatprep.subr.bf16.mxu1 %v13088_v30  ;;  %4500 = vmatprep.subr.bf16.mxu0 %v13090_v31  ;;  %v12806_v30 = vcombine.high %v1286_v25, %v1302_v26  ;;  %v1317_v31 = vld [vmem:[%s19835_s7 + $0x220] sm:$0xff] }
 0x20b   : > { %v12835_v43 = vcombine.low %v1317_v31, %v1333_v32 }
 0x20d   : > { %4448 = vmatpush1.bf16.msra.mxu1 %v13087_v36  ;;  %4501 = vmatpush1.bf16.msra.mxu0 %v13089_v37  ;;  %v12805_v36 = vcombine.low %v1286_v25, %v1302_v26  ;;  %v12836_v37 = vcombine.high %v1317_v31, %v1333_v32  ;;  %v1526_v31 = vld [vmem:[%s19835_s7 + $0x8a8] sm:$0xff] }
 0x20e   : > { %4449 = vmatprep.subr.bf16.mxu1 %v13120_v38  ;;  %4502 = vmatprep.subr.bf16.mxu0 %v13122_v39  ;;  %v12838_v38 = vcombine.high %v1318_v33, %v1334_v34  ;;  %v1349_v39 = vld [vmem:[%s19835_s7 + $0x320] sm:$0xff] }
 0x20f   : > { %v12867_v51 = vcombine.low %v1349_v39, %v1365_v40 }
 0x211   : > { %4450 = vmatpush1.bf16.msra.mxu1 %v13119_v44  ;;  %4503 = vmatpush1.bf16.msra.mxu0 %v13121_v45  ;;  %v12837_v44 = vcombine.low %v1318_v33, %v1334_v34  ;;  %v12868_v45 = vcombine.high %v1349_v39, %v1365_v40  ;;  %v1558_v39 = vld [vmem:[%s19835_s7 + $0x9a8] sm:$0xff] }
 0x212   : > { %4451 = vmatprep.subr.bf16.mxu1 %v13152_v46  ;;  %4504 = vmatprep.subr.bf16.mxu0 %v13154_v47  ;;  %v12870_v46 = vcombine.high %v1350_v41, %v1366_v42  ;;  %v1381_v47 = vld [vmem:[%s19835_s7 + $0x420] sm:$0xff] }
 0x215   : > { %4452 = vmatpush1.bf16.msra.mxu1 %v13151_v52  ;;  %4505 = vmatpush1.bf16.msra.mxu0 %v13153_v53  ;;  %v12869_v52 = vcombine.low %v1350_v41, %v1366_v42  ;;  %v653_v53 = vpop.f32.mrb[4].mxu1 }
 0x216   : > { %4453 = vmatprep.subr.bf16.mxu1 %v13184_v54  ;;  %4506 = vmatprep.subr.bf16.mxu0 %v13186_v55  ;;  %v12900_v54 = vcombine.high %v1381_v47, %v1397_v48  ;;  %v12902_v55 = vcombine.high %v1382_v49, %v1398_v50 }
 0x219   : > { %4454 = vmatpush1.bf16.msra.mxu1 %v13183_v60  ;;  %4507 = vmatpush1.bf16.msra.mxu0 %v13185_v61  ;;  %v655_v60 = vpop.f32.mrb[5].mxu1 }
 0x21a   : > { %4455 = vmatprep.subr.bf16.mxu1 %v13216_v63  ;;  %4508 = vmatprep.subr.bf16.mxu0 %v13218_v1  ;;  %v657_v61 = vpop.f32.mrb[6].mxu1  ;;  %v12899_v63 = vcombine.low %v1381_v47, %v1397_v48  ;;  %v12901_v1 = vcombine.low %v1382_v49, %v1398_v50  ;;  %v1590_v47 = vld [vmem:[%s19835_s7 + $0xaa8] sm:$0xff] }
 0x21b   : > { %v15046_v3 = vpack.c.bf16 %v657_v61, %v653_v53  ;;  %v659_v5 = vpop.f32.mrb[7].mxu1  ;;  %v1621_v53 = vld [vmem:[%s19835_s7 + $0xba0] sm:$0xff] }
 0x21c   : > { %v1653_v61 = vld [vmem:[%s19835_s7 + $0xca0] sm:$0xff] }
 0x21d   : > { %4456 = vmatpush1.bf16.msra.mxu1 %v13215_v9  ;;  %4509 = vmatpush1.bf16.msra.mxu0 %v13217_v10  ;;  %19880 = vst [vmem:[#allocation4_spill] sm:$0xff] %v15046_v3  ;;  %v1445_v9 = vld [vmem:[%s19835_s7 + $0x620] sm:$0xff]  ;;  %v15051_v10 = vpack.c.bf16 %v659_v5, %v655_v60 }
 0x21e   : > { %4457 = vmatprep.subr.bf16.mxu1 %v13248_v11  ;;  %4510 = vmatprep.subr.bf16.mxu0 %v13250_v12  ;;  %v1461_v11 = vld [vmem:[%s19835_s7 + $0x6a0] sm:$0xff]  ;;  %v1446_v12 = vld [vmem:[%s19835_s7 + $0x628] sm:$0xff] }
 0x21f   : > { %v12964_v16 = vcombine.high %v1445_v9, %v1461_v11  ;;  %v12963_v23 = vcombine.low %v1445_v9, %v1461_v11  ;;  %v12965_v25 = vcombine.low %v1446_v12, %v1462_v13  ;;  %v1637_v60 = vld [vmem:[%s19835_s7 + $0xc20] sm:$0xff] }
 0x220   : > { %v1669_v11 = vld [vmem:[%s19835_s7 + $0xd20] sm:$0xff] }
 0x221   : > { %4458 = vmatpush1.bf16.msra.mxu1 %v13247_v17  ;;  %4511 = vmatpush1.bf16.msra.mxu0 %v13249_v18  ;;  %v12966_v17 = vcombine.high %v1446_v12, %v1462_v13  ;;  %v1477_v18 = vld [vmem:[%s19835_s7 + $0x720] sm:$0xff]  ;;  %v1670_v13 = vld [vmem:[%s19835_s7 + $0xd28] sm:$0xff] }
 0x222   : > { %4533 = vmatprep.subr.bf16.mxu1 %v12772_v20  ;;  %4586 = vmatprep.subr.bf16.mxu0 %v12774_v21  ;;  %v1493_v20 = vld [vmem:[%s19835_s7 + $0x7a0] sm:$0xff]  ;;  %v1478_v21 = vld [vmem:[%s19835_s7 + $0x728] sm:$0xff] }
 0x223   : > { %v12996_v26 = vcombine.high %v1477_v18, %v1493_v20  ;;  %v12995_v32 = vcombine.low %v1477_v18, %v1493_v20  ;;  %v12997_v33 = vcombine.low %v1478_v21, %v1494_v22  ;;  %v1685_v12 = vld [vmem:[%s19835_s7 + $0xda0] sm:$0xff] }
 0x224   : > { %4460 = vmatmul.mubr.bf16.vlgmr.msra.gmra.mrb[16].mxu1 %v14776_v2  ;;  %4513 = vmatmul.mubr.bf16.vlgmr.msra.gmra.mrb[24].mxu0 %v14776_v2  ;;  %v1701_v20 = vld [vmem:[%s19835_s7 + $0xe20] sm:$0xff] }
 0x225   : > { %4469 = vmatprep.mubr.bf16.mxu1 %v14810_v24  ;;  %4522 = vmatprep.mubr.bf16.mxu0 %v14810_v24 }
 0x226   : > { %4534 = vmatpush1.bf16.msra.mxu1 %v12771_v27  ;;  %4587 = vmatpush1.bf16.msra.mxu0 %v12773_v28  ;;  %v12998_v27 = vcombine.high %v1478_v21, %v1494_v22  ;;  %v1509_v28 = vld [vmem:[%s19835_s7 + $0x820] sm:$0xff]  ;;  %v1702_v22 = vld [vmem:[%s19835_s7 + $0xe28] sm:$0xff] }
 0x227   : > { %4535 = vmatprep.subr.bf16.mxu1 %v12804_v29  ;;  %4588 = vmatprep.subr.bf16.mxu0 %v12806_v30  ;;  %v1525_v29 = vld [vmem:[%s19835_s7 + $0x8a0] sm:$0xff]  ;;  %v1510_v30 = vld [vmem:[%s19835_s7 + $0x828] sm:$0xff] }
 0x228   : > { %v13028_v34 = vcombine.high %v1509_v28, %v1525_v29  ;;  %v13027_v40 = vcombine.low %v1509_v28, %v1525_v29  ;;  %v13029_v41 = vcombine.low %v1510_v30, %v1526_v31  ;;  %v1717_v21 = vld [vmem:[%s19835_s7 + $0xea0] sm:$0xff] }
 0x229   : > { %v1733_v29 = vld [vmem:[%s19835_s7 + $0xf20] sm:$0xff] }
 0x22a   : > { %4536 = vmatpush1.bf16.msra.mxu1 %v12803_v35  ;;  %4589 = vmatpush1.bf16.msra.mxu0 %v12805_v36  ;;  %v13030_v35 = vcombine.high %v1510_v30, %v1526_v31  ;;  %v1541_v36 = vld [vmem:[%s19835_s7 + $0x920] sm:$0xff]  ;;  %v1734_v31 = vld [vmem:[%s19835_s7 + $0xf28] sm:$0xff] }
 0x22b   : > { %4537 = vmatprep.subr.bf16.mxu1 %v12836_v37  ;;  %4590 = vmatprep.subr.bf16.mxu0 %v12838_v38  ;;  %v1557_v37 = vld [vmem:[%s19835_s7 + $0x9a0] sm:$0xff]  ;;  %v1542_v38 = vld [vmem:[%s19835_s7 + $0x928] sm:$0xff] }
 0x22c   : > { %4470 = vmatmul.mubr.bf16.gmra.mrb[20].mxu1 %v14799_v19  ;;  %4523 = vmatmul.mubr.bf16.gmra.mrb[28].mxu0 %v14799_v19  ;;  %v13060_v42 = vcombine.high %v1541_v36, %v1557_v37  ;;  %v13059_v48 = vcombine.low %v1541_v36, %v1557_v37  ;;  %v13061_v49 = vcombine.low %v1542_v38, %v1558_v39  ;;  %v1749_v30 = vld [vmem:[%s19835_s7 + $0xfa0] sm:$0xff]  ;;  %v1255_v37 = vld [vmem:[%s19835_s7 + $0x30] sm:$0xff] }
 0x22d   : > { %4565 = vmatprep.mubr.bf16.mxu1 %v14778_v4  ;;  %4618 = vmatprep.mubr.bf16.mxu0 %v14778_v4 }
 0x22e   : > { %4538 = vmatpush1.bf16.msra.mxu1 %v12835_v43  ;;  %4591 = vmatpush1.bf16.msra.mxu0 %v12837_v44  ;;  %v13062_v43 = vcombine.high %v1542_v38, %v1558_v39  ;;  %v1573_v44 = vld [vmem:[%s19835_s7 + $0xa20] sm:$0xff]  ;;  %v1271_v38 = vld [vmem:[%s19835_s7 + $0xb0] sm:$0xff]  ;;  %v1256_v39 = vld [vmem:[%s19835_s7 + $0x38] sm:$0xff] }
 0x22f   : > { %4539 = vmatprep.subr.bf16.mxu1 %v12868_v45  ;;  %4592 = vmatprep.subr.bf16.mxu0 %v12870_v46  ;;  %v1589_v45 = vld [vmem:[%s19835_s7 + $0xaa0] sm:$0xff]  ;;  %v1574_v46 = vld [vmem:[%s19835_s7 + $0xa28] sm:$0xff] }
 0x230   : > { %v13092_v50 = vcombine.high %v1573_v44, %v1589_v45  ;;  %v13091_v56 = vcombine.low %v1573_v44, %v1589_v45  ;;  %v13093_v57 = vcombine.low %v1574_v46, %v1590_v47  ;;  %v1287_v45 = vld [vmem:[%s19835_s7 + $0x130] sm:$0xff] }
 0x232   : > { %4540 = vmatpush1.bf16.msra.mxu1 %v12867_v51  ;;  %4593 = vmatpush1.bf16.msra.mxu0 %v12869_v52  ;;  %v13094_v51 = vcombine.high %v1574_v46, %v1590_v47  ;;  %v1605_v52 = vld [vmem:[%s19835_s7 + $0xb20] sm:$0xff]  ;;  %v1303_v46 = vld [vmem:[%s19835_s7 + $0x1b0] sm:$0xff]  ;;  %v1288_v47 = vld [vmem:[%s19835_s7 + $0x138] sm:$0xff] }
 0x233   : > { %4541 = vmatprep.subr.bf16.mxu1 %v12900_v54  ;;  %4594 = vmatprep.subr.bf16.mxu0 %v12902_v55  ;;  %v1606_v54 = vld [vmem:[%s19835_s7 + $0xb28] sm:$0xff]  ;;  %v13124_v58 = vcombine.high %v1605_v52, %v1621_v53  ;;  %v13123_v5 = vcombine.low %v1605_v52, %v1621_v53  ;;  %v1319_v53 = vld [vmem:[%s19835_s7 + $0x230] sm:$0xff] }
 0x234   : > { %v1622_v55 = vld [vmem:[%s19835_s7 + $0xba8] sm:$0xff] }
 0x235   : > { %v13126_v59 = vcombine.high %v1606_v54, %v1622_v55 }
 0x236   : > { %4542 = vmatpush1.bf16.msra.mxu1 %v12899_v63  ;;  %4595 = vmatpush1.bf16.msra.mxu0 %v12901_v1  ;;  %v1638_v63 = vld [vmem:[%s19835_s7 + $0xc28] sm:$0xff] }
 0x237   : > { %4543 = vmatprep.subr.bf16.mxu1 %v12932_v7  ;;  %4596 = vmatprep.subr.bf16.mxu0 %v12934_v8  ;;  %v1654_v1 = vld [vmem:[%s19835_s7 + $0xca8] sm:$0xff]  ;;  %v13125_v7 = vcombine.low %v1606_v54, %v1622_v55  ;;  %v13156_v8 = vcombine.high %v1637_v60, %v1653_v61  ;;  %v1335_v54 = vld [vmem:[%s19835_s7 + $0x2b0] sm:$0xff]  ;;  %v1320_v55 = vld [vmem:[%s19835_s7 + $0x238] sm:$0xff] }
 0x238   : > { %v13158_v9 = vcombine.high %v1638_v63, %v1654_v1 }
 0x23a   : > { %4544 = vmatpush1.bf16.msra.mxu1 %v12931_v14  ;;  %4597 = vmatpush1.bf16.msra.mxu0 %v12933_v15  ;;  %v1686_v14 = vld [vmem:[%s19835_s7 + $0xda8] sm:$0xff]  ;;  %v13155_v15 = vcombine.low %v1637_v60, %v1653_v61  ;;  %v1351_v61 = vld [vmem:[%s19835_s7 + $0x330] sm:$0xff] }
 0x23b   : > { %4545 = vmatprep.subr.bf16.mxu1 %v12964_v16  ;;  %4598 = vmatprep.subr.bf16.mxu0 %v12966_v17  ;;  %v13157_v16 = vcombine.low %v1638_v63, %v1654_v1  ;;  %v13188_v17 = vcombine.high %v1669_v11, %v1685_v12  ;;  %v13190_v18 = vcombine.high %v1670_v13, %v1686_v14  ;;  %v1367_v63 = vld [vmem:[%s19835_s7 + $0x3b0] sm:$0xff]  ;;  %v1352_v1 = vld [vmem:[%s19835_s7 + $0x338] sm:$0xff] }
 0x23e   : > { %4546 = vmatpush1.bf16.msra.mxu1 %v12963_v23  ;;  %4599 = vmatpush1.bf16.msra.mxu0 %v12965_v25  ;;  %v1718_v23 = vld [vmem:[%s19835_s7 + $0xea8] sm:$0xff]  ;;  %v13187_v25 = vcombine.low %v1669_v11, %v1685_v12  ;;  %v1383_v12 = vld [vmem:[%s19835_s7 + $0x430] sm:$0xff] }
 0x23f   : > { %4547 = vmatprep.subr.bf16.mxu1 %v12996_v26  ;;  %4600 = vmatprep.subr.bf16.mxu0 %v12998_v27  ;;  %v13189_v26 = vcombine.low %v1670_v13, %v1686_v14  ;;  %v13220_v27 = vcombine.high %v1701_v20, %v1717_v21  ;;  %v13222_v28 = vcombine.high %v1702_v22, %v1718_v23  ;;  %v1399_v13 = vld [vmem:[%s19835_s7 + $0x4b0] sm:$0xff]  ;;  %v1384_v14 = vld [vmem:[%s19835_s7 + $0x438] sm:$0xff] }
 0x242   : > { %4548 = vmatpush1.bf16.msra.mxu1 %v12995_v32  ;;  %4601 = vmatpush1.bf16.msra.mxu0 %v12997_v33  ;;  %v1750_v32 = vld [vmem:[%s19835_s7 + $0xfa8] sm:$0xff]  ;;  %v13219_v33 = vcombine.low %v1701_v20, %v1717_v21  ;;  %v1415_v21 = vld [vmem:[%s19835_s7 + $0x530] sm:$0xff] }
 0x243   : > { %4549 = vmatprep.subr.bf16.mxu1 %v13028_v34  ;;  %4602 = vmatprep.subr.bf16.mxu0 %v13030_v35  ;;  %v13221_v34 = vcombine.low %v1702_v22, %v1718_v23  ;;  %v13252_v35 = vcombine.high %v1733_v29, %v1749_v30  ;;  %v13254_v36 = vcombine.high %v1734_v31, %v1750_v32  ;;  %v1431_v22 = vld [vmem:[%s19835_s7 + $0x5b0] sm:$0xff]  ;;  %v1416_v23 = vld [vmem:[%s19835_s7 + $0x538] sm:$0xff] }
 0x246   : > { %4550 = vmatpush1.bf16.msra.mxu1 %v13027_v40  ;;  %4603 = vmatpush1.bf16.msra.mxu0 %v13029_v41  ;;  %v1272_v40 = vld [vmem:[%s19835_s7 + $0xb8] sm:$0xff]  ;;  %v13251_v41 = vcombine.low %v1733_v29, %v1749_v30  ;;  %v1447_v30 = vld [vmem:[%s19835_s7 + $0x630] sm:$0xff] }
 0x247   : > { %4551 = vmatprep.subr.bf16.mxu1 %v13060_v42  ;;  %4604 = vmatprep.subr.bf16.mxu0 %v13062_v43  ;;  %v13253_v42 = vcombine.low %v1734_v31, %v1750_v32  ;;  %v12776_v43 = vcombine.high %v1255_v37, %v1271_v38  ;;  %v12778_v44 = vcombine.high %v1256_v39, %v1272_v40  ;;  %v1463_v31 = vld [vmem:[%s19835_s7 + $0x6b0] sm:$0xff]  ;;  %v1448_v32 = vld [vmem:[%s19835_s7 + $0x638] sm:$0xff] }
 0x24a   : > { %4552 = vmatpush1.bf16.msra.mxu1 %v13059_v48  ;;  %4605 = vmatpush1.bf16.msra.mxu0 %v13061_v49  ;;  %v1304_v48 = vld [vmem:[%s19835_s7 + $0x1b8] sm:$0xff]  ;;  %v12775_v49 = vcombine.low %v1255_v37, %v1271_v38  ;;  %v1479_v38 = vld [vmem:[%s19835_s7 + $0x730] sm:$0xff] }
 0x24b   : > { %4553 = vmatprep.subr.bf16.mxu1 %v13092_v50  ;;  %4606 = vmatprep.subr.bf16.mxu0 %v13094_v51  ;;  %v12777_v50 = vcombine.low %v1256_v39, %v1272_v40  ;;  %v12808_v51 = vcombine.high %v1287_v45, %v1303_v46  ;;  %v12810_v52 = vcombine.high %v1288_v47, %v1304_v48  ;;  %v1495_v39 = vld [vmem:[%s19835_s7 + $0x7b0] sm:$0xff]  ;;  %v1480_v40 = vld [vmem:[%s19835_s7 + $0x738] sm:$0xff] }
 0x24e   : > { %4554 = vmatpush1.bf16.msra.mxu1 %v13091_v56  ;;  %4607 = vmatpush1.bf16.msra.mxu0 %v13093_v57  ;;  %v1336_v56 = vld [vmem:[%s19835_s7 + $0x2b8] sm:$0xff]  ;;  %v12807_v57 = vcombine.low %v1287_v45, %v1303_v46  ;;  %v1511_v46 = vld [vmem:[%s19835_s7 + $0x830] sm:$0xff] }
 0x24f   : > { %4555 = vmatprep.subr.bf16.mxu1 %v13124_v58  ;;  %4608 = vmatprep.subr.bf16.mxu0 %v13126_v59  ;;  %v12809_v58 = vcombine.low %v1288_v47, %v1304_v48  ;;  %v12840_v59 = vcombine.high %v1319_v53, %v1335_v54  ;;  %v12842_v60 = vcombine.high %v1320_v55, %v1336_v56  ;;  %v1527_v47 = vld [vmem:[%s19835_s7 + $0x8b0] sm:$0xff]  ;;  %v1512_v48 = vld [vmem:[%s19835_s7 + $0x838] sm:$0xff] }
 0x252   : > { %4556 = vmatpush1.bf16.msra.mxu1 %v13123_v5  ;;  %4609 = vmatpush1.bf16.msra.mxu0 %v13125_v7  ;;  %v1368_v5 = vld [vmem:[%s19835_s7 + $0x3b8] sm:$0xff]  ;;  %v12839_v7 = vcombine.low %v1319_v53, %v1335_v54  ;;  %v1543_v54 = vld [vmem:[%s19835_s7 + $0x930] sm:$0xff] }
 0x253   : > { %4557 = vmatprep.subr.bf16.mxu1 %v13156_v8  ;;  %4610 = vmatprep.subr.bf16.mxu0 %v13158_v9  ;;  %v12841_v8 = vcombine.low %v1320_v55, %v1336_v56  ;;  %v12872_v9 = vcombine.high %v1351_v61, %v1367_v63  ;;  %v12874_v11 = vcombine.high %v1352_v1, %v1368_v5  ;;  %v1559_v55 = vld [vmem:[%s19835_s7 + $0x9b0] sm:$0xff]  ;;  %v1544_v56 = vld [vmem:[%s19835_s7 + $0x938] sm:$0xff] }
 0x256   : > { %4558 = vmatpush1.bf16.msra.mxu1 %v13155_v15  ;;  %4611 = vmatpush1.bf16.msra.mxu0 %v13157_v16  ;;  %v1400_v15 = vld [vmem:[%s19835_s7 + $0x4b8] sm:$0xff]  ;;  %v12871_v16 = vcombine.low %v1351_v61, %v1367_v63  ;;  %v1575_v63 = vld [vmem:[%s19835_s7 + $0xa30] sm:$0xff] }
 0x257   : > { %4559 = vmatprep.subr.bf16.mxu1 %v13188_v17  ;;  %4612 = vmatprep.subr.bf16.mxu0 %v13190_v18  ;;  %v12873_v17 = vcombine.low %v1352_v1, %v1368_v5  ;;  %v12904_v18 = vcombine.high %v1383_v12, %v1399_v13  ;;  %v12906_v20 = vcombine.high %v1384_v14, %v1400_v15  ;;  %v1591_v1 = vld [vmem:[%s19835_s7 + $0xab0] sm:$0xff]  ;;  %v1576_v5 = vld [vmem:[%s19835_s7 + $0xa38] sm:$0xff] }
 0x25a   : > { %4560 = vmatpush1.bf16.msra.mxu1 %v13187_v25  ;;  %4613 = vmatpush1.bf16.msra.mxu0 %v13189_v26  ;;  %v1432_v25 = vld [vmem:[%s19835_s7 + $0x5b8] sm:$0xff]  ;;  %v12903_v26 = vcombine.low %v1383_v12, %v1399_v13  ;;  %v1607_v13 = vld [vmem:[%s19835_s7 + $0xb30] sm:$0xff] }
 0x25b   : > { %4561 = vmatprep.subr.bf16.mxu1 %v13220_v27  ;;  %4614 = vmatprep.subr.bf16.mxu0 %v13222_v28  ;;  %v12905_v27 = vcombine.low %v1384_v14, %v1400_v15  ;;  %v12936_v28 = vcombine.high %v1415_v21, %v1431_v22  ;;  %v12938_v29 = vcombine.high %v1416_v23, %v1432_v25  ;;  %v1623_v14 = vld [vmem:[%s19835_s7 + $0xbb0] sm:$0xff]  ;;  %v1608_v15 = vld [vmem:[%s19835_s7 + $0xb38] sm:$0xff] }
 0x25e   : > { %4562 = vmatpush1.bf16.msra.mxu1 %v13219_v33  ;;  %4615 = vmatpush1.bf16.msra.mxu0 %v13221_v34  ;;  %v1464_v33 = vld [vmem:[%s19835_s7 + $0x6b8] sm:$0xff]  ;;  %v12935_v34 = vcombine.low %v1415_v21, %v1431_v22  ;;  %v1639_v22 = vld [vmem:[%s19835_s7 + $0xc30] sm:$0xff] }
 0x25f   : > { %4563 = vmatprep.subr.bf16.mxu1 %v13252_v35  ;;  %4616 = vmatprep.subr.bf16.mxu0 %v13254_v36  ;;  %v12937_v35 = vcombine.low %v1416_v23, %v1432_v25  ;;  %v12968_v36 = vcombine.high %v1447_v30, %v1463_v31  ;;  %v12970_v37 = vcombine.high %v1448_v32, %v1464_v33  ;;  %v1655_v23 = vld [vmem:[%s19835_s7 + $0xcb0] sm:$0xff]  ;;  %v1640_v25 = vld [vmem:[%s19835_s7 + $0xc38] sm:$0xff] }
 0x262   : > { %4564 = vmatpush1.bf16.msra.mxu1 %v13251_v41  ;;  %4617 = vmatpush1.bf16.msra.mxu0 %v13253_v42  ;;  %v1496_v41 = vld [vmem:[%s19835_s7 + $0x7b8] sm:$0xff]  ;;  %v12967_v42 = vcombine.low %v1447_v30, %v1463_v31  ;;  %v1671_v31 = vld [vmem:[%s19835_s7 + $0xd30] sm:$0xff] }
 0x263   : > { %4639 = vmatprep.subr.bf16.mxu1 %v12776_v43  ;;  %4692 = vmatprep.subr.bf16.mxu0 %v12778_v44  ;;  %v12969_v43 = vcombine.low %v1448_v32, %v1464_v33  ;;  %v13000_v44 = vcombine.high %v1479_v38, %v1495_v39  ;;  %v13002_v45 = vcombine.high %v1480_v40, %v1496_v41  ;;  %v1687_v32 = vld [vmem:[%s19835_s7 + $0xdb0] sm:$0xff]  ;;  %v1672_v33 = vld [vmem:[%s19835_s7 + $0xd38] sm:$0xff] }
 0x265   : > { %4566 = vmatmul.mubr.bf16.vlgmr.msra.gmra.mrb[24].mxu1 %v14776_v2  ;;  %4619 = vmatmul.mubr.bf16.vlgmr.msra.gmra.mrb[32].mxu0 %v14776_v2 }
 0x266   : > { %4575 = vmatprep.mubr.bf16.mxu1 %v14810_v24  ;;  %4628 = vmatprep.mubr.bf16.mxu0 %v14810_v24 }
 0x267   : > { %4640 = vmatpush1.bf16.msra.mxu1 %v12775_v49  ;;  %4693 = vmatpush1.bf16.msra.mxu0 %v12777_v50  ;;  %v1528_v49 = vld [vmem:[%s19835_s7 + $0x8b8] sm:$0xff]  ;;  %v12999_v50 = vcombine.low %v1479_v38, %v1495_v39  ;;  %v1703_v39 = vld [vmem:[%s19835_s7 + $0xe30] sm:$0xff] }
 0x268   : > { %4641 = vmatprep.subr.bf16.mxu1 %v12808_v51  ;;  %4694 = vmatprep.subr.bf16.mxu0 %v12810_v52  ;;  %v13001_v51 = vcombine.low %v1480_v40, %v1496_v41  ;;  %v13032_v52 = vcombine.high %v1511_v46, %v1527_v47  ;;  %v13034_v53 = vcombine.high %v1512_v48, %v1528_v49  ;;  %v1719_v40 = vld [vmem:[%s19835_s7 + $0xeb0] sm:$0xff]  ;;  %v1704_v41 = vld [vmem:[%s19835_s7 + $0xe38] sm:$0xff] }
 0x26b   : > { %4642 = vmatpush1.bf16.msra.mxu1 %v12807_v57  ;;  %4695 = vmatpush1.bf16.msra.mxu0 %v12809_v58  ;;  %v1560_v57 = vld [vmem:[%s19835_s7 + $0x9b8] sm:$0xff]  ;;  %v13031_v58 = vcombine.low %v1511_v46, %v1527_v47  ;;  %v1735_v47 = vld [vmem:[%s19835_s7 + $0xf30] sm:$0xff] }
 0x26c   : > { %4643 = vmatprep.subr.bf16.mxu1 %v12840_v59  ;;  %4696 = vmatprep.subr.bf16.mxu0 %v12842_v60  ;;  %v13033_v59 = vcombine.low %v1512_v48, %v1528_v49  ;;  %v13064_v60 = vcombine.high %v1543_v54, %v1559_v55  ;;  %v13066_v61 = vcombine.high %v1544_v56, %v1560_v57  ;;  %v1751_v48 = vld [vmem:[%s19835_s7 + $0xfb0] sm:$0xff]  ;;  %v1736_v49 = vld [vmem:[%s19835_s7 + $0xf38] sm:$0xff] }
 0x26d   : > { %4576 = vmatmul.mubr.bf16.gmra.mrb[28].mxu1 %v14799_v19  ;;  %4629 = vmatmul.mubr.bf16.gmra.mrb[36].mxu0 %v14799_v19 }
 0x26e   : > { %4671 = vmatprep.mubr.bf16.mxu1 %v14778_v4  ;;  %4724 = vmatprep.mubr.bf16.mxu0 %v14778_v4 }
 0x26f   : > { %4644 = vmatpush1.bf16.msra.mxu1 %v12839_v7  ;;  %4697 = vmatpush1.bf16.msra.mxu0 %v12841_v8  ;;  %v1592_v7 = vld [vmem:[%s19835_s7 + $0xab8] sm:$0xff]  ;;  %v13063_v8 = vcombine.low %v1543_v54, %v1559_v55  ;;  %v1257_v55 = vld [vmem:[%s19835_s7 + $0x40] sm:$0xff] }
 0x270   : > { %4645 = vmatprep.subr.bf16.mxu1 %v12872_v9  ;;  %4698 = vmatprep.subr.bf16.mxu0 %v12874_v11  ;;  %v13065_v9 = vcombine.low %v1544_v56, %v1560_v57  ;;  %v13096_v11 = vcombine.high %v1575_v63, %v1591_v1  ;;  %v13098_v12 = vcombine.high %v1576_v5, %v1592_v7  ;;  %v1273_v56 = vld [vmem:[%s19835_s7 + $0xc0] sm:$0xff]  ;;  %v1258_v57 = vld [vmem:[%s19835_s7 + $0x48] sm:$0xff] }
 0x273   : > { %4646 = vmatpush1.bf16.msra.mxu1 %v12871_v16  ;;  %4699 = vmatpush1.bf16.msra.mxu0 %v12873_v17  ;;  %v1624_v16 = vld [vmem:[%s19835_s7 + $0xbb8] sm:$0xff]  ;;  %v13095_v17 = vcombine.low %v1575_v63, %v1591_v1  ;;  %v1289_v1 = vld [vmem:[%s19835_s7 + $0x140] sm:$0xff] }
 0x274   : > { %4647 = vmatprep.subr.bf16.mxu1 %v12904_v18  ;;  %4700 = vmatprep.subr.bf16.mxu0 %v12906_v20  ;;  %v13097_v18 = vcombine.low %v1576_v5, %v1592_v7  ;;  %v13128_v20 = vcombine.high %v1607_v13, %v1623_v14  ;;  %v13130_v21 = vcombine.high %v1608_v15, %v1624_v16  ;;  %v1305_v5 = vld [vmem:[%s19835_s7 + $0x1c0] sm:$0xff]  ;;  %v1290_v7 = vld [vmem:[%s19835_s7 + $0x148] sm:$0xff] }
 0x277   : > { %4648 = vmatpush1.bf16.msra.mxu1 %v12903_v26  ;;  %4701 = vmatpush1.bf16.msra.mxu0 %v12905_v27  ;;  %v1656_v26 = vld [vmem:[%s19835_s7 + $0xcb8] sm:$0xff]  ;;  %v13127_v27 = vcombine.low %v1607_v13, %v1623_v14  ;;  %v1321_v14 = vld [vmem:[%s19835_s7 + $0x240] sm:$0xff] }
 0x278   : > { %4649 = vmatprep.subr.bf16.mxu1 %v12936_v28  ;;  %4702 = vmatprep.subr.bf16.mxu0 %v12938_v29  ;;  %v13129_v28 = vcombine.low %v1608_v15, %v1624_v16  ;;  %v13160_v29 = vcombine.high %v1639_v22, %v1655_v23  ;;  %v13162_v30 = vcombine.high %v1640_v25, %v1656_v26  ;;  %v1337_v15 = vld [vmem:[%s19835_s7 + $0x2c0] sm:$0xff]  ;;  %v1322_v16 = vld [vmem:[%s19835_s7 + $0x248] sm:$0xff] }
 0x27b   : > { %4650 = vmatpush1.bf16.msra.mxu1 %v12935_v34  ;;  %4703 = vmatpush1.bf16.msra.mxu0 %v12937_v35  ;;  %v1688_v34 = vld [vmem:[%s19835_s7 + $0xdb8] sm:$0xff]  ;;  %v13159_v35 = vcombine.low %v1639_v22, %v1655_v23  ;;  %v1353_v23 = vld [vmem:[%s19835_s7 + $0x340] sm:$0xff] }
 0x27c   : > { %4651 = vmatprep.subr.bf16.mxu1 %v12968_v36  ;;  %4704 = vmatprep.subr.bf16.mxu0 %v12970_v37  ;;  %v13161_v36 = vcombine.low %v1640_v25, %v1656_v26  ;;  %v13192_v37 = vcombine.high %v1671_v31, %v1687_v32  ;;  %v13194_v38 = vcombine.high %v1672_v33, %v1688_v34  ;;  %v1369_v25 = vld [vmem:[%s19835_s7 + $0x3c0] sm:$0xff]  ;;  %v1354_v26 = vld [vmem:[%s19835_s7 + $0x348] sm:$0xff] }
 0x27f   : > { %4652 = vmatpush1.bf16.msra.mxu1 %v12967_v42  ;;  %4705 = vmatpush1.bf16.msra.mxu0 %v12969_v43  ;;  %v1720_v42 = vld [vmem:[%s19835_s7 + $0xeb8] sm:$0xff]  ;;  %v13191_v43 = vcombine.low %v1671_v31, %v1687_v32  ;;  %v1385_v32 = vld [vmem:[%s19835_s7 + $0x440] sm:$0xff] }
 0x280   : > { %4653 = vmatprep.subr.bf16.mxu1 %v13000_v44  ;;  %4706 = vmatprep.subr.bf16.mxu0 %v13002_v45  ;;  %v13193_v44 = vcombine.low %v1672_v33, %v1688_v34  ;;  %v13224_v45 = vcombine.high %v1703_v39, %v1719_v40  ;;  %v13226_v46 = vcombine.high %v1704_v41, %v1720_v42  ;;  %v1401_v33 = vld [vmem:[%s19835_s7 + $0x4c0] sm:$0xff]  ;;  %v1386_v34 = vld [vmem:[%s19835_s7 + $0x448] sm:$0xff] }
 0x283   : > { %4654 = vmatpush1.bf16.msra.mxu1 %v12999_v50  ;;  %4707 = vmatpush1.bf16.msra.mxu0 %v13001_v51  ;;  %v1752_v50 = vld [vmem:[%s19835_s7 + $0xfb8] sm:$0xff]  ;;  %v13223_v51 = vcombine.low %v1703_v39, %v1719_v40  ;;  %v1417_v40 = vld [vmem:[%s19835_s7 + $0x540] sm:$0xff] }
 0x284   : > { %4655 = vmatprep.subr.bf16.mxu1 %v13032_v52  ;;  %4708 = vmatprep.subr.bf16.mxu0 %v13034_v53  ;;  %v13225_v52 = vcombine.low %v1704_v41, %v1720_v42  ;;  %v13256_v53 = vcombine.high %v1735_v47, %v1751_v48  ;;  %v13258_v54 = vcombine.high %v1736_v49, %v1752_v50  ;;  %v1433_v41 = vld [vmem:[%s19835_s7 + $0x5c0] sm:$0xff]  ;;  %v1418_v42 = vld [vmem:[%s19835_s7 + $0x548] sm:$0xff] }
 0x287   : > { %4656 = vmatpush1.bf16.msra.mxu1 %v13031_v58  ;;  %4709 = vmatpush1.bf16.msra.mxu0 %v13033_v59  ;;  %v1274_v58 = vld [vmem:[%s19835_s7 + $0xc8] sm:$0xff]  ;;  %v13255_v59 = vcombine.low %v1735_v47, %v1751_v48  ;;  %v1449_v48 = vld [vmem:[%s19835_s7 + $0x640] sm:$0xff] }
 0x288   : > { %4657 = vmatprep.subr.bf16.mxu1 %v13064_v60  ;;  %4710 = vmatprep.subr.bf16.mxu0 %v13066_v61  ;;  %v13257_v60 = vcombine.low %v1736_v49, %v1752_v50  ;;  %v12780_v61 = vcombine.high %v1257_v55, %v1273_v56  ;;  %v12782_v63 = vcombine.high %v1258_v57, %v1274_v58  ;;  %v1465_v49 = vld [vmem:[%s19835_s7 + $0x6c0] sm:$0xff]  ;;  %v1450_v50 = vld [vmem:[%s19835_s7 + $0x648] sm:$0xff] }
 0x28b   : > { %4658 = vmatpush1.bf16.msra.mxu1 %v13063_v8  ;;  %4711 = vmatpush1.bf16.msra.mxu0 %v13065_v9  ;;  %v1306_v8 = vld [vmem:[%s19835_s7 + $0x1c8] sm:$0xff]  ;;  %v12779_v9 = vcombine.low %v1257_v55, %v1273_v56  ;;  %v1481_v56 = vld [vmem:[%s19835_s7 + $0x740] sm:$0xff] }
 0x28c   : > { %4659 = vmatprep.subr.bf16.mxu1 %v13096_v11  ;;  %4712 = vmatprep.subr.bf16.mxu0 %v13098_v12  ;;  %v12781_v11 = vcombine.low %v1258_v57, %v1274_v58  ;;  %v12812_v12 = vcombine.high %v1289_v1, %v1305_v5  ;;  %v12814_v13 = vcombine.high %v1290_v7, %v1306_v8  ;;  %v1497_v57 = vld [vmem:[%s19835_s7 + $0x7c0] sm:$0xff]  ;;  %v1482_v58 = vld [vmem:[%s19835_s7 + $0x748] sm:$0xff] }
 0x28f   : > { %4660 = vmatpush1.bf16.msra.mxu1 %v13095_v17  ;;  %4713 = vmatpush1.bf16.msra.mxu0 %v13097_v18  ;;  %v1338_v17 = vld [vmem:[%s19835_s7 + $0x2c8] sm:$0xff]  ;;  %v12811_v18 = vcombine.low %v1289_v1, %v1305_v5  ;;  %v1513_v5 = vld [vmem:[%s19835_s7 + $0x840] sm:$0xff] }
 0x290   : > { %4661 = vmatprep.subr.bf16.mxu1 %v13128_v20  ;;  %4714 = vmatprep.subr.bf16.mxu0 %v13130_v21  ;;  %v12813_v20 = vcombine.low %v1290_v7, %v1306_v8  ;;  %v12844_v21 = vcombine.high %v1321_v14, %v1337_v15  ;;  %v12846_v22 = vcombine.high %v1322_v16, %v1338_v17  ;;  %v1529_v7 = vld [vmem:[%s19835_s7 + $0x8c0] sm:$0xff]  ;;  %v1514_v8 = vld [vmem:[%s19835_s7 + $0x848] sm:$0xff] }
 0x293   : > { %4662 = vmatpush1.bf16.msra.mxu1 %v13127_v27  ;;  %4715 = vmatpush1.bf16.msra.mxu0 %v13129_v28  ;;  %v1370_v27 = vld [vmem:[%s19835_s7 + $0x3c8] sm:$0xff]  ;;  %v12843_v28 = vcombine.low %v1321_v14, %v1337_v15  ;;  %v1545_v15 = vld [vmem:[%s19835_s7 + $0x940] sm:$0xff] }
 0x294   : > { %4663 = vmatprep.subr.bf16.mxu1 %v13160_v29  ;;  %4716 = vmatprep.subr.bf16.mxu0 %v13162_v30  ;;  %v12845_v29 = vcombine.low %v1322_v16, %v1338_v17  ;;  %v12876_v30 = vcombine.high %v1353_v23, %v1369_v25  ;;  %v12878_v31 = vcombine.high %v1354_v26, %v1370_v27  ;;  %v1561_v16 = vld [vmem:[%s19835_s7 + $0x9c0] sm:$0xff]  ;;  %v1546_v17 = vld [vmem:[%s19835_s7 + $0x948] sm:$0xff] }
 0x297   : > { %4664 = vmatpush1.bf16.msra.mxu1 %v13159_v35  ;;  %4717 = vmatpush1.bf16.msra.mxu0 %v13161_v36  ;;  %v1402_v35 = vld [vmem:[%s19835_s7 + $0x4c8] sm:$0xff]  ;;  %v12875_v36 = vcombine.low %v1353_v23, %v1369_v25  ;;  %v1577_v25 = vld [vmem:[%s19835_s7 + $0xa40] sm:$0xff] }
 0x298   : > { %4665 = vmatprep.subr.bf16.mxu1 %v13192_v37  ;;  %4718 = vmatprep.subr.bf16.mxu0 %v13194_v38  ;;  %v12877_v37 = vcombine.low %v1354_v26, %v1370_v27  ;;  %v12908_v38 = vcombine.high %v1385_v32, %v1401_v33  ;;  %v12910_v39 = vcombine.high %v1386_v34, %v1402_v35  ;;  %v1593_v26 = vld [vmem:[%s19835_s7 + $0xac0] sm:$0xff]  ;;  %v1578_v27 = vld [vmem:[%s19835_s7 + $0xa48] sm:$0xff] }
 0x29b   : > { %4666 = vmatpush1.bf16.msra.mxu1 %v13191_v43  ;;  %4719 = vmatpush1.bf16.msra.mxu0 %v13193_v44  ;;  %v1434_v43 = vld [vmem:[%s19835_s7 + $0x5c8] sm:$0xff]  ;;  %v12907_v44 = vcombine.low %v1385_v32, %v1401_v33  ;;  %v1609_v33 = vld [vmem:[%s19835_s7 + $0xb40] sm:$0xff] }
 0x29c   : > { %4667 = vmatprep.subr.bf16.mxu1 %v13224_v45  ;;  %4720 = vmatprep.subr.bf16.mxu0 %v13226_v46  ;;  %v12909_v45 = vcombine.low %v1386_v34, %v1402_v35  ;;  %v12940_v46 = vcombine.high %v1417_v40, %v1433_v41  ;;  %v12942_v47 = vcombine.high %v1418_v42, %v1434_v43  ;;  %v1625_v34 = vld [vmem:[%s19835_s7 + $0xbc0] sm:$0xff]  ;;  %v1610_v35 = vld [vmem:[%s19835_s7 + $0xb48] sm:$0xff] }
 0x29f   : > { %4668 = vmatpush1.bf16.msra.mxu1 %v13223_v51  ;;  %4721 = vmatpush1.bf16.msra.mxu0 %v13225_v52  ;;  %v1466_v51 = vld [vmem:[%s19835_s7 + $0x6c8] sm:$0xff]  ;;  %v12939_v52 = vcombine.low %v1417_v40, %v1433_v41  ;;  %v1641_v41 = vld [vmem:[%s19835_s7 + $0xc40] sm:$0xff] }
 0x2a0   : > { %4669 = vmatprep.subr.bf16.mxu1 %v13256_v53  ;;  %4722 = vmatprep.subr.bf16.mxu0 %v13258_v54  ;;  %v12941_v53 = vcombine.low %v1418_v42, %v1434_v43  ;;  %v12972_v54 = vcombine.high %v1449_v48, %v1465_v49  ;;  %v12974_v55 = vcombine.high %v1450_v50, %v1466_v51  ;;  %v1657_v42 = vld [vmem:[%s19835_s7 + $0xcc0] sm:$0xff]  ;;  %v1642_v43 = vld [vmem:[%s19835_s7 + $0xc48] sm:$0xff] }
 0x2a3   : > { %4670 = vmatpush1.bf16.msra.mxu1 %v13255_v59  ;;  %4723 = vmatpush1.bf16.msra.mxu0 %v13257_v60  ;;  %v1498_v59 = vld [vmem:[%s19835_s7 + $0x7c8] sm:$0xff]  ;;  %v12971_v60 = vcombine.low %v1449_v48, %v1465_v49  ;;  %v1673_v49 = vld [vmem:[%s19835_s7 + $0xd40] sm:$0xff] }
 0x2a4   : > { %4745 = vmatprep.subr.bf16.mxu1 %v12780_v61  ;;  %4798 = vmatprep.subr.bf16.mxu0 %v12782_v63  ;;  %v12973_v61 = vcombine.low %v1450_v50, %v1466_v51  ;;  %v13004_v63 = vcombine.high %v1481_v56, %v1497_v57  ;;  %v13006_v1 = vcombine.high %v1482_v58, %v1498_v59  ;;  %v1689_v50 = vld [vmem:[%s19835_s7 + $0xdc0] sm:$0xff]  ;;  %v1674_v51 = vld [vmem:[%s19835_s7 + $0xd48] sm:$0xff] }
 0x2a6   : > { %4672 = vmatmul.mubr.bf16.vlgmr.msra.gmra.mrb[32].mxu1 %v14776_v2  ;;  %4725 = vmatmul.mubr.bf16.vlgmr.msra.gmra.mrb[40].mxu0 %v14776_v2 }
 0x2a7   : > { %4681 = vmatprep.mubr.bf16.mxu1 %v14810_v24  ;;  %4734 = vmatprep.mubr.bf16.mxu0 %v14810_v24 }
 0x2a8   : > { %4746 = vmatpush1.bf16.msra.mxu1 %v12779_v9  ;;  %4799 = vmatpush1.bf16.msra.mxu0 %v12781_v11  ;;  %v1530_v9 = vld [vmem:[%s19835_s7 + $0x8c8] sm:$0xff]  ;;  %v13003_v11 = vcombine.low %v1481_v56, %v1497_v57  ;;  %v1705_v57 = vld [vmem:[%s19835_s7 + $0xe40] sm:$0xff] }
 0x2a9   : > { %4747 = vmatprep.subr.bf16.mxu1 %v12812_v12  ;;  %4800 = vmatprep.subr.bf16.mxu0 %v12814_v13  ;;  %v13005_v12 = vcombine.low %v1482_v58, %v1498_v59  ;;  %v13036_v13 = vcombine.high %v1513_v5, %v1529_v7  ;;  %v13038_v14 = vcombine.high %v1514_v8, %v1530_v9  ;;  %v1721_v58 = vld [vmem:[%s19835_s7 + $0xec0] sm:$0xff]  ;;  %v1706_v59 = vld [vmem:[%s19835_s7 + $0xe48] sm:$0xff] }
 0x2ac   : > { %4748 = vmatpush1.bf16.msra.mxu1 %v12811_v18  ;;  %4801 = vmatpush1.bf16.msra.mxu0 %v12813_v20  ;;  %v1562_v18 = vld [vmem:[%s19835_s7 + $0x9c8] sm:$0xff]  ;;  %v13035_v20 = vcombine.low %v1513_v5, %v1529_v7  ;;  %v1737_v7 = vld [vmem:[%s19835_s7 + $0xf40] sm:$0xff] }
 0x2ad   : > { %4749 = vmatprep.subr.bf16.mxu1 %v12844_v21  ;;  %4802 = vmatprep.subr.bf16.mxu0 %v12846_v22  ;;  %v13037_v21 = vcombine.low %v1514_v8, %v1530_v9  ;;  %v13068_v22 = vcombine.high %v1545_v15, %v1561_v16  ;;  %v13070_v23 = vcombine.high %v1546_v17, %v1562_v18  ;;  %v1753_v8 = vld [vmem:[%s19835_s7 + $0xfc0] sm:$0xff]  ;;  %v1738_v9 = vld [vmem:[%s19835_s7 + $0xf48] sm:$0xff] }
 0x2ae   : > { %4682 = vmatmul.mubr.bf16.gmra.mrb[36].mxu1 %v14799_v19  ;;  %4735 = vmatmul.mubr.bf16.gmra.mrb[44].mxu0 %v14799_v19 }
 0x2af   : > { %4777 = vmatprep.mubr.bf16.mxu1 %v14778_v4  ;;  %4830 = vmatprep.mubr.bf16.mxu0 %v14778_v4 }
 0x2b0   : > { %4750 = vmatpush1.bf16.msra.mxu1 %v12843_v28  ;;  %4803 = vmatpush1.bf16.msra.mxu0 %v12845_v29  ;;  %v1594_v28 = vld [vmem:[%s19835_s7 + $0xac8] sm:$0xff]  ;;  %v13067_v29 = vcombine.low %v1545_v15, %v1561_v16  ;;  %v1259_v16 = vld [vmem:[%s19835_s7 + $0x50] sm:$0xff] }
 0x2b1   : > { %4751 = vmatprep.subr.bf16.mxu1 %v12876_v30  ;;  %4804 = vmatprep.subr.bf16.mxu0 %v12878_v31  ;;  %v13069_v30 = vcombine.low %v1546_v17, %v1562_v18  ;;  %v13100_v31 = vcombine.high %v1577_v25, %v1593_v26  ;;  %v13102_v32 = vcombine.high %v1578_v27, %v1594_v28  ;;  %v1275_v17 = vld [vmem:[%s19835_s7 + $0xd0] sm:$0xff]  ;;  %v1260_v18 = vld [vmem:[%s19835_s7 + $0x58] sm:$0xff] }
 0x2b4   : > { %4752 = vmatpush1.bf16.msra.mxu1 %v12875_v36  ;;  %4805 = vmatpush1.bf16.msra.mxu0 %v12877_v37  ;;  %v1626_v36 = vld [vmem:[%s19835_s7 + $0xbc8] sm:$0xff]  ;;  %v13099_v37 = vcombine.low %v1577_v25, %v1593_v26  ;;  %v1291_v26 = vld [vmem:[%s19835_s7 + $0x150] sm:$0xff] }
 0x2b5   : > { %4753 = vmatprep.subr.bf16.mxu1 %v12908_v38  ;;  %4806 = vmatprep.subr.bf16.mxu0 %v12910_v39  ;;  %v13101_v38 = vcombine.low %v1578_v27, %v1594_v28  ;;  %v13132_v39 = vcombine.high %v1609_v33, %v1625_v34  ;;  %v13134_v40 = vcombine.high %v1610_v35, %v1626_v36  ;;  %v1307_v27 = vld [vmem:[%s19835_s7 + $0x1d0] sm:$0xff]  ;;  %v1292_v28 = vld [vmem:[%s19835_s7 + $0x158] sm:$0xff] }
 0x2b8   : > { %4754 = vmatpush1.bf16.msra.mxu1 %v12907_v44  ;;  %4807 = vmatpush1.bf16.msra.mxu0 %v12909_v45  ;;  %v1658_v44 = vld [vmem:[%s19835_s7 + $0xcc8] sm:$0xff]  ;;  %v13131_v45 = vcombine.low %v1609_v33, %v1625_v34  ;;  %v1323_v34 = vld [vmem:[%s19835_s7 + $0x250] sm:$0xff] }
 0x2b9   : > { %4755 = vmatprep.subr.bf16.mxu1 %v12940_v46  ;;  %4808 = vmatprep.subr.bf16.mxu0 %v12942_v47  ;;  %v13133_v46 = vcombine.low %v1610_v35, %v1626_v36  ;;  %v13164_v47 = vcombine.high %v1641_v41, %v1657_v42  ;;  %v13166_v48 = vcombine.high %v1642_v43, %v1658_v44  ;;  %v1339_v35 = vld [vmem:[%s19835_s7 + $0x2d0] sm:$0xff]  ;;  %v1324_v36 = vld [vmem:[%s19835_s7 + $0x258] sm:$0xff] }
 0x2bc   : > { %4756 = vmatpush1.bf16.msra.mxu1 %v12939_v52  ;;  %4809 = vmatpush1.bf16.msra.mxu0 %v12941_v53  ;;  %v1690_v52 = vld [vmem:[%s19835_s7 + $0xdc8] sm:$0xff]  ;;  %v13163_v53 = vcombine.low %v1641_v41, %v1657_v42  ;;  %v1355_v42 = vld [vmem:[%s19835_s7 + $0x350] sm:$0xff] }
 0x2bd   : > { %4757 = vmatprep.subr.bf16.mxu1 %v12972_v54  ;;  %4810 = vmatprep.subr.bf16.mxu0 %v12974_v55  ;;  %v13165_v54 = vcombine.low %v1642_v43, %v1658_v44  ;;  %v13196_v55 = vcombine.high %v1673_v49, %v1689_v50  ;;  %v13198_v56 = vcombine.high %v1674_v51, %v1690_v52  ;;  %v1371_v43 = vld [vmem:[%s19835_s7 + $0x3d0] sm:$0xff]  ;;  %v1356_v44 = vld [vmem:[%s19835_s7 + $0x358] sm:$0xff] }
 0x2c0   : > { %4758 = vmatpush1.bf16.msra.mxu1 %v12971_v60  ;;  %4811 = vmatpush1.bf16.msra.mxu0 %v12973_v61  ;;  %v1722_v60 = vld [vmem:[%s19835_s7 + $0xec8] sm:$0xff]  ;;  %v13195_v61 = vcombine.low %v1673_v49, %v1689_v50  ;;  %v1387_v50 = vld [vmem:[%s19835_s7 + $0x450] sm:$0xff] }
 0x2c1   : > { %4759 = vmatprep.subr.bf16.mxu1 %v13004_v63  ;;  %4812 = vmatprep.subr.bf16.mxu0 %v13006_v1  ;;  %v13197_v63 = vcombine.low %v1674_v51, %v1690_v52  ;;  %v13228_v1 = vcombine.high %v1705_v57, %v1721_v58  ;;  %v13230_v5 = vcombine.high %v1706_v59, %v1722_v60  ;;  %v1403_v51 = vld [vmem:[%s19835_s7 + $0x4d0] sm:$0xff]  ;;  %v1388_v52 = vld [vmem:[%s19835_s7 + $0x458] sm:$0xff] }
 0x2c4   : > { %4760 = vmatpush1.bf16.msra.mxu1 %v13003_v11  ;;  %4813 = vmatpush1.bf16.msra.mxu0 %v13005_v12  ;;  %v1754_v11 = vld [vmem:[%s19835_s7 + $0xfc8] sm:$0xff]  ;;  %v13227_v12 = vcombine.low %v1705_v57, %v1721_v58  ;;  %v1419_v58 = vld [vmem:[%s19835_s7 + $0x550] sm:$0xff] }
 0x2c5   : > { %4761 = vmatprep.subr.bf16.mxu1 %v13036_v13  ;;  %4814 = vmatprep.subr.bf16.mxu0 %v13038_v14  ;;  %v13229_v13 = vcombine.low %v1706_v59, %v1722_v60  ;;  %v13260_v14 = vcombine.high %v1737_v7, %v1753_v8  ;;  %v13262_v15 = vcombine.high %v1738_v9, %v1754_v11  ;;  %v1435_v59 = vld [vmem:[%s19835_s7 + $0x5d0] sm:$0xff]  ;;  %v1420_v60 = vld [vmem:[%s19835_s7 + $0x558] sm:$0xff] }
 0x2c8   : > { %4762 = vmatpush1.bf16.msra.mxu1 %v13035_v20  ;;  %4815 = vmatpush1.bf16.msra.mxu0 %v13037_v21  ;;  %v1276_v20 = vld [vmem:[%s19835_s7 + $0xd8] sm:$0xff]  ;;  %v13259_v21 = vcombine.low %v1737_v7, %v1753_v8  ;;  %v1451_v8 = vld [vmem:[%s19835_s7 + $0x650] sm:$0xff] }
 0x2c9   : > { %4763 = vmatprep.subr.bf16.mxu1 %v13068_v22  ;;  %4816 = vmatprep.subr.bf16.mxu0 %v13070_v23  ;;  %v13261_v22 = vcombine.low %v1738_v9, %v1754_v11  ;;  %v12784_v23 = vcombine.high %v1259_v16, %v1275_v17  ;;  %v12786_v25 = vcombine.high %v1260_v18, %v1276_v20  ;;  %v1467_v9 = vld [vmem:[%s19835_s7 + $0x6d0] sm:$0xff]  ;;  %v1452_v11 = vld [vmem:[%s19835_s7 + $0x658] sm:$0xff] }
 0x2cc   : > { %4764 = vmatpush1.bf16.msra.mxu1 %v13067_v29  ;;  %4817 = vmatpush1.bf16.msra.mxu0 %v13069_v30  ;;  %v1308_v29 = vld [vmem:[%s19835_s7 + $0x1d8] sm:$0xff]  ;;  %v12783_v30 = vcombine.low %v1259_v16, %v1275_v17  ;;  %v1483_v17 = vld [vmem:[%s19835_s7 + $0x750] sm:$0xff] }
 0x2cd   : > { %4765 = vmatprep.subr.bf16.mxu1 %v13100_v31  ;;  %4818 = vmatprep.subr.bf16.mxu0 %v13102_v32  ;;  %v12785_v31 = vcombine.low %v1260_v18, %v1276_v20  ;;  %v12816_v32 = vcombine.high %v1291_v26, %v1307_v27  ;;  %v12818_v33 = vcombine.high %v1292_v28, %v1308_v29  ;;  %v1499_v18 = vld [vmem:[%s19835_s7 + $0x7d0] sm:$0xff]  ;;  %v1484_v20 = vld [vmem:[%s19835_s7 + $0x758] sm:$0xff] }
 0x2d0   : > { %4766 = vmatpush1.bf16.msra.mxu1 %v13099_v37  ;;  %4819 = vmatpush1.bf16.msra.mxu0 %v13101_v38  ;;  %v1340_v37 = vld [vmem:[%s19835_s7 + $0x2d8] sm:$0xff]  ;;  %v12815_v38 = vcombine.low %v1291_v26, %v1307_v27  ;;  %v1515_v27 = vld [vmem:[%s19835_s7 + $0x850] sm:$0xff] }
 0x2d1   : > { %4767 = vmatprep.subr.bf16.mxu1 %v13132_v39  ;;  %4820 = vmatprep.subr.bf16.mxu0 %v13134_v40  ;;  %v12817_v39 = vcombine.low %v1292_v28, %v1308_v29  ;;  %v12848_v40 = vcombine.high %v1323_v34, %v1339_v35  ;;  %v12850_v41 = vcombine.high %v1324_v36, %v1340_v37  ;;  %v1531_v28 = vld [vmem:[%s19835_s7 + $0x8d0] sm:$0xff]  ;;  %v1516_v29 = vld [vmem:[%s19835_s7 + $0x858] sm:$0xff] }
 0x2d4   : > { %4768 = vmatpush1.bf16.msra.mxu1 %v13131_v45  ;;  %4821 = vmatpush1.bf16.msra.mxu0 %v13133_v46  ;;  %v1372_v45 = vld [vmem:[%s19835_s7 + $0x3d8] sm:$0xff]  ;;  %v12847_v46 = vcombine.low %v1323_v34, %v1339_v35  ;;  %v1547_v35 = vld [vmem:[%s19835_s7 + $0x950] sm:$0xff] }
 0x2d5   : > { %4769 = vmatprep.subr.bf16.mxu1 %v13164_v47  ;;  %4822 = vmatprep.subr.bf16.mxu0 %v13166_v48  ;;  %v12849_v47 = vcombine.low %v1324_v36, %v1340_v37  ;;  %v12880_v48 = vcombine.high %v1355_v42, %v1371_v43  ;;  %v12882_v49 = vcombine.high %v1356_v44, %v1372_v45  ;;  %v1563_v36 = vld [vmem:[%s19835_s7 + $0x9d0] sm:$0xff]  ;;  %v1548_v37 = vld [vmem:[%s19835_s7 + $0x958] sm:$0xff] }
 0x2d8   : > { %4770 = vmatpush1.bf16.msra.mxu1 %v13163_v53  ;;  %4823 = vmatpush1.bf16.msra.mxu0 %v13165_v54  ;;  %v1404_v53 = vld [vmem:[%s19835_s7 + $0x4d8] sm:$0xff]  ;;  %v12879_v54 = vcombine.low %v1355_v42, %v1371_v43  ;;  %v1579_v43 = vld [vmem:[%s19835_s7 + $0xa50] sm:$0xff] }
 0x2d9   : > { %4771 = vmatprep.subr.bf16.mxu1 %v13196_v55  ;;  %4824 = vmatprep.subr.bf16.mxu0 %v13198_v56  ;;  %v12881_v55 = vcombine.low %v1356_v44, %v1372_v45  ;;  %v12912_v56 = vcombine.high %v1387_v50, %v1403_v51  ;;  %v12914_v57 = vcombine.high %v1388_v52, %v1404_v53  ;;  %v1595_v44 = vld [vmem:[%s19835_s7 + $0xad0] sm:$0xff]  ;;  %v1580_v45 = vld [vmem:[%s19835_s7 + $0xa58] sm:$0xff] }
 0x2dc   : > { %4772 = vmatpush1.bf16.msra.mxu1 %v13195_v61  ;;  %4825 = vmatpush1.bf16.msra.mxu0 %v13197_v63  ;;  %v1436_v61 = vld [vmem:[%s19835_s7 + $0x5d8] sm:$0xff]  ;;  %v12911_v63 = vcombine.low %v1387_v50, %v1403_v51  ;;  %v1611_v51 = vld [vmem:[%s19835_s7 + $0xb50] sm:$0xff] }
 0x2dd   : > { %4773 = vmatprep.subr.bf16.mxu1 %v13228_v1  ;;  %4826 = vmatprep.subr.bf16.mxu0 %v13230_v5  ;;  %v12913_v1 = vcombine.low %v1388_v52, %v1404_v53  ;;  %v12944_v5 = vcombine.high %v1419_v58, %v1435_v59  ;;  %v12946_v7 = vcombine.high %v1420_v60, %v1436_v61  ;;  %v1627_v52 = vld [vmem:[%s19835_s7 + $0xbd0] sm:$0xff]  ;;  %v1612_v53 = vld [vmem:[%s19835_s7 + $0xb58] sm:$0xff] }
 0x2e0   : > { %4774 = vmatpush1.bf16.msra.mxu1 %v13227_v12  ;;  %4827 = vmatpush1.bf16.msra.mxu0 %v13229_v13  ;;  %v1468_v12 = vld [vmem:[%s19835_s7 + $0x6d8] sm:$0xff]  ;;  %v12943_v13 = vcombine.low %v1419_v58, %v1435_v59  ;;  %v1643_v59 = vld [vmem:[%s19835_s7 + $0xc50] sm:$0xff] }
 0x2e1   : > { %4775 = vmatprep.subr.bf16.mxu1 %v13260_v14  ;;  %4828 = vmatprep.subr.bf16.mxu0 %v13262_v15  ;;  %v12945_v14 = vcombine.low %v1420_v60, %v1436_v61  ;;  %v12976_v15 = vcombine.high %v1451_v8, %v1467_v9  ;;  %v12978_v16 = vcombine.high %v1452_v11, %v1468_v12  ;;  %v1659_v60 = vld [vmem:[%s19835_s7 + $0xcd0] sm:$0xff]  ;;  %v1644_v61 = vld [vmem:[%s19835_s7 + $0xc58] sm:$0xff] }
 0x2e4   : > { %4776 = vmatpush1.bf16.msra.mxu1 %v13259_v21  ;;  %4829 = vmatpush1.bf16.msra.mxu0 %v13261_v22  ;;  %v1500_v21 = vld [vmem:[%s19835_s7 + $0x7d8] sm:$0xff]  ;;  %v12975_v22 = vcombine.low %v1451_v8, %v1467_v9  ;;  %v1675_v9 = vld [vmem:[%s19835_s7 + $0xd50] sm:$0xff] }
 0x2e5   : > { %4851 = vmatprep.subr.bf16.mxu1 %v12784_v23  ;;  %4904 = vmatprep.subr.bf16.mxu0 %v12786_v25  ;;  %v12977_v23 = vcombine.low %v1452_v11, %v1468_v12  ;;  %v13008_v25 = vcombine.high %v1483_v17, %v1499_v18  ;;  %v13010_v26 = vcombine.high %v1484_v20, %v1500_v21  ;;  %v1691_v11 = vld [vmem:[%s19835_s7 + $0xdd0] sm:$0xff]  ;;  %v1676_v12 = vld [vmem:[%s19835_s7 + $0xd58] sm:$0xff] }
 0x2e7   : > { %4778 = vmatmul.mubr.bf16.vlgmr.msra.gmra.mrb[40].mxu1 %v14776_v2  ;;  %4831 = vmatmul.mubr.bf16.vlgmr.msra.gmra.mrb[48].mxu0 %v14776_v2 }
 0x2e8   : > { %4787 = vmatprep.mubr.bf16.mxu1 %v14810_v24  ;;  %4840 = vmatprep.mubr.bf16.mxu0 %v14810_v24 }
 0x2e9   : > { %4852 = vmatpush1.bf16.msra.mxu1 %v12783_v30  ;;  %4905 = vmatpush1.bf16.msra.mxu0 %v12785_v31  ;;  %v1532_v30 = vld [vmem:[%s19835_s7 + $0x8d8] sm:$0xff]  ;;  %v13007_v31 = vcombine.low %v1483_v17, %v1499_v18  ;;  %v1707_v18 = vld [vmem:[%s19835_s7 + $0xe50] sm:$0xff] }
 0x2ea   : > { %4853 = vmatprep.subr.bf16.mxu1 %v12816_v32  ;;  %4906 = vmatprep.subr.bf16.mxu0 %v12818_v33  ;;  %v13009_v32 = vcombine.low %v1484_v20, %v1500_v21  ;;  %v13040_v33 = vcombine.high %v1515_v27, %v1531_v28  ;;  %v13042_v34 = vcombine.high %v1516_v29, %v1532_v30  ;;  %v1723_v20 = vld [vmem:[%s19835_s7 + $0xed0] sm:$0xff]  ;;  %v1708_v21 = vld [vmem:[%s19835_s7 + $0xe58] sm:$0xff] }
 0x2ed   : > { %4854 = vmatpush1.bf16.msra.mxu1 %v12815_v38  ;;  %4907 = vmatpush1.bf16.msra.mxu0 %v12817_v39  ;;  %v1564_v38 = vld [vmem:[%s19835_s7 + $0x9d8] sm:$0xff]  ;;  %v13039_v39 = vcombine.low %v1515_v27, %v1531_v28  ;;  %v1739_v28 = vld [vmem:[%s19835_s7 + $0xf50] sm:$0xff] }
 0x2ee   : > { %4855 = vmatprep.subr.bf16.mxu1 %v12848_v40  ;;  %4908 = vmatprep.subr.bf16.mxu0 %v12850_v41  ;;  %v13041_v40 = vcombine.low %v1516_v29, %v1532_v30  ;;  %v13072_v41 = vcombine.high %v1547_v35, %v1563_v36  ;;  %v13074_v42 = vcombine.high %v1548_v37, %v1564_v38  ;;  %v1755_v29 = vld [vmem:[%s19835_s7 + $0xfd0] sm:$0xff]  ;;  %v1740_v30 = vld [vmem:[%s19835_s7 + $0xf58] sm:$0xff] }
 0x2ef   : > { %4788 = vmatmul.mubr.bf16.gmra.mrb[44].mxu1 %v14799_v19  ;;  %4841 = vmatmul.mubr.bf16.gmra.mrb[52].mxu0 %v14799_v19 }
 0x2f0   : > { %4883 = vmatprep.mubr.bf16.mxu1 %v14778_v4  ;;  %4936 = vmatprep.mubr.bf16.mxu0 %v14778_v4 }
 0x2f1   : > { %4856 = vmatpush1.bf16.msra.mxu1 %v12847_v46  ;;  %4909 = vmatpush1.bf16.msra.mxu0 %v12849_v47  ;;  %v1596_v46 = vld [vmem:[%s19835_s7 + $0xad8] sm:$0xff]  ;;  %v13071_v47 = vcombine.low %v1547_v35, %v1563_v36  ;;  %v1261_v36 = vld [vmem:[%s19835_s7 + $0x60] sm:$0xff] }
 0x2f2   : > { %4857 = vmatprep.subr.bf16.mxu1 %v12880_v48  ;;  %4910 = vmatprep.subr.bf16.mxu0 %v12882_v49  ;;  %v13073_v48 = vcombine.low %v1548_v37, %v1564_v38  ;;  %v13104_v49 = vcombine.high %v1579_v43, %v1595_v44  ;;  %v13106_v50 = vcombine.high %v1580_v45, %v1596_v46  ;;  %v1277_v37 = vld [vmem:[%s19835_s7 + $0xe0] sm:$0xff]  ;;  %v1262_v38 = vld [vmem:[%s19835_s7 + $0x68] sm:$0xff] }
 0x2f5   : > { %4858 = vmatpush1.bf16.msra.mxu1 %v12879_v54  ;;  %4911 = vmatpush1.bf16.msra.mxu0 %v12881_v55  ;;  %v1628_v54 = vld [vmem:[%s19835_s7 + $0xbd8] sm:$0xff]  ;;  %v13103_v55 = vcombine.low %v1579_v43, %v1595_v44  ;;  %v1293_v44 = vld [vmem:[%s19835_s7 + $0x160] sm:$0xff] }
 0x2f6   : > { %4859 = vmatprep.subr.bf16.mxu1 %v12912_v56  ;;  %4912 = vmatprep.subr.bf16.mxu0 %v12914_v57  ;;  %v13105_v56 = vcombine.low %v1580_v45, %v1596_v46  ;;  %v13136_v57 = vcombine.high %v1611_v51, %v1627_v52  ;;  %v13138_v58 = vcombine.high %v1612_v53, %v1628_v54  ;;  %v1309_v45 = vld [vmem:[%s19835_s7 + $0x1e0] sm:$0xff]  ;;  %v1294_v46 = vld [vmem:[%s19835_s7 + $0x168] sm:$0xff] }
 0x2f9   : > { %4860 = vmatpush1.bf16.msra.mxu1 %v12911_v63  ;;  %4913 = vmatpush1.bf16.msra.mxu0 %v12913_v1  ;;  %v1660_v63 = vld [vmem:[%s19835_s7 + $0xcd8] sm:$0xff]  ;;  %v13135_v1 = vcombine.low %v1611_v51, %v1627_v52  ;;  %v1325_v52 = vld [vmem:[%s19835_s7 + $0x260] sm:$0xff] }
 0x2fa   : > { %4861 = vmatprep.subr.bf16.mxu1 %v12944_v5  ;;  %4914 = vmatprep.subr.bf16.mxu0 %v12946_v7  ;;  %v13137_v5 = vcombine.low %v1612_v53, %v1628_v54  ;;  %v13168_v7 = vcombine.high %v1643_v59, %v1659_v60  ;;  %v13170_v8 = vcombine.high %v1644_v61, %v1660_v63  ;;  %v1341_v53 = vld [vmem:[%s19835_s7 + $0x2e0] sm:$0xff]  ;;  %v1326_v54 = vld [vmem:[%s19835_s7 + $0x268] sm:$0xff] }
 0x2fd   : > { %4862 = vmatpush1.bf16.msra.mxu1 %v12943_v13  ;;  %4915 = vmatpush1.bf16.msra.mxu0 %v12945_v14  ;;  %v1692_v13 = vld [vmem:[%s19835_s7 + $0xdd8] sm:$0xff]  ;;  %v13167_v14 = vcombine.low %v1643_v59, %v1659_v60  ;;  %v1357_v60 = vld [vmem:[%s19835_s7 + $0x360] sm:$0xff] }
 0x2fe   : > { %4863 = vmatprep.subr.bf16.mxu1 %v12976_v15  ;;  %4916 = vmatprep.subr.bf16.mxu0 %v12978_v16  ;;  %v13169_v15 = vcombine.low %v1644_v61, %v1660_v63  ;;  %v13200_v16 = vcombine.high %v1675_v9, %v1691_v11  ;;  %v13202_v17 = vcombine.high %v1676_v12, %v1692_v13  ;;  %v1373_v61 = vld [vmem:[%s19835_s7 + $0x3e0] sm:$0xff]  ;;  %v1358_v63 = vld [vmem:[%s19835_s7 + $0x368] sm:$0xff] }
 0x301   : > { %4864 = vmatpush1.bf16.msra.mxu1 %v12975_v22  ;;  %4917 = vmatpush1.bf16.msra.mxu0 %v12977_v23  ;;  %v1724_v22 = vld [vmem:[%s19835_s7 + $0xed8] sm:$0xff]  ;;  %v13199_v23 = vcombine.low %v1675_v9, %v1691_v11  ;;  %v1389_v11 = vld [vmem:[%s19835_s7 + $0x460] sm:$0xff] }
 0x302   : > { %4865 = vmatprep.subr.bf16.mxu1 %v13008_v25  ;;  %4918 = vmatprep.subr.bf16.mxu0 %v13010_v26  ;;  %v13201_v25 = vcombine.low %v1676_v12, %v1692_v13  ;;  %v13232_v26 = vcombine.high %v1707_v18, %v1723_v20  ;;  %v13234_v27 = vcombine.high %v1708_v21, %v1724_v22  ;;  %v1405_v12 = vld [vmem:[%s19835_s7 + $0x4e0] sm:$0xff]  ;;  %v1390_v13 = vld [vmem:[%s19835_s7 + $0x468] sm:$0xff] }
 0x305   : > { %4866 = vmatpush1.bf16.msra.mxu1 %v13007_v31  ;;  %4919 = vmatpush1.bf16.msra.mxu0 %v13009_v32  ;;  %v1756_v31 = vld [vmem:[%s19835_s7 + $0xfd8] sm:$0xff]  ;;  %v13231_v32 = vcombine.low %v1707_v18, %v1723_v20  ;;  %v1421_v20 = vld [vmem:[%s19835_s7 + $0x560] sm:$0xff] }
 0x306   : > { %4867 = vmatprep.subr.bf16.mxu1 %v13040_v33  ;;  %4920 = vmatprep.subr.bf16.mxu0 %v13042_v34  ;;  %v13233_v33 = vcombine.low %v1708_v21, %v1724_v22  ;;  %v13264_v34 = vcombine.high %v1739_v28, %v1755_v29  ;;  %v13266_v35 = vcombine.high %v1740_v30, %v1756_v31  ;;  %v1437_v21 = vld [vmem:[%s19835_s7 + $0x5e0] sm:$0xff]  ;;  %v1422_v22 = vld [vmem:[%s19835_s7 + $0x568] sm:$0xff] }
 0x309   : > { %4868 = vmatpush1.bf16.msra.mxu1 %v13039_v39  ;;  %4921 = vmatpush1.bf16.msra.mxu0 %v13041_v40  ;;  %v1278_v39 = vld [vmem:[%s19835_s7 + $0xe8] sm:$0xff]  ;;  %v13263_v40 = vcombine.low %v1739_v28, %v1755_v29  ;;  %v1453_v29 = vld [vmem:[%s19835_s7 + $0x660] sm:$0xff] }
 0x30a   : > { %4869 = vmatprep.subr.bf16.mxu1 %v13072_v41  ;;  %4922 = vmatprep.subr.bf16.mxu0 %v13074_v42  ;;  %v13265_v41 = vcombine.low %v1740_v30, %v1756_v31  ;;  %v12788_v42 = vcombine.high %v1261_v36, %v1277_v37  ;;  %v12790_v43 = vcombine.high %v1262_v38, %v1278_v39  ;;  %v1469_v30 = vld [vmem:[%s19835_s7 + $0x6e0] sm:$0xff]  ;;  %v1454_v31 = vld [vmem:[%s19835_s7 + $0x668] sm:$0xff] }
 0x30d   : > { %4870 = vmatpush1.bf16.msra.mxu1 %v13071_v47  ;;  %4923 = vmatpush1.bf16.msra.mxu0 %v13073_v48  ;;  %v1310_v47 = vld [vmem:[%s19835_s7 + $0x1e8] sm:$0xff]  ;;  %v12787_v48 = vcombine.low %v1261_v36, %v1277_v37  ;;  %v1485_v37 = vld [vmem:[%s19835_s7 + $0x760] sm:$0xff] }
 0x30e   : > { %4871 = vmatprep.subr.bf16.mxu1 %v13104_v49  ;;  %4924 = vmatprep.subr.bf16.mxu0 %v13106_v50  ;;  %v12789_v49 = vcombine.low %v1262_v38, %v1278_v39  ;;  %v12820_v50 = vcombine.high %v1293_v44, %v1309_v45  ;;  %v12822_v51 = vcombine.high %v1294_v46, %v1310_v47  ;;  %v1501_v38 = vld [vmem:[%s19835_s7 + $0x7e0] sm:$0xff]  ;;  %v1486_v39 = vld [vmem:[%s19835_s7 + $0x768] sm:$0xff] }
 0x311   : > { %4872 = vmatpush1.bf16.msra.mxu1 %v13103_v55  ;;  %4925 = vmatpush1.bf16.msra.mxu0 %v13105_v56  ;;  %v1342_v55 = vld [vmem:[%s19835_s7 + $0x2e8] sm:$0xff]  ;;  %v12819_v56 = vcombine.low %v1293_v44, %v1309_v45  ;;  %v1517_v45 = vld [vmem:[%s19835_s7 + $0x860] sm:$0xff] }
 0x312   : > { %4873 = vmatprep.subr.bf16.mxu1 %v13136_v57  ;;  %4926 = vmatprep.subr.bf16.mxu0 %v13138_v58  ;;  %v12821_v57 = vcombine.low %v1294_v46, %v1310_v47  ;;  %v12852_v58 = vcombine.high %v1325_v52, %v1341_v53  ;;  %v12854_v59 = vcombine.high %v1326_v54, %v1342_v55  ;;  %v1533_v46 = vld [vmem:[%s19835_s7 + $0x8e0] sm:$0xff]  ;;  %v1518_v47 = vld [vmem:[%s19835_s7 + $0x868] sm:$0xff] }
 0x315   : > { %4874 = vmatpush1.bf16.msra.mxu1 %v13135_v1  ;;  %4927 = vmatpush1.bf16.msra.mxu0 %v13137_v5  ;;  %v1374_v1 = vld [vmem:[%s19835_s7 + $0x3e8] sm:$0xff]  ;;  %v12851_v5 = vcombine.low %v1325_v52, %v1341_v53  ;;  %v1549_v53 = vld [vmem:[%s19835_s7 + $0x960] sm:$0xff] }
 0x316   : > { %4875 = vmatprep.subr.bf16.mxu1 %v13168_v7  ;;  %4928 = vmatprep.subr.bf16.mxu0 %v13170_v8  ;;  %v12853_v7 = vcombine.low %v1326_v54, %v1342_v55  ;;  %v12884_v8 = vcombine.high %v1357_v60, %v1373_v61  ;;  %v12886_v9 = vcombine.high %v1358_v63, %v1374_v1  ;;  %v1565_v54 = vld [vmem:[%s19835_s7 + $0x9e0] sm:$0xff]  ;;  %v1550_v55 = vld [vmem:[%s19835_s7 + $0x968] sm:$0xff] }
 0x319   : > { %4876 = vmatpush1.bf16.msra.mxu1 %v13167_v14  ;;  %4929 = vmatpush1.bf16.msra.mxu0 %v13169_v15  ;;  %v1406_v14 = vld [vmem:[%s19835_s7 + $0x4e8] sm:$0xff]  ;;  %v12883_v15 = vcombine.low %v1357_v60, %v1373_v61  ;;  %v1581_v61 = vld [vmem:[%s19835_s7 + $0xa60] sm:$0xff] }
 0x31a   : > { %4877 = vmatprep.subr.bf16.mxu1 %v13200_v16  ;;  %4930 = vmatprep.subr.bf16.mxu0 %v13202_v17  ;;  %v12885_v16 = vcombine.low %v1358_v63, %v1374_v1  ;;  %v12916_v17 = vcombine.high %v1389_v11, %v1405_v12  ;;  %v12918_v18 = vcombine.high %v1390_v13, %v1406_v14  ;;  %v1597_v63 = vld [vmem:[%s19835_s7 + $0xae0] sm:$0xff]  ;;  %v1582_v1 = vld [vmem:[%s19835_s7 + $0xa68] sm:$0xff] }
 0x31d   : > { %4878 = vmatpush1.bf16.msra.mxu1 %v13199_v23  ;;  %4931 = vmatpush1.bf16.msra.mxu0 %v13201_v25  ;;  %v1438_v23 = vld [vmem:[%s19835_s7 + $0x5e8] sm:$0xff]  ;;  %v12915_v25 = vcombine.low %v1389_v11, %v1405_v12  ;;  %v1613_v12 = vld [vmem:[%s19835_s7 + $0xb60] sm:$0xff] }
 0x31e   : > { %4879 = vmatprep.subr.bf16.mxu1 %v13232_v26  ;;  %4932 = vmatprep.subr.bf16.mxu0 %v13234_v27  ;;  %v12917_v26 = vcombine.low %v1390_v13, %v1406_v14  ;;  %v12948_v27 = vcombine.high %v1421_v20, %v1437_v21  ;;  %v12950_v28 = vcombine.high %v1422_v22, %v1438_v23  ;;  %v1629_v13 = vld [vmem:[%s19835_s7 + $0xbe0] sm:$0xff]  ;;  %v1614_v14 = vld [vmem:[%s19835_s7 + $0xb68] sm:$0xff] }
 0x321   : > { %4880 = vmatpush1.bf16.msra.mxu1 %v13231_v32  ;;  %4933 = vmatpush1.bf16.msra.mxu0 %v13233_v33  ;;  %v1470_v32 = vld [vmem:[%s19835_s7 + $0x6e8] sm:$0xff]  ;;  %v12947_v33 = vcombine.low %v1421_v20, %v1437_v21  ;;  %v1645_v21 = vld [vmem:[%s19835_s7 + $0xc60] sm:$0xff] }
 0x322   : > { %4881 = vmatprep.subr.bf16.mxu1 %v13264_v34  ;;  %4934 = vmatprep.subr.bf16.mxu0 %v13266_v35  ;;  %v12949_v34 = vcombine.low %v1422_v22, %v1438_v23  ;;  %v12980_v35 = vcombine.high %v1453_v29, %v1469_v30  ;;  %v12982_v36 = vcombine.high %v1454_v31, %v1470_v32  ;;  %v1661_v22 = vld [vmem:[%s19835_s7 + $0xce0] sm:$0xff]  ;;  %v1646_v23 = vld [vmem:[%s19835_s7 + $0xc68] sm:$0xff] }
 0x325   : > { %4882 = vmatpush1.bf16.msra.mxu1 %v13263_v40  ;;  %4935 = vmatpush1.bf16.msra.mxu0 %v13265_v41  ;;  %v1502_v40 = vld [vmem:[%s19835_s7 + $0x7e8] sm:$0xff]  ;;  %v12979_v41 = vcombine.low %v1453_v29, %v1469_v30  ;;  %v1677_v30 = vld [vmem:[%s19835_s7 + $0xd60] sm:$0xff] }
 0x326   : > { %4957 = vmatprep.subr.bf16.mxu1 %v12788_v42  ;;  %5010 = vmatprep.subr.bf16.mxu0 %v12790_v43  ;;  %v12981_v42 = vcombine.low %v1454_v31, %v1470_v32  ;;  %v13012_v43 = vcombine.high %v1485_v37, %v1501_v38  ;;  %v13014_v44 = vcombine.high %v1486_v39, %v1502_v40  ;;  %v1693_v31 = vld [vmem:[%s19835_s7 + $0xde0] sm:$0xff]  ;;  %v1678_v32 = vld [vmem:[%s19835_s7 + $0xd68] sm:$0xff] }
 0x328   : > { %4884 = vmatmul.mubr.bf16.vlgmr.msra.gmra.mrb[48].mxu1 %v14776_v2  ;;  %4937 = vmatmul.mubr.bf16.vlgmr.msra.gmra.mrb[56].mxu0 %v14776_v2 }
 0x329   : > { %4893 = vmatprep.mubr.bf16.mxu1 %v14810_v24  ;;  %4946 = vmatprep.mubr.bf16.mxu0 %v14810_v24 }
 0x32a   : > { %4958 = vmatpush1.bf16.msra.mxu1 %v12787_v48  ;;  %5011 = vmatpush1.bf16.msra.mxu0 %v12789_v49  ;;  %v1534_v48 = vld [vmem:[%s19835_s7 + $0x8e8] sm:$0xff]  ;;  %v13011_v49 = vcombine.low %v1485_v37, %v1501_v38  ;;  %v1709_v38 = vld [vmem:[%s19835_s7 + $0xe60] sm:$0xff] }
 0x32b   : > { %4959 = vmatprep.subr.bf16.mxu1 %v12820_v50  ;;  %5012 = vmatprep.subr.bf16.mxu0 %v12822_v51  ;;  %v13013_v50 = vcombine.low %v1486_v39, %v1502_v40  ;;  %v13044_v51 = vcombine.high %v1517_v45, %v1533_v46  ;;  %v13046_v52 = vcombine.high %v1518_v47, %v1534_v48  ;;  %v1725_v39 = vld [vmem:[%s19835_s7 + $0xee0] sm:$0xff]  ;;  %v1710_v40 = vld [vmem:[%s19835_s7 + $0xe68] sm:$0xff] }
 0x32e   : > { %4960 = vmatpush1.bf16.msra.mxu1 %v12819_v56  ;;  %5013 = vmatpush1.bf16.msra.mxu0 %v12821_v57  ;;  %v1566_v56 = vld [vmem:[%s19835_s7 + $0x9e8] sm:$0xff]  ;;  %v13043_v57 = vcombine.low %v1517_v45, %v1533_v46  ;;  %v1741_v46 = vld [vmem:[%s19835_s7 + $0xf60] sm:$0xff] }
 0x32f   : > { %4961 = vmatprep.subr.bf16.mxu1 %v12852_v58  ;;  %5014 = vmatprep.subr.bf16.mxu0 %v12854_v59  ;;  %v13045_v58 = vcombine.low %v1518_v47, %v1534_v48  ;;  %v13076_v59 = vcombine.high %v1549_v53, %v1565_v54  ;;  %v13078_v60 = vcombine.high %v1550_v55, %v1566_v56  ;;  %v1757_v47 = vld [vmem:[%s19835_s7 + $0xfe0] sm:$0xff]  ;;  %v1742_v48 = vld [vmem:[%s19835_s7 + $0xf68] sm:$0xff] }
 0x330   : > { %4894 = vmatmul.mubr.bf16.gmra.mrb[52].mxu1 %v14799_v19  ;;  %4947 = vmatmul.mubr.bf16.gmra.mrb[60].mxu0 %v14799_v19 }
 0x331   : > { %4989 = vmatprep.mubr.bf16.mxu1 %v14778_v4  ;;  %5042 = vmatprep.mubr.bf16.mxu0 %v14778_v4 }
 0x332   : > { %4962 = vmatpush1.bf16.msra.mxu1 %v12851_v5  ;;  %5015 = vmatpush1.bf16.msra.mxu0 %v12853_v7  ;;  %v1598_v5 = vld [vmem:[%s19835_s7 + $0xae8] sm:$0xff]  ;;  %v13075_v7 = vcombine.low %v1549_v53, %v1565_v54  ;;  %v1263_v54 = vld [vmem:[%s19835_s7 + $0x70] sm:$0xff] }
 0x333   : > { %4963 = vmatprep.subr.bf16.mxu1 %v12884_v8  ;;  %5016 = vmatprep.subr.bf16.mxu0 %v12886_v9  ;;  %v13077_v8 = vcombine.low %v1550_v55, %v1566_v56  ;;  %v13108_v9 = vcombine.high %v1581_v61, %v1597_v63  ;;  %v13110_v11 = vcombine.high %v1582_v1, %v1598_v5  ;;  %v1279_v55 = vld [vmem:[%s19835_s7 + $0xf0] sm:$0xff]  ;;  %v1264_v56 = vld [vmem:[%s19835_s7 + $0x78] sm:$0xff] }
 0x336   : > { %4964 = vmatpush1.bf16.msra.mxu1 %v12883_v15  ;;  %5017 = vmatpush1.bf16.msra.mxu0 %v12885_v16  ;;  %v1630_v15 = vld [vmem:[%s19835_s7 + $0xbe8] sm:$0xff]  ;;  %v13107_v16 = vcombine.low %v1581_v61, %v1597_v63  ;;  %v1295_v63 = vld [vmem:[%s19835_s7 + $0x170] sm:$0xff] }
 0x337   : > { %4965 = vmatprep.subr.bf16.mxu1 %v12916_v17  ;;  %5018 = vmatprep.subr.bf16.mxu0 %v12918_v18  ;;  %v13109_v17 = vcombine.low %v1582_v1, %v1598_v5  ;;  %v13140_v18 = vcombine.high %v1613_v12, %v1629_v13  ;;  %v13142_v20 = vcombine.high %v1614_v14, %v1630_v15  ;;  %v1311_v1 = vld [vmem:[%s19835_s7 + $0x1f0] sm:$0xff]  ;;  %v1296_v5 = vld [vmem:[%s19835_s7 + $0x178] sm:$0xff] }
 0x33a   : > { %4966 = vmatpush1.bf16.msra.mxu1 %v12915_v25  ;;  %5019 = vmatpush1.bf16.msra.mxu0 %v12917_v26  ;;  %v1662_v25 = vld [vmem:[%s19835_s7 + $0xce8] sm:$0xff]  ;;  %v13139_v26 = vcombine.low %v1613_v12, %v1629_v13  ;;  %v1327_v13 = vld [vmem:[%s19835_s7 + $0x270] sm:$0xff] }
 0x33b   : > { %4967 = vmatprep.subr.bf16.mxu1 %v12948_v27  ;;  %5020 = vmatprep.subr.bf16.mxu0 %v12950_v28  ;;  %v13141_v27 = vcombine.low %v1614_v14, %v1630_v15  ;;  %v13172_v28 = vcombine.high %v1645_v21, %v1661_v22  ;;  %v13174_v29 = vcombine.high %v1646_v23, %v1662_v25  ;;  %v1343_v14 = vld [vmem:[%s19835_s7 + $0x2f0] sm:$0xff]  ;;  %v1328_v15 = vld [vmem:[%s19835_s7 + $0x278] sm:$0xff] }
 0x33e   : > { %4968 = vmatpush1.bf16.msra.mxu1 %v12947_v33  ;;  %5021 = vmatpush1.bf16.msra.mxu0 %v12949_v34  ;;  %v1694_v33 = vld [vmem:[%s19835_s7 + $0xde8] sm:$0xff]  ;;  %v13171_v34 = vcombine.low %v1645_v21, %v1661_v22  ;;  %v1359_v22 = vld [vmem:[%s19835_s7 + $0x370] sm:$0xff] }
 0x33f   : > { %4969 = vmatprep.subr.bf16.mxu1 %v12980_v35  ;;  %5022 = vmatprep.subr.bf16.mxu0 %v12982_v36  ;;  %v13173_v35 = vcombine.low %v1646_v23, %v1662_v25  ;;  %v13204_v36 = vcombine.high %v1677_v30, %v1693_v31  ;;  %v13206_v37 = vcombine.high %v1678_v32, %v1694_v33  ;;  %v1375_v23 = vld [vmem:[%s19835_s7 + $0x3f0] sm:$0xff]  ;;  %v1360_v25 = vld [vmem:[%s19835_s7 + $0x378] sm:$0xff] }
 0x342   : > { %4970 = vmatpush1.bf16.msra.mxu1 %v12979_v41  ;;  %5023 = vmatpush1.bf16.msra.mxu0 %v12981_v42  ;;  %v1726_v41 = vld [vmem:[%s19835_s7 + $0xee8] sm:$0xff]  ;;  %v13203_v42 = vcombine.low %v1677_v30, %v1693_v31  ;;  %v1391_v31 = vld [vmem:[%s19835_s7 + $0x470] sm:$0xff] }
 0x343   : > { %4971 = vmatprep.subr.bf16.mxu1 %v13012_v43  ;;  %5024 = vmatprep.subr.bf16.mxu0 %v13014_v44  ;;  %v13205_v43 = vcombine.low %v1678_v32, %v1694_v33  ;;  %v13236_v44 = vcombine.high %v1709_v38, %v1725_v39  ;;  %v13238_v45 = vcombine.high %v1710_v40, %v1726_v41  ;;  %v1407_v32 = vld [vmem:[%s19835_s7 + $0x4f0] sm:$0xff]  ;;  %v1392_v33 = vld [vmem:[%s19835_s7 + $0x478] sm:$0xff] }
 0x346   : > { %4972 = vmatpush1.bf16.msra.mxu1 %v13011_v49  ;;  %5025 = vmatpush1.bf16.msra.mxu0 %v13013_v50  ;;  %v1758_v49 = vld [vmem:[%s19835_s7 + $0xfe8] sm:$0xff]  ;;  %v13235_v50 = vcombine.low %v1709_v38, %v1725_v39  ;;  %v1423_v39 = vld [vmem:[%s19835_s7 + $0x570] sm:$0xff] }
 0x347   : > { %4973 = vmatprep.subr.bf16.mxu1 %v13044_v51  ;;  %5026 = vmatprep.subr.bf16.mxu0 %v13046_v52  ;;  %v13237_v51 = vcombine.low %v1710_v40, %v1726_v41  ;;  %v13268_v52 = vcombine.high %v1741_v46, %v1757_v47  ;;  %v13270_v53 = vcombine.high %v1742_v48, %v1758_v49  ;;  %v1439_v40 = vld [vmem:[%s19835_s7 + $0x5f0] sm:$0xff]  ;;  %v1440_v41 = vld [vmem:[%s19835_s7 + $0x5f8] sm:$0xff] }
 0x34a   : > { %4974 = vmatpush1.bf16.msra.mxu1 %v13043_v57  ;;  %5027 = vmatpush1.bf16.msra.mxu0 %v13045_v58  ;;  %v1280_v57 = vld [vmem:[%s19835_s7 + $0xf8] sm:$0xff]  ;;  %v13267_v58 = vcombine.low %v1741_v46, %v1757_v47  ;;  %v1455_v46 = vld [vmem:[%s19835_s7 + $0x670] sm:$0xff] }
 0x34b   : > { %4975 = vmatprep.subr.bf16.mxu1 %v13076_v59  ;;  %5028 = vmatprep.subr.bf16.mxu0 %v13078_v60  ;;  %v13269_v59 = vcombine.low %v1742_v48, %v1758_v49  ;;  %v12792_v60 = vcombine.high %v1263_v54, %v1279_v55  ;;  %v12794_v61 = vcombine.high %v1264_v56, %v1280_v57  ;;  %v1471_v47 = vld [vmem:[%s19835_s7 + $0x6f0] sm:$0xff]  ;;  %v1456_v48 = vld [vmem:[%s19835_s7 + $0x678] sm:$0xff] }
 0x34c   : > { %v1472_v49 = vld [vmem:[%s19835_s7 + $0x6f8] sm:$0xff] }
 0x34e   : > { %4976 = vmatpush1.bf16.msra.mxu1 %v13075_v7  ;;  %5029 = vmatpush1.bf16.msra.mxu0 %v13077_v8  ;;  %v1312_v7 = vld [vmem:[%s19835_s7 + $0x1f8] sm:$0xff]  ;;  %v12791_v8 = vcombine.low %v1263_v54, %v1279_v55  ;;  %v1487_v54 = vld [vmem:[%s19835_s7 + $0x770] sm:$0xff] }
 0x34f   : > { %4977 = vmatprep.subr.bf16.mxu1 %v13108_v9  ;;  %5030 = vmatprep.subr.bf16.mxu0 %v13110_v11  ;;  %v12793_v9 = vcombine.low %v1264_v56, %v1280_v57  ;;  %v12824_v11 = vcombine.high %v1295_v63, %v1311_v1  ;;  %v12826_v12 = vcombine.high %v1296_v5, %v1312_v7  ;;  %v1503_v55 = vld [vmem:[%s19835_s7 + $0x7f0] sm:$0xff]  ;;  %v1488_v56 = vld [vmem:[%s19835_s7 + $0x778] sm:$0xff] }
 0x350   : > { %v1504_v57 = vld [vmem:[%s19835_s7 + $0x7f8] sm:$0xff] }
 0x352   : > { %4978 = vmatpush1.bf16.msra.mxu1 %v13107_v16  ;;  %5031 = vmatpush1.bf16.msra.mxu0 %v13109_v17  ;;  %v1344_v16 = vld [vmem:[%s19835_s7 + $0x2f8] sm:$0xff]  ;;  %v12823_v17 = vcombine.low %v1295_v63, %v1311_v1  ;;  %v1519_v63 = vld [vmem:[%s19835_s7 + $0x870] sm:$0xff] }
 0x353   : > { %4979 = vmatprep.subr.bf16.mxu1 %v13140_v18  ;;  %5032 = vmatprep.subr.bf16.mxu0 %v13142_v20  ;;  %v12825_v18 = vcombine.low %v1296_v5, %v1312_v7  ;;  %v12856_v20 = vcombine.high %v1327_v13, %v1343_v14  ;;  %v12858_v21 = vcombine.high %v1328_v15, %v1344_v16  ;;  %v1535_v1 = vld [vmem:[%s19835_s7 + $0x8f0] sm:$0xff]  ;;  %v1520_v5 = vld [vmem:[%s19835_s7 + $0x878] sm:$0xff] }
 0x354   : > { %v1536_v7 = vld [vmem:[%s19835_s7 + $0x8f8] sm:$0xff] }
 0x356   : > { %4980 = vmatpush1.bf16.msra.mxu1 %v13139_v26  ;;  %5033 = vmatpush1.bf16.msra.mxu0 %v13141_v27  ;;  %v1376_v26 = vld [vmem:[%s19835_s7 + $0x3f8] sm:$0xff]  ;;  %v12855_v27 = vcombine.low %v1327_v13, %v1343_v14  ;;  %v1551_v13 = vld [vmem:[%s19835_s7 + $0x970] sm:$0xff] }
 0x357   : > { %4981 = vmatprep.subr.bf16.mxu1 %v13172_v28  ;;  %5034 = vmatprep.subr.bf16.mxu0 %v13174_v29  ;;  %v12857_v28 = vcombine.low %v1328_v15, %v1344_v16  ;;  %v12888_v29 = vcombine.high %v1359_v22, %v1375_v23  ;;  %v12890_v30 = vcombine.high %v1360_v25, %v1376_v26  ;;  %v1567_v14 = vld [vmem:[%s19835_s7 + $0x9f0] sm:$0xff]  ;;  %v1552_v15 = vld [vmem:[%s19835_s7 + $0x978] sm:$0xff] }
 0x358   : > { %v1568_v16 = vld [vmem:[%s19835_s7 + $0x9f8] sm:$0xff] }
 0x35a   : > { %4982 = vmatpush1.bf16.msra.mxu1 %v13171_v34  ;;  %5035 = vmatpush1.bf16.msra.mxu0 %v13173_v35  ;;  %v1408_v34 = vld [vmem:[%s19835_s7 + $0x4f8] sm:$0xff]  ;;  %v12887_v35 = vcombine.low %v1359_v22, %v1375_v23  ;;  %v1583_v22 = vld [vmem:[%s19835_s7 + $0xa70] sm:$0xff] }
 0x35b   : > { %4983 = vmatprep.subr.bf16.mxu1 %v13204_v36  ;;  %5036 = vmatprep.subr.bf16.mxu0 %v13206_v37  ;;  %v12889_v36 = vcombine.low %v1360_v25, %v1376_v26  ;;  %v12920_v37 = vcombine.high %v1391_v31, %v1407_v32  ;;  %v12922_v38 = vcombine.high %v1392_v33, %v1408_v34  ;;  %v1599_v23 = vld [vmem:[%s19835_s7 + $0xaf0] sm:$0xff]  ;;  %v1584_v25 = vld [vmem:[%s19835_s7 + $0xa78] sm:$0xff] }
 0x35c   : > { %v1600_v26 = vld [vmem:[%s19835_s7 + $0xaf8] sm:$0xff] }
 0x35e   : > { %4984 = vmatpush1.bf16.msra.mxu1 %v13203_v42  ;;  %5037 = vmatpush1.bf16.msra.mxu0 %v13205_v43  ;;  %v12919_v42 = vcombine.low %v1391_v31, %v1407_v32  ;;  %v12921_v43 = vcombine.low %v1392_v33, %v1408_v34  ;;  %v1615_v31 = vld [vmem:[%s19835_s7 + $0xb70] sm:$0xff]  ;;  %v1616_v33 = vld [vmem:[%s19835_s7 + $0xb78] sm:$0xff] }
 0x35f   : > { %4985 = vmatprep.subr.bf16.mxu1 %v13236_v44  ;;  %5038 = vmatprep.subr.bf16.mxu0 %v13238_v45  ;;  %v12952_v44 = vcombine.high %v1423_v39, %v1439_v40  ;;  %v1631_v32 = vld [vmem:[%s19835_s7 + $0xbf0] sm:$0xff]  ;;  %v1632_v34 = vld [vmem:[%s19835_s7 + $0xbf8] sm:$0xff] }
 0x362   : > { %4986 = vmatpush1.bf16.msra.mxu1 %v13235_v50  ;;  %5039 = vmatpush1.bf16.msra.mxu0 %v13237_v51  ;;  %v12951_v50 = vcombine.low %v1423_v39, %v1439_v40  ;;  %v1647_v39 = vld [vmem:[%s19835_s7 + $0xc70] sm:$0xff] }
 0x363   : > { %4987 = vmatprep.subr.bf16.mxu1 %v13268_v52  ;;  %5040 = vmatprep.subr.bf16.mxu0 %v13270_v53  ;;  %v12984_v52 = vcombine.high %v1455_v46, %v1471_v47  ;;  %v12986_v53 = vcombine.high %v1456_v48, %v1472_v49  ;;  %v1663_v40 = vld [vmem:[%s19835_s7 + $0xcf0] sm:$0xff] }
 0x366   : > { %4988 = vmatpush1.bf16.msra.mxu1 %v13267_v58  ;;  %5041 = vmatpush1.bf16.msra.mxu0 %v13269_v59  ;;  %v12983_v58 = vcombine.low %v1455_v46, %v1471_v47  ;;  %v12985_v59 = vcombine.low %v1456_v48, %v1472_v49  ;;  %v1679_v46 = vld [vmem:[%s19835_s7 + $0xd70] sm:$0xff]  ;;  %v1680_v48 = vld [vmem:[%s19835_s7 + $0xd78] sm:$0xff] }
 0x367   : > { %5063 = vmatprep.subr.bf16.mxu1 %v12792_v60  ;;  %5116 = vmatprep.subr.bf16.mxu0 %v12794_v61  ;;  %v13016_v60 = vcombine.high %v1487_v54, %v1503_v55  ;;  %v13018_v61 = vcombine.high %v1488_v56, %v1504_v57  ;;  %v1695_v47 = vld [vmem:[%s19835_s7 + $0xdf0] sm:$0xff]  ;;  %v1696_v49 = vld [vmem:[%s19835_s7 + $0xdf8] sm:$0xff] }
 0x369   : > { %4990 = vmatmul.mubr.bf16.vlgmr.msra.gmra.mrb[56].mxu1 %v14776_v2  ;;  %5043 = vmatmul.mubr.bf16.vlgmr.msra.gmra.mrb[64].mxu0 %v14776_v2 }
 0x36a   : > { %4999 = vmatprep.mubr.bf16.mxu1 %v14810_v24  ;;  %5052 = vmatprep.mubr.bf16.mxu0 %v14810_v24 }
 0x36b   : > { %5064 = vmatpush1.bf16.msra.mxu1 %v12791_v8  ;;  %5117 = vmatpush1.bf16.msra.mxu0 %v12793_v9  ;;  %v13015_v8 = vcombine.low %v1487_v54, %v1503_v55  ;;  %v13017_v9 = vcombine.low %v1488_v56, %v1504_v57  ;;  %v1711_v54 = vld [vmem:[%s19835_s7 + $0xe70] sm:$0xff]  ;;  %v1712_v56 = vld [vmem:[%s19835_s7 + $0xe78] sm:$0xff] }
 0x36c   : > { %5065 = vmatprep.subr.bf16.mxu1 %v12824_v11  ;;  %5118 = vmatprep.subr.bf16.mxu0 %v12826_v12  ;;  %v13048_v11 = vcombine.high %v1519_v63, %v1535_v1  ;;  %v13050_v12 = vcombine.high %v1520_v5, %v1536_v7  ;;  %v1727_v55 = vld [vmem:[%s19835_s7 + $0xef0] sm:$0xff]  ;;  %v1728_v57 = vld [vmem:[%s19835_s7 + $0xef8] sm:$0xff] }
 0x36f   : > { %5066 = vmatpush1.bf16.msra.mxu1 %v12823_v17  ;;  %5119 = vmatpush1.bf16.msra.mxu0 %v12825_v18  ;;  %v13047_v17 = vcombine.low %v1519_v63, %v1535_v1  ;;  %v13049_v18 = vcombine.low %v1520_v5, %v1536_v7  ;;  %v1743_v63 = vld [vmem:[%s19835_s7 + $0xf70] sm:$0xff]  ;;  %v1744_v5 = vld [vmem:[%s19835_s7 + $0xf78] sm:$0xff] }
 0x370   : > { %5067 = vmatprep.subr.bf16.mxu1 %v12856_v20  ;;  %5120 = vmatprep.subr.bf16.mxu0 %v12858_v21  ;;  %v13080_v20 = vcombine.high %v1551_v13, %v1567_v14  ;;  %v13082_v21 = vcombine.high %v1552_v15, %v1568_v16  ;;  %v1759_v1 = vld [vmem:[%s19835_s7 + $0xff0] sm:$0xff]  ;;  %v1760_v7 = vld [vmem:[%s19835_s7 + $0xff8] sm:$0xff] }
 0x371   : > { %5000 = vmatmul.mubr.bf16.gmra.mrb[60].mxu1 %v14799_v19  ;;  %5053 = vmatmul.mubr.bf16.gmra.mrb[68].mxu0 %v14799_v19 }
 0x372   : > { %5095 = vmatprep.mubr.bf16.mxu1 %v14778_v4  ;;  %5148 = vmatprep.mubr.bf16.mxu0 %v14778_v4  ;;  %v1424_v4 = vld [vmem:[%s19835_s7 + $0x578] sm:$0xff] }
 0x373   : > { %5068 = vmatpush1.bf16.msra.mxu1 %v12855_v27  ;;  %5121 = vmatpush1.bf16.msra.mxu0 %v12857_v28  ;;  %v12954_v45 = vcombine.high %v1424_v4, %v1440_v41  ;;  %v12953_v51 = vcombine.low %v1424_v4, %v1440_v41  ;;  %v13079_v27 = vcombine.low %v1551_v13, %v1567_v14  ;;  %v1648_v4 = vld [vmem:[%s19835_s7 + $0xc78] sm:$0xff]  ;;  %v737_v13 = vld [vmem:[%s19834_s6] sm:$0xff] }
 0x374   : > { %5069 = vmatprep.subr.bf16.mxu1 %v12888_v29  ;;  %5122 = vmatprep.subr.bf16.mxu0 %v12890_v30  ;;  %v13081_v28 = vcombine.low %v1552_v15, %v1568_v16  ;;  %v13112_v29 = vcombine.high %v1583_v22, %v1599_v23  ;;  %v13114_v30 = vcombine.high %v1584_v25, %v1600_v26  ;;  %v1664_v41 = vld [vmem:[%s19835_s7 + $0xcf8] sm:$0xff]  ;;  %v753_v14 = vld [vmem:[%s19834_s6 + $0x80] sm:$0xff]  ;;  %v738_v15 = vld [vmem:[%s19834_s6 + $0x8] sm:$0xff] }
 0x375   : > { %v754_v16 = vld [vmem:[%s19834_s6 + $0x88] sm:$0xff] }
 0x377   : > { %5070 = vmatpush1.bf16.msra.mxu1 %v12887_v35  ;;  %5123 = vmatpush1.bf16.msra.mxu0 %v12889_v36  ;;  %v13111_v35 = vcombine.low %v1583_v22, %v1599_v23  ;;  %v13113_v36 = vcombine.low %v1584_v25, %v1600_v26  ;;  %v769_v22 = vld [vmem:[%s19834_s6 + $0x100] sm:$0xff]  ;;  %v770_v25 = vld [vmem:[%s19834_s6 + $0x108] sm:$0xff] }
 0x378   : > { %5071 = vmatprep.subr.bf16.mxu1 %v12920_v37  ;;  %5124 = vmatprep.subr.bf16.mxu0 %v12922_v38  ;;  %v13144_v37 = vcombine.high %v1615_v31, %v1631_v32  ;;  %v13146_v38 = vcombine.high %v1616_v33, %v1632_v34  ;;  %v785_v23 = vld [vmem:[%s19834_s6 + $0x180] sm:$0xff]  ;;  %v786_v26 = vld [vmem:[%s19834_s6 + $0x188] sm:$0xff] }
 0x37b   : > { %5072 = vmatpush1.bf16.msra.mxu1 %v12919_v42  ;;  %5125 = vmatpush1.bf16.msra.mxu0 %v12921_v43  ;;  %v13143_v42 = vcombine.low %v1615_v31, %v1631_v32  ;;  %v13145_v43 = vcombine.low %v1616_v33, %v1632_v34  ;;  %v801_v31 = vld [vmem:[%s19834_s6 + $0x200] sm:$0xff]  ;;  %v802_v33 = vld [vmem:[%s19834_s6 + $0x208] sm:$0xff] }
 0x37c   : > { %5073 = vmatprep.subr.bf16.mxu1 %v12952_v44  ;;  %5126 = vmatprep.subr.bf16.mxu0 %v12954_v45  ;;  %v13176_v44 = vcombine.high %v1647_v39, %v1663_v40  ;;  %v13178_v45 = vcombine.high %v1648_v4, %v1664_v41  ;;  %v817_v32 = vld [vmem:[%s19834_s6 + $0x280] sm:$0xff]  ;;  %v818_v34 = vld [vmem:[%s19834_s6 + $0x288] sm:$0xff] }
 0x37f   : > { %5074 = vmatpush1.bf16.msra.mxu1 %v12951_v50  ;;  %5127 = vmatpush1.bf16.msra.mxu0 %v12953_v51  ;;  %v13175_v50 = vcombine.low %v1647_v39, %v1663_v40  ;;  %v13177_v51 = vcombine.low %v1648_v4, %v1664_v41  ;;  %v849_v39 = vld [vmem:[%s19834_s6 + $0x380] sm:$0xff]  ;;  %v850_v40 = vld [vmem:[%s19834_s6 + $0x388] sm:$0xff]  ;;  %v13339_v4 = vcombine.low %v801_v31, %v817_v32 }
 0x380   : > { %5075 = vmatprep.subr.bf16.mxu1 %v12984_v52  ;;  %5128 = vmatprep.subr.bf16.mxu0 %v12986_v53  ;;  %v13208_v52 = vcombine.high %v1679_v46, %v1695_v47  ;;  %v13210_v53 = vcombine.high %v1680_v48, %v1696_v49  ;;  %v13341_v41 = vcombine.low %v802_v33, %v818_v34 }
 0x383   : > { %5076 = vmatpush1.bf16.msra.mxu1 %v12983_v58  ;;  %5129 = vmatpush1.bf16.msra.mxu0 %v12985_v59  ;;  %v13207_v58 = vcombine.low %v1679_v46, %v1695_v47  ;;  %v13209_v59 = vcombine.low %v1680_v48, %v1696_v49  ;;  %v866_v46 = vld [vmem:[%s19834_s6 + $0x408] sm:$0xff] }
 0x384   : > { %5077 = vmatprep.subr.bf16.mxu1 %v13016_v60  ;;  %5130 = vmatprep.subr.bf16.mxu0 %v13018_v61  ;;  %v13240_v60 = vcombine.high %v1711_v54, %v1727_v55  ;;  %v13242_v61 = vcombine.high %v1712_v56, %v1728_v57  ;;  %v882_v47 = vld [vmem:[%s19834_s6 + $0x488] sm:$0xff] }
 0x387   : > { %5078 = vmatpush1.bf16.msra.mxu1 %v13015_v8  ;;  %5131 = vmatpush1.bf16.msra.mxu0 %v13017_v9  ;;  %v13239_v8 = vcombine.low %v1711_v54, %v1727_v55  ;;  %v13241_v9 = vcombine.low %v1712_v56, %v1728_v57  ;;  %v914_v54 = vld [vmem:[%s19834_s6 + $0x588] sm:$0xff]  ;;  %v14424_v55 = vmov 1   ;;  %v13405_v57 = vcombine.low %v866_v46, %v882_v47 }
 0x388   : > { %5079 = vmatprep.subr.bf16.mxu1 %v13048_v11  ;;  %5132 = vmatprep.subr.bf16.mxu0 %v13050_v12  ;;  %v13272_v11 = vcombine.high %v1743_v63, %v1759_v1  ;;  %v13274_v12 = vcombine.high %v1744_v5, %v1760_v7 }
 0x389   : > { %14232 = vset.pattern.permute.xlu1 %v14424_v55  ;;  %14231 = vset.pattern.permute.xlu0 %v14424_v55  ;;  %v1137_v55 = vld [vmem:[%s19834_s6 + $0xc80] sm:$0xff] }
 0x38b   : > { %5080 = vmatpush1.bf16.msra.mxu1 %v13047_v17  ;;  %5133 = vmatpush1.bf16.msra.mxu0 %v13049_v18  ;;  %v13271_v17 = vcombine.low %v1743_v63, %v1759_v1  ;;  %v13273_v18 = vcombine.low %v1744_v5, %v1760_v7  ;;  %v930_v63 = vld [vmem:[%s19834_s6 + $0x608] sm:$0xff]  ;;  %v14388_v7 = vld [vmem:[%s19832_s4] sm:$0xff] }
 0x38c   : > { %5081 = vmatprep.subr.bf16.mxu1 %v13080_v20  ;;  %5134 = vmatprep.subr.bf16.mxu0 %v13082_v21  ;;  %v13276_v20 = vcombine.high %v737_v13, %v753_v14  ;;  %v13278_v21 = vcombine.high %v738_v15, %v754_v16  ;;  %v946_v1 = vld [vmem:[%s19834_s6 + $0x688] sm:$0xff] }
 0x38d   : > { %v14387_v5 = vld [vmem:[%s19832_s4 + $0x8] sm:$0xff]  ;;  %8578 = vperm.xlu0 %14231, %v14388_v7  }
 0x38e   : > { %8582 = vperm.xlu1 %14232, %v14387_v5  }
 0x38f   : > { %5082 = vmatpush1.bf16.msra.mxu1 %v13079_v27  ;;  %5135 = vmatpush1.bf16.msra.mxu0 %v13081_v28  ;;  %v13275_v27 = vcombine.low %v737_v13, %v753_v14  ;;  %v13277_v28 = vcombine.low %v738_v15, %v754_v16  ;;  %v961_v13 = vld [vmem:[%s19834_s6 + $0x700] sm:$0xff]  ;;  %v962_v15 = vld [vmem:[%s19834_s6 + $0x708] sm:$0xff] }
 0x390   : > { %5083 = vmatprep.subr.bf16.mxu1 %v13112_v29  ;;  %5136 = vmatprep.subr.bf16.mxu0 %v13114_v30  ;;  %v13308_v29 = vcombine.high %v769_v22, %v785_v23  ;;  %v13310_v30 = vcombine.high %v770_v25, %v786_v26  ;;  %v977_v14 = vld [vmem:[%s19834_s6 + $0x780] sm:$0xff]  ;;  %v978_v16 = vld [vmem:[%s19834_s6 + $0x788] sm:$0xff] }
 0x393   : > { %5084 = vmatpush1.bf16.msra.mxu1 %v13111_v35  ;;  %5137 = vmatpush1.bf16.msra.mxu0 %v13113_v36  ;;  %v13307_v35 = vcombine.low %v769_v22, %v785_v23  ;;  %v13340_v36 = vcombine.high %v801_v31, %v817_v32  ;;  %v13500_v22 = vcombine.high %v961_v13, %v977_v14 }
 0x394   : > { %5085 = vmatprep.subr.bf16.mxu1 %v13144_v37  ;;  %5138 = vmatprep.subr.bf16.mxu0 %v13146_v38  ;;  %v13342_v37 = vcombine.high %v802_v33, %v818_v34  ;;  %v833_v38 = vld [vmem:[%s19834_s6 + $0x300] sm:$0xff]  ;;  %v13502_v23 = vcombine.high %v962_v15, %v978_v16  ;;  %v13501_v31 = vcombine.low %v962_v15, %v978_v16  ;;  %v1186_v15 = vld [vmem:[%s19834_s6 + $0xe08] sm:$0xff] }
 0x395   : > { %v13371_v48 = vcombine.low %v833_v38, %v849_v39  ;;  %v1025_v34 = vld [vmem:[%s19834_s6 + $0x900] sm:$0xff]  ;;  %v1202_v16 = vld [vmem:[%s19834_s6 + $0xe88] sm:$0xff] }
 0x397   : > { %5086 = vmatpush1.bf16.msra.mxu1 %v13143_v42  ;;  %5139 = vmatpush1.bf16.msra.mxu0 %v13145_v43  ;;  %v13372_v42 = vcombine.high %v833_v38, %v849_v39 }
 0x398   : > { %5087 = vmatprep.subr.bf16.mxu1 %v13176_v44  ;;  %5140 = vmatprep.subr.bf16.mxu0 %v13178_v45  ;;  %v865_v44 = vld [vmem:[%s19834_s6 + $0x400] sm:$0xff] }
 0x399   : > { %v881_v45 = vld [vmem:[%s19834_s6 + $0x480] sm:$0xff] }
 0x39a   : > { %v13404_v49 = vcombine.high %v865_v44, %v881_v45  ;;  %v13403_v56 = vcombine.low %v865_v44, %v881_v45 }
 0x39b   : > { %5088 = vmatpush1.bf16.msra.mxu1 %v13175_v50  ;;  %5141 = vmatpush1.bf16.msra.mxu0 %v13177_v51  ;;  %v13406_v50 = vcombine.high %v866_v46, %v882_v47  ;;  %v897_v51 = vld [vmem:[%s19834_s6 + $0x500] sm:$0xff] }
 0x39c   : > { %5089 = vmatprep.subr.bf16.mxu1 %v13208_v52  ;;  %5142 = vmatprep.subr.bf16.mxu0 %v13210_v53  ;;  %v913_v52 = vld [vmem:[%s19834_s6 + $0x580] sm:$0xff]  ;;  %v898_v53 = vld [vmem:[%s19834_s6 + $0x508] sm:$0xff] }
 0x39d   : > { %v1089_v47 = vld [vmem:[%s19834_s6 + $0xb00] sm:$0xff] }
 0x39f   : > { %5090 = vmatpush1.bf16.msra.mxu1 %v13207_v58  ;;  %5143 = vmatpush1.bf16.msra.mxu0 %v13209_v59  ;;  %v13436_v58 = vcombine.high %v897_v51, %v913_v52  ;;  %v13438_v59 = vcombine.high %v898_v53, %v914_v54 }
 0x3a0   : > { %5091 = vmatprep.subr.bf16.mxu1 %v13240_v60  ;;  %5144 = vmatprep.subr.bf16.mxu0 %v13242_v61  ;;  %v929_v60 = vld [vmem:[%s19834_s6 + $0x600] sm:$0xff] }
 0x3a1   : > { %v945_v61 = vld [vmem:[%s19834_s6 + $0x680] sm:$0xff] }
 0x3a3   : > { %5092 = vmatpush1.bf16.msra.mxu1 %v13239_v8  ;;  %5145 = vmatpush1.bf16.msra.mxu0 %v13241_v9  ;;  %v13435_v8 = vcombine.low %v897_v51, %v913_v52  ;;  %v13437_v9 = vcombine.low %v898_v53, %v914_v54  ;;  %v1121_v54 = vld [vmem:[%s19834_s6 + $0xc00] sm:$0xff] }
 0x3a4   : > { %5093 = vmatprep.subr.bf16.mxu1 %v13272_v11  ;;  %5146 = vmatprep.subr.bf16.mxu0 %v13274_v12  ;;  %v13468_v11 = vcombine.high %v929_v60, %v945_v61  ;;  %v13470_v12 = vcombine.high %v930_v63, %v946_v1 }
 0x3a7   : > { %5094 = vmatpush1.bf16.msra.mxu1 %v13271_v17  ;;  %5147 = vmatpush1.bf16.msra.mxu0 %v13273_v18  ;;  %v14389_v17 = vld [vmem:[%s19832_s4 + $0x10] sm:$0xff]  ;;  %v14390_v18 = vld [vmem:[%s19832_s4 + $0x18] sm:$0xff] }
 0x3a8   : > { %7729 = vmatprep.subr.bf16.mxu1 %v13276_v20  ;;  %7782 = vmatprep.subr.bf16.mxu0 %v13278_v21  ;;  %v13467_v20 = vcombine.low %v929_v60, %v945_v61  ;;  %v13469_v21 = vcombine.low %v930_v63, %v946_v1  ;;  %v13660_v60 = vcombine.high %v1121_v54, %v1137_v55  ;;  %v1153_v63 = vld [vmem:[%s19834_s6 + $0xd00] sm:$0xff] }
 0x3a9   : > { %8586 = vperm.xlu1 %14232, %v14389_v17   ;;  %8590 = vperm.xlu0 %14231, %v14390_v18   ;;  %v1169_v1 = vld [vmem:[%s19834_s6 + $0xd80] sm:$0xff] }
 0x3aa   : > { %5096 = vmatmul.mubr.bf16.vlgmr.msra.gmra.mrb[64].mxu1 %v14776_v2  ;;  %5149 = vmatmul.mubr.bf16.vlgmr.msra.gmra.mrb[72].mxu0 %v14776_v2  ;;  %v13309_v2 = vcombine.low %v770_v25, %v786_v26  ;;  %v993_v25 = vld [vmem:[%s19834_s6 + $0x800] sm:$0xff] }
 0x3ab   : > { %5105 = vmatprep.mubr.bf16.mxu1 %v14810_v24  ;;  %5158 = vmatprep.mubr.bf16.mxu0 %v14810_v24  ;;  %v834_v24 = vld [vmem:[%s19834_s6 + $0x308] sm:$0xff]  ;;  %v1009_v26 = vld [vmem:[%s19834_s6 + $0x880] sm:$0xff] }
 0x3ac   : > { %7730 = vmatpush1.bf16.msra.mxu1 %v13275_v27  ;;  %7783 = vmatpush1.bf16.msra.mxu0 %v13277_v28  ;;  %v13374_v43 = vcombine.high %v834_v24, %v850_v40  ;;  %v994_v27 = vld [vmem:[%s19834_s6 + $0x808] sm:$0xff]  ;;  %v13532_v32 = vcombine.high %v993_v25, %v1009_v26 }
 0x3ad   : > { %7731 = vmatprep.subr.bf16.mxu1 %v13308_v29  ;;  %7784 = vmatprep.subr.bf16.mxu0 %v13310_v30  ;;  %v1010_v28 = vld [vmem:[%s19834_s6 + $0x888] sm:$0xff]  ;;  %v14425_v29 = vmov 2   ;;  %v13499_v30 = vcombine.low %v961_v13, %v977_v14  ;;  %v1185_v13 = vld [vmem:[%s19834_s6 + $0xe00] sm:$0xff] }
 0x3ae   : > { %14233 = vset.pattern.permute.xlu1 %v14425_v29  ;;  %14234 = vset.pattern.permute.xlu0 %v14425_v29  ;;  %v13534_v33 = vcombine.high %v994_v27, %v1010_v28  ;;  %v13533_v38 = vcombine.low %v994_v27, %v1010_v28  ;;  %v1201_v14 = vld [vmem:[%s19834_s6 + $0xe80] sm:$0xff]  ;;  %v13725_v28 = vcombine.low %v1186_v15, %v1202_v16 }
 0x3af   : > { %9014 = vperm.xlu1 %14233, %v14388_v7   ;;  %9018 = vperm.xlu0 %14234, %v14387_v5   ;;  %v1154_v5 = vld [vmem:[%s19834_s6 + $0xd08] sm:$0xff]  ;;  %v13723_v27 = vcombine.low %v1185_v13, %v1201_v14 }
 0x3b0   : > { %7732 = vmatpush1.bf16.msra.mxu1 %v13307_v35  ;;  %7785 = vmatpush1.bf16.msra.mxu0 %v13309_v2  ;;  %v1041_v35 = vld [vmem:[%s19834_s6 + $0x980] sm:$0xff]  ;;  %v1026_v2 = vld [vmem:[%s19834_s6 + $0x908] sm:$0xff] }
 0x3b1   : > { %7733 = vmatprep.subr.bf16.mxu1 %v13340_v36  ;;  %7786 = vmatprep.subr.bf16.mxu0 %v13342_v37  ;;  %v1042_v36 = vld [vmem:[%s19834_s6 + $0x988] sm:$0xff]  ;;  %v13531_v37 = vcombine.low %v993_v25, %v1009_v26  ;;  %v13564_v39 = vcombine.high %v1025_v34, %v1041_v35 }
 0x3b2   : > { %5106 = vmatmul.mubr.bf16.gmra.mrb[68].mxu1 %v14799_v19  ;;  %5159 = vmatmul.mubr.bf16.gmra.mrb[76].mxu0 %v14799_v19  ;;  %v13373_v19 = vcombine.low %v834_v24, %v850_v40  ;;  %v13566_v24 = vcombine.high %v1026_v2, %v1042_v36  ;;  %v1057_v40 = vld [vmem:[%s19834_s6 + $0xa00] sm:$0xff]  ;;  %v13565_v44 = vcombine.low %v1026_v2, %v1042_v36  ;;  %v1170_v7 = vld [vmem:[%s19834_s6 + $0xd88] sm:$0xff] }
 0x3b3   : > { %7761 = vmatprep.mubr.bf16.mxu1 %v14871_v6  ;;  %7814 = vmatprep.mubr.bf16.mxu0 %v14871_v6  ;;  %v1218_v25 = vld [vmem:[%s19834_s6 + $0xf08] sm:$0xff] }
 0x3b4   : > { %7734 = vmatpush1.bf16.msra.mxu1 %v13339_v4  ;;  %7787 = vmatpush1.bf16.msra.mxu0 %v13341_v41  ;;  %v1073_v4 = vld [vmem:[%s19834_s6 + $0xa80] sm:$0xff]  ;;  %v1058_v41 = vld [vmem:[%s19834_s6 + $0xa08] sm:$0xff] }
 0x3b5   : > { %7735 = vmatprep.subr.bf16.mxu1 %v13372_v42  ;;  %7788 = vmatprep.subr.bf16.mxu0 %v13374_v43  ;;  %v1074_v42 = vld [vmem:[%s19834_s6 + $0xa88] sm:$0xff]  ;;  %v13563_v43 = vcombine.low %v1025_v34, %v1041_v35  ;;  %v13596_v45 = vcombine.high %v1057_v40, %v1073_v4  ;;  %v756_v34 = vld [vmem:[%s19834_s6 + $0x98] sm:$0xff] }
 0x3b6   : > { %9022 = vperm.xlu1 %14233, %v14389_v17   ;;  %v13598_v46 = vcombine.high %v1058_v41, %v1074_v42  ;;  %v13597_v51 = vcombine.low %v1058_v41, %v1074_v42  ;;  %v13691_v17 = vcombine.low %v1153_v63, %v1169_v1  ;;  %v1234_v26 = vld [vmem:[%s19834_s6 + $0xf88] sm:$0xff] }
 0x3b7   : > { %v13757_v2 = vcombine.low %v1218_v25, %v1234_v26 }
 0x3b8   : > { %7736 = vmatpush1.bf16.msra.mxu1 %v13371_v48  ;;  %7789 = vmatpush1.bf16.msra.mxu0 %v13373_v19  ;;  %v1105_v48 = vld [vmem:[%s19834_s6 + $0xb80] sm:$0xff]  ;;  %v1090_v19 = vld [vmem:[%s19834_s6 + $0xb08] sm:$0xff] }
 0x3b9   : > { %7737 = vmatprep.subr.bf16.mxu1 %v13404_v49  ;;  %7790 = vmatprep.subr.bf16.mxu0 %v13406_v50  ;;  %v1106_v49 = vld [vmem:[%s19834_s6 + $0xb88] sm:$0xff]  ;;  %v13595_v50 = vcombine.low %v1057_v40, %v1073_v4  ;;  %v13628_v52 = vcombine.high %v1089_v47, %v1105_v48  ;;  %v788_v40 = vld [vmem:[%s19834_s6 + $0x198] sm:$0xff] }
 0x3ba   : > { %9026 = vperm.xlu1 %14233, %v14390_v18   ;;  %v13630_v53 = vcombine.high %v1090_v19, %v1106_v49  ;;  %v13693_v18 = vcombine.low %v1154_v5, %v1170_v7 }
 0x3bc   : > { %7738 = vmatpush1.bf16.msra.mxu1 %v13403_v56  ;;  %7791 = vmatpush1.bf16.msra.mxu0 %v13405_v57  ;;  %v1122_v56 = vld [vmem:[%s19834_s6 + $0xc08] sm:$0xff] }
 0x3bd   : > { %7739 = vmatprep.subr.bf16.mxu1 %v13436_v58  ;;  %7792 = vmatprep.subr.bf16.mxu0 %v13438_v59  ;;  %v1138_v57 = vld [vmem:[%s19834_s6 + $0xc88] sm:$0xff]  ;;  %v13627_v58 = vcombine.low %v1089_v47, %v1105_v48  ;;  %v13629_v59 = vcombine.low %v1090_v19, %v1106_v49  ;;  %v820_v47 = vld [vmem:[%s19834_s6 + $0x298] sm:$0xff] }
 0x3be   : > { %v13662_v61 = vcombine.high %v1122_v56, %v1138_v57 }
 0x3c0   : > { %7740 = vmatpush1.bf16.msra.mxu1 %v13435_v8  ;;  %7793 = vmatpush1.bf16.msra.mxu0 %v13437_v9  ;;  %v13659_v8 = vcombine.low %v1121_v54, %v1137_v55  ;;  %v13661_v9 = vcombine.low %v1122_v56, %v1138_v57  ;;  %v852_v54 = vld [vmem:[%s19834_s6 + $0x398] sm:$0xff] }
 0x3c1   : > { %7741 = vmatprep.subr.bf16.mxu1 %v13468_v11  ;;  %7794 = vmatprep.subr.bf16.mxu0 %v13470_v12  ;;  %v13692_v11 = vcombine.high %v1153_v63, %v1169_v1  ;;  %v13694_v12 = vcombine.high %v1154_v5, %v1170_v7  ;;  %v884_v63 = vld [vmem:[%s19834_s6 + $0x498] sm:$0xff] }
 0x3c4   : > { %7742 = vmatpush1.bf16.msra.mxu1 %v13467_v20  ;;  %7795 = vmatpush1.bf16.msra.mxu0 %v13469_v21  ;;  %v13724_v20 = vcombine.high %v1185_v13, %v1201_v14  ;;  %v13726_v21 = vcombine.high %v1186_v15, %v1202_v16  ;;  %v916_v13 = vld [vmem:[%s19834_s6 + $0x598] sm:$0xff] }
 0x3c5   : > { %7743 = vmatprep.subr.bf16.mxu1 %v13500_v22  ;;  %7796 = vmatprep.subr.bf16.mxu0 %v13502_v23  ;;  %v1217_v22 = vld [vmem:[%s19834_s6 + $0xf00] sm:$0xff] }
 0x3c6   : > { %v1233_v23 = vld [vmem:[%s19834_s6 + $0xf80] sm:$0xff] }
 0x3c7   : > { %v13756_v29 = vcombine.high %v1217_v22, %v1233_v23  ;;  %v13755_v35 = vcombine.low %v1217_v22, %v1233_v23  ;;  %v948_v22 = vld [vmem:[%s19834_s6 + $0x698] sm:$0xff] }
 0x3c8   : > { %7744 = vmatpush1.bf16.msra.mxu1 %v13499_v30  ;;  %7797 = vmatpush1.bf16.msra.mxu0 %v13501_v31  ;;  %v13758_v30 = vcombine.high %v1218_v25, %v1234_v26  ;;  %v739_v31 = vld [vmem:[%s19834_s6 + $0x10] sm:$0xff] }
 0x3c9   : > { %7745 = vmatprep.subr.bf16.mxu1 %v13532_v32  ;;  %7798 = vmatprep.subr.bf16.mxu0 %v13534_v33  ;;  %v755_v32 = vld [vmem:[%s19834_s6 + $0x90] sm:$0xff]  ;;  %v740_v33 = vld [vmem:[%s19834_s6 + $0x18] sm:$0xff] }
 0x3ca   : > { %v13280_v36 = vcombine.high %v739_v31, %v755_v32  ;;  %v13279_v4 = vcombine.low %v739_v31, %v755_v32  ;;  %v13281_v41 = vcombine.low %v740_v33, %v756_v34  ;;  %v980_v31 = vld [vmem:[%s19834_s6 + $0x798] sm:$0xff] }
 0x3cc   : > { %7746 = vmatpush1.bf16.msra.mxu1 %v13531_v37  ;;  %7799 = vmatpush1.bf16.msra.mxu0 %v13533_v38  ;;  %v13282_v37 = vcombine.high %v740_v33, %v756_v34  ;;  %v771_v38 = vld [vmem:[%s19834_s6 + $0x110] sm:$0xff] }
 0x3cd   : > { %7747 = vmatprep.subr.bf16.mxu1 %v13564_v39  ;;  %7800 = vmatprep.subr.bf16.mxu0 %v13566_v24  ;;  %v787_v39 = vld [vmem:[%s19834_s6 + $0x190] sm:$0xff]  ;;  %v772_v24 = vld [vmem:[%s19834_s6 + $0x118] sm:$0xff] }
 0x3ce   : > { %v13312_v42 = vcombine.high %v771_v38, %v787_v39  ;;  %v13311_v48 = vcombine.low %v771_v38, %v787_v39  ;;  %v13313_v19 = vcombine.low %v772_v24, %v788_v40  ;;  %v1012_v38 = vld [vmem:[%s19834_s6 + $0x898] sm:$0xff] }
 0x3d0   : > { %7748 = vmatpush1.bf16.msra.mxu1 %v13563_v43  ;;  %7801 = vmatpush1.bf16.msra.mxu0 %v13565_v44  ;;  %v13314_v43 = vcombine.high %v772_v24, %v788_v40  ;;  %v803_v44 = vld [vmem:[%s19834_s6 + $0x210] sm:$0xff] }
 0x3d1   : > { %7749 = vmatprep.subr.bf16.mxu1 %v13596_v45  ;;  %7802 = vmatprep.subr.bf16.mxu0 %v13598_v46  ;;  %v819_v45 = vld [vmem:[%s19834_s6 + $0x290] sm:$0xff]  ;;  %v804_v46 = vld [vmem:[%s19834_s6 + $0x218] sm:$0xff] }
 0x3d2   : > { %v13344_v49 = vcombine.high %v803_v44, %v819_v45  ;;  %v13343_v55 = vcombine.low %v803_v44, %v819_v45  ;;  %v13345_v56 = vcombine.low %v804_v46, %v820_v47  ;;  %v1044_v44 = vld [vmem:[%s19834_s6 + $0x998] sm:$0xff] }
 0x3d4   : > { %7750 = vmatpush1.bf16.msra.mxu1 %v13595_v50  ;;  %7803 = vmatpush1.bf16.msra.mxu0 %v13597_v51  ;;  %v13346_v50 = vcombine.high %v804_v46, %v820_v47  ;;  %v835_v51 = vld [vmem:[%s19834_s6 + $0x310] sm:$0xff] }
 0x3d5   : > { %7751 = vmatprep.subr.bf16.mxu1 %v13628_v52  ;;  %7804 = vmatprep.subr.bf16.mxu0 %v13630_v53  ;;  %v851_v52 = vld [vmem:[%s19834_s6 + $0x390] sm:$0xff]  ;;  %v836_v53 = vld [vmem:[%s19834_s6 + $0x318] sm:$0xff] }
 0x3d6   : > { %v13376_v57 = vcombine.high %v835_v51, %v851_v52  ;;  %v13375_v1 = vcombine.low %v835_v51, %v851_v52  ;;  %v13377_v5 = vcombine.low %v836_v53, %v852_v54  ;;  %v1076_v51 = vld [vmem:[%s19834_s6 + $0xa98] sm:$0xff] }
 0x3d8   : > { %7752 = vmatpush1.bf16.msra.mxu1 %v13627_v58  ;;  %7805 = vmatpush1.bf16.msra.mxu0 %v13629_v59  ;;  %v13378_v58 = vcombine.high %v836_v53, %v852_v54  ;;  %v867_v59 = vld [vmem:[%s19834_s6 + $0x410] sm:$0xff] }
 0x3d9   : > { %7753 = vmatprep.subr.bf16.mxu1 %v13660_v60  ;;  %7806 = vmatprep.subr.bf16.mxu0 %v13662_v61  ;;  %v883_v60 = vld [vmem:[%s19834_s6 + $0x490] sm:$0xff]  ;;  %v868_v61 = vld [vmem:[%s19834_s6 + $0x418] sm:$0xff] }
 0x3da   : > { %v13408_v7 = vcombine.high %v867_v59, %v883_v60  ;;  %v13407_v14 = vcombine.low %v867_v59, %v883_v60  ;;  %v13409_v15 = vcombine.low %v868_v61, %v884_v63  ;;  %v1108_v59 = vld [vmem:[%s19834_s6 + $0xb98] sm:$0xff] }
 0x3dc   : > { %7754 = vmatpush1.bf16.msra.mxu1 %v13659_v8  ;;  %7807 = vmatpush1.bf16.msra.mxu0 %v13661_v9  ;;  %v13410_v8 = vcombine.high %v868_v61, %v884_v63  ;;  %v899_v9 = vld [vmem:[%s19834_s6 + $0x510] sm:$0xff] }
 0x3dd   : > { %7755 = vmatprep.subr.bf16.mxu1 %v13692_v11  ;;  %7808 = vmatprep.subr.bf16.mxu0 %v13694_v12  ;;  %v915_v11 = vld [vmem:[%s19834_s6 + $0x590] sm:$0xff]  ;;  %v900_v12 = vld [vmem:[%s19834_s6 + $0x518] sm:$0xff] }
 0x3de   : > { %v13440_v16 = vcombine.high %v899_v9, %v915_v11  ;;  %v13439_v23 = vcombine.low %v899_v9, %v915_v11  ;;  %v13441_v25 = vcombine.low %v900_v12, %v916_v13  ;;  %v1140_v9 = vld [vmem:[%s19834_s6 + $0xc98] sm:$0xff] }
 0x3e0   : > { %7756 = vmatpush1.bf16.msra.mxu1 %v13691_v17  ;;  %7809 = vmatpush1.bf16.msra.mxu0 %v13693_v18  ;;  %v13442_v17 = vcombine.high %v900_v12, %v916_v13  ;;  %v931_v18 = vld [vmem:[%s19834_s6 + $0x610] sm:$0xff] }
 0x3e1   : > { %7757 = vmatprep.subr.bf16.mxu1 %v13724_v20  ;;  %7810 = vmatprep.subr.bf16.mxu0 %v13726_v21  ;;  %v947_v20 = vld [vmem:[%s19834_s6 + $0x690] sm:$0xff]  ;;  %v932_v21 = vld [vmem:[%s19834_s6 + $0x618] sm:$0xff] }
 0x3e2   : > { %v13472_v26 = vcombine.high %v931_v18, %v947_v20  ;;  %v13471_v32 = vcombine.low %v931_v18, %v947_v20  ;;  %v13473_v33 = vcombine.low %v932_v21, %v948_v22  ;;  %v1172_v18 = vld [vmem:[%s19834_s6 + $0xd98] sm:$0xff] }
 0x3e4   : > { %7758 = vmatpush1.bf16.msra.mxu1 %v13723_v27  ;;  %7811 = vmatpush1.bf16.msra.mxu0 %v13725_v28  ;;  %v13474_v27 = vcombine.high %v932_v21, %v948_v22  ;;  %v963_v28 = vld [vmem:[%s19834_s6 + $0x710] sm:$0xff] }
 0x3e5   : > { %7759 = vmatprep.subr.bf16.mxu1 %v13756_v29  ;;  %7812 = vmatprep.subr.bf16.mxu0 %v13758_v30  ;;  %v979_v29 = vld [vmem:[%s19834_s6 + $0x790] sm:$0xff]  ;;  %v964_v30 = vld [vmem:[%s19834_s6 + $0x718] sm:$0xff] }
 0x3e6   : > { %v13504_v34 = vcombine.high %v963_v28, %v979_v29  ;;  %v13503_v39 = vcombine.low %v963_v28, %v979_v29  ;;  %v13505_v24 = vcombine.low %v964_v30, %v980_v31  ;;  %v1204_v28 = vld [vmem:[%s19834_s6 + $0xe98] sm:$0xff] }
 0x3e8   : > { %7760 = vmatpush1.bf16.msra.mxu1 %v13755_v35  ;;  %7813 = vmatpush1.bf16.msra.mxu0 %v13757_v2  ;;  %v13506_v35 = vcombine.high %v964_v30, %v980_v31  ;;  %v995_v2 = vld [vmem:[%s19834_s6 + $0x810] sm:$0xff] }
 0x3e9   : > { %7835 = vmatprep.subr.bf16.mxu1 %v13280_v36  ;;  %7888 = vmatprep.subr.bf16.mxu0 %v13282_v37  ;;  %v1011_v36 = vld [vmem:[%s19834_s6 + $0x890] sm:$0xff]  ;;  %v996_v37 = vld [vmem:[%s19834_s6 + $0x818] sm:$0xff] }
 0x3ea   : > { %v13536_v40 = vcombine.high %v995_v2, %v1011_v36  ;;  %v13535_v45 = vcombine.low %v995_v2, %v1011_v36  ;;  %v13537_v46 = vcombine.low %v996_v37, %v1012_v38  ;;  %v1236_v2 = vld [vmem:[%s19834_s6 + $0xf98] sm:$0xff] }
 0x3eb   : > { %7762 = vmatmul.mubr.bf16.vlgmr.msra.gmra.mrb[8].mxu1 %v14866_v62  ;;  %7815 = vmatmul.mubr.bf16.vlgmr.msra.gmra.mrb[16].mxu0 %v14866_v62 }
 0x3ec   : > { %7771 = vmatprep.mubr.bf16.mxu1 %v15051_v10  ;;  %7824 = vmatprep.mubr.bf16.mxu0 %v15051_v10 }
 0x3ed   : > { %7836 = vmatpush1.bf16.msra.mxu1 %v13279_v4  ;;  %7889 = vmatpush1.bf16.msra.mxu0 %v13281_v41  ;;  %v13538_v4 = vcombine.high %v996_v37, %v1012_v38  ;;  %v1027_v41 = vld [vmem:[%s19834_s6 + $0x910] sm:$0xff] }
 0x3ee   : > { %7837 = vmatprep.subr.bf16.mxu1 %v13312_v42  ;;  %7890 = vmatprep.subr.bf16.mxu0 %v13314_v43  ;;  %v1043_v42 = vld [vmem:[%s19834_s6 + $0x990] sm:$0xff]  ;;  %v1028_v43 = vld [vmem:[%s19834_s6 + $0x918] sm:$0xff] }
 0x3ef   : > { %v13568_v47 = vcombine.high %v1027_v41, %v1043_v42  ;;  %v13567_v52 = vcombine.low %v1027_v41, %v1043_v42  ;;  %v13569_v53 = vcombine.low %v1028_v43, %v1044_v44  ;;  %v758_v41 = vld [vmem:[%s19834_s6 + $0xa8] sm:$0xff] }
 0x3f1   : > { %7838 = vmatpush1.bf16.msra.mxu1 %v13311_v48  ;;  %7891 = vmatpush1.bf16.msra.mxu0 %v13313_v19  ;;  %v13570_v48 = vcombine.high %v1028_v43, %v1044_v44  ;;  %v1059_v19 = vld [vmem:[%s19834_s6 + $0xa10] sm:$0xff] }
 0x3f2   : > { %7839 = vmatprep.subr.bf16.mxu1 %v13344_v49  ;;  %7892 = vmatprep.subr.bf16.mxu0 %v13346_v50  ;;  %v1075_v49 = vld [vmem:[%s19834_s6 + $0xa90] sm:$0xff]  ;;  %v1060_v50 = vld [vmem:[%s19834_s6 + $0xa18] sm:$0xff] }
 0x3f3   : > { %7772 = vmatmul.mubr.bf16.gmra.mrb[12].mxu1 %v15046_v3  ;;  %7825 = vmatmul.mubr.bf16.gmra.mrb[20].mxu0 %v15046_v3  ;;  %v13600_v54 = vcombine.high %v1059_v19, %v1075_v49  ;;  %v13599_v60 = vcombine.low %v1059_v19, %v1075_v49  ;;  %v13601_v61 = vcombine.low %v1060_v50, %v1076_v51  ;;  %v790_v19 = vld [vmem:[%s19834_s6 + $0x1a8] sm:$0xff] }
 0x3f4   : > { %7867 = vmatprep.mubr.bf16.mxu1 %v14871_v6  ;;  %7920 = vmatprep.mubr.bf16.mxu0 %v14871_v6 }
 0x3f5   : > { %7840 = vmatpush1.bf16.msra.mxu1 %v13343_v55  ;;  %7893 = vmatpush1.bf16.msra.mxu0 %v13345_v56  ;;  %v13602_v55 = vcombine.high %v1060_v50, %v1076_v51  ;;  %v1091_v56 = vld [vmem:[%s19834_s6 + $0xb10] sm:$0xff] }
 0x3f6   : > { %7841 = vmatprep.subr.bf16.mxu1 %v13376_v57  ;;  %7894 = vmatprep.subr.bf16.mxu0 %v13378_v58  ;;  %v1107_v57 = vld [vmem:[%s19834_s6 + $0xb90] sm:$0xff]  ;;  %v1092_v58 = vld [vmem:[%s19834_s6 + $0xb18] sm:$0xff] }
 0x3f7   : > { %v13632_v63 = vcombine.high %v1091_v56, %v1107_v57  ;;  %v13631_v11 = vcombine.low %v1091_v56, %v1107_v57  ;;  %v13633_v12 = vcombine.low %v1092_v58, %v1108_v59  ;;  %v822_v56 = vld [vmem:[%s19834_s6 + $0x2a8] sm:$0xff] }
 0x3f9   : > { %7842 = vmatpush1.bf16.msra.mxu1 %v13375_v1  ;;  %7895 = vmatpush1.bf16.msra.mxu0 %v13377_v5  ;;  %v13634_v1 = vcombine.high %v1092_v58, %v1108_v59  ;;  %v1123_v5 = vld [vmem:[%s19834_s6 + $0xc10] sm:$0xff] }
 0x3fa   : > { %7843 = vmatprep.subr.bf16.mxu1 %v13408_v7  ;;  %7896 = vmatprep.subr.bf16.mxu0 %v13410_v8  ;;  %v1139_v7 = vld [vmem:[%s19834_s6 + $0xc90] sm:$0xff]  ;;  %v1124_v8 = vld [vmem:[%s19834_s6 + $0xc18] sm:$0xff] }
 0x3fb   : > { %v13664_v13 = vcombine.high %v1123_v5, %v1139_v7  ;;  %v13663_v20 = vcombine.low %v1123_v5, %v1139_v7  ;;  %v13665_v21 = vcombine.low %v1124_v8, %v1140_v9  ;;  %v854_v5 = vld [vmem:[%s19834_s6 + $0x3a8] sm:$0xff] }
 0x3fd   : > { %7844 = vmatpush1.bf16.msra.mxu1 %v13407_v14  ;;  %7897 = vmatpush1.bf16.msra.mxu0 %v13409_v15  ;;  %v13666_v14 = vcombine.high %v1124_v8, %v1140_v9  ;;  %v1155_v15 = vld [vmem:[%s19834_s6 + $0xd10] sm:$0xff] }
 0x3fe   : > { %7845 = vmatprep.subr.bf16.mxu1 %v13440_v16  ;;  %7898 = vmatprep.subr.bf16.mxu0 %v13442_v17  ;;  %v1171_v16 = vld [vmem:[%s19834_s6 + $0xd90] sm:$0xff]  ;;  %v1156_v17 = vld [vmem:[%s19834_s6 + $0xd18] sm:$0xff] }
 0x3ff   : > { %v13696_v22 = vcombine.high %v1155_v15, %v1171_v16  ;;  %v13695_v29 = vcombine.low %v1155_v15, %v1171_v16  ;;  %v13697_v30 = vcombine.low %v1156_v17, %v1172_v18  ;;  %v886_v15 = vld [vmem:[%s19834_s6 + $0x4a8] sm:$0xff] }
 0x401   : > { %7846 = vmatpush1.bf16.msra.mxu1 %v13439_v23  ;;  %7899 = vmatpush1.bf16.msra.mxu0 %v13441_v25  ;;  %v13698_v23 = vcombine.high %v1156_v17, %v1172_v18  ;;  %v1187_v25 = vld [vmem:[%s19834_s6 + $0xe10] sm:$0xff] }
 0x402   : > { %7847 = vmatprep.subr.bf16.mxu1 %v13472_v26  ;;  %7900 = vmatprep.subr.bf16.mxu0 %v13474_v27  ;;  %v1203_v26 = vld [vmem:[%s19834_s6 + $0xe90] sm:$0xff]  ;;  %v1188_v27 = vld [vmem:[%s19834_s6 + $0xe18] sm:$0xff] }
 0x403   : > { %v13728_v31 = vcombine.high %v1187_v25, %v1203_v26  ;;  %v13727_v36 = vcombine.low %v1187_v25, %v1203_v26  ;;  %v13729_v37 = vcombine.low %v1188_v27, %v1204_v28  ;;  %v918_v25 = vld [vmem:[%s19834_s6 + $0x5a8] sm:$0xff] }
 0x405   : > { %7848 = vmatpush1.bf16.msra.mxu1 %v13471_v32  ;;  %7901 = vmatpush1.bf16.msra.mxu0 %v13473_v33  ;;  %v13730_v32 = vcombine.high %v1188_v27, %v1204_v28  ;;  %v1219_v33 = vld [vmem:[%s19834_s6 + $0xf10] sm:$0xff] }
 0x406   : > { %7849 = vmatprep.subr.bf16.mxu1 %v13504_v34  ;;  %7902 = vmatprep.subr.bf16.mxu0 %v13506_v35  ;;  %v1235_v34 = vld [vmem:[%s19834_s6 + $0xf90] sm:$0xff]  ;;  %v1220_v35 = vld [vmem:[%s19834_s6 + $0xf18] sm:$0xff] }
 0x407   : > { %v13760_v38 = vcombine.high %v1219_v33, %v1235_v34  ;;  %v13759_v42 = vcombine.low %v1219_v33, %v1235_v34  ;;  %v13761_v43 = vcombine.low %v1220_v35, %v1236_v2  ;;  %v950_v33 = vld [vmem:[%s19834_s6 + $0x6a8] sm:$0xff] }
 0x409   : > { %7850 = vmatpush1.bf16.msra.mxu1 %v13503_v39  ;;  %7903 = vmatpush1.bf16.msra.mxu0 %v13505_v24  ;;  %v13762_v39 = vcombine.high %v1220_v35, %v1236_v2  ;;  %v741_v24 = vld [vmem:[%s19834_s6 + $0x20] sm:$0xff] }
 0x40a   : > { %7851 = vmatprep.subr.bf16.mxu1 %v13536_v40  ;;  %7904 = vmatprep.subr.bf16.mxu0 %v13538_v4  ;;  %v757_v40 = vld [vmem:[%s19834_s6 + $0xa0] sm:$0xff]  ;;  %v742_v4 = vld [vmem:[%s19834_s6 + $0x28] sm:$0xff] }
 0x40b   : > { %v13284_v44 = vcombine.high %v741_v24, %v757_v40  ;;  %v13283_v49 = vcombine.low %v741_v24, %v757_v40  ;;  %v13285_v50 = vcombine.low %v742_v4, %v758_v41  ;;  %v982_v24 = vld [vmem:[%s19834_s6 + $0x7a8] sm:$0xff] }
 0x40d   : > { %7852 = vmatpush1.bf16.msra.mxu1 %v13535_v45  ;;  %7905 = vmatpush1.bf16.msra.mxu0 %v13537_v46  ;;  %v13286_v45 = vcombine.high %v742_v4, %v758_v41  ;;  %v773_v46 = vld [vmem:[%s19834_s6 + $0x120] sm:$0xff] }
 0x40e   : > { %7853 = vmatprep.subr.bf16.mxu1 %v13568_v47  ;;  %7906 = vmatprep.subr.bf16.mxu0 %v13570_v48  ;;  %v789_v47 = vld [vmem:[%s19834_s6 + $0x1a0] sm:$0xff]  ;;  %v774_v48 = vld [vmem:[%s19834_s6 + $0x128] sm:$0xff] }
 0x40f   : > { %v13316_v51 = vcombine.high %v773_v46, %v789_v47  ;;  %v13315_v57 = vcombine.low %v773_v46, %v789_v47  ;;  %v13317_v58 = vcombine.low %v774_v48, %v790_v19  ;;  %v1014_v46 = vld [vmem:[%s19834_s6 + $0x8a8] sm:$0xff] }
 0x411   : > { %7854 = vmatpush1.bf16.msra.mxu1 %v13567_v52  ;;  %7907 = vmatpush1.bf16.msra.mxu0 %v13569_v53  ;;  %v13318_v52 = vcombine.high %v774_v48, %v790_v19  ;;  %v805_v53 = vld [vmem:[%s19834_s6 + $0x220] sm:$0xff] }
 0x412   : > { %7855 = vmatprep.subr.bf16.mxu1 %v13600_v54  ;;  %7908 = vmatprep.subr.bf16.mxu0 %v13602_v55  ;;  %v821_v54 = vld [vmem:[%s19834_s6 + $0x2a0] sm:$0xff]  ;;  %v806_v55 = vld [vmem:[%s19834_s6 + $0x228] sm:$0xff] }
 0x413   : > { %v13348_v59 = vcombine.high %v805_v53, %v821_v54  ;;  %v13347_v7 = vcombine.low %v805_v53, %v821_v54  ;;  %v13349_v8 = vcombine.low %v806_v55, %v822_v56  ;;  %v1046_v53 = vld [vmem:[%s19834_s6 + $0x9a8] sm:$0xff] }
 0x415   : > { %7856 = vmatpush1.bf16.msra.mxu1 %v13599_v60  ;;  %7909 = vmatpush1.bf16.msra.mxu0 %v13601_v61  ;;  %v13350_v60 = vcombine.high %v806_v55, %v822_v56  ;;  %v837_v61 = vld [vmem:[%s19834_s6 + $0x320] sm:$0xff] }
 0x416   : > { %7857 = vmatprep.subr.bf16.mxu1 %v13632_v63  ;;  %7910 = vmatprep.subr.bf16.mxu0 %v13634_v1  ;;  %v853_v63 = vld [vmem:[%s19834_s6 + $0x3a0] sm:$0xff]  ;;  %v838_v1 = vld [vmem:[%s19834_s6 + $0x328] sm:$0xff] }
 0x417   : > { %v13380_v9 = vcombine.high %v837_v61, %v853_v63  ;;  %v13379_v16 = vcombine.low %v837_v61, %v853_v63  ;;  %v13381_v17 = vcombine.low %v838_v1, %v854_v5  ;;  %v1078_v61 = vld [vmem:[%s19834_s6 + $0xaa8] sm:$0xff] }
 0x419   : > { %7858 = vmatpush1.bf16.msra.mxu1 %v13631_v11  ;;  %7911 = vmatpush1.bf16.msra.mxu0 %v13633_v12  ;;  %v13382_v11 = vcombine.high %v838_v1, %v854_v5  ;;  %v869_v12 = vld [vmem:[%s19834_s6 + $0x420] sm:$0xff] }
 0x41a   : > { %7859 = vmatprep.subr.bf16.mxu1 %v13664_v13  ;;  %7912 = vmatprep.subr.bf16.mxu0 %v13666_v14  ;;  %v885_v13 = vld [vmem:[%s19834_s6 + $0x4a0] sm:$0xff]  ;;  %v870_v14 = vld [vmem:[%s19834_s6 + $0x428] sm:$0xff] }
 0x41b   : > { %v13412_v18 = vcombine.high %v869_v12, %v885_v13  ;;  %v13411_v26 = vcombine.low %v869_v12, %v885_v13  ;;  %v13413_v27 = vcombine.low %v870_v14, %v886_v15  ;;  %v1110_v12 = vld [vmem:[%s19834_s6 + $0xba8] sm:$0xff] }
 0x41d   : > { %7860 = vmatpush1.bf16.msra.mxu1 %v13663_v20  ;;  %7913 = vmatpush1.bf16.msra.mxu0 %v13665_v21  ;;  %v13414_v20 = vcombine.high %v870_v14, %v886_v15  ;;  %v901_v21 = vld [vmem:[%s19834_s6 + $0x520] sm:$0xff] }
 0x41e   : > { %7861 = vmatprep.subr.bf16.mxu1 %v13696_v22  ;;  %7914 = vmatprep.subr.bf16.mxu0 %v13698_v23  ;;  %v917_v22 = vld [vmem:[%s19834_s6 + $0x5a0] sm:$0xff]  ;;  %v902_v23 = vld [vmem:[%s19834_s6 + $0x528] sm:$0xff] }
 0x41f   : > { %v13444_v28 = vcombine.high %v901_v21, %v917_v22  ;;  %v13443_v34 = vcombine.low %v901_v21, %v917_v22  ;;  %v13445_v35 = vcombine.low %v902_v23, %v918_v25  ;;  %v1142_v21 = vld [vmem:[%s19834_s6 + $0xca8] sm:$0xff] }
 0x421   : > { %7862 = vmatpush1.bf16.msra.mxu1 %v13695_v29  ;;  %7915 = vmatpush1.bf16.msra.mxu0 %v13697_v30  ;;  %v13446_v29 = vcombine.high %v902_v23, %v918_v25  ;;  %v933_v30 = vld [vmem:[%s19834_s6 + $0x620] sm:$0xff] }
 0x422   : > { %7863 = vmatprep.subr.bf16.mxu1 %v13728_v31  ;;  %7916 = vmatprep.subr.bf16.mxu0 %v13730_v32  ;;  %v949_v31 = vld [vmem:[%s19834_s6 + $0x6a0] sm:$0xff]  ;;  %v934_v32 = vld [vmem:[%s19834_s6 + $0x628] sm:$0xff] }
 0x423   : > { %v13476_v2 = vcombine.high %v933_v30, %v949_v31  ;;  %v13475_v40 = vcombine.low %v933_v30, %v949_v31  ;;  %v13477_v4 = vcombine.low %v934_v32, %v950_v33  ;;  %v1174_v30 = vld [vmem:[%s19834_s6 + $0xda8] sm:$0xff] }
 0x425   : > { %7864 = vmatpush1.bf16.msra.mxu1 %v13727_v36  ;;  %7917 = vmatpush1.bf16.msra.mxu0 %v13729_v37  ;;  %v13478_v36 = vcombine.high %v934_v32, %v950_v33  ;;  %v965_v37 = vld [vmem:[%s19834_s6 + $0x720] sm:$0xff] }
 0x426   : > { %7865 = vmatprep.subr.bf16.mxu1 %v13760_v38  ;;  %7918 = vmatprep.subr.bf16.mxu0 %v13762_v39  ;;  %v981_v38 = vld [vmem:[%s19834_s6 + $0x7a0] sm:$0xff]  ;;  %v966_v39 = vld [vmem:[%s19834_s6 + $0x728] sm:$0xff] }
 0x427   : > { %v13508_v41 = vcombine.high %v965_v37, %v981_v38  ;;  %v13507_v47 = vcombine.low %v965_v37, %v981_v38  ;;  %v13509_v48 = vcombine.low %v966_v39, %v982_v24  ;;  %v1206_v37 = vld [vmem:[%s19834_s6 + $0xea8] sm:$0xff] }
 0x429   : > { %7866 = vmatpush1.bf16.msra.mxu1 %v13759_v42  ;;  %7919 = vmatpush1.bf16.msra.mxu0 %v13761_v43  ;;  %v13510_v42 = vcombine.high %v966_v39, %v982_v24  ;;  %v997_v43 = vld [vmem:[%s19834_s6 + $0x820] sm:$0xff] }
 0x42a   : > { %7941 = vmatprep.subr.bf16.mxu1 %v13284_v44  ;;  %7994 = vmatprep.subr.bf16.mxu0 %v13286_v45  ;;  %v1013_v44 = vld [vmem:[%s19834_s6 + $0x8a0] sm:$0xff]  ;;  %v998_v45 = vld [vmem:[%s19834_s6 + $0x828] sm:$0xff] }
 0x42b   : > { %v13540_v19 = vcombine.high %v997_v43, %v1013_v44  ;;  %v13539_v54 = vcombine.low %v997_v43, %v1013_v44  ;;  %v13541_v55 = vcombine.low %v998_v45, %v1014_v46  ;;  %v1238_v43 = vld [vmem:[%s19834_s6 + $0xfa8] sm:$0xff] }
 0x42c   : > { %7868 = vmatmul.mubr.bf16.vlgmr.msra.gmra.mrb[16].mxu1 %v14866_v62  ;;  %7921 = vmatmul.mubr.bf16.vlgmr.msra.gmra.mrb[24].mxu0 %v14866_v62 }
 0x42d   : > { %7877 = vmatprep.mubr.bf16.mxu1 %v15051_v10  ;;  %7930 = vmatprep.mubr.bf16.mxu0 %v15051_v10 }
 0x42e   : > { %7942 = vmatpush1.bf16.msra.mxu1 %v13283_v49  ;;  %7995 = vmatpush1.bf16.msra.mxu0 %v13285_v50  ;;  %v13542_v49 = vcombine.high %v998_v45, %v1014_v46  ;;  %v1029_v50 = vld [vmem:[%s19834_s6 + $0x920] sm:$0xff] }
 0x42f   : > { %7943 = vmatprep.subr.bf16.mxu1 %v13316_v51  ;;  %7996 = vmatprep.subr.bf16.mxu0 %v13318_v52  ;;  %v1045_v51 = vld [vmem:[%s19834_s6 + $0x9a0] sm:$0xff]  ;;  %v1030_v52 = vld [vmem:[%s19834_s6 + $0x928] sm:$0xff] }
 0x430   : > { %v13572_v56 = vcombine.high %v1029_v50, %v1045_v51  ;;  %v13571_v63 = vcombine.low %v1029_v50, %v1045_v51  ;;  %v13573_v1 = vcombine.low %v1030_v52, %v1046_v53  ;;  %v760_v50 = vld [vmem:[%s19834_s6 + $0xb8] sm:$0xff] }
 0x432   : > { %7944 = vmatpush1.bf16.msra.mxu1 %v13315_v57  ;;  %7997 = vmatpush1.bf16.msra.mxu0 %v13317_v58  ;;  %v13574_v57 = vcombine.high %v1030_v52, %v1046_v53  ;;  %v1061_v58 = vld [vmem:[%s19834_s6 + $0xa20] sm:$0xff] }
 0x433   : > { %7945 = vmatprep.subr.bf16.mxu1 %v13348_v59  ;;  %7998 = vmatprep.subr.bf16.mxu0 %v13350_v60  ;;  %v1077_v59 = vld [vmem:[%s19834_s6 + $0xaa0] sm:$0xff]  ;;  %v1062_v60 = vld [vmem:[%s19834_s6 + $0xa28] sm:$0xff] }
 0x434   : > { %7878 = vmatmul.mubr.bf16.gmra.mrb[20].mxu1 %v15046_v3  ;;  %7931 = vmatmul.mubr.bf16.gmra.mrb[28].mxu0 %v15046_v3  ;;  %v13604_v5 = vcombine.high %v1061_v58, %v1077_v59  ;;  %v13603_v13 = vcombine.low %v1061_v58, %v1077_v59  ;;  %v13605_v14 = vcombine.low %v1062_v60, %v1078_v61  ;;  %v792_v58 = vld [vmem:[%s19834_s6 + $0x1b8] sm:$0xff] }
 0x435   : > { %7973 = vmatprep.mubr.bf16.mxu1 %v14871_v6  ;;  %8026 = vmatprep.mubr.bf16.mxu0 %v14871_v6 }
 0x436   : > { %7946 = vmatpush1.bf16.msra.mxu1 %v13347_v7  ;;  %7999 = vmatpush1.bf16.msra.mxu0 %v13349_v8  ;;  %v13606_v7 = vcombine.high %v1062_v60, %v1078_v61  ;;  %v1093_v8 = vld [vmem:[%s19834_s6 + $0xb20] sm:$0xff] }
 0x437   : > { %7947 = vmatprep.subr.bf16.mxu1 %v13380_v9  ;;  %8000 = vmatprep.subr.bf16.mxu0 %v13382_v11  ;;  %v1109_v9 = vld [vmem:[%s19834_s6 + $0xba0] sm:$0xff]  ;;  %v1094_v11 = vld [vmem:[%s19834_s6 + $0xb28] sm:$0xff] }
 0x438   : > { %v13636_v15 = vcombine.high %v1093_v8, %v1109_v9  ;;  %v13635_v22 = vcombine.low %v1093_v8, %v1109_v9  ;;  %v13637_v23 = vcombine.low %v1094_v11, %v1110_v12  ;;  %v824_v8 = vld [vmem:[%s19834_s6 + $0x2b8] sm:$0xff] }
 0x43a   : > { %7948 = vmatpush1.bf16.msra.mxu1 %v13379_v16  ;;  %8001 = vmatpush1.bf16.msra.mxu0 %v13381_v17  ;;  %v13638_v16 = vcombine.high %v1094_v11, %v1110_v12  ;;  %v1125_v17 = vld [vmem:[%s19834_s6 + $0xc20] sm:$0xff] }
 0x43b   : > { %7949 = vmatprep.subr.bf16.mxu1 %v13412_v18  ;;  %8002 = vmatprep.subr.bf16.mxu0 %v13414_v20  ;;  %v1141_v18 = vld [vmem:[%s19834_s6 + $0xca0] sm:$0xff]  ;;  %v1126_v20 = vld [vmem:[%s19834_s6 + $0xc28] sm:$0xff] }
 0x43c   : > { %v13668_v25 = vcombine.high %v1125_v17, %v1141_v18  ;;  %v13667_v31 = vcombine.low %v1125_v17, %v1141_v18  ;;  %v13669_v32 = vcombine.low %v1126_v20, %v1142_v21  ;;  %v856_v17 = vld [vmem:[%s19834_s6 + $0x3b8] sm:$0xff] }
 0x43e   : > { %7950 = vmatpush1.bf16.msra.mxu1 %v13411_v26  ;;  %8003 = vmatpush1.bf16.msra.mxu0 %v13413_v27  ;;  %v13670_v26 = vcombine.high %v1126_v20, %v1142_v21  ;;  %v1157_v27 = vld [vmem:[%s19834_s6 + $0xd20] sm:$0xff] }
 0x43f   : > { %7951 = vmatprep.subr.bf16.mxu1 %v13444_v28  ;;  %8004 = vmatprep.subr.bf16.mxu0 %v13446_v29  ;;  %v1173_v28 = vld [vmem:[%s19834_s6 + $0xda0] sm:$0xff]  ;;  %v1158_v29 = vld [vmem:[%s19834_s6 + $0xd28] sm:$0xff] }
 0x440   : > { %v13700_v33 = vcombine.high %v1157_v27, %v1173_v28  ;;  %v13699_v38 = vcombine.low %v1157_v27, %v1173_v28  ;;  %v13701_v39 = vcombine.low %v1158_v29, %v1174_v30  ;;  %v888_v27 = vld [vmem:[%s19834_s6 + $0x4b8] sm:$0xff] }
 0x442   : > { %7952 = vmatpush1.bf16.msra.mxu1 %v13443_v34  ;;  %8005 = vmatpush1.bf16.msra.mxu0 %v13445_v35  ;;  %v13702_v34 = vcombine.high %v1158_v29, %v1174_v30  ;;  %v1189_v35 = vld [vmem:[%s19834_s6 + $0xe20] sm:$0xff] }
 0x443   : > { %7953 = vmatprep.subr.bf16.mxu1 %v13476_v2  ;;  %8006 = vmatprep.subr.bf16.mxu0 %v13478_v36  ;;  %v1205_v2 = vld [vmem:[%s19834_s6 + $0xea0] sm:$0xff]  ;;  %v1190_v36 = vld [vmem:[%s19834_s6 + $0xe28] sm:$0xff] }
 0x444   : > { %v13732_v24 = vcombine.high %v1189_v35, %v1205_v2  ;;  %v13731_v44 = vcombine.low %v1189_v35, %v1205_v2  ;;  %v13733_v45 = vcombine.low %v1190_v36, %v1206_v37  ;;  %v920_v35 = vld [vmem:[%s19834_s6 + $0x5b8] sm:$0xff] }
 0x446   : > { %7954 = vmatpush1.bf16.msra.mxu1 %v13475_v40  ;;  %8007 = vmatpush1.bf16.msra.mxu0 %v13477_v4  ;;  %v13734_v40 = vcombine.high %v1190_v36, %v1206_v37  ;;  %v1221_v4 = vld [vmem:[%s19834_s6 + $0xf20] sm:$0xff] }
 0x447   : > { %7955 = vmatprep.subr.bf16.mxu1 %v13508_v41  ;;  %8008 = vmatprep.subr.bf16.mxu0 %v13510_v42  ;;  %v1237_v41 = vld [vmem:[%s19834_s6 + $0xfa0] sm:$0xff]  ;;  %v1222_v42 = vld [vmem:[%s19834_s6 + $0xf28] sm:$0xff] }
 0x448   : > { %v13764_v46 = vcombine.high %v1221_v4, %v1237_v41  ;;  %v13763_v51 = vcombine.low %v1221_v4, %v1237_v41  ;;  %v13765_v52 = vcombine.low %v1222_v42, %v1238_v43  ;;  %v952_v4 = vld [vmem:[%s19834_s6 + $0x6b8] sm:$0xff] }
 0x44a   : > { %7956 = vmatpush1.bf16.msra.mxu1 %v13507_v47  ;;  %8009 = vmatpush1.bf16.msra.mxu0 %v13509_v48  ;;  %v13766_v47 = vcombine.high %v1222_v42, %v1238_v43  ;;  %v743_v48 = vld [vmem:[%s19834_s6 + $0x30] sm:$0xff] }
 0x44b   : > { %7957 = vmatprep.subr.bf16.mxu1 %v13540_v19  ;;  %8010 = vmatprep.subr.bf16.mxu0 %v13542_v49  ;;  %v759_v19 = vld [vmem:[%s19834_s6 + $0xb0] sm:$0xff]  ;;  %v744_v49 = vld [vmem:[%s19834_s6 + $0x38] sm:$0xff] }
 0x44c   : > { %v13288_v53 = vcombine.high %v743_v48, %v759_v19  ;;  %v13287_v59 = vcombine.low %v743_v48, %v759_v19  ;;  %v13289_v60 = vcombine.low %v744_v49, %v760_v50  ;;  %v984_v48 = vld [vmem:[%s19834_s6 + $0x7b8] sm:$0xff] }
 0x44e   : > { %7958 = vmatpush1.bf16.msra.mxu1 %v13539_v54  ;;  %8011 = vmatpush1.bf16.msra.mxu0 %v13541_v55  ;;  %v13290_v54 = vcombine.high %v744_v49, %v760_v50  ;;  %v775_v55 = vld [vmem:[%s19834_s6 + $0x130] sm:$0xff] }
 0x44f   : > { %7959 = vmatprep.subr.bf16.mxu1 %v13572_v56  ;;  %8012 = vmatprep.subr.bf16.mxu0 %v13574_v57  ;;  %v791_v56 = vld [vmem:[%s19834_s6 + $0x1b0] sm:$0xff]  ;;  %v776_v57 = vld [vmem:[%s19834_s6 + $0x138] sm:$0xff] }
 0x450   : > { %v13320_v61 = vcombine.high %v775_v55, %v791_v56  ;;  %v13319_v9 = vcombine.low %v775_v55, %v791_v56  ;;  %v13321_v11 = vcombine.low %v776_v57, %v792_v58  ;;  %v1016_v55 = vld [vmem:[%s19834_s6 + $0x8b8] sm:$0xff] }
 0x452   : > { %7960 = vmatpush1.bf16.msra.mxu1 %v13571_v63  ;;  %8013 = vmatpush1.bf16.msra.mxu0 %v13573_v1  ;;  %v13322_v63 = vcombine.high %v776_v57, %v792_v58  ;;  %v807_v1 = vld [vmem:[%s19834_s6 + $0x230] sm:$0xff] }
 0x453   : > { %7961 = vmatprep.subr.bf16.mxu1 %v13604_v5  ;;  %8014 = vmatprep.subr.bf16.mxu0 %v13606_v7  ;;  %v823_v5 = vld [vmem:[%s19834_s6 + $0x2b0] sm:$0xff]  ;;  %v808_v7 = vld [vmem:[%s19834_s6 + $0x238] sm:$0xff] }
 0x454   : > { %v13352_v12 = vcombine.high %v807_v1, %v823_v5  ;;  %v13351_v18 = vcombine.low %v807_v1, %v823_v5  ;;  %v13353_v20 = vcombine.low %v808_v7, %v824_v8  ;;  %v1048_v1 = vld [vmem:[%s19834_s6 + $0x9b8] sm:$0xff] }
 0x456   : > { %7962 = vmatpush1.bf16.msra.mxu1 %v13603_v13  ;;  %8015 = vmatpush1.bf16.msra.mxu0 %v13605_v14  ;;  %v13354_v13 = vcombine.high %v808_v7, %v824_v8  ;;  %v839_v14 = vld [vmem:[%s19834_s6 + $0x330] sm:$0xff] }
 0x457   : > { %7963 = vmatprep.subr.bf16.mxu1 %v13636_v15  ;;  %8016 = vmatprep.subr.bf16.mxu0 %v13638_v16  ;;  %v855_v15 = vld [vmem:[%s19834_s6 + $0x3b0] sm:$0xff]  ;;  %v840_v16 = vld [vmem:[%s19834_s6 + $0x338] sm:$0xff] }
 0x458   : > { %v13384_v21 = vcombine.high %v839_v14, %v855_v15  ;;  %v13383_v28 = vcombine.low %v839_v14, %v855_v15  ;;  %v13385_v29 = vcombine.low %v840_v16, %v856_v17  ;;  %v1080_v14 = vld [vmem:[%s19834_s6 + $0xab8] sm:$0xff] }
 0x45a   : > { %7964 = vmatpush1.bf16.msra.mxu1 %v13635_v22  ;;  %8017 = vmatpush1.bf16.msra.mxu0 %v13637_v23  ;;  %v13386_v22 = vcombine.high %v840_v16, %v856_v17  ;;  %v871_v23 = vld [vmem:[%s19834_s6 + $0x430] sm:$0xff] }
 0x45b   : > { %7965 = vmatprep.subr.bf16.mxu1 %v13668_v25  ;;  %8018 = vmatprep.subr.bf16.mxu0 %v13670_v26  ;;  %v887_v25 = vld [vmem:[%s19834_s6 + $0x4b0] sm:$0xff]  ;;  %v872_v26 = vld [vmem:[%s19834_s6 + $0x438] sm:$0xff] }
 0x45c   : > { %v13416_v30 = vcombine.high %v871_v23, %v887_v25  ;;  %v13415_v2 = vcombine.low %v871_v23, %v887_v25  ;;  %v13417_v36 = vcombine.low %v872_v26, %v888_v27  ;;  %v1112_v23 = vld [vmem:[%s19834_s6 + $0xbb8] sm:$0xff] }
 0x45e   : > { %7966 = vmatpush1.bf16.msra.mxu1 %v13667_v31  ;;  %8019 = vmatpush1.bf16.msra.mxu0 %v13669_v32  ;;  %v13418_v31 = vcombine.high %v872_v26, %v888_v27  ;;  %v903_v32 = vld [vmem:[%s19834_s6 + $0x530] sm:$0xff] }
 0x45f   : > { %7967 = vmatprep.subr.bf16.mxu1 %v13700_v33  ;;  %8020 = vmatprep.subr.bf16.mxu0 %v13702_v34  ;;  %v919_v33 = vld [vmem:[%s19834_s6 + $0x5b0] sm:$0xff]  ;;  %v904_v34 = vld [vmem:[%s19834_s6 + $0x538] sm:$0xff] }
 0x460   : > { %v13448_v37 = vcombine.high %v903_v32, %v919_v33  ;;  %v13447_v41 = vcombine.low %v903_v32, %v919_v33  ;;  %v13449_v42 = vcombine.low %v904_v34, %v920_v35  ;;  %v1144_v32 = vld [vmem:[%s19834_s6 + $0xcb8] sm:$0xff] }
 0x462   : > { %7968 = vmatpush1.bf16.msra.mxu1 %v13699_v38  ;;  %8021 = vmatpush1.bf16.msra.mxu0 %v13701_v39  ;;  %v13450_v38 = vcombine.high %v904_v34, %v920_v35  ;;  %v935_v39 = vld [vmem:[%s19834_s6 + $0x630] sm:$0xff] }
 0x463   : > { %7969 = vmatprep.subr.bf16.mxu1 %v13732_v24  ;;  %8022 = vmatprep.subr.bf16.mxu0 %v13734_v40  ;;  %v951_v24 = vld [vmem:[%s19834_s6 + $0x6b0] sm:$0xff]  ;;  %v936_v40 = vld [vmem:[%s19834_s6 + $0x638] sm:$0xff] }
 0x464   : > { %v13480_v43 = vcombine.high %v935_v39, %v951_v24  ;;  %v13479_v19 = vcombine.low %v935_v39, %v951_v24  ;;  %v13481_v49 = vcombine.low %v936_v40, %v952_v4  ;;  %v1176_v39 = vld [vmem:[%s19834_s6 + $0xdb8] sm:$0xff] }
 0x466   : > { %7970 = vmatpush1.bf16.msra.mxu1 %v13731_v44  ;;  %8023 = vmatpush1.bf16.msra.mxu0 %v13733_v45  ;;  %v13482_v44 = vcombine.high %v936_v40, %v952_v4  ;;  %v967_v45 = vld [vmem:[%s19834_s6 + $0x730] sm:$0xff] }
 0x467   : > { %7971 = vmatprep.subr.bf16.mxu1 %v13764_v46  ;;  %8024 = vmatprep.subr.bf16.mxu0 %v13766_v47  ;;  %v983_v46 = vld [vmem:[%s19834_s6 + $0x7b0] sm:$0xff]  ;;  %v968_v47 = vld [vmem:[%s19834_s6 + $0x738] sm:$0xff] }
 0x468   : > { %v13512_v50 = vcombine.high %v967_v45, %v983_v46  ;;  %v13511_v56 = vcombine.low %v967_v45, %v983_v46  ;;  %v13513_v57 = vcombine.low %v968_v47, %v984_v48  ;;  %v1208_v45 = vld [vmem:[%s19834_s6 + $0xeb8] sm:$0xff] }
 0x46a   : > { %7972 = vmatpush1.bf16.msra.mxu1 %v13763_v51  ;;  %8025 = vmatpush1.bf16.msra.mxu0 %v13765_v52  ;;  %v13514_v51 = vcombine.high %v968_v47, %v984_v48  ;;  %v999_v52 = vld [vmem:[%s19834_s6 + $0x830] sm:$0xff] }
 0x46b   : > { %8047 = vmatprep.subr.bf16.mxu1 %v13288_v53  ;;  %8100 = vmatprep.subr.bf16.mxu0 %v13290_v54  ;;  %v1015_v53 = vld [vmem:[%s19834_s6 + $0x8b0] sm:$0xff]  ;;  %v1000_v54 = vld [vmem:[%s19834_s6 + $0x838] sm:$0xff] }
 0x46c   : > { %v13544_v58 = vcombine.high %v999_v52, %v1015_v53  ;;  %v13543_v5 = vcombine.low %v999_v52, %v1015_v53  ;;  %v13545_v7 = vcombine.low %v1000_v54, %v1016_v55  ;;  %v1240_v52 = vld [vmem:[%s19834_s6 + $0xfb8] sm:$0xff] }
 0x46d   : > { %7974 = vmatmul.mubr.bf16.vlgmr.msra.gmra.mrb[24].mxu1 %v14866_v62  ;;  %8027 = vmatmul.mubr.bf16.vlgmr.msra.gmra.mrb[32].mxu0 %v14866_v62 }
 0x46e   : > { %7983 = vmatprep.mubr.bf16.mxu1 %v15051_v10  ;;  %8036 = vmatprep.mubr.bf16.mxu0 %v15051_v10 }
 0x46f   : > { %8048 = vmatpush1.bf16.msra.mxu1 %v13287_v59  ;;  %8101 = vmatpush1.bf16.msra.mxu0 %v13289_v60  ;;  %v13546_v59 = vcombine.high %v1000_v54, %v1016_v55  ;;  %v1031_v60 = vld [vmem:[%s19834_s6 + $0x930] sm:$0xff] }
 0x470   : > { %8049 = vmatprep.subr.bf16.mxu1 %v13320_v61  ;;  %8102 = vmatprep.subr.bf16.mxu0 %v13322_v63  ;;  %v1047_v61 = vld [vmem:[%s19834_s6 + $0x9b0] sm:$0xff]  ;;  %v1032_v63 = vld [vmem:[%s19834_s6 + $0x938] sm:$0xff] }
 0x471   : > { %v13576_v8 = vcombine.high %v1031_v60, %v1047_v61  ;;  %v13575_v15 = vcombine.low %v1031_v60, %v1047_v61  ;;  %v13577_v16 = vcombine.low %v1032_v63, %v1048_v1  ;;  %v762_v60 = vld [vmem:[%s19834_s6 + $0xc8] sm:$0xff] }
 0x473   : > { %8050 = vmatpush1.bf16.msra.mxu1 %v13319_v9  ;;  %8103 = vmatpush1.bf16.msra.mxu0 %v13321_v11  ;;  %v13578_v9 = vcombine.high %v1032_v63, %v1048_v1  ;;  %v1063_v11 = vld [vmem:[%s19834_s6 + $0xa30] sm:$0xff] }
 0x474   : > { %8051 = vmatprep.subr.bf16.mxu1 %v13352_v12  ;;  %8104 = vmatprep.subr.bf16.mxu0 %v13354_v13  ;;  %v1079_v12 = vld [vmem:[%s19834_s6 + $0xab0] sm:$0xff]  ;;  %v1064_v13 = vld [vmem:[%s19834_s6 + $0xa38] sm:$0xff] }
 0x475   : > { %7984 = vmatmul.mubr.bf16.gmra.mrb[28].mxu1 %v15046_v3  ;;  %8037 = vmatmul.mubr.bf16.gmra.mrb[36].mxu0 %v15046_v3  ;;  %v13608_v17 = vcombine.high %v1063_v11, %v1079_v12  ;;  %v13607_v25 = vcombine.low %v1063_v11, %v1079_v12  ;;  %v13609_v26 = vcombine.low %v1064_v13, %v1080_v14  ;;  %v794_v11 = vld [vmem:[%s19834_s6 + $0x1c8] sm:$0xff] }
 0x476   : > { %8079 = vmatprep.mubr.bf16.mxu1 %v14871_v6  ;;  %8132 = vmatprep.mubr.bf16.mxu0 %v14871_v6 }
 0x477   : > { %8052 = vmatpush1.bf16.msra.mxu1 %v13351_v18  ;;  %8105 = vmatpush1.bf16.msra.mxu0 %v13353_v20  ;;  %v13610_v18 = vcombine.high %v1064_v13, %v1080_v14  ;;  %v1095_v20 = vld [vmem:[%s19834_s6 + $0xb30] sm:$0xff] }
 0x478   : > { %8053 = vmatprep.subr.bf16.mxu1 %v13384_v21  ;;  %8106 = vmatprep.subr.bf16.mxu0 %v13386_v22  ;;  %v1111_v21 = vld [vmem:[%s19834_s6 + $0xbb0] sm:$0xff]  ;;  %v1096_v22 = vld [vmem:[%s19834_s6 + $0xb38] sm:$0xff] }
 0x479   : > { %v13640_v27 = vcombine.high %v1095_v20, %v1111_v21  ;;  %v13639_v33 = vcombine.low %v1095_v20, %v1111_v21  ;;  %v13641_v34 = vcombine.low %v1096_v22, %v1112_v23  ;;  %v826_v20 = vld [vmem:[%s19834_s6 + $0x2c8] sm:$0xff] }
 0x47b   : > { %8054 = vmatpush1.bf16.msra.mxu1 %v13383_v28  ;;  %8107 = vmatpush1.bf16.msra.mxu0 %v13385_v29  ;;  %v13642_v28 = vcombine.high %v1096_v22, %v1112_v23  ;;  %v1127_v29 = vld [vmem:[%s19834_s6 + $0xc30] sm:$0xff] }
 0x47c   : > { %8055 = vmatprep.subr.bf16.mxu1 %v13416_v30  ;;  %8108 = vmatprep.subr.bf16.mxu0 %v13418_v31  ;;  %v1143_v30 = vld [vmem:[%s19834_s6 + $0xcb0] sm:$0xff]  ;;  %v1128_v31 = vld [vmem:[%s19834_s6 + $0xc38] sm:$0xff] }
 0x47d   : > { %v13672_v35 = vcombine.high %v1127_v29, %v1143_v30  ;;  %v13671_v24 = vcombine.low %v1127_v29, %v1143_v30  ;;  %v13673_v40 = vcombine.low %v1128_v31, %v1144_v32  ;;  %v842_v29 = vld [vmem:[%s19834_s6 + $0x348] sm:$0xff] }
 0x47e   : > { %v858_v30 = vld [vmem:[%s19834_s6 + $0x3c8] sm:$0xff] }
 0x47f   : > { %8056 = vmatpush1.bf16.msra.mxu1 %v13415_v2  ;;  %8109 = vmatpush1.bf16.msra.mxu0 %v13417_v36  ;;  %v13674_v2 = vcombine.high %v1128_v31, %v1144_v32  ;;  %v1159_v36 = vld [vmem:[%s19834_s6 + $0xd30] sm:$0xff] }
 0x480   : > { %8057 = vmatprep.subr.bf16.mxu1 %v13448_v37  ;;  %8110 = vmatprep.subr.bf16.mxu0 %v13450_v38  ;;  %v1175_v37 = vld [vmem:[%s19834_s6 + $0xdb0] sm:$0xff]  ;;  %v1160_v38 = vld [vmem:[%s19834_s6 + $0xd38] sm:$0xff] }
 0x481   : > { %v13704_v4 = vcombine.high %v1159_v36, %v1175_v37  ;;  %v13703_v46 = vcombine.low %v1159_v36, %v1175_v37  ;;  %v13705_v47 = vcombine.low %v1160_v38, %v1176_v39  ;;  %v889_v36 = vld [vmem:[%s19834_s6 + $0x4c0] sm:$0xff]  ;;  %v874_v37 = vld [vmem:[%s19834_s6 + $0x448] sm:$0xff] }
 0x483   : > { %8058 = vmatpush1.bf16.msra.mxu1 %v13447_v41  ;;  %8111 = vmatpush1.bf16.msra.mxu0 %v13449_v42  ;;  %v13706_v41 = vcombine.high %v1160_v38, %v1176_v39  ;;  %v1191_v42 = vld [vmem:[%s19834_s6 + $0xe30] sm:$0xff]  ;;  %v890_v38 = vld [vmem:[%s19834_s6 + $0x4c8] sm:$0xff]  ;;  %v17064_v39 = vpop.permute.xlu1 %8582 }
 0x484   : > { %8059 = vmatprep.subr.bf16.mxu1 %v13480_v43  ;;  %8112 = vmatprep.subr.bf16.mxu0 %v13482_v44  ;;  %v1207_v43 = vld [vmem:[%s19834_s6 + $0xeb0] sm:$0xff]  ;;  %v1192_v44 = vld [vmem:[%s19834_s6 + $0xe38] sm:$0xff]  ;;  %19882 = vst [vmem:[#allocation6_spill] sm:$0xff] %v17064_v39 }
 0x485   : > { %v13736_v48 = vcombine.high %v1191_v42, %v1207_v43  ;;  %v13735_v53 = vcombine.low %v1191_v42, %v1207_v43  ;;  %v13737_v54 = vcombine.low %v1192_v44, %v1208_v45  ;;  %v17067_v42 = vld [vmem:[%s17060_s13] sm:$0xff] }
 0x486   : > { %19883 = vst [vmem:[#allocation7_spill] sm:$0xff] %v17067_v42 }
 0x487   : > { %8060 = vmatpush1.bf16.msra.mxu1 %v13479_v19  ;;  %8113 = vmatpush1.bf16.msra.mxu0 %v13481_v49  ;;  %v13738_v19 = vcombine.high %v1192_v44, %v1208_v45  ;;  %v1223_v49 = vld [vmem:[%s19834_s6 + $0xf30] sm:$0xff]  ;;  %v905_v44 = vld [vmem:[%s19834_s6 + $0x540] sm:$0xff] }
 0x488   : > { %8061 = vmatprep.subr.bf16.mxu1 %v13512_v50  ;;  %8114 = vmatprep.subr.bf16.mxu0 %v13514_v51  ;;  %v1239_v50 = vld [vmem:[%s19834_s6 + $0xfb0] sm:$0xff]  ;;  %v1224_v51 = vld [vmem:[%s19834_s6 + $0xf38] sm:$0xff] }
 0x489   : > { %v13768_v55 = vcombine.high %v1223_v49, %v1239_v50  ;;  %v13767_v61 = vcombine.low %v1223_v49, %v1239_v50  ;;  %v13769_v63 = vcombine.low %v1224_v51, %v1240_v52  ;;  %v922_v49 = vld [vmem:[%s19834_s6 + $0x5c8] sm:$0xff] }
 0x48b   : > { %8062 = vmatpush1.bf16.msra.mxu1 %v13511_v56  ;;  %8115 = vmatpush1.bf16.msra.mxu0 %v13513_v57  ;;  %v13770_v56 = vcombine.high %v1224_v51, %v1240_v52  ;;  %v745_v57 = vld [vmem:[%s19834_s6 + $0x40] sm:$0xff]  ;;  %v13421_v51 = vcombine.low %v874_v37, %v890_v38  ;;  %v17093_v52 = vpop.permute.xlu0 %8578 }
 0x48c   : > { %8063 = vmatprep.subr.bf16.mxu1 %v13544_v58  ;;  %8116 = vmatprep.subr.bf16.mxu0 %v13546_v59  ;;  %v761_v58 = vld [vmem:[%s19834_s6 + $0xc0] sm:$0xff]  ;;  %v746_v59 = vld [vmem:[%s19834_s6 + $0x48] sm:$0xff]  ;;  %19888 = vst [vmem:[#allocation12_spill] sm:$0xff] %v17093_v52 }
 0x48d   : > { %v13292_v1 = vcombine.high %v745_v57, %v761_v58  ;;  %v13291_v12 = vcombine.low %v745_v57, %v761_v58  ;;  %v13293_v13 = vcombine.low %v746_v59, %v762_v60  ;;  %v17102_v57 = vld [vmem:[%s19834_s6 + $0x640] sm:$0xff] }
 0x48f   : > { %8064 = vmatpush1.bf16.msra.mxu1 %v13543_v5  ;;  %8117 = vmatpush1.bf16.msra.mxu0 %v13545_v7  ;;  %v13294_v5 = vcombine.high %v746_v59, %v762_v60  ;;  %v777_v7 = vld [vmem:[%s19834_s6 + $0x140] sm:$0xff] }
 0x490   : > { %8065 = vmatprep.subr.bf16.mxu1 %v13576_v8  ;;  %8118 = vmatprep.subr.bf16.mxu0 %v13578_v9  ;;  %v793_v8 = vld [vmem:[%s19834_s6 + $0x1c0] sm:$0xff]  ;;  %v778_v9 = vld [vmem:[%s19834_s6 + $0x148] sm:$0xff] }
 0x491   : > { %v13324_v14 = vcombine.high %v777_v7, %v793_v8  ;;  %v13323_v21 = vcombine.low %v777_v7, %v793_v8  ;;  %v13325_v22 = vcombine.low %v778_v9, %v794_v11  ;;  %v17127_v7 = vld [vmem:[%s19834_s6 + $0x6c8] sm:$0xff] }
 0x493   : > { %8066 = vmatpush1.bf16.msra.mxu1 %v13575_v15  ;;  %8119 = vmatpush1.bf16.msra.mxu0 %v13577_v16  ;;  %v13326_v15 = vcombine.high %v778_v9, %v794_v11  ;;  %v809_v16 = vld [vmem:[%s19834_s6 + $0x240] sm:$0xff] }
 0x494   : > { %8067 = vmatprep.subr.bf16.mxu1 %v13608_v17  ;;  %8120 = vmatprep.subr.bf16.mxu0 %v13610_v18  ;;  %v825_v17 = vld [vmem:[%s19834_s6 + $0x2c0] sm:$0xff]  ;;  %v810_v18 = vld [vmem:[%s19834_s6 + $0x248] sm:$0xff] }
 0x495   : > { %v13356_v23 = vcombine.high %v809_v16, %v825_v17  ;;  %v13355_v31 = vcombine.low %v809_v16, %v825_v17  ;;  %v13357_v32 = vcombine.low %v810_v18, %v826_v20 }
 0x497   : > { %8068 = vmatpush1.bf16.msra.mxu1 %v13607_v25  ;;  %8121 = vmatpush1.bf16.msra.mxu0 %v13609_v26  ;;  %v13358_v25 = vcombine.high %v810_v18, %v826_v20  ;;  %v841_v26 = vld [vmem:[%s19834_s6 + $0x340] sm:$0xff] }
 0x498   : > { %8069 = vmatprep.subr.bf16.mxu1 %v13640_v27  ;;  %8122 = vmatprep.subr.bf16.mxu0 %v13642_v28  ;;  %v8597_v27 = vlaneseq  ;;  %v857_v28 = vld [vmem:[%s19834_s6 + $0x3c0] sm:$0xff] }
 0x49b   : > { %8070 = vmatpush1.bf16.msra.mxu1 %v13639_v33  ;;  %8123 = vmatpush1.bf16.msra.mxu0 %v13641_v34  ;;  %v13388_v33 = vcombine.high %v841_v26, %v857_v28  ;;  %v13390_v34 = vcombine.high %v842_v29, %v858_v30 }
 0x49c   : > { %8071 = vmatprep.subr.bf16.mxu1 %v13672_v35  ;;  %8124 = vmatprep.subr.bf16.mxu0 %v13674_v2  ;;  %v873_v35 = vld [vmem:[%s19834_s6 + $0x440] sm:$0xff]  ;;  %v17044_v2 = vshrl.u32 %v8597_v27, 7 }
 0x49d   : > { %v13419_v50 = vcombine.low %v873_v35, %v889_v36  ;;  %v17166_v27 = vld [vmem:[%s19834_s6 + $0x7c0] sm:$0xff] }
 0x49e   : > { %19881 = vst [vmem:[#allocation5_spill] sm:$0xff] %v17044_v2  ;;  %v17070_v43 = vsub.s32 0, %v17044_v2  ;;  %v17076_v45 = vsub.s32 2, %v17044_v2 }
 0x49f   : > { %8072 = vmatpush1.bf16.msra.mxu1 %v13671_v24  ;;  %8125 = vmatpush1.bf16.msra.mxu0 %v13673_v40  ;;  %v13387_v24 = vcombine.low %v841_v26, %v857_v28  ;;  %v13389_v40 = vcombine.low %v842_v29, %v858_v30  ;;  %v17171_v28 = vld [vmem:[%s19834_s6 + $0x748] sm:$0xff] }
 0x4a0   : > { %8073 = vmatprep.subr.bf16.mxu1 %v13704_v4  ;;  %8126 = vmatprep.subr.bf16.mxu0 %v13706_v41  ;;  %v13420_v4 = vcombine.high %v873_v35, %v889_v36  ;;  %v13422_v41 = vcombine.high %v874_v37, %v890_v38  ;;  %19884 = vst [vmem:[#allocation8_spill] sm:$0xff] %v17070_v43  ;;  %19885 = vst [vmem:[#allocation9_spill] sm:$0xff] %v17076_v45  ;;  %v17176_v29 = vld [vmem:[%s19834_s6 + $0x7c8] sm:$0xff]  ;;  %v17200_v37 = vld [vmem:[%s19834_s6 + $0x840] sm:$0xff] }
 0x4a1   : > { %v8608_v60 = vrot.slane %v17067_v42, %v17076_v45  ;;  %v17205_v38 = vld [vmem:[%s19834_s6 + $0x8c0] sm:$0xff] }
 0x4a3   : > { %8074 = vmatpush1.bf16.msra.mxu1 %v13703_v46  ;;  %8127 = vmatpush1.bf16.msra.mxu0 %v13705_v47  ;;  %v17079_v46 = vsub.s32 1, %v17044_v2  ;;  %v17082_v47 = vsub.s32 3, %v17044_v2  ;;  %v17179_v30 = vmul.f32 %v8608_v60, %v17064_v39 }
 0x4a4   : > { %8075 = vmatprep.subr.bf16.mxu1 %v13736_v48  ;;  %8128 = vmatprep.subr.bf16.mxu0 %v13738_v19  ;;  %v921_v48 = vld [vmem:[%s19834_s6 + $0x5c0] sm:$0xff]  ;;  %v906_v19 = vld [vmem:[%s19834_s6 + $0x548] sm:$0xff] }
 0x4a5   : > { %19886 = vst [vmem:[#allocation10_spill] sm:$0xff] %v17079_v46  ;;  %19887 = vst [vmem:[#allocation11_spill] sm:$0xff] %v17082_v47  ;;  %v13451_v11 = vcombine.low %v905_v44, %v921_v48 }
 0x4a7   : > { %8076 = vmatpush1.bf16.msra.mxu1 %v13735_v53  ;;  %8129 = vmatpush1.bf16.msra.mxu0 %v13737_v54  ;;  %v17095_v53 = vpop.permute.xlu1 %8586  ;;  %v8600_v54 = vrot.slane %v17067_v42, %v17070_v43  ;;  %v17306_v43 = vld [vmem:[%s19834_s6 + $0xb40] sm:$0xff] }
 0x4a8   : > { %8077 = vmatprep.subr.bf16.mxu1 %v13768_v55  ;;  %8130 = vmatprep.subr.bf16.mxu0 %v13770_v56  ;;  %19889 = vst [vmem:[#allocation13_spill] sm:$0xff] %v17095_v53  ;;  %v13452_v55 = vcombine.high %v905_v44, %v921_v48  ;;  %v13454_v56 = vcombine.high %v906_v19, %v922_v49 }
 0x4a9   : > { %v17161_v26 = vmul.f32 %v8600_v54, %v17064_v39  ;;  %v17192_v35 = vmul.f32 %v8600_v54, %v17095_v53  ;;  %v17195_v36 = vmul.f32 %v8608_v60, %v17095_v53  ;;  %v13518_v48 = vcombine.high %v17171_v28, %v17176_v29 }
 0x4ab   : > { %8078 = vmatpush1.bf16.msra.mxu1 %v13767_v61  ;;  %8131 = vmatpush1.bf16.msra.mxu0 %v13769_v63  ;;  %v8604_v61 = vrot.slane %v17067_v42, %v17079_v46  ;;  %v8612_v63 = vrot.slane %v17067_v42, %v17082_v47  ;;  %v13548_v47 = vcombine.high %v17200_v37, %v17205_v38 }
 0x4ac   : > { %8153 = vmatprep.subr.bf16.mxu1 %v13292_v1  ;;  %8206 = vmatprep.subr.bf16.mxu0 %v13294_v5  ;;  %v17117_v1 = vld [vmem:[%s19834_s6 + $0x6c0] sm:$0xff]  ;;  %v17122_v5 = vld [vmem:[%s19834_s6 + $0x648] sm:$0xff] }
 0x4ad   : > { %v13484_v18 = vcombine.high %v17102_v57, %v17117_v1  ;;  %v13486_v20 = vcombine.high %v17122_v5, %v17127_v7 }
 0x4ae   : > { %8080 = vmatmul.mubr.bf16.vlgmr.msra.gmra.mrb[32].mxu1 %v14866_v62  ;;  %8133 = vmatmul.mubr.bf16.vlgmr.msra.gmra.mrb[40].mxu0 %v14866_v62 }
 0x4af   : > { %8089 = vmatprep.mubr.bf16.mxu1 %v15051_v10  ;;  %8142 = vmatprep.mubr.bf16.mxu0 %v15051_v10 }
 0x4b0   : > { %8154 = vmatpush1.bf16.msra.mxu1 %v13291_v12  ;;  %8207 = vmatpush1.bf16.msra.mxu0 %v13293_v13  ;;  %v13453_v12 = vcombine.low %v906_v19, %v922_v49  ;;  %v17226_v19 = vld [vmem:[%s19834_s6 + $0x8c8] sm:$0xff]  ;;  %v17231_v49 = vld [vmem:[%s19834_s6 + $0x940] sm:$0xff] }
 0x4b1   : > { %8155 = vmatprep.subr.bf16.mxu1 %v13324_v14  ;;  %8208 = vmatprep.subr.bf16.mxu0 %v13326_v15  ;;  %v17138_v15 = vmul.f32 %v8600_v54, %v17093_v52 }
 0x4b4   : > { %8156 = vmatpush1.bf16.msra.mxu1 %v13323_v21  ;;  %8209 = vmatpush1.bf16.msra.mxu0 %v13325_v22  ;;  %v17151_v21 = vld [vmem:[%s19834_s6 + $0x740] sm:$0xff]  ;;  %v17154_v22 = vmul.f32 %v8608_v60, %v17093_v52 }
 0x4b5   : > { %8157 = vmatprep.subr.bf16.mxu1 %v13356_v23  ;;  %8210 = vmatprep.subr.bf16.mxu0 %v13358_v25  ;;  %v8758_v23 = vmul.f32 %v8604_v61, %v17093_v52  ;;  %v17158_v25 = vmul.f32 %v8612_v63, %v17093_v52  ;;  %v13516_v44 = vcombine.high %v17151_v21, %v17166_v27 }
 0x4b6   : > { %8090 = vmatmul.mubr.bf16.gmra.mrb[36].mxu1 %v15046_v3  ;;  %8143 = vmatmul.mubr.bf16.gmra.mrb[44].mxu0 %v15046_v3 }
 0x4b7   : > { %8185 = vmatprep.mubr.bf16.mxu1 %v14871_v6  ;;  %8238 = vmatprep.mubr.bf16.mxu0 %v14871_v6 }
 0x4b8   : > { %8158 = vmatpush1.bf16.msra.mxu1 %v13355_v31  ;;  %8211 = vmatpush1.bf16.msra.mxu0 %v13357_v32  ;;  %v17182_v31 = vmul.f32 %v8604_v61, %v17064_v39  ;;  %v17185_v32 = vmul.f32 %v8612_v63, %v17064_v39  ;;  %v17331_v39 = vld [vmem:[%s19834_s6 + $0xc40] sm:$0xff] }
 0x4b9   : > { %8159 = vmatprep.subr.bf16.mxu1 %v13388_v33  ;;  %8212 = vmatprep.subr.bf16.mxu0 %v13390_v34  ;;  %v13483_v33 = vcombine.low %v17102_v57, %v17117_v1  ;;  %v13485_v34 = vcombine.low %v17122_v5, %v17127_v7  ;;  %v13515_v57 = vcombine.low %v17151_v21, %v17166_v27  ;;  %v17255_v7 = vld [vmem:[%s19834_s6 + $0x948] sm:$0xff] }
 0x4ba   : > { %v13517_v1 = vcombine.low %v17171_v28, %v17176_v29  ;;  %v13547_v28 = vcombine.low %v17200_v37, %v17205_v38  ;;  %v17283_v29 = vld [vmem:[%s19834_s6 + $0xac0] sm:$0xff] }
 0x4bc   : > { %8160 = vmatpush1.bf16.msra.mxu1 %v13387_v24  ;;  %8213 = vmatpush1.bf16.msra.mxu0 %v13389_v40  ;;  %v17210_v24 = vld [vmem:[%s19834_s6 + $0x848] sm:$0xff]  ;;  %v17212_v40 = vpop.permute.xlu0 %8590 }
 0x4bd   : > { %8161 = vmatprep.subr.bf16.mxu1 %v13420_v4  ;;  %8214 = vmatprep.subr.bf16.mxu0 %v13422_v41  ;;  %19890 = vst [vmem:[#allocation14_spill] sm:$0xff] %v17212_v40  ;;  %v17214_v4 = vpop.permute.xlu1 %9014  ;;  %v17217_v41 = vmul.f32 %v8604_v61, %v17095_v53  ;;  %v17250_v5 = vmul.f32 %v8600_v54, %v17212_v40 }
 0x4be   : > { %v17104_v58 = vpop.f32.mrb[8].mxu1  ;;  %v17106_v59 = vpop.f32.mrb[16].mxu0  ;;  %v17270_v54 = vmul.f32 %v8608_v60, %v17212_v40  ;;  %v17273_v21 = vmul.f32 %v8604_v61, %v17212_v40  ;;  %v17276_v27 = vmul.f32 %v8612_v63, %v17212_v40  ;;  %v17293_v60 = vld [vmem:[%s19834_s6 + $0xac8] sm:$0xff]  ;;  %v13549_v46 = vcombine.low %v17210_v24, %v17226_v19 }
 0x4bf   : > { %v17129_v8 = vpop.f32.mrb[9].mxu1  ;;  %v17131_v9 = vpop.f32.mrb[17].mxu0  ;;  %v13550_v45 = vcombine.high %v17210_v24, %v17226_v19  ;;  %v13614_v52 = vcombine.high %v17288_v0, %v17293_v60 }
 0x4c0   : > { %8162 = vmatpush1.bf16.msra.mxu1 %v13419_v50  ;;  %8215 = vmatpush1.bf16.msra.mxu0 %v13421_v51  ;;  %v17133_v13 = vpop.f32.mrb[10].mxu1  ;;  %v17135_v14 = vpop.f32.mrb[18].mxu0  ;;  %v17236_v50 = vld [vmem:[%s19834_s6 + $0x9c0] sm:$0xff]  ;;  %v8886_v37 = vadd.f32 %v8758_v23, %v17129_v8 }
 0x4c1   : > { %8163 = vmatprep.subr.bf16.mxu1 %v13452_v55  ;;  %8216 = vmatprep.subr.bf16.mxu0 %v13454_v56  ;;  %v17140_v16 = vpop.f32.mrb[11].mxu1  ;;  %v17142_v17 = vpop.f32.mrb[19].mxu0  ;;  %v17243_v56 = vmul.f32 %v8612_v63, %v17095_v53  ;;  %v13579_v19 = vcombine.low %v17231_v49, %v17236_v50  ;;  %v13580_v40 = vcombine.high %v17231_v49, %v17236_v50  ;;  %v17326_v53 = vld [vmem:[%s19834_s6 + $0xbc8] sm:$0xff]  ;;  %v17336_v8 = vld [vmem:[%s19834_s6 + $0xcc0] sm:$0xff] }
 0x4c2   : > { %v8918_v3 = vadd.f32 %v17182_v31, %v17140_v16  ;;  %v17374_v2 = vpop.permute.xlu1 %9022  ;;  %v8917_v50 = vadd.f32 %v17161_v26, %v17133_v13  ;;  %v8920_v6 = vadd.f32 %v17185_v32, %v17142_v17  ;;  %v17383_v42 = vpop.permute.xlu0 %9018  ;;  %v14392_v16 = vld [vmem:[%s19831_s3 + $0x8] sm:$0xff]  }
 0x4c3   : > { %9367 = vrot.lane.b32.xlu1 %v14392_v16, %s14426_s20 }
 0x4c4   : > { %8164 = vmatpush1.bf16.msra.mxu1 %v13451_v11  ;;  %8217 = vmatpush1.bf16.msra.mxu0 %v13453_v12  ;;  %v17260_v11 = vld [vmem:[%s19834_s6 + $0x9c8] sm:$0xff]  ;;  %v17265_v12 = vld [vmem:[%s19834_s6 + $0xa40] sm:$0xff]  ;;  %v9064_v32 = vadd.f32 %v17383_v42, %v8920_v6 }
 0x4c5   : > { %8165 = vmatprep.subr.bf16.mxu1 %v13484_v18  ;;  %8218 = vmatprep.subr.bf16.mxu0 %v13486_v20  ;;  %v13581_v23 = vcombine.low %v17255_v7, %v17260_v11  ;;  %v13612_v49 = vcombine.high %v17265_v12, %v17283_v29 }
 0x4c6   : > { %v17238_v51 = vpop.f32.mrb[12].mxu1  ;;  %v17240_v55 = vpop.f32.mrb[20].mxu0 }
 0x4c7   : > { %v7775_v18 = vpop.f32.mrb[13].mxu1  ;;  %v17267_v20 = vpop.f32.mrb[21].mxu0  ;;  %v8949_v13 = vadd.f32 %v17192_v35, %v17238_v51  ;;  %v8951_v17 = vadd.f32 %v17195_v36, %v17240_v55  ;;  %v9061_v36 = vadd.f32 %v17383_v42, %v8917_v50 }
 0x4c8   : > { %8166 = vmatpush1.bf16.msra.mxu1 %v13483_v33  ;;  %8219 = vmatpush1.bf16.msra.mxu0 %v13485_v34  ;;  %v7777_v61 = vpop.f32.mrb[14].mxu1  ;;  %v17295_v63 = vpop.f32.mrb[22].mxu0  ;;  %v17311_v33 = vld [vmem:[%s19834_s6 + $0xbc0] sm:$0xff]  ;;  %v17316_v34 = vld [vmem:[%s19834_s6 + $0xb48] sm:$0xff] }
 0x4c9   : > { %8167 = vmatprep.subr.bf16.mxu1 %v13516_v44  ;;  %8220 = vmatprep.subr.bf16.mxu0 %v13518_v48  ;;  %v7779_v38 = vpop.f32.mrb[15].mxu1  ;;  %v7832_v24 = vpop.f32.mrb[23].mxu0  ;;  %v13582_v44 = vcombine.high %v17255_v7, %v17260_v11  ;;  %v17357_v7 = vld [vmem:[%s19834_s6 + $0xc48] sm:$0xff]  ;;  %v8888_v48 = vadd.f32 %v17158_v25, %v17131_v9  ;;  %v8952_v25 = vadd.f32 %v17243_v56, %v17267_v20 }
 0x4ca   : > { %v17362_v11 = vld [vmem:[%s19834_s6 + $0xcc8] sm:$0xff]  ;;  %v8984_v31 = vadd.f32 %v17276_v27, %v7832_v24  ;;  %v17414_v51 = vpop.permute.xlu1 %9026  ;;  %v8983_v56 = vadd.f32 %v17270_v54, %v17295_v63  ;;  %v9095_v63 = vadd.f32 %v17374_v2, %v8951_v17 }
 0x4cb   : > { %v13678_v9 = vcombine.high %v17357_v7, %v17362_v11  ;;  %v9096_v55 = vadd.f32 %v17374_v2, %v8952_v25 }
 0x4cc   : > { %8168 = vmatpush1.bf16.msra.mxu1 %v13515_v57  ;;  %8221 = vmatpush1.bf16.msra.mxu0 %v13517_v1  ;;  %v9030_v57 = vadd.f32 %v17214_v4, %v8886_v37  ;;  %v8885_v1 = vadd.f32 %v17138_v15, %v17104_v58  ;;  %v8919_v58 = vadd.f32 %v17179_v30, %v17135_v14  ;;  %v9223_v17 = vmax.f32 %v9095_v63, 0.0 }
 0x4cd   : > { %8169 = vmatprep.subr.bf16.mxu1 %v13548_v47  ;;  %8222 = vmatprep.subr.bf16.mxu0 %v13550_v45  ;;  %v14391_v45 = vld [vmem:[%s19831_s3] sm:$0xff]   ;;  %v8887_v47 = vadd.f32 %v17154_v22, %v17106_v59  ;;  %v8950_v15 = vadd.f32 %v17217_v41, %v7775_v18  ;;  %v8981_v59 = vadd.f32 %v17250_v5, %v7777_v61  ;;  %v9192_v5 = vmax.f32 %v9064_v32, 0.0 }
 0x4ce   : > { %9365 = vrot.lane.b32.xlu0 %v14391_v45, %s14426_s20  ;;  %v8982_v14 = vadd.f32 %v17273_v21, %v7779_v38  ;;  %v9062_v22 = vadd.f32 %v17383_v42, %v8918_v3  ;;  %v9158_v26 = vmax.f32 %v9030_v57, 0.0  ;;  %v9032_v30 = vadd.f32 %v17214_v4, %v8888_v48  ;;  %v1209_v32 = vld [vmem:[%s19834_s6 + $0xec0] sm:$0xff]  ;;  %s13975_s20 = sshll.u32 %s19982_s30, 4 }
 0x4cf   : > { %v9029_v35 = vadd.f32 %v17214_v4, %v8885_v1  ;;  %v9093_v41 = vadd.f32 %v17374_v2, %v8949_v13  ;;  %v9031_v3 = vadd.f32 %v17214_v4, %v8887_v47  ;;  %v9189_v21 = vmax.f32 %v9061_v36, 0.0  ;;  %v1178_v13 = vld [vmem:[%s19834_s6 + $0xdc8] sm:$0xff]  ;;  %v1225_v36 = vld [vmem:[%s19834_s6 + $0xf40] sm:$0xff]  ;;  %s468_s24 = scalar_lea.vmem %s19839_s11, %s13975_s20  ;;  %s461_s15 = scalar_lea.vmem %s19830_s2, %s13975_s20 }
 0x4d0   : > { %8170 = vmatpush1.bf16.msra.mxu1 %v13547_v28  ;;  %8223 = vmatpush1.bf16.msra.mxu0 %v13549_v46  ;;  %v9094_v46 = vadd.f32 %v17374_v2, %v8950_v15  ;;  %v9160_v6 = vmax.f32 %v9032_v30, 0.0  ;;  %v9063_v27 = vadd.f32 %v17383_v42, %v8919_v58  ;;  %v9126_v61 = vadd.f32 %v17414_v51, %v8982_v14  ;;  %v1162_v58 = vld [vmem:[%s19834_s6 + $0xd48] sm:$0xff] }
 0x4d1   : > { %8171 = vmatprep.subr.bf16.mxu1 %v13580_v40  ;;  %8224 = vmatprep.subr.bf16.mxu0 %v13582_v44  ;;  %v9190_v40 = vmax.f32 %v9062_v22, 0.0  ;;  %v9157_v20 = vmax.f32 %v9029_v35, 0.0  ;;  %v9128_v37 = vadd.f32 %v17414_v51, %v8984_v31  ;;  %v9125_v54 = vadd.f32 %v17414_v51, %v8981_v59 }
 0x4d2   : > { %v17423_v28 = vpack.c.bf16 %v9192_v5, %v9160_v6  ;;  %v9159_v24 = vmax.f32 %v9031_v3, 0.0  ;;  %v19894_v44 = vcombine.low %v17265_v12, %v17283_v29  ;;  %v19895_v48 = vcombine.low %v17288_v0, %v17293_v60  ;;  %v1161_v12 = vld [vmem:[%s19834_s6 + $0xd40] sm:$0xff]  ;;  %v747_v5 = vld [vmem:[%s19834_s6 + $0x50] sm:$0xff] }
 0x4d3   : > { %v17420_v18 = vpack.c.bf16 %v9190_v40, %v9158_v26  ;;  %v17429_v38 = vpack.c.bf16 %v9189_v21, %v9157_v20  ;;  %v9256_v50 = vmax.f32 %v9128_v37, 0.0  ;;  %v9221_v57 = vmax.f32 %v9093_v41, 0.0  ;;  %v1177_v60 = vld [vmem:[%s19834_s6 + $0xdc0] sm:$0xff]  ;;  %v1242_v40 = vld [vmem:[%s19834_s6 + $0xfc8] sm:$0xff]  ;;  %v763_v20 = vld [vmem:[%s19834_s6 + $0xd0] sm:$0xff] }
 0x4d4   : > { %8172 = vmatpush1.bf16.msra.mxu1 %v13579_v19  ;;  %8225 = vmatpush1.bf16.msra.mxu0 %v13581_v23  ;;  %19892 = vst [vmem:[#allocation16_spill] sm:$0xff] %v17423_v28  ;;  %v9222_v19 = vmax.f32 %v9094_v46, 0.0  ;;  %v9224_v23 = vmax.f32 %v9096_v55, 0.0  ;;  %v19896_v1 = vcombine.high %v17306_v43, %v17311_v33  ;;  %v19897_v45 = vcombine.high %v17316_v34, %v17326_v53  ;;  %v1241_v41 = vld [vmem:[%s19834_s6 + $0xfc0] sm:$0xff]  ;;  %v1226_v46 = vld [vmem:[%s19834_s6 + $0xf48] sm:$0xff]  ;;  %v748_v21 = vld [vmem:[%s19834_s6 + $0x58] sm:$0xff] }
 0x4d5   : > { %8173 = vmatprep.subr.bf16.mxu1 %v13612_v49  ;;  %8226 = vmatprep.subr.bf16.mxu0 %v13614_v52  ;;  %19891 = vst [vmem:[#allocation15_spill] sm:$0xff] %v17420_v18  ;;  %19893 = vst [vmem:[#allocation17_spill] sm:$0xff] %v17429_v38  ;;  %v9191_v52 = vmax.f32 %v9063_v27, 0.0  ;;  %v9254_v49 = vmax.f32 %v9126_v61, 0.0  ;;  %v9253_v47 = vmax.f32 %v9125_v54, 0.0  ;;  %v9127_v0 = vadd.f32 %v17414_v51, %v8983_v56  ;;  %v764_v27 = vld [vmem:[%s19834_s6 + $0xd8] sm:$0xff] }
 0x4d6   : > { %v17460_v16 = vpack.c.bf16 %v9256_v50, %v9224_v23  ;;  %v19902_v14 = vcombine.low %v17306_v43, %v17311_v33  ;;  %v19903_v22 = vcombine.low %v17316_v34, %v17326_v53  ;;  %v13675_v26 = vcombine.low %v17331_v39, %v17336_v8  ;;  %v1193_v53 = vld [vmem:[%s19834_s6 + $0xe40] sm:$0xff]  ;;  %v796_v23 = vld [vmem:[%s19834_s6 + $0x1d8] sm:$0xff] }
 0x4d7   : > { %v17446_v29 = vpack.c.bf16 %v9191_v52, %v9159_v24  ;;  %v17458_v15 = vpack.c.bf16 %v9254_v49, %v9222_v19  ;;  %v17462_v25 = vpack.c.bf16 %v9253_v47, %v9221_v57  ;;  %v9255_v59 = vmax.f32 %v9127_v0, 0.0  ;;  %v779_v24 = vld [vmem:[%s19834_s6 + $0x150] sm:$0xff]  ;;  %v780_v19 = vld [vmem:[%s19834_s6 + $0x158] sm:$0xff] }
 0x4d8   : > { %8174 = vmatpush1.bf16.msra.mxu1 %v19894_v44  ;;  %8227 = vmatpush1.bf16.msra.mxu0 %v19895_v48  ;;  %19900 = vst [vmem:[#allocation20_spill] sm:$0xff] %v17460_v16  ;;  %v13677_v30 = vcombine.low %v17357_v7, %v17362_v11  ;;  %v19904_v31 = vcombine.high %v17331_v39, %v17336_v8  ;;  %v1194_v39 = vld [vmem:[%s19834_s6 + $0xe48] sm:$0xff]  ;;  %v795_v52 = vld [vmem:[%s19834_s6 + $0x1d0] sm:$0xff] }
 0x4d9   : > { %8175 = vmatprep.subr.bf16.mxu1 %v19896_v1  ;;  %8228 = vmatprep.subr.bf16.mxu0 %v19897_v45  ;;  %19898 = vst [vmem:[#allocation18_spill] sm:$0xff] %v17446_v29  ;;  %19899 = vst [vmem:[#allocation19_spill] sm:$0xff] %v17458_v15  ;;  %v13708_v43 = vcombine.high %v1161_v12, %v1177_v60  ;;  %v13710_v33 = vcombine.high %v1162_v58, %v1178_v13  ;;  %v1210_v8 = vld [vmem:[%s19834_s6 + $0xec8] sm:$0xff]  ;;  %v811_v57 = vld [vmem:[%s19834_s6 + $0x250] sm:$0xff] }
 0x4da   : > { %19901 = vst [vmem:[#allocation21_spill] sm:$0xff] %v17462_v25  ;;  %v17483_v34 = vpack.c.bf16 %v9255_v59, %v9223_v17  ;;  %v13707_v7 = vcombine.low %v1161_v12, %v1177_v60  ;;  %v13709_v11 = vcombine.low %v1162_v58, %v1178_v13  ;;  %v13742_v35 = vcombine.high %v1194_v39, %v1210_v8  ;;  %v827_v1 = vld [vmem:[%s19834_s6 + $0x2d0] sm:$0xff]  ;;  %v812_v45 = vld [vmem:[%s19834_s6 + $0x258] sm:$0xff] }
 0x4db   : > { %v13739_v3 = vcombine.low %v1193_v53, %v1209_v32  ;;  %v13741_v55 = vcombine.low %v1194_v39, %v1210_v8  ;;  %v13772_v56 = vcombine.high %v1225_v36, %v1241_v41  ;;  %v13774_v6 = vcombine.high %v1226_v46, %v1242_v40  ;;  %v828_v12 = vld [vmem:[%s19834_s6 + $0x2d8] sm:$0xff]  ;;  %v843_v13 = vld [vmem:[%s19834_s6 + $0x350] sm:$0xff]  ;;  %v19909_v39 = vld [vmem:[#allocation4_spill] sm:$0xff] }
 0x4dc   : > { %8176 = vmatpush1.bf16.msra.mxu1 %v19902_v14  ;;  %8229 = vmatpush1.bf16.msra.mxu0 %v19903_v22  ;;  %19905 = vst [vmem:[#allocation22_spill] sm:$0xff] %v17483_v34  ;;  %v13771_v61 = vcombine.low %v1225_v36, %v1241_v41  ;;  %v13773_v37 = vcombine.low %v1226_v46, %v1242_v40  ;;  %v859_v17 = vld [vmem:[%s19834_s6 + $0x3d0] sm:$0xff]  ;;  %v844_v59 = vld [vmem:[%s19834_s6 + $0x358] sm:$0xff] }
 0x4dd   : > { %8177 = vmatprep.subr.bf16.mxu1 %v19904_v31  ;;  %8230 = vmatprep.subr.bf16.mxu0 %v13678_v9  ;;  %v13740_v9 = vcombine.high %v1193_v53, %v1209_v32  ;;  %v13296_v54 = vcombine.high %v747_v5, %v763_v20  ;;  %v13298_v63 = vcombine.high %v748_v21, %v764_v27  ;;  %v860_v14 = vld [vmem:[%s19834_s6 + $0x3d8] sm:$0xff]  ;;  %v19906_v22 = vld [vmem:[#allocation5_spill] sm:$0xff] }
 0x4de   : > { %v13295_v44 = vcombine.low %v747_v5, %v763_v20  ;;  %v13297_v48 = vcombine.low %v748_v21, %v764_v27  ;;  %v13328_v49 = vcombine.high %v779_v24, %v795_v52  ;;  %v13330_v50 = vcombine.high %v780_v19, %v796_v23  ;;  %v875_v32 = vld [vmem:[%s19834_s6 + $0x450] sm:$0xff]  ;;  %v908_v21 = vld [vmem:[%s19834_s6 + $0x558] sm:$0xff] }
 0x4df   : > { %v13327_v47 = vcombine.low %v779_v24, %v795_v52  ;;  %v13329_v0 = vcombine.low %v780_v19, %v796_v23  ;;  %v13360_v60 = vcombine.high %v811_v57, %v827_v1  ;;  %v13362_v58 = vcombine.high %v812_v45, %v828_v12  ;;  %v891_v8 = vld [vmem:[%s19834_s6 + $0x4d0] sm:$0xff]  ;;  %v924_v27 = vld [vmem:[%s19834_s6 + $0x5d8] sm:$0xff] }
 0x4e0   : > { %8178 = vmatpush1.bf16.msra.mxu1 %v13675_v26  ;;  %8231 = vmatpush1.bf16.msra.mxu0 %v13677_v30  ;;  %v17559_v26 = vsub.s32 4, %v19906_v22  ;;  %v17562_v30 = vsub.s32 6, %v19906_v22  ;;  %v13359_v31 = vcombine.low %v811_v57, %v827_v1  ;;  %v13394_v53 = vcombine.high %v844_v59, %v860_v14  ;;  %v907_v5 = vld [vmem:[%s19834_s6 + $0x550] sm:$0xff] }
 0x4e1   : > { %8179 = vmatprep.subr.bf16.mxu1 %v13708_v43  ;;  %8232 = vmatprep.subr.bf16.mxu0 %v13710_v33  ;;  %v13361_v43 = vcombine.low %v812_v45, %v828_v12  ;;  %v13392_v33 = vcombine.high %v843_v13, %v859_v17  ;;  %v17589_v46 = vsub.s32 5, %v19906_v22  ;;  %v17592_v40 = vsub.s32 7, %v19906_v22  ;;  %v923_v20 = vld [vmem:[%s19834_s6 + $0x5d0] sm:$0xff] }
 0x4e2   : > { %19907 = vst [vmem:[#allocation23_spill] sm:$0xff] %v17559_v26  ;;  %19908 = vst [vmem:[#allocation24_spill] sm:$0xff] %v17562_v30  ;;  %v13423_v52 = vcombine.low %v875_v32, %v891_v8  ;;  %v13456_v23 = vcombine.high %v907_v5, %v923_v20  ;;  %v17628_v57 = vld [vmem:[%s19834_s6 + $0x6d0] sm:$0xff] }
 0x4e3   : > { %19912 = vst [vmem:[#allocation4_spill] sm:$0xff] %v17589_v46 }
 0x4e4   : > { %8180 = vmatpush1.bf16.msra.mxu1 %v13707_v7  ;;  %8233 = vmatpush1.bf16.msra.mxu0 %v13709_v11  ;;  %v876_v7 = vld [vmem:[%s19834_s6 + $0x458] sm:$0xff] }
 0x4e5   : > { %8181 = vmatprep.subr.bf16.mxu1 %v13740_v9  ;;  %8234 = vmatprep.subr.bf16.mxu0 %v13742_v35  ;;  %v892_v11 = vld [vmem:[%s19834_s6 + $0x4d8] sm:$0xff]  ;;  %v19910_v9 = vld [vmem:[#allocation3_spill] sm:$0xff] }
 0x4e6   : > { %v19911_v35 = vld [vmem:[#allocation7_spill] sm:$0xff]  ;;  %19913 = vst [vmem:[#allocation3_spill] sm:$0xff] %v17592_v40  ;;  %v13425_v19 = vcombine.low %v876_v7, %v892_v11 }
 0x4e7   : > { %v17582_v36 = vrot.slane %v19911_v35, %v17559_v26  ;;  %v17586_v41 = vrot.slane %v19911_v35, %v17562_v30  ;;  %v17616_v24 = vrot.slane %v19911_v35, %v17592_v40 }
 0x4e8   : > { %8182 = vmatpush1.bf16.msra.mxu1 %v13739_v3  ;;  %8235 = vmatpush1.bf16.msra.mxu0 %v13741_v55  ;;  %v13391_v3 = vcombine.low %v843_v13, %v859_v17  ;;  %v13393_v55 = vcombine.low %v844_v59, %v860_v14 }
 0x4e9   : > { %8183 = vmatprep.subr.bf16.mxu1 %v13772_v56  ;;  %8236 = vmatprep.subr.bf16.mxu0 %v13774_v6  ;;  %v13424_v56 = vcombine.high %v875_v32, %v891_v8  ;;  %v13426_v6 = vcombine.high %v876_v7, %v892_v11 }
 0x4ec   : > { %8184 = vmatpush1.bf16.msra.mxu1 %v13771_v61  ;;  %8237 = vmatpush1.bf16.msra.mxu0 %v13773_v37  ;;  %v19914_v61 = vld [vmem:[#allocation12_spill] sm:$0xff] }
 0x4ed   : > { %8259 = vmatprep.subr.bf16.mxu1 %v13296_v54  ;;  %8312 = vmatprep.subr.bf16.mxu0 %v13298_v63  ;;  %v8761_v37 = vmul.f32 %v17582_v36, %v19914_v61  ;;  %v8763_v54 = vmul.f32 %v17586_v41, %v19914_v61  ;;  %v17612_v63 = vrot.slane %v19911_v35, %v17589_v46 }
 0x4ee   : > { %v17650_v14 = vmul.f32 %v17616_v24, %v19914_v61 }
 0x4ef   : > { %8186 = vmatmul.mubr.bf16.vlgmr.msra.gmra.mrb[40].mxu1 %v14866_v62  ;;  %8239 = vmatmul.mubr.bf16.vlgmr.msra.gmra.mrb[48].mxu0 %v14866_v62  ;;  %v17644_v17 = vmul.f32 %v17612_v63, %v19914_v61 }
 0x4f0   : > { %8195 = vmatprep.mubr.bf16.mxu1 %v15051_v10  ;;  %8248 = vmatprep.mubr.bf16.mxu0 %v15051_v10 }
 0x4f1   : > { %8260 = vmatpush1.bf16.msra.mxu1 %v13295_v44  ;;  %8313 = vmatpush1.bf16.msra.mxu0 %v13297_v48  ;;  %v13458_v44 = vcombine.high %v908_v21, %v924_v27  ;;  %v19915_v48 = vld [vmem:[#allocation6_spill] sm:$0xff] }
 0x4f2   : > { %8261 = vmatprep.subr.bf16.mxu1 %v13328_v49  ;;  %8314 = vmatprep.subr.bf16.mxu0 %v13330_v50  ;;  %v8793_v49 = vmul.f32 %v17582_v36, %v19915_v48  ;;  %v17623_v50 = vld [vmem:[%s19834_s6 + $0x650] sm:$0xff]  ;;  %v8795_v12 = vmul.f32 %v17586_v41, %v19915_v48 }
 0x4f3   : > { %v13488_v32 = vcombine.high %v17623_v50, %v17628_v57 }
 0x4f5   : > { %8262 = vmatpush1.bf16.msra.mxu1 %v13327_v47  ;;  %8315 = vmatpush1.bf16.msra.mxu0 %v13329_v0  ;;  %v17635_v47 = vld [vmem:[%s19834_s6 + $0x658] sm:$0xff] }
 0x4f6   : > { %8263 = vmatprep.subr.bf16.mxu1 %v13360_v60  ;;  %8316 = vmatprep.subr.bf16.mxu0 %v13362_v58  ;;  %v956_v0 = vld [vmem:[%s19834_s6 + $0x6d8] sm:$0xff] }
 0x4f7   : > { %8196 = vmatmul.mubr.bf16.gmra.mrb[44].mxu1 %v19909_v39  ;;  %8249 = vmatmul.mubr.bf16.gmra.mrb[52].mxu0 %v19909_v39 }
 0x4f8   : > { %8291 = vmatprep.mubr.bf16.mxu1 %v19910_v9  ;;  %8344 = vmatprep.mubr.bf16.mxu0 %v19910_v9 }
 0x4f9   : > { %8264 = vmatpush1.bf16.msra.mxu1 %v13359_v31  ;;  %8317 = vmatpush1.bf16.msra.mxu0 %v13361_v43  ;;  %v13455_v31 = vcombine.low %v907_v5, %v923_v20  ;;  %v13457_v43 = vcombine.low %v908_v21, %v924_v27  ;;  %v17673_v20 = vmul.f32 %v17612_v63, %v19915_v48  ;;  %v972_v27 = vld [vmem:[%s19834_s6 + $0x758] sm:$0xff] }
 0x4fa   : > { %8265 = vmatprep.subr.bf16.mxu1 %v13392_v33  ;;  %8318 = vmatprep.subr.bf16.mxu0 %v13394_v53  ;;  %v17677_v21 = vmul.f32 %v17616_v24, %v19915_v48 }
 0x4fd   : > { %8266 = vmatpush1.bf16.msra.mxu1 %v13391_v3  ;;  %8319 = vmatpush1.bf16.msra.mxu0 %v13393_v55  ;;  %v13490_v3 = vcombine.high %v17635_v47, %v956_v0  ;;  %v17663_v55 = vld [vmem:[%s19834_s6 + $0x750] sm:$0xff] }
 0x4fe   : > { %8267 = vmatprep.subr.bf16.mxu1 %v13424_v56  ;;  %8320 = vmatprep.subr.bf16.mxu0 %v13426_v6  ;;  %v17668_v56 = vld [vmem:[%s19834_s6 + $0x7d0] sm:$0xff] }
 0x4ff   : > { %v7869_v1 = vpop.f32.mrb[16].mxu1  ;;  %v7922_v45 = vpop.f32.mrb[24].mxu0  ;;  %v13519_v22 = vcombine.low %v17663_v55, %v17668_v56 }
 0x500   : > { %v8889_v60 = vadd.f32 %v8761_v37, %v7869_v1  ;;  %v8891_v58 = vadd.f32 %v8763_v54, %v7922_v45  ;;  %v17640_v13 = vpop.f32.mrb[17].mxu1  ;;  %v17646_v59 = vpop.f32.mrb[25].mxu0  ;;  %v988_v37 = vld [vmem:[%s19834_s6 + $0x7d8] sm:$0xff]  ;;  %v13489_v1 = vcombine.low %v17635_v47, %v956_v0  ;;  %v13520_v45 = vcombine.high %v17663_v55, %v17668_v56  ;;  %v17706_v47 = vld [vmem:[%s19834_s6 + $0x8d0] sm:$0xff] }
 0x501   : > { %8268 = vmatpush1.bf16.msra.mxu1 %v13423_v52  ;;  %8321 = vmatpush1.bf16.msra.mxu0 %v13425_v19  ;;  %v7873_v33 = vpop.f32.mrb[18].mxu1  ;;  %v7926_v53 = vpop.f32.mrb[26].mxu0  ;;  %v13487_v52 = vcombine.low %v17623_v50, %v17628_v57  ;;  %v19916_v19 = vld [vmem:[#allocation13_spill] sm:$0xff]  ;;  %v13522_v50 = vcombine.high %v972_v27, %v988_v37  ;;  %v19917_v57 = vld [vmem:[#allocation14_spill] sm:$0xff] }
 0x502   : > { %v9033_v8 = vadd.f32 %v17214_v4, %v8889_v60  ;;  %8269 = vmatprep.subr.bf16.mxu1 %v13456_v23  ;;  %8322 = vmatprep.subr.bf16.mxu0 %v13458_v44  ;;  %v8921_v7 = vadd.f32 %v8793_v49, %v7873_v33  ;;  %v17655_v11 = vpop.f32.mrb[19].mxu1  ;;  %v17657_v35 = vpop.f32.mrb[27].mxu0  ;;  %v9035_v6 = vadd.f32 %v17214_v4, %v8891_v58  ;;  %v17701_v33 = vld [vmem:[%s19834_s6 + $0x850] sm:$0xff] }
 0x503   : > { %v8923_v5 = vadd.f32 %v8795_v12, %v7926_v53  ;;  %v8825_v23 = vmul.f32 %v17582_v36, %v19916_v19  ;;  %v8827_v44 = vmul.f32 %v17586_v41, %v19916_v19  ;;  %v8857_v58 = vmul.f32 %v17582_v36, %v19917_v57  ;;  %v1035_v55 = vld [vmem:[%s19834_s6 + $0x950] sm:$0xff] }
 0x504   : > { %v9065_v54 = vadd.f32 %v17383_v42, %v8921_v7  ;;  %v9161_v12 = vmax.f32 %v9033_v8, 0.0  ;;  %v9163_v0 = vmax.f32 %v9035_v6, 0.0  ;;  %v8859_v36 = vmul.f32 %v17586_v41, %v19917_v57  ;;  %v1004_v8 = vld [vmem:[%s19834_s6 + $0x858] sm:$0xff]  ;;  %v1051_v56 = vld [vmem:[%s19834_s6 + $0x9d0] sm:$0xff] }
 0x505   : > { %v9067_v49 = vadd.f32 %v17383_v42, %v8923_v5  ;;  %8270 = vmatpush1.bf16.msra.mxu1 %v13455_v31  ;;  %8323 = vmatpush1.bf16.msra.mxu0 %v13457_v43  ;;  %v1020_v7 = vld [vmem:[%s19834_s6 + $0x8d8] sm:$0xff]  ;;  %v13521_v41 = vcombine.low %v972_v27, %v988_v37  ;;  %v13552_v15 = vcombine.high %v17701_v33, %v17706_v47 }
 0x506   : > { %v9193_v60 = vmax.f32 %v9065_v54, 0.0  ;;  %8271 = vmatprep.subr.bf16.mxu1 %v13488_v32  ;;  %8324 = vmatprep.subr.bf16.mxu0 %v13490_v3  ;;  %v17710_v32 = vmul.f32 %v17612_v63, %v19916_v19  ;;  %v8828_v37 = vmul.f32 %v17616_v24, %v19916_v19 }
 0x507   : > { %v9195_v31 = vmax.f32 %v9067_v49, 0.0  ;;  %v7879_v43 = vpop.f32.mrb[20].mxu1  ;;  %v7932_v53 = vpop.f32.mrb[28].mxu0 }
 0x508   : > { %v17720_v3 = vpack.c.bf16 %v9193_v60, %v9161_v12  ;;  %v8953_v6 = vadd.f32 %v8825_v23, %v7879_v43  ;;  %v8955_v5 = vadd.f32 %v8827_v44, %v7932_v53  ;;  %v7881_v54 = vpop.f32.mrb[21].mxu1  ;;  %v7934_v49 = vpop.f32.mrb[29].mxu0  ;;  %v13554_v43 = vcombine.high %v1004_v8, %v1020_v7 }
 0x509   : > { %v17724_v34 = vpack.c.bf16 %v9195_v31, %v9163_v0  ;;  %8272 = vmatpush1.bf16.msra.mxu1 %v13487_v52  ;;  %8325 = vmatpush1.bf16.msra.mxu0 %v13489_v1  ;;  %v7883_v25 = vpop.f32.mrb[22].mxu1  ;;  %v7936_v16 = vpop.f32.mrb[30].mxu0  ;;  %v1036_v1 = vld [vmem:[%s19834_s6 + $0x958] sm:$0xff]  ;;  %v13551_v0 = vcombine.low %v17701_v33, %v17706_v47  ;;  %v13584_v53 = vcombine.high %v1035_v55, %v1051_v56 }
 0x50a   : > { %19918 = vst [vmem:[#allocation7_spill] sm:$0xff] %v17720_v3  ;;  %v9097_v12 = vadd.f32 %v17374_v2, %v8953_v6  ;;  %8273 = vmatprep.subr.bf16.mxu1 %v13520_v45  ;;  %8326 = vmatprep.subr.bf16.mxu0 %v13522_v50  ;;  %v8985_v23 = vadd.f32 %v8857_v58, %v7883_v25  ;;  %v7885_v44 = vpop.f32.mrb[23].mxu1  ;;  %v7938_v60 = vpop.f32.mrb[31].mxu0  ;;  %v1052_v45 = vld [vmem:[%s19834_s6 + $0x9d8] sm:$0xff]  ;;  %v1083_v6 = vld [vmem:[%s19834_s6 + $0xad0] sm:$0xff] }
 0x50b   : > { %19919 = vst [vmem:[#allocation12_spill] sm:$0xff] %v17724_v34  ;;  %v9099_v27 = vadd.f32 %v17374_v2, %v8955_v5  ;;  %v8987_v52 = vadd.f32 %v8859_v36, %v7936_v16  ;;  %v8858_v25 = vmul.f32 %v17612_v63, %v19917_v57  ;;  %v8860_v58 = vmul.f32 %v17616_v24, %v19917_v57  ;;  %v1067_v36 = vld [vmem:[%s19834_s6 + $0xa50] sm:$0xff] }
 0x50c   : > { %v9129_v50 = vadd.f32 %v17414_v51, %v8985_v23  ;;  %v13553_v16 = vcombine.low %v1004_v8, %v1020_v7  ;;  %v13583_v63 = vcombine.low %v1035_v55, %v1051_v56  ;;  %v9225_v5 = vmax.f32 %v9097_v12, 0.0  ;;  %v1068_v23 = vld [vmem:[%s19834_s6 + $0xa58] sm:$0xff] }
 0x50d   : > { %v9131_v31 = vadd.f32 %v17414_v51, %v8987_v52  ;;  %8274 = vmatpush1.bf16.msra.mxu1 %v13519_v22  ;;  %8327 = vmatpush1.bf16.msra.mxu0 %v13521_v41  ;;  %v13585_v33 = vcombine.low %v1036_v1, %v1052_v45  ;;  %v13586_v47 = vcombine.high %v1036_v1, %v1052_v45  ;;  %v9227_v7 = vmax.f32 %v9099_v27, 0.0  ;;  %v1084_v12 = vld [vmem:[%s19834_s6 + $0xad8] sm:$0xff] }
 0x50e   : > { %v9257_v24 = vmax.f32 %v9129_v50, 0.0  ;;  %8275 = vmatprep.subr.bf16.mxu1 %v13552_v15  ;;  %8328 = vmatprep.subr.bf16.mxu0 %v13554_v43  ;;  %v8922_v22 = vadd.f32 %v17673_v20, %v17655_v11  ;;  %v8924_v8 = vadd.f32 %v17677_v21, %v17657_v35  ;;  %v8986_v43 = vadd.f32 %v8858_v25, %v7885_v44  ;;  %v1099_v44 = vld [vmem:[%s19834_s6 + $0xb50] sm:$0xff] }
 0x50f   : > { %v9259_v41 = vmax.f32 %v9131_v31, 0.0  ;;  %v8988_v55 = vadd.f32 %v8860_v58, %v7938_v60  ;;  %v13616_v56 = vcombine.high %v1067_v36, %v1083_v6  ;;  %v8890_v11 = vadd.f32 %v17644_v17, %v17640_v13  ;;  %v1115_v13 = vld [vmem:[%s19834_s6 + $0xbd0] sm:$0xff] }
 0x510   : > { %v17768_v15 = vpack.c.bf16 %v9257_v24, %v9225_v5  ;;  %v8892_v35 = vadd.f32 %v17650_v14, %v17646_v59  ;;  %v8954_v21 = vadd.f32 %v17710_v32, %v7881_v54  ;;  %v8956_v27 = vadd.f32 %v8828_v37, %v7934_v49  ;;  %v1100_v14 = vld [vmem:[%s19834_s6 + $0xb58] sm:$0xff] }
 0x511   : > { %v17774_v20 = vpack.c.bf16 %v9259_v41, %v9227_v7  ;;  %8276 = vmatpush1.bf16.msra.mxu1 %v13551_v0  ;;  %8329 = vmatpush1.bf16.msra.mxu0 %v13553_v16  ;;  %v13618_v52 = vcombine.high %v1068_v23, %v1084_v12  ;;  %v9066_v17 = vadd.f32 %v17383_v42, %v8922_v22  ;;  %v1116_v32 = vld [vmem:[%s19834_s6 + $0xbd8] sm:$0xff]  ;;  %v1131_v16 = vld [vmem:[%s19834_s6 + $0xc50] sm:$0xff] }
 0x512   : > { %19920 = vst [vmem:[#allocation6_spill] sm:$0xff] %v17768_v15  ;;  %8277 = vmatprep.subr.bf16.mxu1 %v13584_v53  ;;  %8330 = vmatprep.subr.bf16.mxu0 %v13586_v47  ;;  %v9068_v59 = vadd.f32 %v17383_v42, %v8924_v8  ;;  %v9130_v54 = vadd.f32 %v17414_v51, %v8986_v43  ;;  %v1163_v43 = vld [vmem:[%s19834_s6 + $0xd50] sm:$0xff]  ;;  %v18042_v15 = vld [vmem:[%s19834_s6 + $0x7e8] sm:$0xff] }
 0x513   : > { %19921 = vst [vmem:[#allocation25_spill] sm:$0xff] %v17774_v20  ;;  %v9132_v49 = vadd.f32 %v17414_v51, %v8988_v55  ;;  %v13615_v60 = vcombine.low %v1067_v36, %v1083_v6  ;;  %v13617_v37 = vcombine.low %v1068_v23, %v1084_v12  ;;  %v9034_v25 = vadd.f32 %v17214_v4, %v8890_v11  ;;  %v1147_v36 = vld [vmem:[%s19834_s6 + $0xcd0] sm:$0xff]  ;;  %v1148_v6 = vld [vmem:[%s19834_s6 + $0xcd8] sm:$0xff]  ;;  %v18037_v20 = vld [vmem:[%s19834_s6 + $0x768] sm:$0xff] }
 0x514   : > { %v9036_v1 = vadd.f32 %v17214_v4, %v8892_v35  ;;  %v13648_v45 = vcombine.high %v1099_v44, %v1115_v13  ;;  %v9098_v50 = vadd.f32 %v17374_v2, %v8954_v21  ;;  %v9100_v58 = vadd.f32 %v17374_v2, %v8956_v27  ;;  %v1179_v55 = vld [vmem:[%s19834_s6 + $0xdd0] sm:$0xff]  ;;  %v1180_v11 = vld [vmem:[%s19834_s6 + $0xdd8] sm:$0xff] }
 0x515   : > { %8278 = vmatpush1.bf16.msra.mxu1 %v13583_v63  ;;  %8331 = vmatpush1.bf16.msra.mxu0 %v13585_v33  ;;  %v13650_v0 = vcombine.high %v1100_v14, %v1116_v32  ;;  %v9194_v31 = vmax.f32 %v9066_v17, 0.0  ;;  %v9196_v53 = vmax.f32 %v9068_v59, 0.0  ;;  %v1132_v63 = vld [vmem:[%s19834_s6 + $0xc58] sm:$0xff]  ;;  %v9258_v5 = vmax.f32 %v9130_v54, 0.0 }
 0x516   : > { %8279 = vmatprep.subr.bf16.mxu1 %v13616_v56  ;;  %8332 = vmatprep.subr.bf16.mxu0 %v13618_v52  ;;  %v9260_v24 = vmax.f32 %v9132_v49, 0.0  ;;  %v9162_v33 = vmax.f32 %v9034_v25, 0.0  ;;  %v9164_v47 = vmax.f32 %v9036_v1, 0.0  ;;  %v13647_v22 = vcombine.low %v1099_v44, %v1115_v13  ;;  %v1164_v56 = vld [vmem:[%s19834_s6 + $0xd58] sm:$0xff] }
 0x517   : > { %v13649_v8 = vcombine.low %v1100_v14, %v1116_v32  ;;  %v9226_v7 = vmax.f32 %v9098_v50, 0.0  ;;  %v9228_v41 = vmax.f32 %v9100_v58, 0.0  ;;  %v13680_v23 = vcombine.high %v1131_v16, %v1147_v36  ;;  %v1195_v14 = vld [vmem:[%s19834_s6 + $0xe50] sm:$0xff]  ;;  %v1196_v54 = vld [vmem:[%s19834_s6 + $0xe58] sm:$0xff] }
 0x518   : > { %v13682_v12 = vcombine.high %v1132_v63, %v1148_v6  ;;  %v17821_v35 = vpack.c.bf16 %v9194_v31, %v9162_v33  ;;  %v17823_v21 = vpack.c.bf16 %v9196_v53, %v9164_v47  ;;  %v13679_v44 = vcombine.low %v1131_v16, %v1147_v36  ;;  %v1211_v32 = vld [vmem:[%s19834_s6 + $0xed0] sm:$0xff]  ;;  %v1212_v49 = vld [vmem:[%s19834_s6 + $0xed8] sm:$0xff] }
 0x519   : > { %8280 = vmatpush1.bf16.msra.mxu1 %v13615_v60  ;;  %8333 = vmatpush1.bf16.msra.mxu0 %v13617_v37  ;;  %v17825_v27 = vpack.c.bf16 %v9258_v5, %v9226_v7  ;;  %v17827_v52 = vpack.c.bf16 %v9260_v24, %v9228_v41  ;;  %v13681_v13 = vcombine.low %v1132_v63, %v1148_v6  ;;  %v1243_v50 = vld [vmem:[%s19834_s6 + $0xfd0] sm:$0xff]  ;;  %v1228_v58 = vld [vmem:[%s19834_s6 + $0xf58] sm:$0xff]  ;;  %v749_v63 = vld [vmem:[%s19834_s6 + $0x60] sm:$0xff] }
 0x51a   : > { %8281 = vmatprep.subr.bf16.mxu1 %v13648_v45  ;;  %8334 = vmatprep.subr.bf16.mxu0 %v13650_v0  ;;  %19922 = vst [vmem:[#allocation26_spill] sm:$0xff] %v17821_v35  ;;  %19923 = vst [vmem:[#allocation27_spill] sm:$0xff] %v17823_v21  ;;  %v13712_v17 = vcombine.high %v1163_v43, %v1179_v55  ;;  %v13714_v59 = vcombine.high %v1164_v56, %v1180_v11  ;;  %v1227_v45 = vld [vmem:[%s19834_s6 + $0xf50] sm:$0xff]  ;;  %v1244_v0 = vld [vmem:[%s19834_s6 + $0xfd8] sm:$0xff] }
 0x51b   : > { %19924 = vst [vmem:[#allocation28_spill] sm:$0xff] %v17825_v27  ;;  %19925 = vst [vmem:[#allocation29_spill] sm:$0xff] %v17827_v52  ;;  %v13711_v60 = vcombine.low %v1163_v43, %v1179_v55  ;;  %v13713_v37 = vcombine.low %v1164_v56, %v1180_v11  ;;  %v13744_v25 = vcombine.high %v1195_v14, %v1211_v32  ;;  %v765_v6 = vld [vmem:[%s19834_s6 + $0xe0] sm:$0xff]  ;;  %v750_v5 = vld [vmem:[%s19834_s6 + $0x68] sm:$0xff] }
 0x51c   : > { %v13746_v1 = vcombine.high %v1196_v54, %v1212_v49  ;;  %v13743_v16 = vcombine.low %v1195_v14, %v1211_v32  ;;  %v13745_v31 = vcombine.low %v1196_v54, %v1212_v49  ;;  %v13776_v53 = vcombine.high %v1227_v45, %v1243_v50  ;;  %v766_v24 = vld [vmem:[%s19834_s6 + $0xe8] sm:$0xff]  ;;  %v781_v7 = vld [vmem:[%s19834_s6 + $0x160] sm:$0xff] }
 0x51d   : > { %8282 = vmatpush1.bf16.msra.mxu1 %v13647_v22  ;;  %8335 = vmatpush1.bf16.msra.mxu0 %v13649_v8  ;;  %v13778_v36 = vcombine.high %v1228_v58, %v1244_v0  ;;  %v13775_v33 = vcombine.low %v1227_v45, %v1243_v50  ;;  %v13777_v47 = vcombine.low %v1228_v58, %v1244_v0  ;;  %v797_v41 = vld [vmem:[%s19834_s6 + $0x1e0] sm:$0xff]  ;;  %v17906_v45 = vld [vmem:[%s17060_s13 + $0x8] sm:$0xff] }
 0x51e   : > { %8283 = vmatprep.subr.bf16.mxu1 %v13680_v23  ;;  %8336 = vmatprep.subr.bf16.mxu0 %v13682_v12  ;;  %v13300_v22 = vcombine.high %v749_v63, %v765_v6  ;;  %v13302_v8 = vcombine.high %v750_v5, %v766_v24  ;;  %v782_v23 = vld [vmem:[%s19834_s6 + $0x168] sm:$0xff]  ;;  %v13299_v43 = vcombine.low %v749_v63, %v765_v6 }
 0x51f   : > { %v798_v12 = vld [vmem:[%s19834_s6 + $0x1e8] sm:$0xff]  ;;  %v13301_v55 = vcombine.low %v750_v5, %v766_v24  ;;  %v13332_v56 = vcombine.high %v781_v7, %v797_v41  ;;  %v13331_v14 = vcombine.low %v781_v7, %v797_v41  ;;  %v19927_v24 = vld [vmem:[#allocation9_spill] sm:$0xff]  ;;  %v17949_v41 = vld [vmem:[%s19834_s6 + $0x560] sm:$0xff]  ;;  %v13526_v38 = vcombine.high %v18037_v20, %v18042_v15 }
 0x520   : > { %v13334_v11 = vcombine.high %v782_v23, %v798_v12  ;;  %v13333_v32 = vcombine.low %v782_v23, %v798_v12  ;;  %v17926_v63 = vld [vmem:[%s19834_s6 + $0x4e8] sm:$0xff]  ;;  %v17954_v23 = vld [vmem:[%s19834_s6 + $0x5e0] sm:$0xff] }
 0x521   : > { %8284 = vmatpush1.bf16.msra.mxu1 %v13679_v44  ;;  %8337 = vmatpush1.bf16.msra.mxu0 %v13681_v13  ;;  %v813_v44 = vld [vmem:[%s19834_s6 + $0x260] sm:$0xff]  ;;  %v19926_v6 = vld [vmem:[#allocation8_spill] sm:$0xff] }
 0x522   : > { %8285 = vmatprep.subr.bf16.mxu1 %v13712_v17  ;;  %8338 = vmatprep.subr.bf16.mxu0 %v13714_v59  ;;  %v829_v13 = vld [vmem:[%s19834_s6 + $0x2e0] sm:$0xff]  ;;  %v814_v17 = vld [vmem:[%s19834_s6 + $0x268] sm:$0xff]  ;;  %v17930_v5 = vrot.slane %v17906_v45, %v19926_v6 }
 0x523   : > { %v830_v59 = vld [vmem:[%s19834_s6 + $0x2e8] sm:$0xff]  ;;  %v13364_v54 = vcombine.high %v813_v44, %v829_v13  ;;  %v13363_v50 = vcombine.low %v813_v44, %v829_v13 }
 0x524   : > { %v13366_v49 = vcombine.high %v814_v17, %v830_v59  ;;  %v13365_v58 = vcombine.low %v814_v17, %v830_v59  ;;  %v8765_v59 = vmul.f32 %v17930_v5, %v19914_v61 }
 0x525   : > { %8286 = vmatpush1.bf16.msra.mxu1 %v13711_v60  ;;  %8339 = vmatpush1.bf16.msra.mxu0 %v13713_v37  ;;  %v845_v60 = vld [vmem:[%s19834_s6 + $0x360] sm:$0xff] }
 0x526   : > { %8287 = vmatprep.subr.bf16.mxu1 %v13744_v25  ;;  %8340 = vmatprep.subr.bf16.mxu0 %v13746_v1  ;;  %v861_v37 = vld [vmem:[%s19834_s6 + $0x3e0] sm:$0xff]  ;;  %v846_v25 = vld [vmem:[%s19834_s6 + $0x368] sm:$0xff] }
 0x527   : > { %v862_v1 = vld [vmem:[%s19834_s6 + $0x3e8] sm:$0xff]  ;;  %v13396_v0 = vcombine.high %v845_v60, %v861_v37  ;;  %v13395_v12 = vcombine.low %v845_v60, %v861_v37 }
 0x529   : > { %8288 = vmatpush1.bf16.msra.mxu1 %v13743_v16  ;;  %8341 = vmatpush1.bf16.msra.mxu0 %v13745_v31  ;;  %v17911_v16 = vld [vmem:[%s19834_s6 + $0x460] sm:$0xff] }
 0x52a   : > { %8289 = vmatprep.subr.bf16.mxu1 %v13776_v53  ;;  %8342 = vmatprep.subr.bf16.mxu0 %v13778_v36  ;;  %v17916_v31 = vld [vmem:[%s19834_s6 + $0x4e0] sm:$0xff]  ;;  %v13398_v53 = vcombine.high %v846_v25, %v862_v1  ;;  %v17921_v36 = vld [vmem:[%s19834_s6 + $0x468] sm:$0xff] }
 0x52b   : > { %v13428_v44 = vcombine.high %v17911_v16, %v17916_v31  ;;  %v13429_v13 = vcombine.low %v17921_v36, %v17926_v63  ;;  %v13430_v17 = vcombine.high %v17921_v36, %v17926_v63  ;;  %v18021_v36 = vld [vmem:[%s19834_s6 + $0x760] sm:$0xff] }
 0x52c   : > { %v18026_v63 = vld [vmem:[%s19834_s6 + $0x7e0] sm:$0xff] }
 0x52d   : > { %8290 = vmatpush1.bf16.msra.mxu1 %v13775_v33  ;;  %8343 = vmatpush1.bf16.msra.mxu0 %v13777_v47  ;;  %v17934_v33 = vrot.slane %v17906_v45, %v19927_v24  ;;  %v19928_v47 = vld [vmem:[#allocation10_spill] sm:$0xff] }
 0x52e   : > { %8365 = vmatprep.subr.bf16.mxu1 %v13300_v22  ;;  %8418 = vmatprep.subr.bf16.mxu0 %v13302_v8  ;;  %v17940_v22 = vrot.slane %v17906_v45, %v19928_v47  ;;  %v19929_v8 = vld [vmem:[#allocation11_spill] sm:$0xff] }
 0x52f   : > { %v17944_v7 = vrot.slane %v17906_v45, %v19929_v8  ;;  %v8831_v34 = vmul.f32 %v17934_v33, %v19916_v19 }
 0x530   : > { %8292 = vmatmul.mubr.bf16.vlgmr.msra.gmra.mrb[48].mxu1 %v14866_v62  ;;  %8345 = vmatmul.mubr.bf16.vlgmr.msra.gmra.mrb[56].mxu0 %v14866_v62  ;;  %v8766_v60 = vmul.f32 %v17940_v22, %v19914_v61  ;;  %v18054_v3 = vmul.f32 %v17940_v22, %v19916_v19 }
 0x531   : > { %8301 = vmatprep.mubr.bf16.mxu1 %v15051_v10  ;;  %8354 = vmatprep.mubr.bf16.mxu0 %v15051_v10  ;;  %v8768_v37 = vmul.f32 %v17944_v7, %v19914_v61  ;;  %v8864_v18 = vmul.f32 %v17944_v7, %v19917_v57 }
 0x532   : > { %8366 = vmatpush1.bf16.msra.mxu1 %v13299_v43  ;;  %8419 = vmatpush1.bf16.msra.mxu0 %v13301_v55  ;;  %v13397_v43 = vcombine.low %v846_v25, %v862_v1  ;;  %v13427_v55 = vcombine.low %v17911_v16, %v17916_v31  ;;  %v8797_v16 = vmul.f32 %v17930_v5, %v19915_v48 }
 0x533   : > { %8367 = vmatprep.subr.bf16.mxu1 %v13332_v56  ;;  %8420 = vmatprep.subr.bf16.mxu0 %v13334_v11  ;;  %v17963_v56 = vld [vmem:[%s19834_s6 + $0x568] sm:$0xff]  ;;  %v8799_v31 = vmul.f32 %v17934_v33, %v19915_v48 }
 0x534   : > { %v17968_v11 = vld [vmem:[%s19834_s6 + $0x5e8] sm:$0xff] }
 0x535   : > { %v13461_v1 = vcombine.low %v17963_v56, %v17968_v11 }
 0x536   : > { %8368 = vmatpush1.bf16.msra.mxu1 %v13331_v14  ;;  %8421 = vmatpush1.bf16.msra.mxu0 %v13333_v32  ;;  %v8767_v14 = vmul.f32 %v17934_v33, %v19914_v61  ;;  %v13460_v32 = vcombine.high %v17949_v41, %v17954_v23 }
 0x537   : > { %8369 = vmatprep.subr.bf16.mxu1 %v13364_v54  ;;  %8422 = vmatprep.subr.bf16.mxu0 %v13366_v49  ;;  %v17985_v54 = vld [vmem:[%s19834_s6 + $0x660] sm:$0xff] }
 0x538   : > { %8302 = vmatmul.mubr.bf16.gmra.mrb[52].mxu1 %v19909_v39  ;;  %8355 = vmatmul.mubr.bf16.gmra.mrb[60].mxu0 %v19909_v39  ;;  %v17990_v49 = vld [vmem:[%s19834_s6 + $0x6e0] sm:$0xff] }
 0x539   : > { %8397 = vmatprep.mubr.bf16.mxu1 %v19910_v9  ;;  %8450 = vmatprep.mubr.bf16.mxu0 %v19910_v9  ;;  %v13492_v25 = vcombine.high %v17985_v54, %v17990_v49 }
 0x53a   : > { %8370 = vmatpush1.bf16.msra.mxu1 %v13363_v50  ;;  %8423 = vmatpush1.bf16.msra.mxu0 %v13365_v58  ;;  %v18003_v50 = vld [vmem:[%s19834_s6 + $0x668] sm:$0xff] }
 0x53b   : > { %8371 = vmatprep.subr.bf16.mxu1 %v13396_v0  ;;  %8424 = vmatprep.subr.bf16.mxu0 %v13398_v53  ;;  %v18008_v58 = vld [vmem:[%s19834_s6 + $0x6e8] sm:$0xff]  ;;  %v13462_v0 = vcombine.high %v17963_v56, %v17968_v11  ;;  %v8798_v53 = vmul.f32 %v17940_v22, %v19915_v48  ;;  %v8800_v56 = vmul.f32 %v17944_v7, %v19915_v48 }
 0x53c   : > { %v8829_v11 = vmul.f32 %v17930_v5, %v19916_v19 }
 0x53e   : > { %8372 = vmatpush1.bf16.msra.mxu1 %v13395_v12  ;;  %8425 = vmatpush1.bf16.msra.mxu0 %v13397_v43  ;;  %v13494_v43 = vcombine.high %v18003_v50, %v18008_v58 }
 0x53f   : > { %8373 = vmatprep.subr.bf16.mxu1 %v13428_v44  ;;  %8426 = vmatprep.subr.bf16.mxu0 %v13430_v17  ;;  %v18058_v44 = vmul.f32 %v17944_v7, %v19916_v19  ;;  %v8861_v17 = vmul.f32 %v17930_v5, %v19917_v57  ;;  %v18093_v19 = vld [vmem:[%s19834_s6 + $0x868] sm:$0xff]  ;;  %v18113_v7 = vld [vmem:[%s19834_s6 + $0x9e0] sm:$0xff] }
 0x540   : > { %v7975_v52 = vpop.f32.mrb[24].mxu1  ;;  %v8028_v27 = vpop.f32.mrb[32].mxu0 }
 0x541   : > { %v8893_v12 = vadd.f32 %v8765_v59, %v7975_v52  ;;  %v8895_v8 = vadd.f32 %v8767_v14, %v8028_v27  ;;  %v7977_v47 = vpop.f32.mrb[25].mxu1  ;;  %v8030_v24 = vpop.f32.mrb[33].mxu0  ;;  %v18072_v27 = vmul.f32 %v17934_v33, %v19917_v57  ;;  %v18077_v52 = vld [vmem:[%s19834_s6 + $0x860] sm:$0xff]  ;;  %v8862_v33 = vmul.f32 %v17940_v22, %v19917_v57 }
 0x542   : > { %8374 = vmatpush1.bf16.msra.mxu1 %v13427_v55  ;;  %8427 = vmatpush1.bf16.msra.mxu0 %v13429_v13  ;;  %v7979_v35 = vpop.f32.mrb[26].mxu1  ;;  %v8032_v29 = vpop.f32.mrb[34].mxu0  ;;  %v18082_v55 = vld [vmem:[%s19834_s6 + $0x8e0] sm:$0xff]  ;;  %v8894_v6 = vadd.f32 %v8766_v60, %v7977_v47  ;;  %v19930_v60 = vcombine.low %v17949_v41, %v17954_v23 }
 0x543   : > { %v9037_v13 = vadd.f32 %v17214_v4, %v8893_v12  ;;  %8375 = vmatprep.subr.bf16.mxu1 %v13460_v32  ;;  %8428 = vmatprep.subr.bf16.mxu0 %v13462_v0  ;;  %v8925_v59 = vadd.f32 %v8797_v16, %v7979_v35  ;;  %v7981_v5 = vpop.f32.mrb[27].mxu1  ;;  %v8034_v14 = vpop.f32.mrb[35].mxu0  ;;  %v9039_v21 = vadd.f32 %v17214_v4, %v8895_v8  ;;  %v18098_v35 = vld [vmem:[%s19834_s6 + $0x8e8] sm:$0xff]  ;;  %v18108_v8 = vld [vmem:[%s19834_s6 + $0x960] sm:$0xff] }
 0x544   : > { %v8927_v28 = vadd.f32 %v8799_v31, %v8032_v29  ;;  %v8896_v32 = vadd.f32 %v8768_v37, %v8030_v24  ;;  %v13556_v29 = vcombine.high %v18077_v52, %v18082_v55  ;;  %v8926_v37 = vadd.f32 %v8798_v53, %v7981_v5 }
 0x545   : > { %v9069_v22 = vadd.f32 %v17383_v42, %v8925_v59  ;;  %v8928_v0 = vadd.f32 %v8800_v56, %v8034_v14  ;;  %v9165_v16 = vmax.f32 %v9037_v13, 0.0  ;;  %v13557_v12 = vcombine.low %v18093_v19, %v18098_v35 }
 0x546   : > { %v9071_v24 = vadd.f32 %v17383_v42, %v8927_v28  ;;  %8376 = vmatpush1.bf16.msra.mxu1 %v19930_v60  ;;  %8429 = vmatpush1.bf16.msra.mxu0 %v13461_v1  ;;  %v13558_v59 = vcombine.high %v18093_v19, %v18098_v35  ;;  %v9167_v47 = vmax.f32 %v9039_v21, 0.0  ;;  %v18124_v28 = vadd.f32 %v17214_v4, %v8894_v6  ;;  %v1102_v19 = vld [vmem:[%s19834_s6 + $0xb68] sm:$0xff] }
 0x547   : > { %v9197_v31 = vmax.f32 %v9069_v22, 0.0  ;;  %8377 = vmatprep.subr.bf16.mxu1 %v13492_v25  ;;  %8430 = vmatprep.subr.bf16.mxu0 %v13494_v43  ;;  %v13588_v1 = vcombine.high %v18108_v8, %v18113_v7  ;;  %v9040_v53 = vadd.f32 %v17214_v4, %v8896_v32  ;;  %v9070_v21 = vadd.f32 %v17383_v42, %v8926_v37 }
 0x548   : > { %v9199_v57 = vmax.f32 %v9071_v24, 0.0  ;;  %v7985_v41 = vpop.f32.mrb[28].mxu1  ;;  %v8038_v23 = vpop.f32.mrb[36].mxu0  ;;  %v9072_v6 = vadd.f32 %v17383_v42, %v8928_v0  ;;  %v19931_v22 = vcombine.low %v17985_v54, %v17990_v49  ;;  %v19932_v24 = vcombine.low %v18003_v50, %v18008_v58 }
 0x549   : > { %v18129_v25 = vpack.c.bf16 %v9197_v31, %v9165_v16  ;;  %v8957_v56 = vadd.f32 %v8829_v11, %v7985_v41  ;;  %v8959_v43 = vadd.f32 %v8831_v34, %v8038_v23  ;;  %v7987_v13 = vpop.f32.mrb[29].mxu1  ;;  %v8040_v5 = vpop.f32.mrb[37].mxu0  ;;  %v1038_v34 = vld [vmem:[%s19834_s6 + $0x968] sm:$0xff]  ;;  %v19933_v54 = vcombine.high %v18021_v36, %v18026_v63 }
 0x54a   : > { %v18131_v14 = vpack.c.bf16 %v9199_v57, %v9167_v47  ;;  %8378 = vmatpush1.bf16.msra.mxu1 %v19931_v22  ;;  %8431 = vmatpush1.bf16.msra.mxu0 %v19932_v24  ;;  %v7989_v32 = vpop.f32.mrb[30].mxu1  ;;  %v8042_v60 = vpop.f32.mrb[38].mxu0  ;;  %v1054_v57 = vld [vmem:[%s19834_s6 + $0x9e8] sm:$0xff]  ;;  %v8958_v47 = vadd.f32 %v18054_v3, %v7987_v13  ;;  %v8960_v0 = vadd.f32 %v18058_v44, %v8040_v5  ;;  %v9166_v41 = vmax.f32 %v18124_v28, 0.0  ;;  %v1069_v5 = vld [vmem:[%s19834_s6 + $0xa60] sm:$0xff] }
 0x54b   : > { %v9101_v11 = vadd.f32 %v17374_v2, %v8957_v56  ;;  %8379 = vmatprep.subr.bf16.mxu1 %v19933_v54  ;;  %8432 = vmatprep.subr.bf16.mxu0 %v13526_v38  ;;  %v8989_v49 = vadd.f32 %v8861_v17, %v7989_v32  ;;  %v7991_v50 = vpop.f32.mrb[31].mxu1  ;;  %v8044_v58 = vpop.f32.mrb[39].mxu0  ;;  %v9103_v37 = vadd.f32 %v17374_v2, %v8959_v43  ;;  %v9198_v13 = vmax.f32 %v9070_v21, 0.0 }
 0x54c   : > { %v8991_v16 = vadd.f32 %v18072_v27, %v8042_v60  ;;  %v8990_v31 = vadd.f32 %v8862_v33, %v7991_v50  ;;  %v8992_v3 = vadd.f32 %v8864_v18, %v8044_v58  ;;  %v13590_v56 = vcombine.high %v1038_v34, %v1054_v57 }
 0x54d   : > { %v9133_v23 = vadd.f32 %v17414_v51, %v8989_v49  ;;  %v9200_v22 = vmax.f32 %v9072_v6, 0.0  ;;  %v19934_v17 = vcombine.low %v18021_v36, %v18026_v63  ;;  %v19935_v44 = vcombine.low %v18037_v20, %v18042_v15  ;;  %v1085_v20 = vld [vmem:[%s19834_s6 + $0xae0] sm:$0xff]  ;;  %v1070_v6 = vld [vmem:[%s19834_s6 + $0xa68] sm:$0xff] }
 0x54e   : > { %v9135_v38 = vadd.f32 %v17414_v51, %v8991_v16  ;;  %v9134_v27 = vadd.f32 %v17414_v51, %v8990_v31  ;;  %v9229_v33 = vmax.f32 %v9101_v11, 0.0  ;;  %v9102_v28 = vadd.f32 %v17374_v2, %v8958_v47  ;;  %v1133_v16 = vld [vmem:[%s19834_s6 + $0xc60] sm:$0xff] }
 0x54f   : > { %8380 = vmatpush1.bf16.msra.mxu1 %v19934_v17  ;;  %8433 = vmatpush1.bf16.msra.mxu0 %v19935_v44  ;;  %v9261_v43 = vmax.f32 %v9133_v23, 0.0  ;;  %v9136_v18 = vadd.f32 %v17414_v51, %v8992_v3  ;;  %v9168_v36 = vmax.f32 %v9040_v53, 0.0  ;;  %v9231_v63 = vmax.f32 %v9103_v37, 0.0  ;;  %v1149_v31 = vld [vmem:[%s19834_s6 + $0xce0] sm:$0xff]  ;;  %v1150_v23 = vld [vmem:[%s19834_s6 + $0xce8] sm:$0xff] }
 0x550   : > { %8381 = vmatprep.subr.bf16.mxu1 %v13556_v29  ;;  %8434 = vmatprep.subr.bf16.mxu0 %v13558_v59  ;;  %v9104_v21 = vadd.f32 %v17374_v2, %v8960_v0  ;;  %v9263_v15 = vmax.f32 %v9135_v38, 0.0  ;;  %v1086_v29 = vld [vmem:[%s19834_s6 + $0xae8] sm:$0xff]  ;;  %v9262_v24 = vmax.f32 %v9134_v27, 0.0  ;;  %v13587_v53 = vcombine.low %v18108_v8, %v18113_v7  ;;  %v1165_v38 = vld [vmem:[%s19834_s6 + $0xd60] sm:$0xff] }
 0x551   : > { %v18180_v59 = vpack.c.bf16 %v9261_v43, %v9229_v33  ;;  %v13589_v32 = vcombine.low %v1038_v34, %v1054_v57  ;;  %v9264_v11 = vmax.f32 %v9136_v18, 0.0  ;;  %v19938_v47 = vcombine.low %v18077_v52, %v18082_v55  ;;  %v1101_v34 = vld [vmem:[%s19834_s6 + $0xb60] sm:$0xff]  ;;  %v1118_v55 = vld [vmem:[%s19834_s6 + $0xbe8] sm:$0xff] }
 0x552   : > { %v18184_v60 = vpack.c.bf16 %v9263_v15, %v9231_v63  ;;  %v18192_v54 = vpack.c.bf16 %v9198_v13, %v9166_v41  ;;  %v18194_v49 = vpack.c.bf16 %v9200_v22, %v9168_v36  ;;  %v9230_v50 = vmax.f32 %v9102_v28, 0.0  ;;  %v1117_v52 = vld [vmem:[%s19834_s6 + $0xbe0] sm:$0xff]  ;;  %v1134_v41 = vld [vmem:[%s19834_s6 + $0xc68] sm:$0xff] }
 0x553   : > { %19936 = vst [vmem:[#allocation30_spill] sm:$0xff] %v18180_v59  ;;  %8382 = vmatpush1.bf16.msra.mxu1 %v19938_v47  ;;  %8435 = vmatpush1.bf16.msra.mxu0 %v13557_v12  ;;  %v13620_v8 = vcombine.high %v1069_v5, %v1085_v20  ;;  %v13622_v7 = vcombine.high %v1070_v6, %v1086_v29  ;;  %v9232_v57 = vmax.f32 %v9104_v21, 0.0  ;;  %v1181_v17 = vld [vmem:[%s19834_s6 + $0xde0] sm:$0xff]  ;;  %v1166_v44 = vld [vmem:[%s19834_s6 + $0xd68] sm:$0xff] }
 0x554   : > { %19937 = vst [vmem:[#allocation31_spill] sm:$0xff] %v18184_v60  ;;  %8383 = vmatprep.subr.bf16.mxu1 %v13588_v1  ;;  %8436 = vmatprep.subr.bf16.mxu0 %v13590_v56  ;;  %v18208_v35 = vpack.c.bf16 %v9262_v24, %v9230_v50  ;;  %v13619_v12 = vcombine.low %v1069_v5, %v1085_v20  ;;  %v1182_v27 = vld [vmem:[%s19834_s6 + $0xde8] sm:$0xff]  ;;  %v1197_v5 = vld [vmem:[%s19834_s6 + $0xe60] sm:$0xff] }
 0x555   : > { %v13621_v1 = vcombine.low %v1070_v6, %v1086_v29  ;;  %v18210_v58 = vpack.c.bf16 %v9264_v11, %v9232_v57  ;;  %v13652_v37 = vcombine.high %v1101_v34, %v1117_v52  ;;  %v13654_v0 = vcombine.high %v1102_v19, %v1118_v55  ;;  %v1213_v36 = vld [vmem:[%s19834_s6 + $0xee0] sm:$0xff]  ;;  %v1198_v63 = vld [vmem:[%s19834_s6 + $0xe68] sm:$0xff]  ;;  %v767_v57 = vld [vmem:[%s19834_s6 + $0xf0] sm:$0xff] }
 0x556   : > { %v13651_v3 = vcombine.low %v1101_v34, %v1117_v52  ;;  %v13653_v56 = vcombine.low %v1102_v19, %v1118_v55  ;;  %v13684_v13 = vcombine.high %v1133_v16, %v1149_v31  ;;  %v13686_v22 = vcombine.high %v1134_v41, %v1150_v23  ;;  %v1214_v21 = vld [vmem:[%s19834_s6 + $0xee8] sm:$0xff]  ;;  %v1229_v24 = vld [vmem:[%s19834_s6 + $0xf60] sm:$0xff]  ;;  %v751_v34 = vld [vmem:[%s19834_s6 + $0x70] sm:$0xff] }
 0x557   : > { %8384 = vmatpush1.bf16.msra.mxu1 %v13587_v53  ;;  %8437 = vmatpush1.bf16.msra.mxu0 %v13589_v32  ;;  %v13683_v33 = vcombine.low %v1133_v16, %v1149_v31  ;;  %v13685_v28 = vcombine.low %v1134_v41, %v1150_v23  ;;  %v13716_v43 = vcombine.high %v1165_v38, %v1181_v17  ;;  %v1245_v53 = vld [vmem:[%s19834_s6 + $0xfe0] sm:$0xff]  ;;  %v1230_v32 = vld [vmem:[%s19834_s6 + $0xf68] sm:$0xff]  ;;  %v752_v52 = vld [vmem:[%s19834_s6 + $0x78] sm:$0xff] }
 0x558   : > { %8385 = vmatprep.subr.bf16.mxu1 %v13620_v8  ;;  %8438 = vmatprep.subr.bf16.mxu0 %v13622_v7  ;;  %v13718_v18 = vcombine.high %v1166_v44, %v1182_v27  ;;  %v13715_v15 = vcombine.low %v1165_v38, %v1181_v17  ;;  %v13717_v20 = vcombine.low %v1166_v44, %v1182_v27  ;;  %v1246_v11 = vld [vmem:[%s19834_s6 + $0xfe8] sm:$0xff]  ;;  %v768_v19 = vld [vmem:[%s19834_s6 + $0xf8] sm:$0xff]  ;;  %v799_v16 = vld [vmem:[%s19834_s6 + $0x1f0] sm:$0xff] }
 0x559   : > { %v13748_v6 = vcombine.high %v1197_v5, %v1213_v36  ;;  %v13750_v29 = vcombine.high %v1198_v63, %v1214_v21  ;;  %v13747_v47 = vcombine.low %v1197_v5, %v1213_v36  ;;  %v13749_v50 = vcombine.low %v1198_v63, %v1214_v21  ;;  %v784_v31 = vld [vmem:[%s19834_s6 + $0x178] sm:$0xff]  ;;  %v831_v38 = vld [vmem:[%s19834_s6 + $0x2f0] sm:$0xff] }
 0x55a   : > { %v13780_v8 = vcombine.high %v1229_v24, %v1245_v53  ;;  %v13782_v7 = vcombine.high %v1230_v32, %v1246_v11  ;;  %v13779_v55 = vcombine.low %v1229_v24, %v1245_v53  ;;  %v800_v41 = vld [vmem:[%s19834_s6 + $0x1f8] sm:$0xff]  ;;  %v13303_v23 = vcombine.low %v751_v34, %v767_v57  ;;  %v863_v5 = vld [vmem:[%s19834_s6 + $0x3f0] sm:$0xff] }
 0x55b   : > { %8386 = vmatpush1.bf16.msra.mxu1 %v13619_v12  ;;  %8439 = vmatpush1.bf16.msra.mxu0 %v13621_v1  ;;  %v13781_v12 = vcombine.low %v1230_v32, %v1246_v11  ;;  %v13304_v1 = vcombine.high %v751_v34, %v767_v57  ;;  %v816_v17 = vld [vmem:[%s19834_s6 + $0x278] sm:$0xff]  ;;  %v18334_v53 = vrot.slane %v17906_v45, %v17559_v26  ;;  %v18353_v57 = vld [vmem:[%s19834_s6 + $0x570] sm:$0xff] }
 0x55c   : > { %8387 = vmatprep.subr.bf16.mxu1 %v13652_v37  ;;  %8440 = vmatprep.subr.bf16.mxu0 %v13654_v0  ;;  %v13306_v37 = vcombine.high %v752_v52, %v768_v19  ;;  %v783_v0 = vld [vmem:[%s19834_s6 + $0x170] sm:$0xff]  ;;  %v832_v44 = vld [vmem:[%s19834_s6 + $0x2f8] sm:$0xff]  ;;  %v18338_v32 = vrot.slane %v17906_v45, %v17562_v30  ;;  %v18348_v34 = vrot.slane %v17906_v45, %v17592_v40 }
 0x55d   : > { %v13335_v27 = vcombine.low %v783_v0, %v799_v16  ;;  %v848_v36 = vld [vmem:[%s19834_s6 + $0x378] sm:$0xff] }
 0x55e   : > { %v864_v63 = vld [vmem:[%s19834_s6 + $0x3f8] sm:$0xff] }
 0x55f   : > { %8388 = vmatpush1.bf16.msra.mxu1 %v13651_v3  ;;  %8441 = vmatpush1.bf16.msra.mxu0 %v13653_v56  ;;  %v13305_v3 = vcombine.low %v752_v52, %v768_v19  ;;  %v13336_v56 = vcombine.high %v783_v0, %v799_v16  ;;  %v18330_v24 = vld [vmem:[%s19834_s6 + $0x4f8] sm:$0xff]  ;;  %v18358_v52 = vld [vmem:[%s19834_s6 + $0x5f0] sm:$0xff]  ;;  %v8771_v0 = vmul.f32 %v18338_v32, %v19914_v61 }
 0x560   : > { %8389 = vmatprep.subr.bf16.mxu1 %v13684_v13  ;;  %8442 = vmatprep.subr.bf16.mxu0 %v13686_v22  ;;  %v13338_v13 = vcombine.high %v784_v31, %v800_v41  ;;  %v815_v22 = vld [vmem:[%s19834_s6 + $0x270] sm:$0xff]  ;;  %v19940_v30 = vld [vmem:[#allocation14_spill] sm:$0xff] }
 0x561   : > { %v13367_v21 = vcombine.low %v815_v22, %v831_v38  ;;  %v18387_v16 = vld [vmem:[%s19834_s6 + $0x670] sm:$0xff]  ;;  %v18474_v26 = vmul.f32 %v18334_v53, %v19940_v30 }
 0x563   : > { %8390 = vmatpush1.bf16.msra.mxu1 %v13683_v33  ;;  %8443 = vmatpush1.bf16.msra.mxu0 %v13685_v28  ;;  %v13337_v33 = vcombine.low %v784_v31, %v800_v41  ;;  %v13368_v28 = vcombine.high %v815_v22, %v831_v38  ;;  %v18392_v31 = vld [vmem:[%s19834_s6 + $0x6f0] sm:$0xff]  ;;  %v8772_v22 = vmul.f32 %v18348_v34, %v19914_v61 }
 0x564   : > { %8391 = vmatprep.subr.bf16.mxu1 %v13716_v43  ;;  %8444 = vmatprep.subr.bf16.mxu0 %v13718_v18  ;;  %v13370_v43 = vcombine.high %v816_v17, %v832_v44  ;;  %v847_v18 = vld [vmem:[%s19834_s6 + $0x370] sm:$0xff] }
 0x565   : > { %v13400_v11 = vcombine.high %v847_v18, %v863_v5 }
 0x567   : > { %8392 = vmatpush1.bf16.msra.mxu1 %v13715_v15  ;;  %8445 = vmatpush1.bf16.msra.mxu0 %v13717_v20  ;;  %v18315_v15 = vld [vmem:[%s19834_s6 + $0x470] sm:$0xff]  ;;  %v13369_v20 = vcombine.low %v816_v17, %v832_v44  ;;  %v8801_v44 = vmul.f32 %v18334_v53, %v19915_v48 }
 0x568   : > { %8393 = vmatprep.subr.bf16.mxu1 %v13748_v6  ;;  %8446 = vmatprep.subr.bf16.mxu0 %v13750_v29  ;;  %v18320_v6 = vld [vmem:[%s19834_s6 + $0x4f0] sm:$0xff]  ;;  %v18325_v29 = vld [vmem:[%s19834_s6 + $0x478] sm:$0xff] }
 0x569   : > { %v13431_v19 = vcombine.low %v18315_v15, %v18320_v6 }
 0x56b   : > { %8394 = vmatpush1.bf16.msra.mxu1 %v13747_v47  ;;  %8447 = vmatpush1.bf16.msra.mxu0 %v13749_v50  ;;  %v13402_v47 = vcombine.high %v848_v36, %v864_v63  ;;  %v18342_v50 = vrot.slane %v17906_v45, %v17589_v46  ;;  %v13432_v45 = vcombine.high %v18315_v15, %v18320_v6  ;;  %v19939_v6 = vld [vmem:[#allocation13_spill] sm:$0xff] }
 0x56c   : > { %8395 = vmatprep.subr.bf16.mxu1 %v13780_v8  ;;  %8448 = vmatprep.subr.bf16.mxu0 %v13782_v7  ;;  %v13399_v8 = vcombine.low %v847_v18, %v863_v5  ;;  %v13401_v7 = vcombine.low %v848_v36, %v864_v63  ;;  %v18434_v5 = vld [vmem:[%s19834_s6 + $0x7f0] sm:$0xff]  ;;  %v18439_v36 = vld [vmem:[%s19834_s6 + $0x778] sm:$0xff] }
 0x56d   : > { %v8770_v41 = vmul.f32 %v18342_v50, %v19914_v61  ;;  %v18444_v63 = vld [vmem:[%s19834_s6 + $0x7f8] sm:$0xff]  ;;  %v18484_v15 = vld [vmem:[%s19834_s6 + $0x8f0] sm:$0xff] }
 0x56f   : > { %8396 = vmatpush1.bf16.msra.mxu1 %v13779_v55  ;;  %8449 = vmatpush1.bf16.msra.mxu0 %v13781_v12  ;;  %v13433_v55 = vcombine.low %v18325_v29, %v18330_v24  ;;  %v18371_v12 = vld [vmem:[%s19834_s6 + $0x578] sm:$0xff] }
 0x570   : > { %8471 = vmatprep.subr.bf16.mxu1 %v13304_v1  ;;  %8524 = vmatprep.subr.bf16.mxu0 %v13306_v37  ;;  %v18376_v1 = vld [vmem:[%s19834_s6 + $0x5f8] sm:$0xff]  ;;  %v8769_v37 = vmul.f32 %v18334_v53, %v19914_v61 }
 0x571   : > { %v13466_v17 = vcombine.high %v18371_v12, %v18376_v1 }
 0x572   : > { %8398 = vmatmul.mubr.bf16.vlgmr.msra.gmra.mrb[56].mxu1 %v14866_v62  ;;  %8451 = vmatmul.mubr.bf16.vlgmr.msra.gmra.mrb[64].mxu0 %v14866_v62 }
 0x573   : > { %8407 = vmatprep.mubr.bf16.mxu1 %v15051_v10  ;;  %8460 = vmatprep.mubr.bf16.mxu0 %v15051_v10 }
 0x574   : > { %8472 = vmatpush1.bf16.msra.mxu1 %v13303_v23  ;;  %8525 = vmatpush1.bf16.msra.mxu0 %v13305_v3  ;;  %v13464_v3 = vcombine.high %v18353_v57, %v18358_v52 }
 0x575   : > { %8473 = vmatprep.subr.bf16.mxu1 %v13336_v56  ;;  %8526 = vmatprep.subr.bf16.mxu0 %v13338_v13  ;;  %v18403_v56 = vld [vmem:[%s19834_s6 + $0x678] sm:$0xff] }
 0x576   : > { %v18408_v13 = vld [vmem:[%s19834_s6 + $0x6f8] sm:$0xff] }
 0x578   : > { %8474 = vmatpush1.bf16.msra.mxu1 %v13335_v27  ;;  %8527 = vmatpush1.bf16.msra.mxu0 %v13337_v33  ;;  %v18421_v27 = vld [vmem:[%s19834_s6 + $0x770] sm:$0xff]  ;;  %v8803_v33 = vmul.f32 %v18338_v32, %v19915_v48 }
 0x579   : > { %8475 = vmatprep.subr.bf16.mxu1 %v13368_v28  ;;  %8528 = vmatprep.subr.bf16.mxu0 %v13370_v43  ;;  %v8802_v28 = vmul.f32 %v18342_v50, %v19915_v48  ;;  %v8804_v43 = vmul.f32 %v18348_v34, %v19915_v48 }
 0x57a   : > { %8408 = vmatmul.mubr.bf16.gmra.mrb[60].mxu1 %v19909_v39  ;;  %8461 = vmatmul.mubr.bf16.gmra.mrb[68].mxu0 %v19909_v39 }
 0x57b   : > { %8503 = vmatprep.mubr.bf16.mxu1 %v19910_v9  ;;  %8556 = vmatprep.mubr.bf16.mxu0 %v19910_v9  ;;  %v13434_v9 = vcombine.high %v18325_v29, %v18330_v24  ;;  %v8833_v29 = vmul.f32 %v18334_v53, %v19939_v6  ;;  %v8835_v24 = vmul.f32 %v18338_v32, %v19939_v6 }
 0x57c   : > { %8476 = vmatpush1.bf16.msra.mxu1 %v13367_v21  ;;  %8529 = vmatpush1.bf16.msra.mxu0 %v13369_v20  ;;  %v13496_v21 = vcombine.high %v18387_v16, %v18392_v31  ;;  %v13498_v20 = vcombine.high %v18403_v56, %v18408_v13  ;;  %v18492_v53 = vmul.f32 %v18342_v50, %v19940_v30 }
 0x57d   : > { %8477 = vmatprep.subr.bf16.mxu1 %v13400_v11  ;;  %8530 = vmatprep.subr.bf16.mxu0 %v13402_v47  ;;  %v18458_v11 = vmul.f32 %v18342_v50, %v19939_v6 }
 0x580   : > { %8478 = vmatpush1.bf16.msra.mxu1 %v13399_v8  ;;  %8531 = vmatpush1.bf16.msra.mxu0 %v13401_v7  ;;  %v18462_v7 = vmul.f32 %v18348_v34, %v19939_v6 }
 0x581   : > { %8479 = vmatprep.subr.bf16.mxu1 %v13432_v45  ;;  %8532 = vmatprep.subr.bf16.mxu0 %v13434_v9  ;;  %v8081_v47 = vpop.f32.mrb[32].mxu1  ;;  %v8134_v8 = vpop.f32.mrb[40].mxu0  ;;  %v18479_v45 = vld [vmem:[%s19834_s6 + $0x870] sm:$0xff] }
 0x582   : > { %v8897_v18 = vadd.f32 %v8769_v37, %v8081_v47  ;;  %v8899_v38 = vadd.f32 %v8771_v0, %v8134_v8  ;;  %v8083_v23 = vpop.f32.mrb[33].mxu1  ;;  %v8136_v40 = vpop.f32.mrb[41].mxu0  ;;  %v18488_v8 = vmul.f32 %v18338_v32, %v19940_v30  ;;  %v18505_v32 = vld [vmem:[%s19834_s6 + $0x8f8] sm:$0xff] }
 0x583   : > { %v8898_v37 = vadd.f32 %v8770_v41, %v8083_v23  ;;  %v8085_v0 = vpop.f32.mrb[34].mxu1  ;;  %v8138_v47 = vpop.f32.mrb[42].mxu0 }
 0x584   : > { %8480 = vmatpush1.bf16.msra.mxu1 %v13431_v19  ;;  %8533 = vmatpush1.bf16.msra.mxu0 %v13433_v55  ;;  %v9041_v46 = vadd.f32 %v17214_v4, %v8897_v18  ;;  %v8929_v9 = vadd.f32 %v8801_v44, %v8085_v0  ;;  %v8087_v60 = vpop.f32.mrb[35].mxu1  ;;  %v8140_v59 = vpop.f32.mrb[43].mxu0  ;;  %v8868_v19 = vmul.f32 %v18348_v34, %v19940_v30  ;;  %v18500_v55 = vld [vmem:[%s19834_s6 + $0x878] sm:$0xff]  ;;  %v18516_v0 = vld [vmem:[%s19834_s6 + $0x970] sm:$0xff] }
 0x585   : > { %8481 = vmatprep.subr.bf16.mxu1 %v13464_v3  ;;  %8534 = vmatprep.subr.bf16.mxu0 %v13466_v17  ;;  %v9043_v50 = vadd.f32 %v17214_v4, %v8899_v38  ;;  %v8931_v41 = vadd.f32 %v8803_v33, %v8138_v47  ;;  %v8930_v23 = vadd.f32 %v8802_v28, %v8087_v60  ;;  %v18521_v38 = vld [vmem:[%s19834_s6 + $0x9f0] sm:$0xff] }
 0x586   : > { %v8900_v17 = vadd.f32 %v8772_v22, %v8136_v40  ;;  %v9073_v34 = vadd.f32 %v17383_v42, %v8929_v9  ;;  %v8932_v44 = vadd.f32 %v8804_v43, %v8140_v59  ;;  %v13560_v18 = vcombine.high %v18479_v45, %v18484_v15 }
 0x587   : > { %v9042_v60 = vadd.f32 %v17214_v4, %v8898_v37  ;;  %v9075_v40 = vadd.f32 %v17383_v42, %v8931_v41  ;;  %v19941_v59 = vcombine.low %v18353_v57, %v18358_v52  ;;  %v19942_v22 = vcombine.low %v18371_v12, %v18376_v1 }
 0x588   : > { %v13561_v33 = vcombine.low %v18500_v55, %v18505_v32  ;;  %v9169_v28 = vmax.f32 %v9041_v46, 0.0  ;;  %v9201_v43 = vmax.f32 %v9073_v34, 0.0  ;;  %v9074_v9 = vadd.f32 %v17383_v42, %v8930_v23 }
 0x589   : > { %8482 = vmatpush1.bf16.msra.mxu1 %v19941_v59  ;;  %8535 = vmatpush1.bf16.msra.mxu0 %v19942_v22  ;;  %v9076_v47 = vadd.f32 %v17383_v42, %v8932_v44  ;;  %v9171_v37 = vmax.f32 %v9043_v50, 0.0  ;;  %v9203_v41 = vmax.f32 %v9075_v40, 0.0  ;;  %v8091_v3 = vpop.f32.mrb[36].mxu1  ;;  %v8144_v57 = vpop.f32.mrb[44].mxu0  ;;  %v13562_v52 = vcombine.high %v18500_v55, %v18505_v32  ;;  %v1120_v55 = vld [vmem:[%s19834_s6 + $0xbf8] sm:$0xff] }
 0x58a   : > { %8483 = vmatprep.subr.bf16.mxu1 %v13496_v21  ;;  %8536 = vmatprep.subr.bf16.mxu0 %v13498_v20  ;;  %v13592_v12 = vcombine.high %v18516_v0, %v18521_v38  ;;  %v9044_v1 = vadd.f32 %v17214_v4, %v8900_v17  ;;  %v18540_v46 = vpack.c.bf16 %v9201_v43, %v9169_v28  ;;  %v8093_v59 = vpop.f32.mrb[37].mxu1  ;;  %v8146_v44 = vpop.f32.mrb[45].mxu0  ;;  %v9170_v21 = vmax.f32 %v9042_v60, 0.0 }
 0x58b   : > { %v8961_v34 = vadd.f32 %v8833_v29, %v8091_v3  ;;  %v8963_v23 = vadd.f32 %v8835_v24, %v8144_v57  ;;  %v18542_v20 = vpack.c.bf16 %v9203_v41, %v9171_v37  ;;  %v19943_v50 = vcombine.low %v18387_v16, %v18392_v31  ;;  %v8095_v28 = vpop.f32.mrb[38].mxu1  ;;  %v8148_v29 = vpop.f32.mrb[46].mxu0 }
 0x58c   : > { %v19944_v40 = vcombine.low %v18403_v56, %v18408_v13  ;;  %v8962_v22 = vadd.f32 %v18458_v11, %v8093_v59  ;;  %v8964_v17 = vadd.f32 %v18462_v7, %v8146_v44  ;;  %v9202_v24 = vmax.f32 %v9074_v9, 0.0  ;;  %v8097_v56 = vpop.f32.mrb[39].mxu1  ;;  %v8150_v13 = vpop.f32.mrb[47].mxu0  ;;  %v1040_v11 = vld [vmem:[%s19834_s6 + $0x978] sm:$0xff] }
 0x58d   : > { %8484 = vmatpush1.bf16.msra.mxu1 %v19943_v50  ;;  %v9204_v3 = vmax.f32 %v9076_v47, 0.0  ;;  %v9105_v60 = vadd.f32 %v17374_v2, %v8961_v34  ;;  %v19945_v43 = vcombine.high %v18421_v27, %v18434_v5  ;;  %v19946_v16 = vcombine.high %v18439_v36, %v18444_v63  ;;  %v1056_v7 = vld [vmem:[%s19834_s6 + $0x9f8] sm:$0xff] }
 0x58e   : > { %8537 = vmatpush1.bf16.msra.mxu0 %v19944_v40  ;;  %v8993_v31 = vadd.f32 %v18474_v26, %v8095_v28  ;;  %v9107_v9 = vadd.f32 %v17374_v2, %v8963_v23  ;;  %v9106_v47 = vadd.f32 %v17374_v2, %v8962_v22  ;;  %v8995_v37 = vadd.f32 %v18488_v8, %v8148_v29 }
 0x58f   : > { %8485 = vmatprep.subr.bf16.mxu1 %v19945_v43  ;;  %8538 = vmatprep.subr.bf16.mxu0 %v19946_v16  ;;  %v8994_v41 = vadd.f32 %v18492_v53, %v8097_v56  ;;  %v9172_v57 = vmax.f32 %v9044_v1, 0.0  ;;  %v9108_v26 = vadd.f32 %v17374_v2, %v8964_v17  ;;  %v8996_v59 = vadd.f32 %v8868_v19, %v8150_v13  ;;  %v1071_v19 = vld [vmem:[%s19834_s6 + $0xa70] sm:$0xff] }
 0x590   : > { %v9137_v34 = vadd.f32 %v17414_v51, %v8993_v31  ;;  %v9233_v44 = vmax.f32 %v9105_v60, 0.0  ;;  %v9139_v50 = vadd.f32 %v17414_v51, %v8995_v37  ;;  %v19947_v40 = vcombine.low %v18421_v27, %v18434_v5  ;;  %v1087_v27 = vld [vmem:[%s19834_s6 + $0xaf0] sm:$0xff]  ;;  %v1136_v37 = vld [vmem:[%s19834_s6 + $0xc78] sm:$0xff] }
 0x591   : > { %v19948_v23 = vcombine.low %v18439_v36, %v18444_v63  ;;  %v9138_v8 = vadd.f32 %v17414_v51, %v8994_v41  ;;  %v13594_v53 = vcombine.high %v1040_v11, %v1056_v7  ;;  %v9140_v22 = vadd.f32 %v17414_v51, %v8996_v59  ;;  %v1152_v41 = vld [vmem:[%s19834_s6 + $0xcf8] sm:$0xff] }
 0x592   : > { %8486 = vmatpush1.bf16.msra.mxu1 %v19947_v40  ;;  %v9265_v1 = vmax.f32 %v9137_v34, 0.0  ;;  %v18587_v5 = vpack.c.bf16 %v9202_v24, %v9170_v21  ;;  %v18589_v36 = vpack.c.bf16 %v9204_v3, %v9172_v57  ;;  %v9235_v63 = vmax.f32 %v9107_v9, 0.0  ;;  %v1168_v40 = vld [vmem:[%s19834_s6 + $0xd78] sm:$0xff] }
 0x593   : > { %8539 = vmatpush1.bf16.msra.mxu0 %v19948_v23  ;;  %8487 = vmatprep.subr.bf16.mxu1 %v13560_v18  ;;  %v9234_v17 = vmax.f32 %v9106_v47, 0.0  ;;  %v9267_v28 = vmax.f32 %v9139_v50, 0.0  ;;  %v9266_v29 = vmax.f32 %v9138_v8, 0.0  ;;  %v1072_v18 = vld [vmem:[%s19834_s6 + $0xa78] sm:$0xff]  ;;  %v9236_v60 = vmax.f32 %v9108_v26, 0.0  ;;  %v1151_v47 = vld [vmem:[%s19834_s6 + $0xcf0] sm:$0xff] }
 0x594   : > { %8540 = vmatprep.subr.bf16.mxu0 %v13562_v52  ;;  %v1088_v52 = vld [vmem:[%s19834_s6 + $0xaf8] sm:$0xff]  ;;  %v18597_v43 = vpack.c.bf16 %v9265_v1, %v9233_v44  ;;  %v9268_v16 = vmax.f32 %v9140_v22, 0.0  ;;  %v13591_v21 = vcombine.low %v18516_v0, %v18521_v38  ;;  %v19949_v3 = vcombine.low %v18479_v45, %v18484_v15  ;;  %v1103_v0 = vld [vmem:[%s19834_s6 + $0xb70] sm:$0xff] }
 0x595   : > { %v18601_v24 = vpack.c.bf16 %v9267_v28, %v9235_v63  ;;  %v13593_v31 = vcombine.low %v1040_v11, %v1056_v7  ;;  %v18609_v56 = vpack.c.bf16 %v9266_v29, %v9234_v17  ;;  %v13624_v13 = vcombine.high %v1071_v19, %v1087_v27  ;;  %v1119_v15 = vld [vmem:[%s19834_s6 + $0xbf0] sm:$0xff]  ;;  %v1104_v45 = vld [vmem:[%s19834_s6 + $0xb78] sm:$0xff] }
 0x596   : > { %8488 = vmatpush1.bf16.msra.mxu1 %v19949_v3  ;;  %v13626_v9 = vcombine.high %v1072_v18, %v1088_v52  ;;  %v18614_v38 = vpack.c.bf16 %v9268_v16, %v9236_v60  ;;  %v13623_v32 = vcombine.low %v1071_v19, %v1087_v27  ;;  %v13658_v11 = vcombine.high %v1104_v45, %v1120_v55  ;;  %v1135_v7 = vld [vmem:[%s19834_s6 + $0xc70] sm:$0xff]  ;;  %v1184_v23 = vld [vmem:[%s19834_s6 + $0xdf8] sm:$0xff] }
 0x597   : > { %8541 = vmatpush1.bf16.msra.mxu0 %v13561_v33  ;;  %8489 = vmatprep.subr.bf16.mxu1 %v13592_v12  ;;  %v13625_v33 = vcombine.low %v1072_v18, %v1088_v52  ;;  %v13656_v12 = vcombine.high %v1103_v0, %v1119_v15  ;;  %v13655_v57 = vcombine.low %v1103_v0, %v1119_v15  ;;  %v1167_v44 = vld [vmem:[%s19834_s6 + $0xd70] sm:$0xff]  ;;  %v1200_v63 = vld [vmem:[%s19834_s6 + $0xe78] sm:$0xff] }
 0x598   : > { %8542 = vmatprep.subr.bf16.mxu0 %v13594_v53  ;;  %v13657_v26 = vcombine.low %v1104_v45, %v1120_v55  ;;  %v13688_v34 = vcombine.high %v1135_v7, %v1151_v47  ;;  %v13690_v59 = vcombine.high %v1136_v37, %v1152_v41  ;;  %v1183_v50 = vld [vmem:[%s19834_s6 + $0xdf0] sm:$0xff]  ;;  %v13687_v8 = vcombine.low %v1135_v7, %v1151_v47  ;;  %v1216_v17 = vld [vmem:[%s19834_s6 + $0xef8] sm:$0xff]  ;;  %v19950_v55 = vld [vmem:[#allocation15_spill] sm:$0xff] }
 0x599   : > { %v13689_v53 = vcombine.low %v1136_v37, %v1152_v41  ;;  %v13720_v1 = vcombine.high %v1167_v44, %v1183_v50  ;;  %v13722_v22 = vcombine.high %v1168_v40, %v1184_v23  ;;  %v1199_v19 = vld [vmem:[%s19834_s6 + $0xe70] sm:$0xff]  ;;  %v13719_v28 = vcombine.low %v1167_v44, %v1183_v50  ;;  %v1248_v3 = vld [vmem:[%s19834_s6 + $0xff8] sm:$0xff]  ;;  %v19955_v7 = vld [vmem:[#allocation20_spill] sm:$0xff] }
 0x59a   : > { %8490 = vmatpush1.bf16.msra.mxu1 %v13591_v21  ;;  %v1215_v27 = vld [vmem:[%s19834_s6 + $0xef0] sm:$0xff]  ;;  %v13721_v29 = vcombine.low %v1168_v40, %v1184_v23  ;;  %v13754_v52 = vcombine.high %v1200_v63, %v1216_v17  ;;  %v1232_v21 = vld [vmem:[%s19834_s6 + $0xf78] sm:$0xff]  ;;  %v19964_v23 = vld [vmem:[#allocation11_spill] sm:$0xff] }
 0x59b   : > { %8543 = vmatpush1.bf16.msra.mxu0 %v13593_v31  ;;  %8491 = vmatprep.subr.bf16.mxu1 %v13624_v13  ;;  %v13752_v18 = vcombine.high %v1199_v19, %v1215_v27  ;;  %v1231_v60 = vld [vmem:[%s19834_s6 + $0xf70] sm:$0xff]  ;;  %v13751_v31 = vcombine.low %v1199_v19, %v1215_v27  ;;  %v13753_v13 = vcombine.low %v1200_v63, %v1216_v17  ;;  %v19957_v37 = vld [vmem:[#allocation22_spill] sm:$0xff] }
 0x59c   : > { %8544 = vmatprep.subr.bf16.mxu0 %v13626_v9  ;;  %v1247_v16 = vld [vmem:[%s19834_s6 + $0xff0] sm:$0xff]  ;;  %v13786_v0 = vcombine.high %v1232_v21, %v1248_v3  ;;  %v13785_v45 = vcombine.low %v1232_v21, %v1248_v3  ;;  %v19963_v50 = vld [vmem:[#allocation10_spill] sm:$0xff]  ;;  %v19965_v3 = vld [vmem:[#allocation7_spill] sm:$0xff] }
 0x59d   : > { %v13784_v9 = vcombine.high %v1231_v60, %v1247_v16  ;;  %v13783_v15 = vcombine.low %v1231_v60, %v1247_v16  ;;  %v19956_v47 = vld [vmem:[#allocation21_spill] sm:$0xff] }
 0x59e   : > { %8492 = vmatpush1.bf16.msra.mxu1 %v13623_v32  ;;  %v19951_v32 = vld [vmem:[#allocation16_spill] sm:$0xff]  ;;  %v18686_v41 = vld [vmem:[%s17060_s13 + $0x10] sm:$0xff] }
 0x59f   : > { %8545 = vmatpush1.bf16.msra.mxu0 %v13625_v33  ;;  %8493 = vmatprep.subr.bf16.mxu1 %v13656_v12  ;;  %v19952_v33 = vld [vmem:[#allocation17_spill] sm:$0xff]  ;;  %v19953_v12 = vld [vmem:[#allocation18_spill] sm:$0xff]  ;;  %v8668_v40 = vrot.slane %v18686_v41, %v19963_v50 }
 0x5a0   : > { %8546 = vmatprep.subr.bf16.mxu0 %v13658_v11  ;;  %v19954_v11 = vld [vmem:[#allocation19_spill] sm:$0xff] }
 0x5a1   : > { %v8806_v17 = vmul.f32 %v8668_v40, %v19915_v48  ;;  %v8838_v16 = vmul.f32 %v8668_v40, %v19939_v6 }
 0x5a2   : > { %8494 = vmatpush1.bf16.msra.mxu1 %v13655_v57  ;;  %v19958_v57 = vld [vmem:[#allocation26_spill] sm:$0xff] }
 0x5a3   : > { %8547 = vmatpush1.bf16.msra.mxu0 %v13657_v26  ;;  %8495 = vmatprep.subr.bf16.mxu1 %v13688_v34  ;;  %v19961_v26 = vld [vmem:[#allocation8_spill] sm:$0xff] }
 0x5a4   : > { %8548 = vmatprep.subr.bf16.mxu0 %v13690_v59  ;;  %v8664_v34 = vrot.slane %v18686_v41, %v19961_v26  ;;  %v19962_v59 = vld [vmem:[#allocation9_spill] sm:$0xff] }
 0x5a5   : > { %v8672_v44 = vrot.slane %v18686_v41, %v19962_v59 }
 0x5a6   : > { %8496 = vmatpush1.bf16.msra.mxu1 %v13687_v8  ;;  %v8676_v8 = vrot.slane %v18686_v41, %v19964_v23  ;;  %v8805_v27 = vmul.f32 %v8664_v34, %v19915_v48 }
 0x5a7   : > { %8549 = vmatpush1.bf16.msra.mxu0 %v13689_v53  ;;  %8497 = vmatprep.subr.bf16.mxu1 %v13720_v1  ;;  %v18702_v53 = vpop.permute.xlu0 %9365  ;;  %v8775_v1 = vmul.f32 %v8672_v44, %v19914_v61  ;;  %v8807_v63 = vmul.f32 %v8672_v44, %v19915_v48  ;;  %v8839_v60 = vmul.f32 %v8672_v44, %v19939_v6 }
 0x5a8   : > { %8550 = vmatprep.subr.bf16.mxu0 %v13722_v22  ;;  %v8774_v22 = vmul.f32 %v8668_v40, %v19914_v61  ;;  %v8776_v19 = vmul.f32 %v8676_v8, %v19914_v61  ;;  %v8840_v21 = vmul.f32 %v8676_v8, %v19939_v6 }
 0x5aa   : > { %8498 = vmatpush1.bf16.msra.mxu1 %v13719_v28  ;;  %v8808_v28 = vmul.f32 %v8676_v8, %v19915_v48 }
 0x5ab   : > { %8551 = vmatpush1.bf16.msra.mxu0 %v13721_v29  ;;  %8499 = vmatprep.subr.bf16.mxu1 %v13752_v18  ;;  %v8837_v29 = vmul.f32 %v8664_v34, %v19939_v6 }
 0x5ac   : > { %8552 = vmatprep.subr.bf16.mxu0 %v13754_v52 }
 0x5ae   : > { %8500 = vmatpush1.bf16.msra.mxu1 %v13751_v31  ;;  %v19966_v31 = vld [vmem:[#allocation12_spill] sm:$0xff] }
 0x5af   : > { %8553 = vmatpush1.bf16.msra.mxu0 %v13753_v13  ;;  %8501 = vmatprep.subr.bf16.mxu1 %v13784_v9 }
 0x5b0   : > { %8554 = vmatprep.subr.bf16.mxu0 %v13786_v0 }
 0x5b2   : > { %8502 = vmatpush1.bf16.msra.mxu1 %v13783_v15 }
 0x5b3   : > { %8555 = vmatpush1.bf16.msra.mxu0 %v13785_v45  ;;  %9375 = vmatprep.subr.bf16.mxu1 %v19950_v55  ;;  %v8869_v45 = vmul.f32 %v8664_v34, %v19940_v30  ;;  %v19967_v55 = vld [vmem:[#allocation28_spill] sm:$0xff] }
 0x5b4   : > { %9428 = vmatprep.subr.bf16.mxu0 %v19951_v32  ;;  %v19968_v32 = vld [vmem:[#allocation29_spill] sm:$0xff] }
 0x5b5   : > { %8504 = vmatmul.mubr.bf16.vlgmr.msra.gmra.mrb[64].mxu1 %v14866_v62 }
 0x5b6   : > { %8557 = vmatmul.mubr.bf16.vlgmr.msra.gmra.mrb[72].mxu0 %v14866_v62  ;;  %8513 = vmatprep.mubr.bf16.mxu1 %v15051_v10  ;;  %v19959_v62 = vld [vmem:[#allocation27_spill] sm:$0xff] }
 0x5b7   : > { %8566 = vmatprep.mubr.bf16.mxu0 %v15051_v10  ;;  %9376 = vmatpush1.bf16.msra.mxu1 %v19952_v33  ;;  %v19960_v10 = vmov 0  }
 0x5b8   : > { %9429 = vmatpush1.bf16.msra.mxu0 %v19953_v12  ;;  %9377 = vmatprep.subr.bf16.mxu1 %v19954_v11 }
 0x5b9   : > { %9430 = vmatprep.subr.bf16.mxu0 %v19955_v7 }
 0x5bb   : > { %9378 = vmatpush1.bf16.msra.mxu1 %v19956_v47  ;;  %v8871_v47 = vmul.f32 %v8672_v44, %v19940_v30  ;;  %v19970_v44 = vld [vmem:[#allocation25_spill] sm:$0xff] }
 0x5bc   : > { %9431 = vmatpush1.bf16.msra.mxu0 %v19957_v37  ;;  %9481 = vmatprep.subr.bf16.mxu1 %v19958_v57 }
 0x5bd   : > { %9534 = vmatprep.subr.bf16.mxu0 %v19959_v62  ;;  %8514 = vmatmul.mubr.bf16.gmra.mrb[68].mxu1 %v19909_v39 }
 0x5be   : > { %8567 = vmatmul.mubr.bf16.gmra.mrb[76].mxu0 %v19909_v39  ;;  %9407 = vmatprep.mubr.bf16.mxu1 %v19960_v10  ;;  %v8773_v39 = vmul.f32 %v8664_v34, %v19914_v61 }
 0x5bf   : > { %9460 = vmatprep.mubr.bf16.mxu0 %v19960_v10 }
 0x5c2   : > { %v8187_v18 = vpop.f32.mrb[40].mxu1  ;;  %v8240_v52 = vpop.f32.mrb[48].mxu0 }
 0x5c3   : > { %v8901_v13 = vadd.f32 %v8773_v39, %v8187_v18  ;;  %v8903_v9 = vadd.f32 %v8775_v1, %v8240_v52  ;;  %v8189_v0 = vpop.f32.mrb[41].mxu1  ;;  %v8242_v15 = vpop.f32.mrb[49].mxu0 }
 0x5c4   : > { %v8902_v33 = vadd.f32 %v8774_v22, %v8189_v0  ;;  %v8904_v12 = vadd.f32 %v8776_v19, %v8242_v15  ;;  %v8191_v11 = vpop.f32.mrb[42].mxu1  ;;  %v8244_v7 = vpop.f32.mrb[50].mxu0 }
 0x5c5   : > { %13787 = vmatmul.mubr.msk.bf16.vlgmr.msra.gmra.mrb[72].mxu1 %vm602_vm2, %v18702_v53  ;;  %v9045_v37 = vadd.f32 %v17214_v4, %v8901_v13  ;;  %v9047_v57 = vadd.f32 %v17214_v4, %v8903_v9  ;;  %v8933_v62 = vadd.f32 %v8805_v27, %v8191_v11  ;;  %v8935_v39 = vadd.f32 %v8807_v63, %v8244_v7  ;;  %v8193_v1 = vpop.f32.mrb[43].mxu1  ;;  %v8246_v18 = vpop.f32.mrb[51].mxu0 }
 0x5c6   : > { %13789 = vmatmul.mubr.msk.bf16.vlgmr.msra.gmra.mrb[80].mxu0 %vm602_vm2, %v18702_v53  ;;  %9482 = vmatpush1.bf16.msra.mxu1 %v19965_v3  ;;  %v9046_v34 = vadd.f32 %v17214_v4, %v8902_v33  ;;  %v9048_v52 = vadd.f32 %v17214_v4, %v8904_v12  ;;  %v8934_v22 = vadd.f32 %v8806_v17, %v8193_v1  ;;  %v19969_v3 = vld [vmem:[#allocation6_spill] sm:$0xff]  ;;  %v18736_v63 = vpop.permute.xlu1 %9367 }
 0x5c7   : > { %9535 = vmatpush1.bf16.msra.mxu0 %v19966_v31  ;;  %9483 = vmatprep.subr.bf16.mxu1 %v19967_v55  ;;  %v8936_v19 = vadd.f32 %v8808_v28, %v8246_v18  ;;  %v9077_v31 = vadd.f32 %v17383_v42, %v8933_v62  ;;  %v9079_v27 = vadd.f32 %v17383_v42, %v8935_v39  ;;  %v9173_v0 = vmax.f32 %v9045_v37, 0.0 }
 0x5c8   : > { %9536 = vmatprep.subr.bf16.mxu0 %v19968_v32  ;;  %9417 = vmatprep.mubr.bf16.mxu1 %v19960_v10  ;;  %v8870_v13 = vmul.f32 %v8668_v40, %v19940_v30  ;;  %v9078_v17 = vadd.f32 %v17383_v42, %v8934_v22  ;;  %v8872_v9 = vmul.f32 %v8676_v8, %v19940_v30  ;;  %v9175_v15 = vmax.f32 %v9047_v57, 0.0 }
 0x5c9   : > { %9470 = vmatprep.mubr.bf16.mxu0 %v19960_v10  ;;  %v9080_v28 = vadd.f32 %v17383_v42, %v8936_v19  ;;  %v9205_v55 = vmax.f32 %v9077_v31, 0.0  ;;  %v9207_v32 = vmax.f32 %v9079_v27, 0.0  ;;  %v9174_v33 = vmax.f32 %v9046_v34, 0.0 }
 0x5ca   : > { %9484 = vmatpush1.bf16.msra.mxu1 %v19969_v3  ;;  %v9176_v12 = vmax.f32 %v9048_v52, 0.0  ;;  %v9206_v11 = vmax.f32 %v9078_v17, 0.0 }
 0x5cb   : > { %9537 = vmatpush1.bf16.msra.mxu0 %v19970_v44  ;;  %9587 = vmatprep.subr.bf16.mxu1 %v18192_v54  ;;  %v9208_v7 = vmax.f32 %v9080_v28, 0.0  ;;  %v8197_v54 = vpop.f32.mrb[44].mxu1  ;;  %v18748_v40 = vpack.c.bf16 %v9205_v55, %v9173_v0  ;;  %v18750_v62 = vpack.c.bf16 %v9207_v32, %v9175_v15 }
 0x5cc   : > { %9640 = vmatprep.subr.bf16.mxu0 %v18194_v49  ;;  %v8250_v49 = vpop.f32.mrb[52].mxu0  ;;  %v8965_v8 = vadd.f32 %v8837_v29, %v8197_v54  ;;  %v8199_v57 = vpop.f32.mrb[45].mxu1  ;;  %v18754_v22 = vpack.c.bf16 %v9206_v11, %v9174_v33 }
 0x5cd   : > { %13788 = vmatmul.mubr.msk.bf16.gmra.mrb[76].mxu1 %vm602_vm2, %v18736_v63  ;;  %v8967_v37 = vadd.f32 %v8839_v60, %v8250_v49  ;;  %v8252_v39 = vpop.f32.mrb[53].mxu0  ;;  %v8966_v1 = vadd.f32 %v8838_v16, %v8199_v57  ;;  %v8201_v34 = vpop.f32.mrb[46].mxu1  ;;  %v18756_v19 = vpack.c.bf16 %v9208_v7, %v9176_v12  ;;  %v14427_v57 = vmov 3  }
 0x5ce   : > { %13790 = vmatmul.mubr.msk.bf16.gmra.mrb[84].mxu0 %vm602_vm2, %v18736_v63  ;;  %9513 = vmatprep.mubr.bf16.mxu1 %v19960_v10  ;;  %v8968_v18 = vadd.f32 %v8840_v21, %v8252_v39  ;;  %v8254_v52 = vpop.f32.mrb[54].mxu0  ;;  %v9109_v3 = vadd.f32 %v17374_v2, %v8965_v8  ;;  %v8997_v29 = vadd.f32 %v8869_v45, %v8201_v34  ;;  %v8203_v31 = vpop.f32.mrb[47].mxu1  ;;  %v19971_v39 = vld [vmem:[#allocation30_spill] sm:$0xff] }
 0x5cf   : > { %9566 = vmatprep.mubr.bf16.mxu0 %v19960_v10  ;;  %v9111_v44 = vadd.f32 %v17374_v2, %v8967_v37  ;;  %v8999_v60 = vadd.f32 %v8871_v47, %v8254_v52  ;;  %v8256_v27 = vpop.f32.mrb[55].mxu0  ;;  %v9110_v17 = vadd.f32 %v17374_v2, %v8966_v1  ;;  %v8998_v21 = vadd.f32 %v8870_v13, %v8203_v31  ;;  %v19972_v1 = vld [vmem:[#allocation31_spill] sm:$0xff] }
 0x5d0   : > { %v9112_v16 = vadd.f32 %v17374_v2, %v8968_v18  ;;  %v9000_v28 = vadd.f32 %v8872_v9, %v8256_v27  ;;  %v9141_v0 = vadd.f32 %v17414_v51, %v8997_v29  ;;  %v9237_v33 = vmax.f32 %v9109_v3, 0.0  ;;  %14236 = vset.pattern.permute.xlu1 %v14427_v57  ;;  %14235 = vset.pattern.permute.xlu0 %v14427_v57 }
 0x5d1   : > { %v9143_v15 = vadd.f32 %v17414_v51, %v8999_v60  ;;  %v9142_v55 = vadd.f32 %v17414_v51, %v8998_v21  ;;  %v9239_v12 = vmax.f32 %v9111_v44, 0.0  ;;  %v9238_v11 = vmax.f32 %v9110_v17, 0.0 }
 0x5d2   : > { %v9144_v32 = vadd.f32 %v17414_v51, %v9000_v28  ;;  %v9269_v45 = vmax.f32 %v9141_v0, 0.0  ;;  %v9240_v7 = vmax.f32 %v9112_v16, 0.0 }
 0x5d3   : > { %v9271_v47 = vmax.f32 %v9143_v15, 0.0  ;;  %v9270_v54 = vmax.f32 %v9142_v55, 0.0 }
 0x5d4   : > { %v9272_v49 = vmax.f32 %v9144_v32, 0.0  ;;  %v9333_v13 = vpack.c.bf16 %v9269_v45, %v9237_v33 }
 0x5d5   : > { %13791 = vmatmul.mubr.msk.bf16.vlgmr.msra.gmra.mrb[80].mxu1 %vm602_vm2, %v18702_v53  ;;  %v9335_v9 = vpack.c.bf16 %v9271_v47, %v9239_v12  ;;  %v9334_v8 = vpack.c.bf16 %v9270_v54, %v9238_v11 }
 0x5d6   : > { %13793 = vmatmul.mubr.msk.bf16.vlgmr.msra.gmra.mrb[88].mxu0 %vm602_vm2, %v18702_v53  ;;  %9588 = vmatpush1.bf16.msra.mxu1 %v18129_v25  ;;  %v9336_v37 = vpack.c.bf16 %v9272_v49, %v9240_v7  ;;  %v14393_v25 = vld [vmem:[%s19832_s4 + $0x8] sm:$0xff] }
 0x5d7   : > { %9641 = vmatpush1.bf16.msra.mxu0 %v18131_v14  ;;  %9589 = vmatprep.subr.bf16.mxu1 %v18208_v35  ;;  %v14394_v14 = vld [vmem:[%s19832_s4] sm:$0xff]  ;;  %v14395_v35 = vld [vmem:[%s19832_s4 + $0x10] sm:$0xff] }
 0x5d8   : > { %9642 = vmatprep.subr.bf16.mxu0 %v18210_v58  ;;  %9523 = vmatprep.mubr.bf16.mxu1 %v19960_v10  ;;  %v14396_v58 = vld [vmem:[%s19832_s4 + $0x18] sm:$0xff] }
 0x5d9   : > { %9576 = vmatprep.mubr.bf16.mxu0 %v19960_v10  ;;  %9354 = vperm.xlu1 %14236, %v14393_v25  }
 0x5da   : > { %9590 = vmatpush1.bf16.msra.mxu1 %v19971_v39  ;;  %9350 = vperm.xlu0 %14235, %v14394_v14  }
 0x5db   : > { %9643 = vmatpush1.bf16.msra.mxu0 %v19972_v1  ;;  %9693 = vmatprep.subr.bf16.mxu1 %v18587_v5  ;;  %v19974_v5 = vld [vmem:[#allocation24_spill] sm:$0xff] }
 0x5dc   : > { %9746 = vmatprep.subr.bf16.mxu0 %v18589_v36  ;;  %v8688_v36 = vrot.slane %v18686_v41, %v19974_v5 }
 0x5dd   : > { %13792 = vmatmul.mubr.msk.bf16.gmra.mrb[84].mxu1 %vm602_vm2, %v18736_v63  ;;  %9358 = vperm.xlu1 %14236, %v14395_v35  }
 0x5de   : > { %13794 = vmatmul.mubr.msk.bf16.gmra.mrb[92].mxu0 %vm602_vm2, %v18736_v63  ;;  %9619 = vmatprep.mubr.bf16.mxu1 %v19960_v10  ;;  %v8843_v16 = vmul.f32 %v8688_v36, %v19939_v6  ;;  %v8875_v39 = vmul.f32 %v8688_v36, %v19940_v30 }
 0x5df   : > { %9672 = vmatprep.mubr.bf16.mxu0 %v19960_v10  ;;  %9362 = vperm.xlu0 %14235, %v14396_v58  }
 0x5e5   : > { %13795 = vmatmul.mubr.msk.bf16.vlgmr.msra.gmra.mrb[88].mxu1 %vm602_vm2, %v18702_v53 }
 0x5e6   : > { %13797 = vmatmul.mubr.msk.bf16.vlgmr.msra.gmra.mrb[96].mxu0 %vm602_vm2, %v18702_v53  ;;  %9694 = vmatpush1.bf16.msra.mxu1 %v18540_v46  ;;  %v19973_v46 = vld [vmem:[#allocation23_spill] sm:$0xff] }
 0x5e7   : > { %9747 = vmatpush1.bf16.msra.mxu0 %v18542_v20  ;;  %9695 = vmatprep.subr.bf16.mxu1 %v18609_v56  ;;  %v8680_v20 = vrot.slane %v18686_v41, %v19973_v46  ;;  %v19976_v56 = vld [vmem:[#allocation3_spill] sm:$0xff] }
 0x5e8   : > { %9748 = vmatprep.subr.bf16.mxu0 %v18614_v38  ;;  %9629 = vmatprep.mubr.bf16.mxu1 %v19960_v10  ;;  %v8692_v38 = vrot.slane %v18686_v41, %v19976_v56 }
 0x5e9   : > { %9682 = vmatprep.mubr.bf16.mxu0 %v19960_v10  ;;  %v8809_v52 = vmul.f32 %v8680_v20, %v19915_v48  ;;  %v8841_v17 = vmul.f32 %v8680_v20, %v19939_v6  ;;  %v8873_v57 = vmul.f32 %v8680_v20, %v19940_v30 }
 0x5ea   : > { %9696 = vmatpush1.bf16.msra.mxu1 %v18597_v43  ;;  %v19975_v43 = vld [vmem:[#allocation4_spill] sm:$0xff]  ;;  %v8780_v34 = vmul.f32 %v8692_v38, %v19914_v61  ;;  %v8812_v44 = vmul.f32 %v8692_v38, %v19915_v48  ;;  %v8844_v32 = vmul.f32 %v8692_v38, %v19939_v6  ;;  %v8876_v35 = vmul.f32 %v8692_v38, %v19940_v30 }
 0x5eb   : > { %9749 = vmatpush1.bf16.msra.mxu0 %v18601_v24  ;;  %9799 = vmatprep.subr.bf16.mxu1 %v18754_v22  ;;  %v8684_v24 = vrot.slane %v18686_v41, %v19975_v43  ;;  %v8811_v22 = vmul.f32 %v8688_v36, %v19915_v48 }
 0x5ec   : > { %9852 = vmatprep.subr.bf16.mxu0 %v18756_v19 }
 0x5ed   : > { %13796 = vmatmul.mubr.msk.bf16.gmra.mrb[92].mxu1 %vm602_vm2, %v18736_v63  ;;  %v8778_v18 = vmul.f32 %v8684_v24, %v19914_v61  ;;  %v8810_v3 = vmul.f32 %v8684_v24, %v19915_v48  ;;  %v8842_v55 = vmul.f32 %v8684_v24, %v19939_v6  ;;  %v8874_v14 = vmul.f32 %v8684_v24, %v19940_v30 }
 0x5ee   : > { %13798 = vmatmul.mubr.msk.bf16.gmra.mrb[100].mxu0 %vm602_vm2, %v18736_v63  ;;  %9725 = vmatprep.mubr.bf16.mxu1 %v19960_v10 }
 0x5ef   : > { %9778 = vmatprep.mubr.bf16.mxu0 %v19960_v10 }
 0x5f5   : > { %13799 = vmatmul.mubr.msk.bf16.vlgmr.msra.gmra.mrb[96].mxu1 %vm602_vm2, %v18702_v53 }
 0x5f6   : > { %13801 = vmatmul.mubr.msk.bf16.vlgmr.msra.gmra.mrb[104].mxu0 %vm602_vm2, %v18702_v53  ;;  %9800 = vmatpush1.bf16.msra.mxu1 %v18748_v40  ;;  %v8777_v40 = vmul.f32 %v8680_v20, %v19914_v61 }
 0x5f7   : > { %9853 = vmatpush1.bf16.msra.mxu0 %v18750_v62  ;;  %9801 = vmatprep.subr.bf16.mxu1 %v9334_v8  ;;  %v8779_v62 = vmul.f32 %v8688_v36, %v19914_v61 }
 0x5f8   : > { %9854 = vmatprep.subr.bf16.mxu0 %v9336_v37  ;;  %9735 = vmatprep.mubr.bf16.mxu1 %v19960_v10 }
 0x5f9   : > { %9788 = vmatprep.mubr.bf16.mxu0 %v19960_v10 }
 0x5fa   : > { %9802 = vmatpush1.bf16.msra.mxu1 %v9333_v13 }
 0x5fb   : > { %9855 = vmatpush1.bf16.msra.mxu0 %v9335_v9 }
 0x5fd   : > { %13800 = vmatmul.mubr.msk.bf16.gmra.mrb[100].mxu1 %vm602_vm2, %v18736_v63 }
 0x5fe   : > { %13802 = vmatmul.mubr.msk.bf16.gmra.mrb[108].mxu0 %vm602_vm2, %v18736_v63  ;;  %9831 = vmatprep.mubr.bf16.mxu1 %v19960_v10 }
 0x5ff   : > { %9884 = vmatprep.mubr.bf16.mxu0 %v19960_v10 }
 0x603   : > { %v8293_v19 = vpop.f32.mrb[48].mxu1  ;;  %v8346_v41 = vpop.f32.mrb[56].mxu0 }
 0x604   : > { %v8905_v29 = vadd.f32 %v8777_v40, %v8293_v19  ;;  %v8907_v60 = vadd.f32 %v8779_v62, %v8346_v41  ;;  %v8295_v31 = vpop.f32.mrb[49].mxu1  ;;  %v8348_v27 = vpop.f32.mrb[57].mxu0 }
 0x605   : > { %13803 = vmatmul.mubr.msk.bf16.vlgmr.msra.gmra.mrb[104].mxu1 %vm602_vm2, %v18702_v53  ;;  %v8906_v21 = vadd.f32 %v8778_v18, %v8295_v31  ;;  %v8908_v28 = vadd.f32 %v8780_v34, %v8348_v27  ;;  %v8297_v0 = vpop.f32.mrb[50].mxu1  ;;  %v8350_v15 = vpop.f32.mrb[58].mxu0 }
 0x606   : > { %13805 = vmatmul.mubr.msk.bf16.vlgmr.msra.gmra.mrb[112].mxu0 %vm602_vm2, %v18702_v53  ;;  %9841 = vmatprep.mubr.bf16.mxu1 %v19960_v10  ;;  %v9049_v33 = vadd.f32 %v17214_v4, %v8905_v29  ;;  %v9051_v12 = vadd.f32 %v17214_v4, %v8907_v60  ;;  %v8937_v45 = vadd.f32 %v8809_v52, %v8297_v0  ;;  %v8299_v11 = vpop.f32.mrb[51].mxu1  ;;  %v8352_v7 = vpop.f32.mrb[59].mxu0 }
 0x607   : > { %9894 = vmatprep.mubr.bf16.mxu0 %v19960_v10  ;;  %v8939_v47 = vadd.f32 %v8811_v22, %v8350_v15  ;;  %v9050_v54 = vadd.f32 %v17214_v4, %v8906_v21  ;;  %v9052_v49 = vadd.f32 %v17214_v4, %v8908_v28  ;;  %v8938_v13 = vadd.f32 %v8810_v3, %v8299_v11 }
 0x608   : > { %v8940_v9 = vadd.f32 %v8812_v44, %v8352_v7  ;;  %v9081_v8 = vadd.f32 %v17383_v42, %v8937_v45  ;;  %v9177_v58 = vmax.f32 %v9049_v33, 0.0  ;;  %v9179_v40 = vmax.f32 %v9051_v12, 0.0 }
 0x609   : > { %v9083_v37 = vadd.f32 %v17383_v42, %v8939_v47  ;;  %v9082_v1 = vadd.f32 %v17383_v42, %v8938_v13  ;;  %v9178_v20 = vmax.f32 %v9050_v54, 0.0  ;;  %v9180_v36 = vmax.f32 %v9052_v49, 0.0 }
 0x60a   : > { %v9084_v25 = vadd.f32 %v17383_v42, %v8940_v9  ;;  %v9209_v62 = vmax.f32 %v9081_v8, 0.0 }
 0x60b   : > { %v9211_v18 = vmax.f32 %v9083_v37, 0.0  ;;  %v9210_v34 = vmax.f32 %v9082_v1, 0.0  ;;  %v8303_v22 = vpop.f32.mrb[52].mxu1  ;;  %v8356_v19 = vpop.f32.mrb[60].mxu0 }
 0x60c   : > { %v9212_v52 = vmax.f32 %v9084_v25, 0.0  ;;  %v9305_v24 = vpack.c.bf16 %v9209_v62, %v9177_v58  ;;  %v8969_v41 = vadd.f32 %v8841_v17, %v8303_v22  ;;  %v8971_v3 = vadd.f32 %v8843_v16, %v8356_v19  ;;  %v8305_v44 = vpop.f32.mrb[53].mxu1  ;;  %v8358_v29 = vpop.f32.mrb[61].mxu0 }
 0x60d   : > { %13804 = vmatmul.mubr.msk.bf16.gmra.mrb[108].mxu1 %vm602_vm2, %v18736_v63  ;;  %v9307_v38 = vpack.c.bf16 %v9211_v18, %v9179_v40  ;;  %v8970_v60 = vadd.f32 %v8842_v55, %v8305_v44  ;;  %v8972_v31 = vadd.f32 %v8844_v32, %v8358_v29  ;;  %v8307_v27 = vpop.f32.mrb[54].mxu1  ;;  %v8360_v21 = vpop.f32.mrb[62].mxu0  ;;  %v9306_v28 = vpack.c.bf16 %v9210_v34, %v9178_v20  ;;  %v18897_v18 = vld [vmem:[%s17060_s13 + $0x18] sm:$0xff] }
 0x60e   : > { %13806 = vmatmul.mubr.msk.bf16.gmra.mrb[116].mxu0 %vm602_vm2, %v18736_v63  ;;  %9937 = vmatprep.mubr.bf16.mxu1 %v19960_v10  ;;  %v9308_v0 = vpack.c.bf16 %v9212_v52, %v9180_v36  ;;  %v9113_v15 = vadd.f32 %v17374_v2, %v8969_v41  ;;  %v9115_v33 = vadd.f32 %v17374_v2, %v8971_v3  ;;  %v8309_v47 = vpop.f32.mrb[55].mxu1  ;;  %v8362_v11 = vpop.f32.mrb[63].mxu0 }
 0x60f   : > { %9990 = vmatprep.mubr.bf16.mxu0 %v19960_v10  ;;  %v9001_v12 = vadd.f32 %v8873_v57, %v8307_v27  ;;  %v9003_v45 = vadd.f32 %v8875_v39, %v8360_v21  ;;  %v9114_v7 = vadd.f32 %v17374_v2, %v8970_v60  ;;  %v9116_v17 = vadd.f32 %v17374_v2, %v8972_v31 }
 0x610   : > { %v9002_v16 = vadd.f32 %v8874_v14, %v8309_v47  ;;  %v9004_v54 = vadd.f32 %v8876_v35, %v8362_v11  ;;  %9905 = vmatprep.subr.bf16.mxu1 %v9306_v28  ;;  %9958 = vmatprep.subr.bf16.mxu0 %v9308_v0  ;;  %v9241_v9 = vmax.f32 %v9113_v15, 0.0  ;;  %v9243_v8 = vmax.f32 %v9115_v33, 0.0 }
 0x611   : > { %v9145_v55 = vadd.f32 %v17414_v51, %v9001_v12  ;;  %v9147_v32 = vadd.f32 %v17414_v51, %v9003_v45  ;;  %9906 = vmatpush1.bf16.msra.mxu1 %v9305_v24  ;;  %9959 = vmatpush1.bf16.msra.mxu0 %v9307_v38  ;;  %v9242_v39 = vmax.f32 %v9114_v7, 0.0  ;;  %v9244_v1 = vmax.f32 %v9116_v17, 0.0 }
 0x612   : > { %v9146_v49 = vadd.f32 %v17414_v51, %v9002_v16  ;;  %v9148_v13 = vadd.f32 %v17414_v51, %v9004_v54  ;;  %v8696_v20 = vrot.slane %v18897_v18, %v19961_v26  ;;  %v8704_v36 = vrot.slane %v18897_v18, %v19962_v59 }
 0x613   : > { %v9273_v37 = vmax.f32 %v9145_v55, 0.0  ;;  %v9275_v57 = vmax.f32 %v9147_v32, 0.0  ;;  %v8700_v34 = vrot.slane %v18897_v18, %v19963_v50  ;;  %v8708_v52 = vrot.slane %v18897_v18, %v19964_v23 }
 0x614   : > { %v9274_v25 = vmax.f32 %v9146_v49, 0.0  ;;  %v9276_v14 = vmax.f32 %v9148_v13, 0.0  ;;  %v8781_v22 = vmul.f32 %v8696_v20, %v19914_v61  ;;  %v8783_v19 = vmul.f32 %v8704_v36, %v19914_v61 }
 0x615   : > { %v9337_v35 = vpack.c.bf16 %v9273_v37, %v9241_v9  ;;  %v9339_v58 = vpack.c.bf16 %v9275_v57, %v9243_v8  ;;  %v8813_v24 = vmul.f32 %v8696_v20, %v19915_v48  ;;  %v8815_v38 = vmul.f32 %v8704_v36, %v19915_v48 }
 0x616   : > { %v9338_v40 = vpack.c.bf16 %v9274_v25, %v9242_v39  ;;  %v9340_v62 = vpack.c.bf16 %v9276_v14, %v9244_v1  ;;  %v8782_v44 = vmul.f32 %v8700_v34, %v19914_v61  ;;  %v8784_v59 = vmul.f32 %v8708_v52, %v19914_v61 }
 0x617   : > { %v8814_v29 = vmul.f32 %v8700_v34, %v19915_v48  ;;  %v8845_v50 = vmul.f32 %v8696_v20, %v19939_v6  ;;  %v8816_v21 = vmul.f32 %v8708_v52, %v19915_v48  ;;  %v8847_v28 = vmul.f32 %v8704_v36, %v19939_v6 }
 0x618   : > { %9907 = vmatprep.subr.bf16.mxu1 %v9338_v40  ;;  %9960 = vmatprep.subr.bf16.mxu0 %v9340_v62  ;;  %v8846_v45 = vmul.f32 %v8700_v34, %v19939_v6  ;;  %v8848_v47 = vmul.f32 %v8708_v52, %v19939_v6  ;;  %v8877_v57 = vmul.f32 %v8696_v20, %v19940_v30 }
 0x619   : > { %9908 = vmatpush1.bf16.msra.mxu1 %v9337_v35  ;;  %9961 = vmatpush1.bf16.msra.mxu0 %v9339_v58  ;;  %v8879_v39 = vmul.f32 %v8704_v36, %v19940_v30  ;;  %v8878_v14 = vmul.f32 %v8700_v34, %v19940_v30  ;;  %v8880_v35 = vmul.f32 %v8708_v52, %v19940_v30 }
 0x61c   : > { %13807 = vmatmul.mubr.msk.bf16.vlgmr.msra.gmra.mrb[112].mxu1 %vm602_vm2, %v18702_v53  ;;  %13809 = vmatmul.mubr.msk.bf16.vlgmr.msra.gmra.mrb[120].mxu0 %vm602_vm2, %v18702_v53 }
 0x61d   : > { %9947 = vmatprep.mubr.bf16.mxu1 %v19960_v10  ;;  %10000 = vmatprep.mubr.bf16.mxu0 %v19960_v10 }
 0x624   : > { %13808 = vmatmul.mubr.msk.bf16.gmra.mrb[116].mxu1 %vm602_vm2, %v18736_v63  ;;  %13810 = vmatmul.mubr.msk.bf16.gmra.mrb[124].mxu0 %vm602_vm2, %v18736_v63 }
 0x625   : > { %10043 = vmatprep.mubr.bf16.mxu1 %v19960_v10  ;;  %10096 = vmatprep.mubr.bf16.mxu0 %v19960_v10 }
 0x645   : > { %v8399_v41 = vpop.f32.mrb[56].mxu1  ;;  %v8452_v3 = vpop.f32.mrb[64].mxu0 }
 0x646   : > { %v8909_v60 = vadd.f32 %v8781_v22, %v8399_v41  ;;  %v8911_v23 = vadd.f32 %v8783_v19, %v8452_v3  ;;  %v8401_v31 = vpop.f32.mrb[57].mxu1  ;;  %v8454_v27 = vpop.f32.mrb[65].mxu0 }
 0x647   : > { %v8910_v0 = vadd.f32 %v8782_v44, %v8401_v31  ;;  %v8912_v15 = vadd.f32 %v8784_v59, %v8454_v27  ;;  %v8403_v33 = vpop.f32.mrb[58].mxu1  ;;  %v8456_v12 = vpop.f32.mrb[66].mxu0 }
 0x648   : > { %v9053_v11 = vadd.f32 %v17214_v4, %v8909_v60  ;;  %v9055_v7 = vadd.f32 %v17214_v4, %v8911_v23  ;;  %v8941_v17 = vadd.f32 %v8813_v24, %v8403_v33  ;;  %v8943_v16 = vadd.f32 %v8815_v38, %v8456_v12  ;;  %v8405_v54 = vpop.f32.mrb[59].mxu1  ;;  %v8458_v55 = vpop.f32.mrb[67].mxu0 }
 0x649   : > { %v9054_v32 = vadd.f32 %v17214_v4, %v8910_v0  ;;  %v9056_v49 = vadd.f32 %v17214_v4, %v8912_v15  ;;  %v8942_v13 = vadd.f32 %v8814_v29, %v8405_v54  ;;  %v8944_v9 = vadd.f32 %v8816_v21, %v8458_v55 }
 0x64a   : > { %v9085_v8 = vadd.f32 %v17383_v42, %v8941_v17  ;;  %v9087_v37 = vadd.f32 %v17383_v42, %v8943_v16  ;;  %v9181_v58 = vmax.f32 %v9053_v11, 0.0  ;;  %v9183_v40 = vmax.f32 %v9055_v7, 0.0 }
 0x64b   : > { %v9086_v1 = vadd.f32 %v17383_v42, %v8942_v13  ;;  %v9088_v25 = vadd.f32 %v17383_v42, %v8944_v9  ;;  %v9182_v19 = vmax.f32 %v9054_v32, 0.0  ;;  %v9184_v24 = vmax.f32 %v9056_v49, 0.0 }
 0x64c   : > { %v9213_v62 = vmax.f32 %v9085_v8, 0.0  ;;  %v9215_v22 = vmax.f32 %v9087_v37, 0.0 }
 0x64d   : > { %v9214_v38 = vmax.f32 %v9086_v1, 0.0  ;;  %v9216_v41 = vmax.f32 %v9088_v25, 0.0  ;;  %v8409_v3 = vpop.f32.mrb[60].mxu1  ;;  %v8462_v20 = vpop.f32.mrb[68].mxu0 }
 0x64e   : > { %v9309_v44 = vpack.c.bf16 %v9213_v62, %v9181_v58  ;;  %v9311_v36 = vpack.c.bf16 %v9215_v22, %v9183_v40  ;;  %v8973_v59 = vadd.f32 %v8845_v50, %v8409_v3  ;;  %v8975_v29 = vadd.f32 %v8847_v28, %v8462_v20  ;;  %v8411_v60 = vpop.f32.mrb[61].mxu1  ;;  %v8464_v23 = vpop.f32.mrb[69].mxu0 }
 0x64f   : > { %v8974_v31 = vadd.f32 %v8846_v45, %v8411_v60  ;;  %v8976_v34 = vadd.f32 %v8848_v47, %v8464_v23  ;;  %v8413_v27 = vpop.f32.mrb[62].mxu1  ;;  %v8466_v52 = vpop.f32.mrb[70].mxu0  ;;  %v9310_v21 = vpack.c.bf16 %v9214_v38, %v9182_v19  ;;  %v9312_v0 = vpack.c.bf16 %v9216_v41, %v9184_v24 }
 0x650   : > { %v9117_v15 = vadd.f32 %v17374_v2, %v8973_v59  ;;  %v9119_v33 = vadd.f32 %v17374_v2, %v8975_v29  ;;  %v9005_v12 = vadd.f32 %v8877_v57, %v8413_v27  ;;  %v9007_v11 = vadd.f32 %v8879_v39, %v8466_v52  ;;  %v8415_v7 = vpop.f32.mrb[63].mxu1  ;;  %v8468_v17 = vpop.f32.mrb[71].mxu0 }
 0x651   : > { %v9118_v16 = vadd.f32 %v17374_v2, %v8974_v31  ;;  %v9120_v50 = vadd.f32 %v17374_v2, %v8976_v34  ;;  %v9006_v28 = vadd.f32 %v8878_v14, %v8415_v7  ;;  %v9008_v54 = vadd.f32 %v8880_v35, %v8468_v17  ;;  %10011 = vmatprep.subr.bf16.mxu1 %v9310_v21 }
 0x652   : > { %v9149_v45 = vadd.f32 %v17414_v51, %v9005_v12  ;;  %v9151_v47 = vadd.f32 %v17414_v51, %v9007_v11  ;;  %10064 = vmatprep.subr.bf16.mxu0 %v9312_v0  ;;  %10012 = vmatpush1.bf16.msra.mxu1 %v9309_v44  ;;  %v9245_v49 = vmax.f32 %v9117_v15, 0.0  ;;  %v9247_v13 = vmax.f32 %v9119_v33, 0.0 }
 0x653   : > { %v9150_v55 = vadd.f32 %v17414_v51, %v9006_v28  ;;  %v9152_v32 = vadd.f32 %v17414_v51, %v9008_v54  ;;  %10065 = vmatpush1.bf16.msra.mxu0 %v9311_v36  ;;  %v9246_v37 = vmax.f32 %v9118_v16, 0.0  ;;  %v9248_v57 = vmax.f32 %v9120_v50, 0.0 }
 0x654   : > { %v9277_v9 = vmax.f32 %v9149_v45, 0.0  ;;  %v9279_v8 = vmax.f32 %v9151_v47, 0.0  ;;  %v8712_v40 = vrot.slane %v18897_v18, %v19973_v46  ;;  %v8720_v62 = vrot.slane %v18897_v18, %v19974_v5 }
 0x655   : > { %v9278_v39 = vmax.f32 %v9150_v55, 0.0  ;;  %v9280_v1 = vmax.f32 %v9152_v32, 0.0  ;;  %v8716_v22 = vrot.slane %v18897_v18, %v19975_v43  ;;  %v8724_v19 = vrot.slane %v18897_v18, %v19976_v56 }
 0x656   : > { %v9341_v25 = vpack.c.bf16 %v9277_v9, %v9245_v49  ;;  %v9343_v14 = vpack.c.bf16 %v9279_v8, %v9247_v13  ;;  %v8785_v24 = vmul.f32 %v8712_v40, %v19914_v61  ;;  %v8787_v38 = vmul.f32 %v8720_v62, %v19914_v61 }
 0x657   : > { %v9342_v35 = vpack.c.bf16 %v9278_v39, %v9246_v37  ;;  %v9344_v58 = vpack.c.bf16 %v9280_v1, %v9248_v57  ;;  %v8817_v41 = vmul.f32 %v8712_v40, %v19915_v48  ;;  %v8819_v3 = vmul.f32 %v8720_v62, %v19915_v48 }
 0x658   : > { %v8786_v46 = vmul.f32 %v8716_v22, %v19914_v61  ;;  %v8788_v5 = vmul.f32 %v8724_v19, %v19914_v61  ;;  %v8818_v36 = vmul.f32 %v8716_v22, %v19915_v48  ;;  %v8849_v43 = vmul.f32 %v8712_v40, %v19939_v6 }
 0x659   : > { %10013 = vmatprep.subr.bf16.mxu1 %v9342_v35  ;;  %10066 = vmatprep.subr.bf16.mxu0 %v9344_v58  ;;  %v8820_v60 = vmul.f32 %v8724_v19, %v19915_v48  ;;  %v8851_v23 = vmul.f32 %v8720_v62, %v19939_v6  ;;  %v8850_v21 = vmul.f32 %v8716_v22, %v19939_v6 }
 0x65a   : > { %10014 = vmatpush1.bf16.msra.mxu1 %v9341_v25  ;;  %10067 = vmatpush1.bf16.msra.mxu0 %v9343_v14  ;;  %v8852_v61 = vmul.f32 %v8724_v19, %v19939_v6  ;;  %v8881_v6 = vmul.f32 %v8712_v40, %v19940_v30  ;;  %v8883_v45 = vmul.f32 %v8720_v62, %v19940_v30 }
 0x65b   : > { %v8882_v32 = vmul.f32 %v8716_v22, %v19940_v30  ;;  %v8884_v49 = vmul.f32 %v8724_v19, %v19940_v30 }
 0x65d   : > { %13811 = vmatmul.mubr.msk.bf16.vlgmr.msra.gmra.mrb[120].mxu1 %vm602_vm2, %v18702_v53  ;;  %13813 = vmatmul.mubr.msk.bf16.vlgmr.msra.gmra.mrb[128].mxu0 %vm602_vm2, %v18702_v53 }
 0x65e   : > { %10053 = vmatprep.mubr.bf16.mxu1 %v19960_v10  ;;  %10106 = vmatprep.mubr.bf16.mxu0 %v19960_v10 }
 0x665   : > { %13812 = vmatmul.mubr.msk.bf16.gmra.mrb[124].mxu1 %vm602_vm2, %v18736_v63  ;;  %13814 = vmatmul.mubr.msk.bf16.gmra.mrb[132].mxu0 %vm602_vm2, %v18736_v63 }
 0x666   : > { %10149 = vmatprep.mubr.bf16.mxu1 %v19960_v10  ;;  %10202 = vmatprep.mubr.bf16.mxu0 %v19960_v10 }
 0x688   : > { %v8505_v20 = vpop.f32.mrb[64].mxu1 }
 0x689   : > { %v8558_v44 = vpop.f32.mrb[72].mxu0  ;;  %v8913_v59 = vadd.f32 %v8785_v24, %v8505_v20  ;;  %v8507_v18 = vpop.f32.mrb[65].mxu1 }
 0x68a   : > { %v8915_v56 = vadd.f32 %v8787_v38, %v8558_v44  ;;  %v8560_v29 = vpop.f32.mrb[73].mxu0  ;;  %v8914_v31 = vadd.f32 %v8786_v46, %v8507_v18  ;;  %v8509_v27 = vpop.f32.mrb[66].mxu1 }
 0x68b   : > { %v8916_v34 = vadd.f32 %v8788_v5, %v8560_v29  ;;  %v8562_v52 = vpop.f32.mrb[74].mxu0  ;;  %v9057_v0 = vadd.f32 %v17214_v4, %v8913_v59  ;;  %v8945_v33 = vadd.f32 %v8817_v41, %v8509_v27  ;;  %v8511_v11 = vpop.f32.mrb[67].mxu1 }
 0x68c   : > { %v9059_v15 = vadd.f32 %v17214_v4, %v8915_v56  ;;  %v8947_v12 = vadd.f32 %v8819_v3, %v8562_v52  ;;  %v8564_v7 = vpop.f32.mrb[75].mxu0  ;;  %v9058_v48 = vadd.f32 %v17214_v4, %v8914_v31  ;;  %v8946_v16 = vadd.f32 %v8818_v36, %v8511_v11  ;;  %v18991_v27 = vpop.permute.xlu0 %9350 }
 0x68d   : > { %v9060_v17 = vadd.f32 %v17214_v4, %v8916_v34  ;;  %v8948_v50 = vadd.f32 %v8820_v60, %v8564_v7  ;;  %v9089_v28 = vadd.f32 %v17383_v42, %v8945_v33  ;;  %v9185_v13 = vmax.f32 %v9057_v0, 0.0  ;;  %v18993_v0 = vpop.permute.xlu1 %9354 }
 0x68e   : > { %v9091_v54 = vadd.f32 %v17383_v42, %v8947_v12  ;;  %v9090_v47 = vadd.f32 %v17383_v42, %v8946_v16  ;;  %v9187_v4 = vmax.f32 %v9059_v15, 0.0  ;;  %v9186_v37 = vmax.f32 %v9058_v48, 0.0 }
 0x68f   : > { %v9092_v55 = vadd.f32 %v17383_v42, %v8948_v50  ;;  %v9217_v9 = vmax.f32 %v9089_v28, 0.0  ;;  %v9188_v57 = vmax.f32 %v9060_v17, 0.0 }
 0x690   : > { %v9219_v8 = vmax.f32 %v9091_v54, 0.0  ;;  %v9218_v39 = vmax.f32 %v9090_v47, 0.0  ;;  %v8515_v25 = vpop.f32.mrb[68].mxu1 }
 0x691   : > { %v9220_v1 = vmax.f32 %v9092_v55, 0.0  ;;  %v8568_v14 = vpop.f32.mrb[76].mxu0  ;;  %v9313_v35 = vpack.c.bf16 %v9217_v9, %v9185_v13  ;;  %v8977_v40 = vadd.f32 %v8849_v43, %v8515_v25  ;;  %v8517_v24 = vpop.f32.mrb[69].mxu1 }
 0x692   : > { %v9315_v58 = vpack.c.bf16 %v9219_v8, %v9187_v4  ;;  %v8979_v62 = vadd.f32 %v8851_v23, %v8568_v14  ;;  %v8570_v42 = vpop.f32.mrb[77].mxu0  ;;  %v8978_v38 = vadd.f32 %v8850_v21, %v8517_v24  ;;  %v8519_v41 = vpop.f32.mrb[70].mxu1  ;;  %v9314_v19 = vpack.c.bf16 %v9218_v39, %v9186_v37 }
 0x693   : > { %v8980_v22 = vadd.f32 %v8852_v61, %v8570_v42  ;;  %v8572_v30 = vpop.f32.mrb[78].mxu0  ;;  %v9316_v3 = vpack.c.bf16 %v9220_v1, %v9188_v57  ;;  %v9121_v20 = vadd.f32 %v17374_v2, %v8977_v40  ;;  %v9009_v46 = vadd.f32 %v8881_v6, %v8519_v41  ;;  %v8521_v36 = vpop.f32.mrb[71].mxu1 }
 0x694   : > { %v9123_v44 = vadd.f32 %v17374_v2, %v8979_v62  ;;  %v9011_v5 = vadd.f32 %v8883_v45, %v8572_v30  ;;  %v8574_v59 = vpop.f32.mrb[79].mxu0  ;;  %v9122_v56 = vadd.f32 %v17374_v2, %v8978_v38  ;;  %v9010_v18 = vadd.f32 %v8882_v32, %v8521_v36  ;;  %10117 = vmatprep.subr.bf16.mxu1 %v9314_v19  ;;  %v19003_v62 = vpop.permute.xlu1 %9358 }
 0x695   : > { %v9124_v43 = vadd.f32 %v17374_v2, %v8980_v22  ;;  %v9012_v29 = vadd.f32 %v8884_v49, %v8574_v59  ;;  %v9153_v60 = vadd.f32 %v17414_v51, %v9009_v46  ;;  %10170 = vmatprep.subr.bf16.mxu0 %v9316_v3  ;;  %10118 = vmatpush1.bf16.msra.mxu1 %v9313_v35  ;;  %v9249_v52 = vmax.f32 %v9121_v20, 0.0  ;;  %v19005_v42 = vpop.permute.xlu0 %9362 }
 0x696   : > { %v9155_v23 = vadd.f32 %v17414_v51, %v9011_v5  ;;  %v9154_v31 = vadd.f32 %v17414_v51, %v9010_v18  ;;  %10171 = vmatpush1.bf16.msra.mxu0 %v9315_v58  ;;  %v9251_v21 = vmax.f32 %v9123_v44, 0.0  ;;  %v9250_v15 = vmax.f32 %v9122_v56, 0.0 }
 0x697   : > { %v9156_v34 = vadd.f32 %v17414_v51, %v9012_v29  ;;  %v9281_v61 = vmax.f32 %v9153_v60, 0.0  ;;  %v9252_v33 = vmax.f32 %v9124_v43, 0.0 }
 0x698   : > { %v9283_v2 = vmax.f32 %v9155_v23, 0.0  ;;  %v9282_v12 = vmax.f32 %v9154_v31, 0.0  ;;  %v9409_v7 = vpop.f32.mrb[72].mxu1 }
 0x699   : > { %v9284_v11 = vmax.f32 %v9156_v34, 0.0  ;;  %v9462_v48 = vpop.f32.mrb[80].mxu0  ;;  %v9345_v17 = vpack.c.bf16 %v9281_v61, %v9249_v52  ;;  %v9411_v50 = vpop.f32.mrb[73].mxu1  ;;  %v9410_v54 = vadd.f32 %v9409_v7, %v18991_v27 }
 0x69a   : > { %v9347_v16 = vpack.c.bf16 %v9283_v2, %v9251_v21  ;;  %v9463_v51 = vadd.f32 %v9462_v48, %v18991_v27  ;;  %v9464_v28 = vpop.f32.mrb[81].mxu0  ;;  %v9346_v6 = vpack.c.bf16 %v9282_v12, %v9250_v15  ;;  %v9413_v47 = vpop.f32.mrb[74].mxu1  ;;  %v9412_v55 = vadd.f32 %v9411_v50, %v18991_v27  ;;  %v480_v48 = vld [vmem:[%s19833_s5] sm:$0x1] }
 0x69b   : > { %v9348_v45 = vpack.c.bf16 %v9284_v11, %v9252_v33  ;;  %v9465_v32 = vadd.f32 %v9464_v28, %v18991_v27  ;;  %v9466_v49 = vpop.f32.mrb[82].mxu0  ;;  %v9415_v13 = vpop.f32.mrb[75].mxu1  ;;  %v9414_v37 = vadd.f32 %v9413_v47, %v18993_v0  ;;  %v10223_v57 = vmax.f32 %v9410_v54, 0.0 }
 0x69c   : > { %v10225_v4 = vmax.f32 %v9463_v51, 0.0  ;;  %v9467_v9 = vadd.f32 %v9466_v49, %v18993_v0  ;;  %v9468_v8 = vpop.f32.mrb[83].mxu0  ;;  %10119 = vmatprep.subr.bf16.mxu1 %v9346_v6  ;;  %v9416_v39 = vadd.f32 %v9415_v13, %v18993_v0  ;;  %v10224_v1 = vmax.f32 %v9412_v55, 0.0 }
 0x69d   : > { %10172 = vmatprep.subr.bf16.mxu0 %v9348_v45  ;;  %v10226_v25 = vmax.f32 %v9465_v32, 0.0  ;;  %v9469_v14 = vadd.f32 %v9468_v8, %v18993_v0  ;;  %10120 = vmatpush1.bf16.msra.mxu1 %v9345_v17  ;;  %v10255_v58 = vmax.f32 %v9414_v37, 0.0  ;;  %v19038_v49 = vpack.c.bf16 %v480_v48, %v480_v48 }
 0x69e   : > { %10173 = vmatpush1.bf16.msra.mxu0 %v9347_v16  ;;  %v10257_v35 = vmax.f32 %v9467_v9, 0.0  ;;  %v10256_v40 = vmax.f32 %v9416_v39, 0.0 }
 0x69f   : > { %v10258_v24 = vmax.f32 %v9469_v14, 0.0  ;;  %v10351_v22 = vpack.c.bf16 %v10255_v58, %v10223_v57 }
 0x6a0   : > { %v19007_v38 = vpack.c.bf16 %v10257_v35, %v10225_v4  ;;  %13815 = vmatmul.mubr.msk.bf16.vlgmr.msra.gmra.mrb[128].mxu1 %vm602_vm2, %v18702_v53  ;;  %v10352_v41 = vpack.c.bf16 %v10256_v40, %v10224_v1  ;;  %v9419_v30 = vpop.f32.mrb[76].mxu1 }
 0x6a1   : > { %13817 = vmatmul.mubr.msk.bf16.vlgmr.msra.gmra.mrb[136].mxu0 %vm602_vm2, %v18702_v53  ;;  %v10354_v19 = vpack.c.bf16 %v10258_v24, %v10226_v25  ;;  %v9472_v3 = vpop.f32.mrb[84].mxu0  ;;  %10159 = vmatprep.mubr.bf16.mxu1 %v19960_v10  ;;  %v9421_v20 = vpop.f32.mrb[77].mxu1  ;;  %v9420_v5 = vadd.f32 %v9419_v30, %v19003_v62 }
 0x6a2   : > { %10212 = vmatprep.mubr.bf16.mxu0 %v19960_v10  ;;  %v9473_v44 = vadd.f32 %v9472_v3, %v19003_v62  ;;  %v9474_v46 = vpop.f32.mrb[85].mxu0  ;;  %v9423_v36 = vpop.f32.mrb[78].mxu1  ;;  %v9422_v59 = vadd.f32 %v9421_v20, %v19003_v62  ;;  %10418 = vmatprep.subr.bf16.mxu1 %v10352_v41 }
 0x6a3   : > { %v9475_v53 = vadd.f32 %v9474_v46, %v19003_v62  ;;  %v9476_v56 = vpop.f32.mrb[86].mxu0  ;;  %v9425_v43 = vpop.f32.mrb[79].mxu1  ;;  %10419 = vmatpush1.bf16.msra.mxu1 %v10351_v22  ;;  %v9424_v23 = vadd.f32 %v9423_v36, %v19005_v42  ;;  %v10287_v31 = vmax.f32 %v9420_v5, 0.0 }
 0x6a4   : > { %v10289_v18 = vmax.f32 %v9473_v44, 0.0  ;;  %v9477_v29 = vadd.f32 %v9476_v56, %v19005_v42  ;;  %v9478_v60 = vpop.f32.mrb[87].mxu0  ;;  %v9426_v34 = vadd.f32 %v9425_v43, %v19005_v42  ;;  %v10288_v52 = vmax.f32 %v9422_v59, 0.0 }
 0x6a5   : > { %v10290_v21 = vmax.f32 %v9475_v53, 0.0  ;;  %v9479_v61 = vadd.f32 %v9478_v60, %v19005_v42  ;;  %v10319_v15 = vmax.f32 %v9424_v23, 0.0 }
 0x6a6   : > { %v10321_v2 = vmax.f32 %v9477_v29, 0.0  ;;  %v10320_v33 = vmax.f32 %v9426_v34, 0.0 }
 0x6a7   : > { %v10322_v12 = vmax.f32 %v9479_v61, 0.0  ;;  %v10383_v7 = vpack.c.bf16 %v10319_v15, %v10287_v31 }
 0x6a8   : > { %v19023_v11 = vpack.c.bf16 %v10321_v2, %v10289_v18  ;;  %13816 = vmatmul.mubr.msk.bf16.gmra.mrb[132].mxu1 %vm602_vm2, %v18736_v63  ;;  %v10384_v17 = vpack.c.bf16 %v10320_v33, %v10288_v52  ;;  %v9515_v50 = vpop.f32.mrb[80].mxu1 }
 0x6a9   : > { %13818 = vmatmul.mubr.msk.bf16.gmra.mrb[140].mxu0 %vm602_vm2, %v18736_v63  ;;  %v10386_v16 = vpack.c.bf16 %v10322_v12, %v10290_v21  ;;  %v9568_v51 = vpop.f32.mrb[88].mxu0  ;;  %v9516_v28 = vadd.f32 %v9515_v50, %v18991_v27  ;;  %v9517_v6 = vpop.f32.mrb[81].mxu1  ;;  %10450 = vmatprep.mubr.bf16.mxu1 %v19960_v10 }
 0x6aa   : > { %v9569_v54 = vadd.f32 %v9568_v51, %v18991_v27  ;;  %v9570_v45 = vpop.f32.mrb[89].mxu0  ;;  %10532 = vmatprep.mubr.bf16.mxu0 %v19960_v10  ;;  %10420 = vmatprep.subr.bf16.mxu1 %v10384_v17  ;;  %v9518_v47 = vadd.f32 %v9517_v6, %v18991_v27  ;;  %v9519_v63 = vpop.f32.mrb[82].mxu1 }
 0x6ab   : > { %v9571_v55 = vadd.f32 %v9570_v45, %v18991_v27  ;;  %v9572_v32 = vpop.f32.mrb[90].mxu0  ;;  %10421 = vmatpush1.bf16.msra.mxu1 %v10383_v7  ;;  %v10227_v13 = vmax.f32 %v9516_v28, 0.0  ;;  %v9520_v9 = vadd.f32 %v9519_v63, %v18993_v0  ;;  %v9521_v37 = vpop.f32.mrb[83].mxu1 }
 0x6ac   : > { %v10229_v4 = vmax.f32 %v9569_v54, 0.0  ;;  %v9573_v8 = vadd.f32 %v9572_v32, %v18993_v0  ;;  %v9574_v57 = vpop.f32.mrb[91].mxu0  ;;  %v10228_v39 = vmax.f32 %v9518_v47, 0.0  ;;  %10459 = vmatprep.subr.bf16.mxu1 %v10354_v19  ;;  %v9522_v25 = vadd.f32 %v9521_v37, %v18993_v0 }
 0x6ad   : > { %v10230_v1 = vmax.f32 %v9571_v55, 0.0  ;;  %v9575_v14 = vadd.f32 %v9574_v57, %v18993_v0  ;;  %v10259_v35 = vmax.f32 %v9520_v9, 0.0 }
 0x6ae   : > { %v10261_v58 = vmax.f32 %v9573_v8, 0.0  ;;  %v10260_v40 = vmax.f32 %v9522_v25, 0.0 }
 0x6af   : > { %v10262_v24 = vmax.f32 %v9575_v14, 0.0  ;;  %v10355_v22 = vpack.c.bf16 %v10259_v35, %v10227_v13 }
 0x6b0   : > { %v10357_v41 = vpack.c.bf16 %v10261_v58, %v10229_v4  ;;  %v10356_v30 = vpack.c.bf16 %v10260_v40, %v10228_v39  ;;  %13819 = vmatmul.mubr.msk.bf16.vlgmr.msra.gmra.mrb[136].mxu1 %vm602_vm2, %v19038_v49  ;;  %v9525_v20 = vpop.f32.mrb[84].mxu1 }
 0x6b1   : > { %v10358_v3 = vpack.c.bf16 %v10262_v24, %v10230_v1  ;;  %v9578_v44 = vpop.f32.mrb[92].mxu0  ;;  %10460 = vmatpush1.bf16.msra.mxu1 %v19007_v38  ;;  %v9526_v19 = vadd.f32 %v9525_v20, %v19003_v62  ;;  %v9527_v5 = vpop.f32.mrb[85].mxu1  ;;  %10491 = vmatprep.mubr.bf16.mxu1 %v19960_v10 }
 0x6b2   : > { %v9579_v46 = vadd.f32 %v9578_v44, %v19003_v62  ;;  %v9580_v36 = vpop.f32.mrb[93].mxu0  ;;  %v9528_v59 = vadd.f32 %v9527_v5, %v19003_v62  ;;  %v9529_v56 = vpop.f32.mrb[86].mxu1  ;;  %10461 = vmatprep.subr.bf16.mxu1 %v10386_v16  ;;  %10500 = vmatprep.subr.bf16.mxu0 %v10356_v30 }
 0x6b3   : > { %v9581_v53 = vadd.f32 %v9580_v36, %v19003_v62  ;;  %v9582_v43 = vpop.f32.mrb[94].mxu0  ;;  %v10291_v18 = vmax.f32 %v9526_v19, 0.0  ;;  %v9530_v38 = vadd.f32 %v9529_v56, %v19005_v42  ;;  %v9531_v23 = vpop.f32.mrb[87].mxu1  ;;  %10501 = vmatpush1.bf16.msra.mxu0 %v10355_v22 }
 0x6b4   : > { %v10293_v29 = vmax.f32 %v9579_v46, 0.0  ;;  %v9583_v60 = vadd.f32 %v9582_v43, %v19005_v42  ;;  %v9584_v31 = vpop.f32.mrb[95].mxu0  ;;  %v10292_v34 = vmax.f32 %v9528_v59, 0.0  ;;  %v9532_v21 = vadd.f32 %v9531_v23, %v19005_v42 }
 0x6b5   : > { %v10294_v52 = vmax.f32 %v9581_v53, 0.0  ;;  %v9585_v61 = vadd.f32 %v9584_v31, %v19005_v42  ;;  %v10323_v2 = vmax.f32 %v9530_v38, 0.0  ;;  %10462 = vmatpush1.bf16.msra.mxu1 %v19023_v11 }
 0x6b6   : > { %v10325_v15 = vmax.f32 %v9583_v60, 0.0  ;;  %v10324_v33 = vmax.f32 %v9532_v21, 0.0  ;;  %10541 = vmatprep.subr.bf16.mxu1 %v10358_v3 }
 0x6b7   : > { %v10326_v12 = vmax.f32 %v9585_v61, 0.0  ;;  %v10387_v7 = vpack.c.bf16 %v10323_v2, %v10291_v18 }
 0x6b8   : > { %v10389_v48 = vpack.c.bf16 %v10325_v15, %v10293_v29  ;;  %v10388_v17 = vpack.c.bf16 %v10324_v33, %v10292_v34  ;;  %v9621_v50 = vpop.f32.mrb[88].mxu1  ;;  %13820 = vmatmul.mubr.msk.bf16.vlgmr.msra.gmra.mrb[140].mxu1 %vm602_vm2, %v19038_v49 }
 0x6b9   : > { %v10390_v16 = vpack.c.bf16 %v10326_v12, %v10294_v52  ;;  %v9674_v51 = vpop.f32.mrb[96].mxu0  ;;  %v9622_v28 = vadd.f32 %v9621_v50, %v18991_v27  ;;  %v9623_v6 = vpop.f32.mrb[89].mxu1  ;;  %10542 = vmatpush1.bf16.msra.mxu1 %v10357_v41  ;;  %10573 = vmatprep.mubr.bf16.mxu1 %v19960_v10 }
 0x6ba   : > { %v9675_v54 = vadd.f32 %v9674_v51, %v18991_v27  ;;  %v9676_v45 = vpop.f32.mrb[97].mxu0  ;;  %v9624_v11 = vadd.f32 %v9623_v6, %v18991_v27  ;;  %v9625_v55 = vpop.f32.mrb[90].mxu1  ;;  %10502 = vmatprep.subr.bf16.mxu0 %v10388_v17 }
 0x6bb   : > { %v9677_v47 = vadd.f32 %v9676_v45, %v18991_v27  ;;  %v9678_v63 = vpop.f32.mrb[98].mxu0  ;;  %10543 = vmatprep.subr.bf16.mxu1 %v10390_v16  ;;  %v10231_v32 = vmax.f32 %v9622_v28, 0.0  ;;  %v9626_v4 = vadd.f32 %v9625_v55, %v18993_v0  ;;  %v9627_v8 = vpop.f32.mrb[91].mxu1  ;;  %10503 = vmatpush1.bf16.msra.mxu0 %v10387_v7 }
 0x6bc   : > { %v10233_v13 = vmax.f32 %v9675_v54, 0.0  ;;  %v9679_v9 = vadd.f32 %v9678_v63, %v18993_v0  ;;  %v9680_v37 = vpop.f32.mrb[99].mxu0  ;;  %v10232_v57 = vmax.f32 %v9624_v11, 0.0  ;;  %v9628_v1 = vadd.f32 %v9627_v8, %v18993_v0 }
 0x6bd   : > { %v10234_v39 = vmax.f32 %v9677_v47, 0.0  ;;  %v9681_v25 = vadd.f32 %v9680_v37, %v18993_v0  ;;  %v10263_v14 = vmax.f32 %v9626_v4, 0.0  ;;  %10544 = vmatpush1.bf16.msra.mxu1 %v10389_v48 }
 0x6be   : > { %v10265_v35 = vmax.f32 %v9679_v9, 0.0  ;;  %v10264_v58 = vmax.f32 %v9628_v1, 0.0  ;;  %13821 = vmatmul.mubr.msk.bf16.vlgmr.msra.gmra.mrb[144].mxu0 %vm602_vm2, %v19038_v49 }
 0x6bf   : > { %v10266_v40 = vmax.f32 %v9681_v25, 0.0  ;;  %v10359_v24 = vpack.c.bf16 %v10263_v14, %v10231_v32  ;;  %10614 = vmatprep.mubr.bf16.mxu0 %v19960_v10 }
 0x6c0   : > { %v10361_v22 = vpack.c.bf16 %v10265_v35, %v10233_v13  ;;  %v10360_v41 = vpack.c.bf16 %v10264_v58, %v10232_v57  ;;  %v9631_v3 = vpop.f32.mrb[92].mxu1  ;;  %13822 = vmatmul.mubr.msk.bf16.vlgmr.msra.gmra.mrb[144].mxu1 %vm602_vm2, %v19038_v49 }
 0x6c1   : > { %v10362_v30 = vpack.c.bf16 %v10266_v40, %v10234_v39  ;;  %v9684_v20 = vpop.f32.mrb[100].mxu0  ;;  %v9632_v44 = vadd.f32 %v9631_v3, %v19003_v62  ;;  %v9633_v46 = vpop.f32.mrb[93].mxu1  ;;  %10655 = vmatprep.mubr.bf16.mxu1 %v19960_v10 }
 0x6c2   : > { %v9685_v19 = vadd.f32 %v9684_v20, %v19003_v62  ;;  %v9686_v5 = vpop.f32.mrb[101].mxu0  ;;  %v9634_v36 = vadd.f32 %v9633_v46, %v19003_v62  ;;  %v9635_v53 = vpop.f32.mrb[94].mxu1  ;;  %10582 = vmatprep.subr.bf16.mxu0 %v10360_v41 }
 0x6c3   : > { %v9687_v59 = vadd.f32 %v9686_v5, %v19003_v62  ;;  %v9688_v56 = vpop.f32.mrb[102].mxu0  ;;  %10623 = vmatprep.subr.bf16.mxu1 %v10362_v30  ;;  %v10295_v43 = vmax.f32 %v9632_v44, 0.0  ;;  %v9636_v29 = vadd.f32 %v9635_v53, %v19005_v42  ;;  %v9637_v60 = vpop.f32.mrb[95].mxu1  ;;  %10583 = vmatpush1.bf16.msra.mxu0 %v10359_v24 }
 0x6c4   : > { %v10297_v18 = vmax.f32 %v9685_v19, 0.0  ;;  %v9689_v38 = vadd.f32 %v9688_v56, %v19005_v42  ;;  %v9690_v23 = vpop.f32.mrb[103].mxu0  ;;  %10624 = vmatpush1.bf16.msra.mxu1 %v10361_v22  ;;  %v10296_v31 = vmax.f32 %v9634_v36, 0.0  ;;  %v9638_v52 = vadd.f32 %v9637_v60, %v19005_v42 }
 0x6c5   : > { %v10298_v34 = vmax.f32 %v9687_v59, 0.0  ;;  %v9691_v21 = vadd.f32 %v9690_v23, %v19005_v42  ;;  %v10327_v61 = vmax.f32 %v9636_v29, 0.0 }
 0x6c6   : > { %v10329_v2 = vmax.f32 %v9689_v38, 0.0  ;;  %v10328_v15 = vmax.f32 %v9638_v52, 0.0 }
 0x6c7   : > { %v10330_v33 = vmax.f32 %v9691_v21, 0.0  ;;  %v10391_v12 = vpack.c.bf16 %v10327_v61, %v10295_v43 }
 0x6c8   : > { %v10393_v7 = vpack.c.bf16 %v10329_v2, %v10297_v18  ;;  %v10392_v48 = vpack.c.bf16 %v10328_v15, %v10296_v31  ;;  %v9727_v16 = vpop.f32.mrb[96].mxu1 }
 0x6c9   : > { %v10394_v17 = vpack.c.bf16 %v10330_v33, %v10298_v34  ;;  %v9780_v50 = vpop.f32.mrb[104].mxu0  ;;  %v9728_v51 = vadd.f32 %v9727_v16, %v18991_v27  ;;  %v9729_v54 = vpop.f32.mrb[97].mxu1 }
 0x6ca   : > { %v9781_v28 = vadd.f32 %v9780_v50, %v18991_v27  ;;  %v9782_v6 = vpop.f32.mrb[105].mxu0  ;;  %v9730_v45 = vadd.f32 %v9729_v54, %v18991_v27  ;;  %v9731_v47 = vpop.f32.mrb[98].mxu1  ;;  %10584 = vmatprep.subr.bf16.mxu0 %v10392_v48 }
 0x6cb   : > { %v9783_v11 = vadd.f32 %v9782_v6, %v18991_v27  ;;  %v9784_v55 = vpop.f32.mrb[106].mxu0  ;;  %10625 = vmatprep.subr.bf16.mxu1 %v10394_v17  ;;  %v10235_v63 = vmax.f32 %v9728_v51, 0.0  ;;  %v9732_v13 = vadd.f32 %v9731_v47, %v18993_v0  ;;  %v9733_v9 = vpop.f32.mrb[99].mxu1  ;;  %10585 = vmatpush1.bf16.msra.mxu0 %v10391_v12 }
 0x6cc   : > { %v10237_v32 = vmax.f32 %v9781_v28, 0.0  ;;  %v9785_v4 = vadd.f32 %v9784_v55, %v18993_v0  ;;  %v9786_v8 = vpop.f32.mrb[107].mxu0  ;;  %10626 = vmatpush1.bf16.msra.mxu1 %v10393_v7  ;;  %v10236_v37 = vmax.f32 %v9730_v45, 0.0  ;;  %v9734_v39 = vadd.f32 %v9733_v9, %v18993_v0 }
 0x6cd   : > { %v10238_v57 = vmax.f32 %v9783_v11, 0.0  ;;  %v9787_v1 = vadd.f32 %v9786_v8, %v18993_v0  ;;  %v10267_v25 = vmax.f32 %v9732_v13, 0.0 }
 0x6ce   : > { %v10269_v14 = vmax.f32 %v9785_v4, 0.0  ;;  %v10268_v35 = vmax.f32 %v9734_v39, 0.0  ;;  %13823 = vmatmul.mubr.msk.bf16.vlgmr.msra.gmra.mrb[148].mxu0 %vm602_vm2, %v19038_v49 }
 0x6cf   : > { %v10270_v58 = vmax.f32 %v9787_v1, 0.0  ;;  %13824 = vmatmul.mubr.msk.bf16.vlgmr.msra.gmra.mrb[148].mxu1 %vm602_vm2, %v19038_v49  ;;  %v10363_v40 = vpack.c.bf16 %v10267_v25, %v10235_v63  ;;  %10696 = vmatprep.mubr.bf16.mxu0 %v19960_v10 }
 0x6d0   : > { %v10365_v24 = vpack.c.bf16 %v10269_v14, %v10237_v32  ;;  %10737 = vmatprep.mubr.bf16.mxu1 %v19960_v10  ;;  %v10364_v22 = vpack.c.bf16 %v10268_v35, %v10236_v37  ;;  %v9737_v30 = vpop.f32.mrb[100].mxu1 }
 0x6d1   : > { %v10366_v41 = vpack.c.bf16 %v10270_v58, %v10238_v57  ;;  %v9790_v3 = vpop.f32.mrb[108].mxu0  ;;  %v9738_v20 = vadd.f32 %v9737_v30, %v19003_v62  ;;  %v9739_v19 = vpop.f32.mrb[101].mxu1 }
 0x6d2   : > { %v9791_v44 = vadd.f32 %v9790_v3, %v19003_v62  ;;  %v9792_v46 = vpop.f32.mrb[109].mxu0  ;;  %v9740_v5 = vadd.f32 %v9739_v19, %v19003_v62  ;;  %v9741_v59 = vpop.f32.mrb[102].mxu1  ;;  %10664 = vmatprep.subr.bf16.mxu0 %v10364_v22 }
 0x6d3   : > { %v9793_v36 = vadd.f32 %v9792_v46, %v19003_v62  ;;  %v9794_v53 = vpop.f32.mrb[110].mxu0  ;;  %10705 = vmatprep.subr.bf16.mxu1 %v10366_v41  ;;  %v10299_v56 = vmax.f32 %v9738_v20, 0.0  ;;  %v9742_v18 = vadd.f32 %v9741_v59, %v19005_v42  ;;  %v9743_v38 = vpop.f32.mrb[103].mxu1  ;;  %10665 = vmatpush1.bf16.msra.mxu0 %v10363_v40 }
 0x6d4   : > { %v10301_v43 = vmax.f32 %v9791_v44, 0.0  ;;  %v9795_v29 = vadd.f32 %v9794_v53, %v19005_v42  ;;  %v9796_v60 = vpop.f32.mrb[111].mxu0  ;;  %10706 = vmatpush1.bf16.msra.mxu1 %v10365_v24  ;;  %v10300_v23 = vmax.f32 %v9740_v5, 0.0  ;;  %v9744_v34 = vadd.f32 %v9743_v38, %v19005_v42 }
 0x6d5   : > { %v10302_v31 = vmax.f32 %v9793_v36, 0.0  ;;  %v9797_v52 = vadd.f32 %v9796_v60, %v19005_v42  ;;  %v10331_v21 = vmax.f32 %v9742_v18, 0.0 }
 0x6d6   : > { %v10333_v61 = vmax.f32 %v9795_v29, 0.0  ;;  %v10332_v2 = vmax.f32 %v9744_v34, 0.0 }
 0x6d7   : > { %v10334_v15 = vmax.f32 %v9797_v52, 0.0  ;;  %v10395_v33 = vpack.c.bf16 %v10331_v21, %v10299_v56 }
 0x6d8   : > { %v10397_v12 = vpack.c.bf16 %v10333_v61, %v10301_v43  ;;  %v10396_v7 = vpack.c.bf16 %v10332_v2, %v10300_v23  ;;  %v9833_v17 = vpop.f32.mrb[104].mxu1 }
 0x6d9   : > { %v10398_v48 = vpack.c.bf16 %v10334_v15, %v10302_v31  ;;  %v9886_v16 = vpop.f32.mrb[112].mxu0  ;;  %v9834_v50 = vadd.f32 %v9833_v17, %v18991_v27  ;;  %v9835_v28 = vpop.f32.mrb[105].mxu1 }
 0x6da   : > { %v9887_v51 = vadd.f32 %v9886_v16, %v18991_v27  ;;  %v9888_v54 = vpop.f32.mrb[113].mxu0  ;;  %v9836_v6 = vadd.f32 %v9835_v28, %v18991_v27  ;;  %v9837_v11 = vpop.f32.mrb[106].mxu1  ;;  %10666 = vmatprep.subr.bf16.mxu0 %v10396_v7 }
 0x6db   : > { %v9889_v45 = vadd.f32 %v9888_v54, %v18991_v27  ;;  %v9890_v47 = vpop.f32.mrb[114].mxu0  ;;  %10707 = vmatprep.subr.bf16.mxu1 %v10398_v48  ;;  %v10239_v55 = vmax.f32 %v9834_v50, 0.0  ;;  %v9838_v32 = vadd.f32 %v9837_v11, %v18993_v0  ;;  %v9839_v4 = vpop.f32.mrb[107].mxu1  ;;  %10667 = vmatpush1.bf16.msra.mxu0 %v10395_v33 }
 0x6dc   : > { %v10241_v63 = vmax.f32 %v9887_v51, 0.0  ;;  %v9891_v13 = vadd.f32 %v9890_v47, %v18993_v0  ;;  %v9892_v9 = vpop.f32.mrb[115].mxu0  ;;  %10708 = vmatpush1.bf16.msra.mxu1 %v10397_v12  ;;  %v10240_v8 = vmax.f32 %v9836_v6, 0.0  ;;  %v9840_v57 = vadd.f32 %v9839_v4, %v18993_v0 }
 0x6dd   : > { %v10242_v37 = vmax.f32 %v9889_v45, 0.0  ;;  %v9893_v39 = vadd.f32 %v9892_v9, %v18993_v0  ;;  %v10271_v1 = vmax.f32 %v9838_v32, 0.0 }
 0x6de   : > { %v10273_v25 = vmax.f32 %v9891_v13, 0.0  ;;  %v10272_v14 = vmax.f32 %v9840_v57, 0.0  ;;  %13825 = vmatmul.mubr.msk.bf16.vlgmr.msra.gmra.mrb[152].mxu0 %vm602_vm2, %v19038_v49 }
 0x6df   : > { %v10274_v35 = vmax.f32 %v9893_v39, 0.0  ;;  %13826 = vmatmul.mubr.msk.bf16.vlgmr.msra.gmra.mrb[152].mxu1 %vm602_vm2, %v19038_v49  ;;  %v10367_v58 = vpack.c.bf16 %v10271_v1, %v10239_v55  ;;  %10778 = vmatprep.mubr.bf16.mxu0 %v19960_v10 }
 0x6e0   : > { %v10369_v40 = vpack.c.bf16 %v10273_v25, %v10241_v63  ;;  %10819 = vmatprep.mubr.bf16.mxu1 %v19960_v10  ;;  %v10368_v24 = vpack.c.bf16 %v10272_v14, %v10240_v8  ;;  %v9843_v41 = vpop.f32.mrb[108].mxu1 }
 0x6e1   : > { %v10370_v22 = vpack.c.bf16 %v10274_v35, %v10242_v37  ;;  %v9896_v30 = vpop.f32.mrb[116].mxu0  ;;  %v9844_v3 = vadd.f32 %v9843_v41, %v19003_v62  ;;  %v9845_v44 = vpop.f32.mrb[109].mxu1 }
 0x6e2   : > { %v9897_v20 = vadd.f32 %v9896_v30, %v19003_v62  ;;  %v9898_v19 = vpop.f32.mrb[117].mxu0  ;;  %v9846_v46 = vadd.f32 %v9845_v44, %v19003_v62  ;;  %v9847_v36 = vpop.f32.mrb[110].mxu1  ;;  %10746 = vmatprep.subr.bf16.mxu0 %v10368_v24 }
 0x6e3   : > { %v9899_v5 = vadd.f32 %v9898_v19, %v19003_v62  ;;  %v9900_v59 = vpop.f32.mrb[118].mxu0  ;;  %10787 = vmatprep.subr.bf16.mxu1 %v10370_v22  ;;  %v10303_v53 = vmax.f32 %v9844_v3, 0.0  ;;  %v9848_v43 = vadd.f32 %v9847_v36, %v19005_v42  ;;  %v9849_v29 = vpop.f32.mrb[111].mxu1  ;;  %10747 = vmatpush1.bf16.msra.mxu0 %v10367_v58 }
 0x6e4   : > { %v10305_v56 = vmax.f32 %v9897_v20, 0.0  ;;  %v9901_v18 = vadd.f32 %v9900_v59, %v19005_v42  ;;  %v9902_v38 = vpop.f32.mrb[119].mxu0  ;;  %10788 = vmatpush1.bf16.msra.mxu1 %v10369_v40  ;;  %v10304_v60 = vmax.f32 %v9846_v46, 0.0  ;;  %v9850_v31 = vadd.f32 %v9849_v29, %v19005_v42 }
 0x6e5   : > { %v10306_v23 = vmax.f32 %v9899_v5, 0.0  ;;  %v9903_v34 = vadd.f32 %v9902_v38, %v19005_v42  ;;  %v10335_v52 = vmax.f32 %v9848_v43, 0.0 }
 0x6e6   : > { %v10337_v21 = vmax.f32 %v9901_v18, 0.0  ;;  %v10336_v61 = vmax.f32 %v9850_v31, 0.0 }
 0x6e7   : > { %v10338_v2 = vmax.f32 %v9903_v34, 0.0  ;;  %v10399_v15 = vpack.c.bf16 %v10335_v52, %v10303_v53 }
 0x6e8   : > { %v10401_v33 = vpack.c.bf16 %v10337_v21, %v10305_v56  ;;  %v10400_v12 = vpack.c.bf16 %v10336_v61, %v10304_v60 }
 0x6e9   : > { %v10402_v7 = vpack.c.bf16 %v10338_v2, %v10306_v23 }
 0x6ea   : > { %10748 = vmatprep.subr.bf16.mxu0 %v10400_v12 }
 0x6eb   : > { %10789 = vmatprep.subr.bf16.mxu1 %v10402_v7  ;;  %10749 = vmatpush1.bf16.msra.mxu0 %v10399_v15 }
 0x6ec   : > { %10790 = vmatpush1.bf16.msra.mxu1 %v10401_v33 }
 0x6ee   : > { %13827 = vmatmul.mubr.msk.bf16.vlgmr.msra.gmra.mrb[156].mxu0 %vm602_vm2, %v19038_v49 }
 0x6ef   : > { %13828 = vmatmul.mubr.msk.bf16.vlgmr.msra.gmra.mrb[156].mxu1 %vm602_vm2, %v19038_v49  ;;  %10860 = vmatprep.mubr.bf16.mxu0 %v19960_v10  ;;  %v9939_v48 = vpop.f32.mrb[112].mxu1  ;;  %v9992_v17 = vpop.f32.mrb[120].mxu0 }
 0x6f0   : > { %10901 = vmatprep.mubr.bf16.mxu1 %v19960_v10  ;;  %v9940_v16 = vadd.f32 %v9939_v48, %v18991_v27  ;;  %v9993_v50 = vadd.f32 %v9992_v17, %v18991_v27  ;;  %v9941_v51 = vpop.f32.mrb[113].mxu1  ;;  %v9994_v28 = vpop.f32.mrb[121].mxu0 }
 0x6f1   : > { %v9942_v54 = vadd.f32 %v9941_v51, %v18991_v27  ;;  %v9995_v6 = vadd.f32 %v9994_v28, %v18991_v27  ;;  %v9943_v45 = vpop.f32.mrb[114].mxu1  ;;  %v9996_v11 = vpop.f32.mrb[122].mxu0 }
 0x6f2   : > { %v10243_v47 = vmax.f32 %v9940_v16, 0.0  ;;  %v10245_v55 = vmax.f32 %v9993_v50, 0.0  ;;  %v9944_v63 = vadd.f32 %v9943_v45, %v18993_v0  ;;  %v9997_v32 = vadd.f32 %v9996_v11, %v18993_v0  ;;  %v9945_v13 = vpop.f32.mrb[115].mxu1  ;;  %v9998_v4 = vpop.f32.mrb[123].mxu0 }
 0x6f3   : > { %v10244_v9 = vmax.f32 %v9942_v54, 0.0  ;;  %v10246_v8 = vmax.f32 %v9995_v6, 0.0  ;;  %v9946_v37 = vadd.f32 %v9945_v13, %v18993_v0  ;;  %v9999_v57 = vadd.f32 %v9998_v4, %v18993_v0 }
 0x6f4   : > { %v10275_v39 = vmax.f32 %v9944_v63, 0.0  ;;  %v10277_v1 = vmax.f32 %v9997_v32, 0.0 }
 0x6f5   : > { %v10276_v25 = vmax.f32 %v9946_v37, 0.0  ;;  %v10278_v14 = vmax.f32 %v9999_v57, 0.0 }
 0x6f6   : > { %v10371_v35 = vpack.c.bf16 %v10275_v39, %v10243_v47  ;;  %v10373_v58 = vpack.c.bf16 %v10277_v1, %v10245_v55 }
 0x6f7   : > { %v10372_v40 = vpack.c.bf16 %v10276_v25, %v10244_v9  ;;  %v10374_v24 = vpack.c.bf16 %v10278_v14, %v10246_v8  ;;  %v9949_v22 = vpop.f32.mrb[116].mxu1  ;;  %v10002_v41 = vpop.f32.mrb[124].mxu0 }
 0x6f8   : > { %v9950_v30 = vadd.f32 %v9949_v22, %v19003_v62  ;;  %v10003_v3 = vadd.f32 %v10002_v41, %v19003_v62  ;;  %v9951_v20 = vpop.f32.mrb[117].mxu1  ;;  %v10004_v44 = vpop.f32.mrb[125].mxu0 }
 0x6f9   : > { %v9952_v19 = vadd.f32 %v9951_v20, %v19003_v62  ;;  %v10005_v46 = vadd.f32 %v10004_v44, %v19003_v62  ;;  %v9953_v5 = vpop.f32.mrb[118].mxu1  ;;  %v10006_v36 = vpop.f32.mrb[126].mxu0  ;;  %10828 = vmatprep.subr.bf16.mxu0 %v10372_v40  ;;  %10869 = vmatprep.subr.bf16.mxu1 %v10374_v24 }
 0x6fa   : > { %v10307_v59 = vmax.f32 %v9950_v30, 0.0  ;;  %v10309_v53 = vmax.f32 %v10003_v3, 0.0  ;;  %v9954_v56 = vadd.f32 %v9953_v5, %v19005_v42  ;;  %v10007_v43 = vadd.f32 %v10006_v36, %v19005_v42  ;;  %v9955_v18 = vpop.f32.mrb[119].mxu1  ;;  %v10008_v29 = vpop.f32.mrb[127].mxu0  ;;  %10829 = vmatpush1.bf16.msra.mxu0 %v10371_v35  ;;  %10870 = vmatpush1.bf16.msra.mxu1 %v10373_v58 }
 0x6fb   : > { %v10308_v38 = vmax.f32 %v9952_v19, 0.0  ;;  %v10310_v60 = vmax.f32 %v10005_v46, 0.0  ;;  %v9956_v23 = vadd.f32 %v9955_v18, %v19005_v42  ;;  %v10009_v31 = vadd.f32 %v10008_v29, %v19005_v42 }
 0x6fc   : > { %v10339_v34 = vmax.f32 %v9954_v56, 0.0  ;;  %v10341_v52 = vmax.f32 %v10007_v43, 0.0 }
 0x6fd   : > { %v10340_v21 = vmax.f32 %v9956_v23, 0.0  ;;  %v10342_v61 = vmax.f32 %v10009_v31, 0.0 }
 0x6fe   : > { %v10403_v2 = vpack.c.bf16 %v10339_v34, %v10307_v59  ;;  %v10405_v15 = vpack.c.bf16 %v10341_v52, %v10309_v53 }
 0x6ff   : > { %v10404_v33 = vpack.c.bf16 %v10340_v21, %v10308_v38  ;;  %v10406_v12 = vpack.c.bf16 %v10342_v61, %v10310_v60 }
 0x701   : > { %10830 = vmatprep.subr.bf16.mxu0 %v10404_v33  ;;  %10871 = vmatprep.subr.bf16.mxu1 %v10406_v12 }
 0x702   : > { %10831 = vmatpush1.bf16.msra.mxu0 %v10403_v2  ;;  %10872 = vmatpush1.bf16.msra.mxu1 %v10405_v15 }
 0x705   : > { %13829 = vmatmul.mubr.msk.bf16.vlgmr.msra.gmra.mrb[160].mxu0 %vm602_vm2, %v19038_v49  ;;  %13830 = vmatmul.mubr.msk.bf16.vlgmr.msra.gmra.mrb[160].mxu1 %vm602_vm2, %v19038_v49 }
 0x706   : > { %10942 = vmatprep.mubr.bf16.mxu0 %v19960_v10  ;;  %10983 = vmatprep.mubr.bf16.mxu1 %v19960_v10 }
 0x730   : > { %v10045_v7 = vpop.f32.mrb[120].mxu1  ;;  %v10098_v48 = vpop.f32.mrb[128].mxu0 }
 0x731   : > { %v10046_v17 = vadd.f32 %v10045_v7, %v18991_v27  ;;  %v10099_v16 = vadd.f32 %v10098_v48, %v18991_v27  ;;  %v10047_v50 = vpop.f32.mrb[121].mxu1  ;;  %v10100_v51 = vpop.f32.mrb[129].mxu0 }
 0x732   : > { %v10048_v28 = vadd.f32 %v10047_v50, %v18991_v27  ;;  %v10101_v54 = vadd.f32 %v10100_v51, %v18991_v27  ;;  %v10049_v6 = vpop.f32.mrb[122].mxu1  ;;  %v10102_v45 = vpop.f32.mrb[130].mxu0 }
 0x733   : > { %v10050_v11 = vadd.f32 %v10049_v6, %v18993_v0  ;;  %v10103_v47 = vadd.f32 %v10102_v45, %v18993_v0  ;;  %v10051_v55 = vpop.f32.mrb[123].mxu1  ;;  %v10104_v63 = vpop.f32.mrb[131].mxu0  ;;  %v10247_v4 = vmax.f32 %v10046_v17, 0.0  ;;  %v10249_v9 = vmax.f32 %v10099_v16, 0.0 }
 0x734   : > { %v10052_v32 = vadd.f32 %v10051_v55, %v18993_v0  ;;  %v10105_v13 = vadd.f32 %v10104_v63, %v18993_v0  ;;  %v10248_v57 = vmax.f32 %v10048_v28, 0.0  ;;  %v10250_v39 = vmax.f32 %v10101_v54, 0.0 }
 0x735   : > { %v10279_v8 = vmax.f32 %v10050_v11, 0.0  ;;  %v10281_v37 = vmax.f32 %v10103_v47, 0.0 }
 0x736   : > { %v10280_v1 = vmax.f32 %v10052_v32, 0.0  ;;  %v10282_v25 = vmax.f32 %v10105_v13, 0.0 }
 0x737   : > { %v10375_v14 = vpack.c.bf16 %v10279_v8, %v10247_v4  ;;  %v10377_v35 = vpack.c.bf16 %v10281_v37, %v10249_v9 }
 0x738   : > { %v10376_v58 = vpack.c.bf16 %v10280_v1, %v10248_v57  ;;  %v10378_v40 = vpack.c.bf16 %v10282_v25, %v10250_v39  ;;  %v10055_v24 = vpop.f32.mrb[124].mxu1  ;;  %v10108_v22 = vpop.f32.mrb[132].mxu0 }
 0x739   : > { %v10056_v41 = vadd.f32 %v10055_v24, %v19003_v62  ;;  %v10109_v30 = vadd.f32 %v10108_v22, %v19003_v62  ;;  %v10057_v3 = vpop.f32.mrb[125].mxu1  ;;  %v10110_v20 = vpop.f32.mrb[133].mxu0 }
 0x73a   : > { %v10058_v44 = vadd.f32 %v10057_v3, %v19003_v62  ;;  %v10111_v19 = vadd.f32 %v10110_v20, %v19003_v62  ;;  %v10059_v46 = vpop.f32.mrb[126].mxu1  ;;  %v10112_v5 = vpop.f32.mrb[134].mxu0  ;;  %10910 = vmatprep.subr.bf16.mxu0 %v10376_v58  ;;  %10951 = vmatprep.subr.bf16.mxu1 %v10378_v40 }
 0x73b   : > { %v10060_v36 = vadd.f32 %v10059_v46, %v19005_v42  ;;  %v10113_v59 = vadd.f32 %v10112_v5, %v19005_v42  ;;  %v10061_v53 = vpop.f32.mrb[127].mxu1  ;;  %v10114_v56 = vpop.f32.mrb[135].mxu0  ;;  %10911 = vmatpush1.bf16.msra.mxu0 %v10375_v14  ;;  %10952 = vmatpush1.bf16.msra.mxu1 %v10377_v35  ;;  %v10311_v29 = vmax.f32 %v10056_v41, 0.0  ;;  %v10313_v38 = vmax.f32 %v10109_v30, 0.0 }
 0x73c   : > { %v10062_v43 = vadd.f32 %v10061_v53, %v19005_v42  ;;  %v10115_v18 = vadd.f32 %v10114_v56, %v19005_v42  ;;  %v10312_v31 = vmax.f32 %v10058_v44, 0.0  ;;  %v10314_v34 = vmax.f32 %v10111_v19, 0.0 }
 0x73d   : > { %v10343_v60 = vmax.f32 %v10060_v36, 0.0  ;;  %v10345_v23 = vmax.f32 %v10113_v59, 0.0 }
 0x73e   : > { %v10344_v52 = vmax.f32 %v10062_v43, 0.0  ;;  %v10346_v21 = vmax.f32 %v10115_v18, 0.0 }
 0x73f   : > { %v10407_v61 = vpack.c.bf16 %v10343_v60, %v10311_v29  ;;  %v10409_v2 = vpack.c.bf16 %v10345_v23, %v10313_v38 }
 0x740   : > { %v10408_v15 = vpack.c.bf16 %v10344_v52, %v10312_v31  ;;  %v10410_v33 = vpack.c.bf16 %v10346_v21, %v10314_v34 }
 0x742   : > { %10912 = vmatprep.subr.bf16.mxu0 %v10408_v15  ;;  %10953 = vmatprep.subr.bf16.mxu1 %v10410_v33  ;;  %v19977_v33 = vld [vmem:[#allocation5_spill] sm:$0xff] }
 0x743   : > { %10913 = vmatpush1.bf16.msra.mxu0 %v10407_v61  ;;  %10954 = vmatpush1.bf16.msra.mxu1 %v10409_v2  ;;  %v14242_v2 = vld [vmem:[%s19837_s9 + $0x4] ss:$8 sps:$4 sm:$0xff]   ;;  %vm11077_vm3 = vcmp.eq.s32.totalorder %v19977_v33, 0  ;;  %vm11097_vm4 = vcmp.eq.s32.totalorder %v19977_v33, 1  ;;  %vm11117_vm5 = vcmp.eq.s32.totalorder %v19977_v33, 2  ;;  %vm11137_vm6 = vcmp.eq.s32.totalorder %v19977_v33, 3 }
 0x744   : > { %vm11157_vm7 = vcmp.eq.s32.totalorder %v19977_v33, 4  ;;  %vm11177_vm8 = vcmp.eq.s32.totalorder %v19977_v33, 5  ;;  %vm11197_vm9 = vcmp.eq.s32.totalorder %v19977_v33, 6  ;;  %vm11217_vm10 = vcmp.eq.s32.totalorder %v19977_v33, 7 }
 0x746   : > { %13831 = vmatmul.mubr.msk.bf16.vlgmr.msra.gmra.mrb[164].mxu0 %vm602_vm2, %v19038_v49  ;;  %13832 = vmatmul.mubr.msk.bf16.vlgmr.msra.gmra.mrb[164].mxu1 %vm602_vm2, %v19038_v49 }
 0x747   : > { %11024 = vmatprep.mubr.bf16.mxu0 %v19960_v10  ;;  %11065 = vmatprep.mubr.bf16.mxu1 %v19960_v10 }
 0x773   : > { %v10151_v12 = vpop.f32.mrb[128].mxu1 }
 0x774   : > { %v10204_v7 = vpop.f32.mrb[136].mxu0  ;;  %v10152_v48 = vadd.f32 %v10151_v12, %v18991_v27  ;;  %v10153_v16 = vpop.f32.mrb[129].mxu1 }
 0x775   : > { %v10205_v17 = vadd.f32 %v10204_v7, %v18991_v27  ;;  %v10206_v50 = vpop.f32.mrb[137].mxu0  ;;  %v10154_v51 = vadd.f32 %v10153_v16, %v18991_v27  ;;  %v10155_v54 = vpop.f32.mrb[130].mxu1  ;;  %v14240_v7 = vld [vmem:[%s19837_s9] ss:$8 sps:$4 sm:$0xff]   ;;  %v14428_v16 = vmov 0.0  }
 0x776   : > { %v10207_v28 = vadd.f32 %v10206_v50, %v18991_v27  ;;  %v10208_v6 = vpop.f32.mrb[138].mxu0  ;;  %v10156_v45 = vadd.f32 %v10155_v54, %v18993_v0  ;;  %v10157_v47 = vpop.f32.mrb[131].mxu1  ;;  %v10251_v13 = vmax.f32 %v10152_v48, 0.0  ;;  %v14245_v48 = vld [vmem:[%s19837_s9 + $0x14] ss:$8 sps:$4 sm:$0xff]   ;;  %v11079_v50 = vsel %vm11077_vm3, 1.0, %v14428_v16 }
 0x777   : > { %v10209_v11 = vadd.f32 %v10208_v6, %v18993_v0  ;;  %v10210_v55 = vpop.f32.mrb[139].mxu0  ;;  %v10158_v63 = vadd.f32 %v10157_v47, %v18993_v0  ;;  %v10253_v4 = vmax.f32 %v10205_v17, 0.0  ;;  %v10252_v37 = vmax.f32 %v10154_v51, 0.0 }
 0x778   : > { %v10211_v32 = vadd.f32 %v10210_v55, %v18993_v0  ;;  %v10283_v9 = vmax.f32 %v10156_v45, 0.0  ;;  %v10254_v57 = vmax.f32 %v10207_v28, 0.0  ;;  %v14243_v28 = vld [vmem:[%s19837_s9 + $0x10] ss:$8 sps:$4 sm:$0xff]   ;;  %v11099_v6 = vsel %vm11097_vm4, 1.0, %v14428_v16 }
 0x779   : > { %v10285_v8 = vmax.f32 %v10209_v11, 0.0  ;;  %v10284_v39 = vmax.f32 %v10158_v63, 0.0  ;;  %v14248_v45 = vld [vmem:[%s19837_s9 + $0x24] ss:$8 sps:$4 sm:$0xff]   ;;  %vm11974_vm3 = vcmask 130048  }
 0x77a   : > { %v10286_v27 = vmax.f32 %v10211_v32, 0.0  ;;  %v10379_v1 = vpack.c.bf16 %v10283_v9, %v10251_v13 }
 0x77b   : > { %v10381_v25 = vpack.c.bf16 %v10285_v8, %v10253_v4  ;;  %v10380_v14 = vpack.c.bf16 %v10284_v39, %v10252_v37  ;;  %v10161_v58 = vpop.f32.mrb[132].mxu1 }
 0x77c   : > { %v10382_v35 = vpack.c.bf16 %v10286_v27, %v10254_v57  ;;  %v10214_v40 = vpop.f32.mrb[140].mxu0  ;;  %v10162_v24 = vadd.f32 %v10161_v58, %v19003_v62  ;;  %v10163_v41 = vpop.f32.mrb[133].mxu1  ;;  %v14246_v57 = vld [vmem:[%s19837_s9 + $0x20] ss:$8 sps:$4 sm:$0xff]  }
 0x77d   : > { %v10215_v22 = vadd.f32 %v10214_v40, %v19003_v62  ;;  %v10216_v0 = vpop.f32.mrb[141].mxu0  ;;  %v10164_v30 = vadd.f32 %v10163_v41, %v19003_v62  ;;  %v10165_v20 = vpop.f32.mrb[134].mxu1  ;;  %10992 = vmatprep.subr.bf16.mxu0 %v10380_v14 }
 0x77e   : > { %v10217_v3 = vadd.f32 %v10216_v0, %v19003_v62  ;;  %v10218_v44 = vpop.f32.mrb[142].mxu0  ;;  %11033 = vmatprep.subr.bf16.mxu1 %v10382_v35  ;;  %v10166_v19 = vadd.f32 %v10165_v20, %v19005_v42  ;;  %v10167_v5 = vpop.f32.mrb[135].mxu1  ;;  %10993 = vmatpush1.bf16.msra.mxu0 %v10379_v1  ;;  %v10315_v56 = vmax.f32 %v10162_v24, 0.0  ;;  %v14251_v1 = vld [vmem:[%s19837_s9 + $0x34] ss:$8 sps:$4 sm:$0xff]   ;;  %v11119_v24 = vsel %vm11117_vm5, 1.0, %v14428_v16 }
 0x77f   : > { %v10219_v46 = vadd.f32 %v10218_v44, %v19005_v42  ;;  %v10220_v36 = vpop.f32.mrb[143].mxu0  ;;  %11034 = vmatpush1.bf16.msra.mxu1 %v10381_v25  ;;  %v10168_v59 = vadd.f32 %v10167_v5, %v19005_v42  ;;  %v10317_v43 = vmax.f32 %v10215_v22, 0.0  ;;  %v10316_v29 = vmax.f32 %v10164_v30, 0.0  ;;  %v14249_v0 = vld [vmem:[%s19837_s9 + $0x30] ss:$8 sps:$4 sm:$0xff]  }
 0x780   : > { %v10221_v53 = vadd.f32 %v10220_v36, %v19005_v42  ;;  %v10347_v18 = vmax.f32 %v10166_v19, 0.0  ;;  %v10318_v38 = vmax.f32 %v10217_v3, 0.0  ;;  %v11139_v44 = vsel %vm11137_vm6, 1.0, %v14428_v16 }
 0x781   : > { %v10349_v62 = vmax.f32 %v10219_v46, 0.0  ;;  %v10348_v60 = vmax.f32 %v10168_v59, 0.0 }
 0x782   : > { %v10350_v23 = vmax.f32 %v10221_v53, 0.0  ;;  %v10411_v31 = vpack.c.bf16 %v10347_v18, %v10315_v56 }
 0x783   : > { %v10413_v34 = vpack.c.bf16 %v10349_v62, %v10317_v43  ;;  %v10412_v52 = vpack.c.bf16 %v10348_v60, %v10316_v29  ;;  %v10452_v61 = vpop.f32.mrb[136].mxu1 }
 0x784   : > { %v10414_v21 = vpack.c.bf16 %v10350_v23, %v10318_v38  ;;  %v10454_v15 = vpop.f32.mrb[137].mxu1  ;;  %v11084_v17 = vrot.slane %v10452_v61, %v19961_v26 }
 0x785   : > { %10994 = vmatprep.subr.bf16.mxu0 %v10412_v52  ;;  %v10456_v42 = vpop.f32.mrb[138].mxu1  ;;  %v11088_v51 = vrot.slane %v10454_v15, %v19961_v26 }
 0x786   : > { %11035 = vmatprep.subr.bf16.mxu1 %v10414_v21  ;;  %10995 = vmatpush1.bf16.msra.mxu0 %v10411_v31  ;;  %v10457_v12 = vpop.f32.mrb[139].mxu1  ;;  %v11089_v11 = vmul.f32 %v11084_v17, %v11079_v50 }
 0x787   : > { %11036 = vmatpush1.bf16.msra.mxu1 %v10413_v34  ;;  %11595 = vmatprep.subr.bf16.mxu0 %v14242_v2  ;;  %v11090_v63 = vmul.f32 %v11088_v51, %v11079_v50  ;;  %v11092_v32 = vmul.f32 0.0, %v11088_v51  ;;  %v11159_v12 = vsel %vm11157_vm7, 1.0, %v14428_v16  ;;  %v14252_v50 = vld [vmem:[%s19837_s9 + $0x40] ss:$8 sps:$4 sm:$0xff]   ;;  %v14254_v51 = vld [vmem:[%s19837_s9 + $0x44] ss:$8 sps:$4 sm:$0xff]  }
 0x789   : > { %13833 = vmatmul.mubr.msk.bf16.vlgmr.msra.gmra.mrb[168].mxu0 %vm602_vm2, %v19038_v49 }
 0x78a   : > { %13834 = vmatmul.mubr.msk.bf16.vlgmr.msra.gmra.mrb[168].mxu1 %vm602_vm2, %v19038_v49  ;;  %11596 = vmatpush1.bf16.msra.mxu0 %v14240_v7  ;;  %v11091_v49 = vmul.f32 0.0, %v11084_v17  ;;  %v11179_v7 = vsel %vm11177_vm8, 1.0, %v14428_v16 }
 0x78b   : > { %v10493_v54 = vpop.f32.mrb[140].mxu1  ;;  %11597 = vmatprep.subr.bf16.mxu0 %v14245_v48 }
 0x78c   : > { %v11104_v47 = vrot.slane %v10493_v54, %v19961_v26  ;;  %v10495_v55 = vpop.f32.mrb[141].mxu1 }
 0x78d   : > { %v11108_v13 = vrot.slane %v10495_v55, %v19961_v26  ;;  %v10497_v4 = vpop.f32.mrb[142].mxu1 }
 0x78e   : > { %v11109_v9 = vmul.f32 %v11104_v47, %v11099_v6  ;;  %v11111_v8 = vmul.f32 0.0, %v11104_v47  ;;  %v10498_v37 = vpop.f32.mrb[143].mxu1  ;;  %11598 = vmatpush1.bf16.msra.mxu0 %v14243_v28 }
 0x78f   : > { %v11110_v39 = vmul.f32 %v11108_v13, %v11099_v6  ;;  %v11112_v27 = vmul.f32 0.0, %v11108_v13  ;;  %11599 = vmatprep.subr.bf16.mxu0 %v14248_v45 }
 0x790   : > { %v11113_v25 = vadd.f32 %v11109_v9, %v11089_v11  ;;  %v11115_v14 = vadd.f32 %v11111_v8, %v11091_v49 }
 0x791   : > { %v11114_v35 = vadd.f32 %v11110_v39, %v11090_v63  ;;  %v11116_v58 = vadd.f32 %v11112_v27, %v11092_v32  ;;  %v10534_v40 = vpop.f32.mrb[144].mxu0  ;;  %v14255_v63 = vld [vmem:[%s19837_s9 + $0x50] ss:$8 sps:$4 sm:$0xff]  }
 0x792   : > { %v11124_v22 = vrot.slane %v10534_v40, %v19961_v26  ;;  %v10536_v41 = vpop.f32.mrb[145].mxu0  ;;  %11600 = vmatpush1.bf16.msra.mxu0 %v14246_v57  ;;  %v14257_v57 = vld [vmem:[%s19837_s9 + $0x54] ss:$8 sps:$4 sm:$0xff]  }
 0x793   : > { %v11128_v30 = vrot.slane %v10536_v41, %v19961_v26  ;;  %v10538_v3 = vpop.f32.mrb[146].mxu0  ;;  %v10575_v20 = vpop.f32.mrb[144].mxu1  ;;  %11601 = vmatprep.subr.bf16.mxu0 %v14251_v1 }
 0x794   : > { %v11129_v19 = vmul.f32 %v11124_v22, %v11119_v24  ;;  %v11131_v46 = vmul.f32 0.0, %v11124_v22  ;;  %v11144_v5 = vrot.slane %v10575_v20, %v19961_v26  ;;  %v10539_v36 = vpop.f32.mrb[147].mxu0  ;;  %v10577_v59 = vpop.f32.mrb[145].mxu1  ;;  %v14263_v20 = vld [vmem:[%s19837_s9 + $0x74] ss:$8 sps:$4 sm:$0xff]  }
 0x795   : > { %v11130_v53 = vmul.f32 %v11128_v30, %v11119_v24  ;;  %v11132_v56 = vmul.f32 0.0, %v11128_v30  ;;  %v11148_v43 = vrot.slane %v10577_v59, %v19961_v26  ;;  %v10579_v18 = vpop.f32.mrb[146].mxu1  ;;  %v11199_v36 = vsel %vm11197_vm9, 1.0, %v14428_v16 }
 0x796   : > { %v11133_v62 = vadd.f32 %v11129_v19, %v11113_v25  ;;  %v11135_v29 = vadd.f32 %v11131_v46, %v11115_v14  ;;  %v11149_v38 = vmul.f32 %v11144_v5, %v11139_v44  ;;  %v11151_v60 = vmul.f32 0.0, %v11144_v5  ;;  %v10580_v23 = vpop.f32.mrb[147].mxu1  ;;  %11602 = vmatpush1.bf16.msra.mxu0 %v14249_v0  ;;  %v14260_v14 = vld [vmem:[%s19837_s9 + $0x64] ss:$8 sps:$4 sm:$0xff]   ;;  %v14258_v0 = vld [vmem:[%s19837_s9 + $0x60] ss:$8 sps:$4 sm:$0xff]  }
 0x797   : > { %v11134_v31 = vadd.f32 %v11130_v53, %v11114_v35  ;;  %v11136_v34 = vadd.f32 %v11132_v56, %v11116_v58  ;;  %v11150_v52 = vmul.f32 %v11148_v43, %v11139_v44  ;;  %v11152_v21 = vmul.f32 0.0, %v11148_v43  ;;  %11603 = vmatprep.subr.bf16.mxu0 %v14254_v51  ;;  %v14261_v44 = vld [vmem:[%s19837_s9 + $0x70] ss:$8 sps:$4 sm:$0xff]   ;;  %v14266_v19 = vld [vmem:[%s19837_s9 + $0x84] ss:$8 sps:$4 sm:$0xff]  }
 0x798   : > { %v11153_v61 = vadd.f32 %v11149_v38, %v11133_v62  ;;  %v11155_v2 = vadd.f32 %v11151_v60, %v11135_v29  ;;  %v14264_v46 = vld [vmem:[%s19837_s9 + $0x80] ss:$8 sps:$4 sm:$0xff]   ;;  %v11219_v53 = vsel %vm11217_vm10, 1.0, %v14428_v16  ;;  %v14269_v56 = vld [vmem:[%s19837_s9 + $0x94] ss:$8 sps:$4 sm:$0xff]  }
 0x799   : > { %v11154_v15 = vadd.f32 %v11150_v52, %v11134_v31  ;;  %v11156_v42 = vadd.f32 %v11152_v21, %v11136_v34 }
 0x79a   : > { %11604 = vmatpush1.bf16.msra.mxu0 %v14252_v50  ;;  %v14272_v50 = vld [vmem:[%s19837_s9 + $0xa4] ss:$8 sps:$4 sm:$0xff]  }
 0x79b   : > { %11605 = vmatprep.subr.bf16.mxu0 %v14257_v57 }
 0x79e   : > { %11606 = vmatpush1.bf16.msra.mxu0 %v14255_v63  ;;  %v14275_v63 = vld [vmem:[%s19837_s9 + $0xb4] ss:$8 sps:$4 sm:$0xff]  }
 0x79f   : > { %11607 = vmatprep.subr.bf16.mxu0 %v14260_v14 }
 0x7a1   : > { %v10616_v48 = vpop.f32.mrb[148].mxu0 }
 0x7a2   : > { %v10657_v17 = vpop.f32.mrb[148].mxu1  ;;  %v11164_v28 = vrot.slane %v10616_v48, %v19961_v26  ;;  %v10618_v54 = vpop.f32.mrb[149].mxu0  ;;  %11608 = vmatpush1.bf16.msra.mxu0 %v14258_v0 }
 0x7a3   : > { %v11184_v6 = vrot.slane %v10657_v17, %v19961_v26  ;;  %v10659_v45 = vpop.f32.mrb[149].mxu1  ;;  %v11168_v11 = vrot.slane %v10618_v54, %v19961_v26  ;;  %v10620_v49 = vpop.f32.mrb[150].mxu0  ;;  %11609 = vmatprep.subr.bf16.mxu0 %v14263_v20 }
 0x7a4   : > { %v11188_v47 = vrot.slane %v10659_v45, %v19961_v26  ;;  %v10661_v55 = vpop.f32.mrb[150].mxu1  ;;  %v11169_v32 = vmul.f32 %v11164_v28, %v11159_v12  ;;  %v11171_v13 = vmul.f32 0.0, %v11164_v28  ;;  %v10621_v8 = vpop.f32.mrb[151].mxu0  ;;  %v14270_v49 = vld [vmem:[%s19837_s9 + $0xa0] ss:$8 sps:$4 sm:$0xff]  }
 0x7a5   : > { %v11189_v4 = vmul.f32 %v11184_v6, %v11179_v7  ;;  %v11191_v9 = vmul.f32 0.0, %v11184_v6  ;;  %v10662_v37 = vpop.f32.mrb[151].mxu1  ;;  %v11170_v39 = vmul.f32 %v11168_v11, %v11159_v12  ;;  %v11172_v27 = vmul.f32 0.0, %v11168_v11 }
 0x7a6   : > { %v11190_v1 = vmul.f32 %v11188_v47, %v11179_v7  ;;  %v11192_v25 = vmul.f32 0.0, %v11188_v47  ;;  %v11173_v35 = vadd.f32 %v11169_v32, %v11153_v61  ;;  %v11175_v58 = vadd.f32 %v11171_v13, %v11155_v2  ;;  %11610 = vmatpush1.bf16.msra.mxu0 %v14261_v44  ;;  %v14273_v13 = vld [vmem:[%s19837_s9 + $0xb0] ss:$8 sps:$4 sm:$0xff]  }
 0x7a7   : > { %v11174_v40 = vadd.f32 %v11170_v39, %v11154_v15  ;;  %v11176_v24 = vadd.f32 %v11172_v27, %v11156_v42  ;;  %11611 = vmatprep.subr.bf16.mxu0 %v14266_v19  ;;  %v14267_v42 = vld [vmem:[%s19837_s9 + $0x90] ss:$8 sps:$4 sm:$0xff]   ;;  %v19298_v32 = vadd.s32 8, %v19977_v33  ;;  %v14276_v33 = vld [vmem:[%s19837_s9 + $0xc0] ss:$8 sps:$4 sm:$0xff]  }
 0x7a8   : > { %v11193_v22 = vadd.f32 %v11189_v4, %v11173_v35  ;;  %v11195_v41 = vadd.f32 %v11191_v9, %v11175_v58  ;;  %v14278_v4 = vld [vmem:[%s19837_s9 + $0xc4] ss:$8 sps:$4 sm:$0xff]  }
 0x7a9   : > { %v11194_v30 = vadd.f32 %v11190_v1, %v11174_v40  ;;  %v11196_v3 = vadd.f32 %v11192_v25, %v11176_v24  ;;  %vm11238_vm11 = vcmp.eq.s32.totalorder %v19298_v32, 8  ;;  %vm11258_vm12 = vcmp.eq.s32.totalorder %v19298_v32, 9 }
 0x7aa   : > { %11612 = vmatpush1.bf16.msra.mxu0 %v14264_v46  ;;  %v11240_v8 = vsel %vm11238_vm11, 1.0, %v14428_v16  ;;  %v11260_v57 = vsel %vm11258_vm12, 1.0, %v14428_v16  ;;  %vm11278_vm13 = vcmp.eq.s32.totalorder %v19298_v32, 10  ;;  %vm11298_vm14 = vcmp.eq.s32.totalorder %v19298_v32, 11 }
 0x7ab   : > { %11613 = vmatprep.subr.bf16.mxu0 %v14269_v56  ;;  %vm11318_vm15 = vcmp.eq.s32.totalorder %v19298_v32, 12  ;;  %vm11338_vm0 = vcmp.eq.s32.totalorder %v19298_v32, 13  ;;  %vm11358_vm1 = vcmp.eq.s32.totalorder %v19298_v32, 14  ;;  %vm11378_vm2 = vcmp.eq.s32.totalorder %v19298_v32, 15 }
 0x7ae   : > { %11614 = vmatpush1.bf16.msra.mxu0 %v14267_v42 }
 0x7af   : > { %11615 = vmatprep.subr.bf16.mxu0 %v14272_v50 }
 0x7b1   : > { %v10698_v5 = vpop.f32.mrb[152].mxu0 }
 0x7b2   : > { %v10739_v59 = vpop.f32.mrb[152].mxu1  ;;  %v11204_v43 = vrot.slane %v10698_v5, %v19961_v26  ;;  %v10700_v18 = vpop.f32.mrb[153].mxu0  ;;  %11616 = vmatpush1.bf16.msra.mxu0 %v14270_v49 }
 0x7b3   : > { %v11224_v62 = vrot.slane %v10739_v59, %v19961_v26  ;;  %v10741_v29 = vpop.f32.mrb[153].mxu1  ;;  %v11208_v38 = vrot.slane %v10700_v18, %v19961_v26  ;;  %v10702_v60 = vpop.f32.mrb[154].mxu0  ;;  %11617 = vmatprep.subr.bf16.mxu0 %v14275_v63 }
 0x7b4   : > { %v11228_v23 = vrot.slane %v10741_v29, %v19961_v26  ;;  %v10743_v31 = vpop.f32.mrb[154].mxu1  ;;  %v11209_v34 = vmul.f32 %v11204_v43, %v11199_v36  ;;  %v11211_v52 = vmul.f32 0.0, %v11204_v43  ;;  %v10703_v2 = vpop.f32.mrb[155].mxu0 }
 0x7b5   : > { %v11229_v21 = vmul.f32 %v11224_v62, %v11219_v53  ;;  %v11231_v61 = vmul.f32 0.0, %v11224_v62  ;;  %v10744_v15 = vpop.f32.mrb[155].mxu1  ;;  %v11210_v12 = vmul.f32 %v11208_v38, %v11199_v36  ;;  %v11212_v7 = vmul.f32 0.0, %v11208_v38 }
 0x7b6   : > { %v11230_v48 = vmul.f32 %v11228_v23, %v11219_v53  ;;  %v11232_v17 = vmul.f32 0.0, %v11228_v23  ;;  %v11213_v51 = vadd.f32 %v11209_v34, %v11193_v22  ;;  %v11215_v28 = vadd.f32 %v11211_v52, %v11195_v41  ;;  %11618 = vmatpush1.bf16.msra.mxu0 %v14273_v13 }
 0x7b7   : > { %v11214_v54 = vadd.f32 %v11210_v12, %v11194_v30  ;;  %v11216_v6 = vadd.f32 %v11212_v7, %v11196_v3  ;;  %11619 = vmatprep.subr.bf16.mxu0 %v14278_v4  ;;  %v11280_v38 = vsel %vm11278_vm13, 1.0, %v14428_v16  ;;  %v11300_v23 = vsel %vm11298_vm14, 1.0, %v14428_v16 }
 0x7b8   : > { %v11233_v45 = vadd.f32 %v11229_v21, %v11213_v51  ;;  %v11235_v11 = vadd.f32 %v11231_v61, %v11215_v28 }
 0x7b9   : > { %v11234_v47 = vadd.f32 %v11230_v48, %v11214_v54  ;;  %v11236_v55 = vadd.f32 %v11232_v17, %v11216_v6 }
 0x7ba   : > { %11620 = vmatpush1.bf16.msra.mxu0 %v14276_v33 }
 0x7c1   : > { %v10780_v9 = vpop.f32.mrb[156].mxu0 }
 0x7c2   : > { %v10821_v37 = vpop.f32.mrb[156].mxu1  ;;  %v11244_v39 = vrot.slane %v10780_v9, %v19961_v26  ;;  %v10782_v27 = vpop.f32.mrb[157].mxu0  ;;  %v14279_v9 = vld [vmem:[%s19837_s9 + $0xd0] ss:$8 sps:$4 sm:$0xff]  }
 0x7c3   : > { %v11264_v1 = vrot.slane %v10821_v37, %v19961_v26  ;;  %v10823_v25 = vpop.f32.mrb[157].mxu1  ;;  %v11248_v14 = vrot.slane %v10782_v27, %v19961_v26  ;;  %v10784_v35 = vpop.f32.mrb[158].mxu0  ;;  %v14282_v37 = vld [vmem:[%s19837_s9 + $0xe0] ss:$8 sps:$4 sm:$0xff]   ;;  %v14285_v27 = vld [vmem:[%s19837_s9 + $0xf0] ss:$8 sps:$4 sm:$0xff]  }
 0x7c4   : > { %v11268_v58 = vrot.slane %v10823_v25, %v19961_v26  ;;  %v10825_v40 = vpop.f32.mrb[158].mxu1  ;;  %v11249_v24 = vmul.f32 0.0, %v11244_v39  ;;  %v11251_v22 = vmul.f32 %v11244_v39, %v11240_v8  ;;  %v10785_v30 = vpop.f32.mrb[159].mxu0  ;;  %v14287_v39 = vld [vmem:[%s19837_s9 + $0xf4] ss:$8 sps:$4 sm:$0xff]  }
 0x7c5   : > { %v11269_v41 = vmul.f32 0.0, %v11264_v1  ;;  %v11271_v0 = vmul.f32 %v11264_v1, %v11260_v57  ;;  %v10826_v3 = vpop.f32.mrb[159].mxu1  ;;  %v11250_v20 = vmul.f32 0.0, %v11248_v14  ;;  %v11252_v44 = vmul.f32 %v11248_v14, %v11240_v8  ;;  %v14281_v8 = vld [vmem:[%s19837_s9 + $0xd4] ss:$8 sps:$4 sm:$0xff]  }
 0x7c6   : > { %v11270_v19 = vmul.f32 0.0, %v11268_v58  ;;  %v11272_v46 = vmul.f32 %v11268_v58, %v11260_v57  ;;  %v11253_v5 = vadd.f32 %v11249_v24, %v11233_v45  ;;  %v11255_v36 = vadd.f32 %v11251_v22, %v11235_v11  ;;  %11621 = vmatprep.subr.bf16.mxu0 %v14281_v8  ;;  %v14284_v57 = vld [vmem:[%s19837_s9 + $0xe4] ss:$8 sps:$4 sm:$0xff]   ;;  %v482_v1 = vld [vmem:[%s19833_s5 + $0x1] sm:$0x1] }
 0x7c7   : > { %v11254_v59 = vadd.f32 %v11250_v20, %v11234_v47  ;;  %v11256_v53 = vadd.f32 %v11252_v44, %v11236_v55  ;;  %11622 = vmatpush1.bf16.msra.mxu0 %v14279_v9  ;;  %14195 = vpush %v482_v1  ;;  %v11320_v14 = vsel %vm11318_vm15, 1.0, %v14428_v16  ;;  %v11340_v58 = vsel %vm11338_vm0, 1.0, %v14428_v16  ;;  %v19366_v1 = vld [vmem:[%s19836_s8 + $0x40] sm:$0xff]  }
 0x7c8   : > { %v11273_v56 = vadd.f32 %v11269_v41, %v11253_v5  ;;  %v11275_v43 = vadd.f32 %v11271_v0, %v11255_v36  ;;  %11623 = vmatprep.subr.bf16.mxu0 %v14284_v57  ;;  %13979 = vmatprep.subr.bf16.mxu1 %v19366_v1 }
 0x7c9   : > { %v11274_v18 = vadd.f32 %v11270_v19, %v11254_v59  ;;  %v11276_v62 = vadd.f32 %v11272_v46, %v11256_v53 }
 0x7cb   : > { %11624 = vmatpush1.bf16.msra.mxu0 %v14282_v37 }
 0x7cc   : > { %11625 = vmatprep.subr.bf16.mxu0 %v14287_v39 }
 0x7cf   : > { %11626 = vmatpush1.bf16.msra.mxu0 %v14285_v27 }
 0x7d8   : > { %v10862_v29 = vpop.f32.mrb[160].mxu0  ;;  %v10903_v60 = vpop.f32.mrb[160].mxu1 }
 0x7d9   : > { %v11284_v31 = vrot.slane %v10862_v29, %v19961_v26  ;;  %v10864_v34 = vpop.f32.mrb[161].mxu0  ;;  %v11304_v52 = vrot.slane %v10903_v60, %v19961_v26  ;;  %v10905_v21 = vpop.f32.mrb[161].mxu1 }
 0x7da   : > { %v11288_v61 = vrot.slane %v10864_v34, %v19961_v26  ;;  %v10866_v2 = vpop.f32.mrb[162].mxu0  ;;  %v11308_v15 = vrot.slane %v10905_v21, %v19961_v26  ;;  %v10907_v42 = vpop.f32.mrb[162].mxu1 }
 0x7db   : > { %v11289_v12 = vmul.f32 0.0, %v11284_v31  ;;  %v11291_v7 = vmul.f32 %v11284_v31, %v11280_v38  ;;  %v11309_v48 = vmul.f32 0.0, %v11304_v52  ;;  %v11311_v17 = vmul.f32 %v11304_v52, %v11300_v23  ;;  %v10867_v50 = vpop.f32.mrb[163].mxu0  ;;  %v10908_v51 = vpop.f32.mrb[163].mxu1 }
 0x7dc   : > { %v11290_v28 = vmul.f32 0.0, %v11288_v61  ;;  %v11292_v54 = vmul.f32 %v11288_v61, %v11280_v38  ;;  %v11310_v6 = vmul.f32 0.0, %v11308_v15  ;;  %v11312_v45 = vmul.f32 %v11308_v15, %v11300_v23 }
 0x7dd   : > { %v11293_v11 = vadd.f32 %v11289_v12, %v11273_v56  ;;  %v11295_v49 = vadd.f32 %v11291_v7, %v11275_v43  ;;  %v11360_v61 = vsel %vm11358_vm1, 1.0, %v14428_v16  ;;  %v11380_v15 = vsel %vm11378_vm2, 1.0, %v14428_v16 }
 0x7de   : > { %v11294_v47 = vadd.f32 %v11290_v28, %v11274_v18  ;;  %v11296_v55 = vadd.f32 %v11292_v54, %v11276_v62 }
 0x7df   : > { %v11313_v63 = vadd.f32 %v11309_v48, %v11293_v11  ;;  %v11315_v13 = vadd.f32 %v11311_v17, %v11295_v49 }
 0x7e0   : > { %v11314_v4 = vadd.f32 %v11310_v6, %v11294_v47  ;;  %v11316_v33 = vadd.f32 %v11312_v45, %v11296_v55 }
 0x7f8   : > { %s14196_s19 = spop %14195 }
 0x819   : > { %v10944_v25 = vpop.f32.mrb[164].mxu0  ;;  %v10985_v35 = vpop.f32.mrb[164].mxu1 }
 0x81a   : > { %v11324_v40 = vrot.slane %v10944_v25, %v19961_v26  ;;  %v10946_v24 = vpop.f32.mrb[165].mxu0  ;;  %v11344_v22 = vrot.slane %v10985_v35, %v19961_v26  ;;  %v10987_v41 = vpop.f32.mrb[165].mxu1  ;;  %v19371_v25 = vld [vmem:[%s19836_s8] sm:$0xff]   ;;  %v19383_v35 = vld [vmem:[%s19836_s8 + $0x8] sm:$0xff]  }
 0x81b   : > { %v11328_v0 = vrot.slane %v10946_v24, %v19961_v26  ;;  %v11348_v30 = vrot.slane %v10987_v41, %v19961_v26  ;;  %v10948_v3 = vpop.f32.mrb[166].mxu0  ;;  %v10989_v20 = vpop.f32.mrb[166].mxu1  ;;  %13980 = vmatpush3.bf16.msra.mxu1 %v19371_v25  ;;  %v19401_v24 = vld [vmem:[%s19836_s8 + $0x58] sm:$0xff]   ;;  %v19413_v41 = vld [vmem:[%s19836_s8 + $0x60] sm:$0xff]  }
 0x81c   : > { %v11329_v44 = vmul.f32 0.0, %v11324_v40  ;;  %v11331_v19 = vmul.f32 %v11324_v40, %v11320_v14  ;;  %v11349_v46 = vmul.f32 0.0, %v11344_v22  ;;  %v11351_v5 = vmul.f32 %v11344_v22, %v11340_v58  ;;  %v10949_v36 = vpop.f32.mrb[167].mxu0  ;;  %v10990_v59 = vpop.f32.mrb[167].mxu1  ;;  %v19395_v40 = vld [vmem:[%s19836_s8 + $0x10] sm:$0xff]   ;;  %v19407_v22 = vld [vmem:[%s19836_s8 + $0x18] sm:$0xff]  }
 0x81d   : > { %v11330_v53 = vmul.f32 0.0, %v11328_v0  ;;  %v11332_v56 = vmul.f32 %v11328_v0, %v11320_v14  ;;  %v11350_v43 = vmul.f32 0.0, %v11348_v30  ;;  %v11352_v18 = vmul.f32 %v11348_v30, %v11340_v58  ;;  %v19377_v14 = vld [vmem:[%s19836_s8 + $0x48] sm:$0xff]   ;;  %v19389_v58 = vld [vmem:[%s19836_s8 + $0x50] sm:$0xff]   ;;  %v19419_v0 = vld [vmem:[%s19836_s8 + $0x20] sm:$0xff]  }
 0x81e   : > { %v11333_v62 = vadd.f32 %v11329_v44, %v11313_v63  ;;  %v11335_v29 = vadd.f32 %v11331_v19, %v11315_v13  ;;  %13981 = vmatprep.subr.bf16.mxu1 %v19377_v14  ;;  %v19425_v30 = vld [vmem:[%s19836_s8 + $0x68] sm:$0xff]   ;;  %v19437_v20 = vld [vmem:[%s19836_s8 + $0x70] sm:$0xff]   ;;  %v19449_v19 = vld [vmem:[%s19836_s8 + $0x78] sm:$0xff]  }
 0x81f   : > { %v11334_v38 = vadd.f32 %v11330_v53, %v11314_v4  ;;  %v11336_v60 = vadd.f32 %v11332_v56, %v11316_v33  ;;  %13982 = vmatpush3.bf16.msra.mxu1 %v19383_v35  ;;  %v19431_v3 = vld [vmem:[%s19836_s8 + $0x28] sm:$0xff]   ;;  %v19443_v44 = vld [vmem:[%s19836_s8 + $0x30] sm:$0xff]  }
 0x820   : > { %v11353_v23 = vadd.f32 %v11349_v46, %v11333_v62  ;;  %v11355_v31 = vadd.f32 %v11351_v5, %v11335_v29  ;;  %13983 = vmatprep.subr.bf16.mxu1 %v19389_v58  ;;  %v19455_v46 = vld [vmem:[%s19836_s8 + $0x38] sm:$0xff]  }
 0x821   : > { %v11354_v34 = vadd.f32 %v11350_v43, %v11334_v38  ;;  %v11356_v52 = vadd.f32 %v11352_v18, %v11336_v60  ;;  %v11648_v38 = vstv %s14196_s19  ;;  %s442_s19 = sand.u32 1, %s14411_s21  }
 0x822   : > { %s12744_s20 = sshll.u32 %s442_s19, 7 }
 0x823   : > { %13984 = vmatpush3.bf16.msra.mxu1 %v19395_v40  ;;  %s19608_s21 = scalar_lea.vmem [#allocation2], %s12744_s20 }
 0x824   : > { %13985 = vmatprep.subr.bf16.mxu1 %v19401_v24 }
 0x827   : > { %13986 = vmatpush3.bf16.msra.mxu1 %v19407_v22 }
 0x828   : > { %13987 = vmatprep.subr.bf16.mxu1 %v19413_v41 }
 0x82b   : > { %13988 = vmatpush3.bf16.msra.mxu1 %v19419_v0 }
 0x82c   : > { %13989 = vmatprep.subr.bf16.mxu1 %v19425_v30 }
 0x82f   : > { %13990 = vmatpush3.bf16.msra.mxu1 %v19431_v3 }
 0x830   : > { %13991 = vmatprep.subr.bf16.mxu1 %v19437_v20 }
 0x833   : > { %13992 = vmatpush3.bf16.msra.mxu1 %v19443_v44 }
 0x834   : > { %13993 = vmatprep.subr.bf16.mxu1 %v19449_v19 }
 0x837   : > { %13994 = vmatpush3.bf16.msra.mxu1 %v19455_v46 }
 0x85c   : > { %v11026_v21 = vpop.f32.mrb[168].mxu0 }
 0x85d   : > { %v11067_v2 = vpop.f32.mrb[168].mxu1  ;;  %v11364_v42 = vrot.slane %v11026_v21, %v19961_v26  ;;  %v11028_v12 = vpop.f32.mrb[169].mxu0 }
 0x85e   : > { %v11384_v7 = vrot.slane %v11067_v2, %v19961_v26  ;;  %v11069_v48 = vpop.f32.mrb[169].mxu1  ;;  %v11368_v17 = vrot.slane %v11028_v12, %v19961_v26  ;;  %v11030_v51 = vpop.f32.mrb[170].mxu0 }
 0x85f   : > { %v11388_v50 = vrot.slane %v11069_v48, %v19961_v26  ;;  %v11071_v28 = vpop.f32.mrb[170].mxu1  ;;  %v11369_v54 = vmul.f32 0.0, %v11364_v42  ;;  %v11371_v32 = vmul.f32 %v11364_v42, %v11360_v61  ;;  %v11031_v11 = vpop.f32.mrb[171].mxu0 }
 0x860   : > { %v11389_v6 = vmul.f32 0.0, %v11384_v7  ;;  %v11391_v45 = vmul.f32 %v11384_v7, %v11380_v15  ;;  %v11072_v49 = vpop.f32.mrb[171].mxu1  ;;  %v11370_v47 = vmul.f32 0.0, %v11368_v17  ;;  %v11372_v16 = vmul.f32 %v11368_v17, %v11360_v61 }
 0x861   : > { %v11390_v55 = vmul.f32 0.0, %v11388_v50  ;;  %v11392_v63 = vmul.f32 %v11388_v50, %v11380_v15  ;;  %v11373_v13 = vadd.f32 %v11369_v54, %v11353_v23  ;;  %v11375_v4 = vadd.f32 %v11371_v32, %v11355_v31 }
 0x862   : > { %v11374_v33 = vadd.f32 %v11370_v47, %v11354_v34  ;;  %v11376_v9 = vadd.f32 %v11372_v16, %v11356_v52 }
 0x863   : > { %v11393_v8 = vadd.f32 %v11389_v6, %v11373_v13  ;;  %v11395_v37 = vadd.f32 %v11391_v45, %v11375_v4 }
 0x864   : > { %v11394_v57 = vadd.f32 %v11390_v55, %v11374_v33  ;;  %v11396_v26 = vadd.f32 %v11392_v63, %v11376_v9 }
 0x865   : > { %v11397_v39 = vpack.c.bf16 %v11395_v37, %v11393_v8 }
 0x866   : > { %v11398_v27 = vpack.c.bf16 %v11396_v26, %v11394_v57 }
 0x867   : > { %v11399_v5 = vunpack.c.l.bf16 %v11397_v39  ;;  %v11401_v43 = vunpack.c.h.bf16 %v11397_v39 }
 0x868   : > { %11627 = vmatprep.mubr.bf16.mxu0 %v11398_v27  ;;  %v11400_v59 = vunpack.c.l.bf16 %v11398_v27  ;;  %v11402_v29 = vunpack.c.h.bf16 %v11398_v27 }
 0x869   : > { %11628 = vmatmul.mubr.bf16.vlgmr.msra.gmra.mrb[172].mxu0 %v11397_v39 }
 0x86a   : > { %12176 = vmatprep.mubr.bf16.mxu0 %v19960_v10 }
 0x93c   : > { %v11629_v36 = vpop.f32.mrb[172].mxu0 }
 0x93d   : > { %v11638_v53 = vadd.f32 %v11629_v36, %v11399_v5  ;;  %v11631_v56 = vpop.f32.mrb[173].mxu0 }
 0x93e   : > { %v11639_v18 = vadd.f32 %v11631_v56, %v11400_v59  ;;  %v11633_v62 = vpop.f32.mrb[174].mxu0 }
 0x93f   : > { %v11642_v60 = vmul.f32 0.5, %v11638_v53  ;;  %v11640_v23 = vadd.f32 %v11633_v62, %v11401_v43  ;;  %v11635_v31 = vpop.f32.mrb[175].mxu0 }
 0x940   : > { %v11643_v34 = vmul.f32 0.5, %v11639_v18  ;;  %v11641_v52 = vadd.f32 %v11635_v31, %v11402_v29 }
 0x941   : > { %v11644_v21 = vmul.f32 0.5, %v11640_v23  ;;  %v11650_v61 = vadd.f32 %v11648_v38, %v11642_v60 }
 0x942   : > { %v11645_v2 = vmul.f32 0.5, %v11641_v52  ;;  %v11651_v15 = vadd.f32 %v11648_v38, %v11643_v34 }
 0x943   : > { %v11652_v42 = vadd.f32 %v11648_v38, %v11644_v21  ;;  %11654 = vst [vmem:[%s468_s24] sm:$0xff] %v11650_v61  ;;  %v13867_v12 = vadd.f32 -2.1972246, %v11650_v61 }
 0x944   : > { %v11653_v7 = vadd.f32 %v11648_v38, %v11645_v2  ;;  %11655 = vst [vmem:[%s468_s24 + $0x8] sm:$0xff] %v11651_v15  ;;  %v13868_v48 = vadd.f32 -2.1972246, %v11651_v15 }
 0x945   : > { %11656 = vst [vmem:[%s468_s24 + $0x10] sm:$0xff] %v11652_v42  ;;  %v13869_v17 = vadd.f32 -2.1972246, %v11652_v42  ;;  %v13871_v50 = vmul.f32 -2.0, %v13867_v12 }
 0x946   : > { %11657 = vst [vmem:[%s468_s24 + $0x18] sm:$0xff] %v11653_v7  ;;  %v13870_v51 = vadd.f32 -2.1972246, %v11653_v7  ;;  %v13872_v28 = vmul.f32 -2.0, %v13868_v48  ;;  %s19784_s24 = scalar_lea.vmem (%p14519_p4), %s19840_s12, %s17007_s18 }
 0x947   : > { %v13873_v54 = vmul.f32 -2.0, %v13869_v17  ;;  %v11708_v32 = vmul.f32 1.442695, %v13871_v50 }
 0x948   : > { %v13874_v6 = vmul.f32 -2.0, %v13870_v51  ;;  %v11710_v45 = vmul.f32 1.442695, %v13872_v28 }
 0x949   : > { %14307 = vpow2.f32 %v11708_v32  ;;  %v11712_v11 = vmul.f32 1.442695, %v13873_v54 }
 0x94a   : > { %14309 = vpow2.f32 %v11710_v45  ;;  %v11714_v49 = vmul.f32 1.442695, %v13874_v6 }
 0x94b   : > { %14311 = vpow2.f32 %v11712_v11 }
 0x94c   : > { %14313 = vpow2.f32 %v11714_v49 }
 0x953   : > { %v14308_v47 = vpop.eup %14307 }
 0x954   : > { %v14310_v16 = vpop.eup %14309  ;;  %v11716_v55 = vadd.f32 1.0, %v14308_v47 }
 0x955   : > { %v14312_v63 = vpop.eup %14311  ;;  %v11717_v13 = vadd.f32 1.0, %v14310_v16 }
 0x956   : > { %v14314_v4 = vpop.eup %14313  ;;  %v11718_v33 = vadd.f32 1.0, %v14312_v63  ;;  %14315 = vrcp.f32 %v11716_v55 }
 0x957   : > { %v11719_v9 = vadd.f32 1.0, %v14314_v4  ;;  %14317 = vrcp.f32 %v11717_v13 }
 0x958   : > { %14319 = vrcp.f32 %v11718_v33 }
 0x959   : > { %14321 = vrcp.f32 %v11719_v9 }
 0x960   : > { %v14316_v8 = vpop.eup %14315 }
 0x961   : > { %v14318_v37 = vpop.eup %14317  ;;  %v19465_v57 = vmul.f32 %v14316_v8, %v11650_v61 }
 0x962   : > { %v14320_v26 = vpop.eup %14319  ;;  %v19467_v39 = vmul.f32 %v14318_v37, %v11651_v15 }
 0x963   : > { %v14322_v27 = vpop.eup %14321  ;;  %v19469_v5 = vmul.f32 %v14320_v26, %v11652_v42  ;;  %v13875_v36 = vmul.f32 -1.442695, %v19465_v57  ;;  %v13879_v59 = vadd.f32 -2.1972246, %v19465_v57 }
 0x964   : > { %v19473_v53 = vmul.f32 %v14322_v27, %v11653_v7  ;;  %v13876_v56 = vmul.f32 -1.442695, %v19467_v39  ;;  %v13880_v43 = vadd.f32 -2.1972246, %v19467_v39 }
 0x965   : > { %14323 = vpow2.f32 %v13875_v36  ;;  %v13877_v18 = vmul.f32 -1.442695, %v19469_v5  ;;  %v13881_v62 = vadd.f32 -2.1972246, %v19469_v5  ;;  %v13883_v29 = vmul.f32 -2.0, %v13879_v59 }
 0x966   : > { %14325 = vpow2.f32 %v13876_v56  ;;  %v13878_v38 = vmul.f32 -1.442695, %v19473_v53  ;;  %v13882_v60 = vadd.f32 -2.1972246, %v19473_v53  ;;  %v13884_v23 = vmul.f32 -2.0, %v13880_v43 }
 0x967   : > { %14327 = vpow2.f32 %v13877_v18  ;;  %v13885_v31 = vmul.f32 -2.0, %v13881_v62  ;;  %v11768_v34 = vmul.f32 1.442695, %v13883_v29  ;;  %v19500_v18 = vld [vmem:[%s461_s15 + $0x10] sm:$0xff]  ;;  %v19504_v29 = vld [vmem:[%s461_s15 + $0x8] sm:$0xff] }
 0x968   : > { %14329 = vpow2.f32 %v13878_v38  ;;  %v13886_v52 = vmul.f32 -2.0, %v13882_v60  ;;  %v11770_v21 = vmul.f32 1.442695, %v13884_v23  ;;  %v19506_v38 = vld [vmem:[%s461_s15 + $0x18] sm:$0xff]  ;;  %v19509_v23 = vld [vmem:[%s461_s15] sm:$0xff] }
 0x969   : > { %14331 = vpow2.f32 %v11768_v34  ;;  %v11772_v61 = vmul.f32 1.442695, %v13885_v31 }
 0x96a   : > { %14333 = vpow2.f32 %v11770_v21  ;;  %v11774_v2 = vmul.f32 1.442695, %v13886_v52 }
 0x96b   : > { %14335 = vpow2.f32 %v11772_v61 }
 0x96c   : > { %14337 = vpow2.f32 %v11774_v2  ;;  %v19518_v2 = vld [vmem:[%s19838_s10 + $0x4] ss:$8 sps:$4 sm:$0xff]  }
 0x96d   : > { %11978 = vmatprep.subr.bf16.mxu1 %v19518_v2  ;;  %12144 = vmatprep.subr.bf16.mxu0 %v19518_v2 }
 0x96f   : > { %v14324_v15 = vpop.eup %14323 }
 0x970   : > { %v14326_v42 = vpop.eup %14325  ;;  %v11744_v12 = vadd.f32 1.0, %v14324_v15  ;;  %v19523_v15 = vld [vmem:[%s19838_s10] ss:$8 sps:$4 sm:$0xff]  }
 0x971   : > { %v14328_v7 = vpop.eup %14327  ;;  %v11745_v48 = vadd.f32 1.0, %v14326_v42  ;;  %12145 = vmatpush1.bf16.msra.mxu0 %v19523_v15 }
 0x972   : > { %v14330_v17 = vpop.eup %14329  ;;  %v11746_v50 = vadd.f32 1.0, %v14328_v7  ;;  %14339 = vrcp.f32 %v11744_v12  ;;  %14023 = vmatprep.subr.bf16.mxu0 %v19366_v1 }
 0x973   : > { %v14332_v51 = vpop.eup %14331  ;;  %v11747_v28 = vadd.f32 1.0, %v14330_v17  ;;  %14341 = vrcp.f32 %v11745_v48 }
 0x974   : > { %v14334_v54 = vpop.eup %14333  ;;  %14343 = vrcp.f32 %v11746_v50  ;;  %v11776_v32 = vadd.f32 1.0, %v14332_v51 }
 0x975   : > { %v14336_v6 = vpop.eup %14335  ;;  %14345 = vrcp.f32 %v11747_v28  ;;  %v11777_v45 = vadd.f32 1.0, %v14334_v54 }
 0x976   : > { %v14338_v11 = vpop.eup %14337  ;;  %v11778_v49 = vadd.f32 1.0, %v14336_v6  ;;  %14347 = vrcp.f32 %v11776_v32 }
 0x977   : > { %v11779_v47 = vadd.f32 1.0, %v14338_v11  ;;  %14349 = vrcp.f32 %v11777_v45 }
 0x978   : > { %14351 = vrcp.f32 %v11778_v49 }
 0x979   : > { %14353 = vrcp.f32 %v11779_v47 }
 0x97c   : > { %v14340_v16 = vpop.eup %14339 }
 0x97d   : > { %v14342_v55 = vpop.eup %14341 }
 0x97e   : > { %v14344_v63 = vpop.eup %14343 }
 0x97f   : > { %v14346_v13 = vpop.eup %14345 }
 0x980   : > { %v14348_v4 = vpop.eup %14347 }
 0x981   : > { %v14350_v33 = vpop.eup %14349  ;;  %v19481_v9 = vmul.f32 %v14348_v4, %v14340_v16 }
 0x982   : > { %v14352_v8 = vpop.eup %14351  ;;  %v19483_v37 = vmul.f32 %v14350_v33, %v14342_v55 }
 0x983   : > { %v14354_v26 = vpop.eup %14353  ;;  %v19485_v27 = vmul.f32 %v14352_v8, %v14344_v63  ;;  %v11792_v56 = vmul.f32 %v19481_v9, %v19481_v9 }
 0x984   : > { %v19492_v36 = vmul.f32 %v14354_v26, %v14346_v13  ;;  %v11793_v59 = vmul.f32 %v19483_v37, %v19483_v37 }
 0x985   : > { %v11794_v43 = vmul.f32 %v19485_v27, %v19485_v27  ;;  %v11796_v52 = vmul.f32 %v11792_v56, %v19509_v23 }
 0x986   : > { %v11795_v62 = vmul.f32 %v19492_v36, %v19492_v36  ;;  %v11797_v31 = vmul.f32 %v11793_v59, %v19504_v29  ;;  %v19561_v59 = vsub.f32 0.0, %v19465_v57 }
 0x987   : > { %v11798_v60 = vmul.f32 %v11794_v43, %v19500_v18  ;;  %v19564_v43 = vsub.f32 0.0, %v19467_v39 }
 0x988   : > { %v11799_v34 = vmul.f32 %v11795_v62, %v19506_v38 }
 0x989   : > { %v11800_v61 = vpack.c.bf16 %v11798_v60, %v11796_v52  ;;  %v12025_v60 = vmul.f32 %v19481_v9, %v19509_v23 }
 0x98a   : > { %v11801_v21 = vpack.c.bf16 %v11799_v34, %v11797_v31  ;;  %v19570_v34 = vsub.f32 0.0, %v19469_v5 }
 0x98c   : > { %11930 = vmatprep.mubr.bf16.mxu1 %v11801_v21  ;;  %v12026_v21 = vmul.f32 %v19483_v37, %v19504_v29 }
 0x98d   : > { %11931 = vmatmul.mubr.bf16.vlgmr.msra.gmra.mrb[172].mxu1 %v11800_v61  ;;  %v19576_v61 = vsub.f32 0.0, %v19473_v53 }
 0x98e   : > { %12010 = vmatprep.mubr.bf16.mxu1 %v19960_v10  ;;  %11979 = vmatpush1.bf16.msra.mxu1 %v19523_v15 }
 0x98f   : > { %14001 = vmatprep.subr.bf16.mxu1 %v19366_v1 }
 0xa60   : > { %v13995_v42 = vpop.f32.mrb[172].mxu1 }
 0xa61   : > { %v13996_v12 = vpop.f32.mrb[173].mxu1 }
 0xa62   : > { %v13997_v7 = vadd.f32 %v13996_v12, %v13995_v42  ;;  %v13998_v48 = vpop.f32.mrb[174].mxu1  ;;  %v12027_v12 = vmul.f32 %v19485_v27, %v19500_v18 }
 0xa63   : > { %v13999_v17 = vpop.f32.mrb[175].mxu1 }
 0xa64   : > { %v19531_v50 = vadd.f32 -1.0, %v13997_v7  ;;  %v14000_v51 = vadd.f32 %v13999_v17, %v13998_v48  ;;  %v12028_v17 = vmul.f32 %v19492_v36, %v19506_v38 }
 0xa66   : > { %v13905_v28 = vmul.f32 -2.0, %v19531_v50  ;;  %v19534_v54 = vadd.f32 -1.0, %v14000_v51  ;;  %v11941_v63 = vmax.f32 %v19531_v50, 0.0 }
 0xa68   : > { %v11947_v32 = vmul.f32 1.442695, %v13905_v28  ;;  %v13906_v6 = vmul.f32 -2.0, %v19534_v54  ;;  %v11942_v13 = vmax.f32 %v19534_v54, 0.0 }
 0xa6a   : > { %14355 = vpow2.f32 %v11947_v32  ;;  %v11949_v45 = vmul.f32 1.442695, %v13906_v6 }
 0xa6c   : > { %14357 = vpow2.f32 %v11949_v45 }
 0xa74   : > { %v14356_v11 = vpop.eup %14355 }
 0xa75   : > { %v11951_v49 = vadd.f32 1.0, %v14356_v11 }
 0xa76   : > { %v14358_v47 = vpop.eup %14357 }
 0xa77   : > { %14359 = vrcp.f32 %v11951_v49  ;;  %v11952_v16 = vadd.f32 1.0, %v14358_v47 }
 0xa79   : > { %14361 = vrcp.f32 %v11952_v16 }
 0xa81   : > { %v14360_v55 = vpop.eup %14359 }
 0xa82   : > { %v11957_v33 = vmul.f32 %v14360_v55, %v11941_v63 }
 0xa83   : > { %v14362_v4 = vpop.eup %14361 }
 0xa84   : > { %v11958_v8 = vmul.f32 %v14362_v4, %v11942_v13 }
 0xa86   : > { %v11963_v26 = vpack.c.bf16 %v11958_v8, %v11957_v33 }
 0xa88   : > { %13909 = vmatmul.mubr.msk.bf16.vlgmr.msra.gmra.mrb[176].mxu1 %vm11974_vm3, %v11963_v26 }
 0xa89   : > { %14002 = vmatpush3.bf16.msra.mxu1 %v19371_v25 }
 0xa8a   : > { %14003 = vmatprep.subr.bf16.mxu1 %v19377_v14 }
 0xa8d   : > { %14004 = vmatpush3.bf16.msra.mxu1 %v19383_v35 }
 0xa8e   : > { %14005 = vmatprep.subr.bf16.mxu1 %v19389_v58 }
 0xa91   : > { %14006 = vmatpush3.bf16.msra.mxu1 %v19395_v40 }
 0xa92   : > { %14007 = vmatprep.subr.bf16.mxu1 %v19401_v24 }
 0xa95   : > { %14008 = vmatpush3.bf16.msra.mxu1 %v19407_v22 }
 0xa96   : > { %14009 = vmatprep.subr.bf16.mxu1 %v19413_v41 }
 0xa99   : > { %14010 = vmatpush3.bf16.msra.mxu1 %v19419_v0 }
 0xa9a   : > { %14011 = vmatprep.subr.bf16.mxu1 %v19425_v30 }
 0xa9d   : > { %14012 = vmatpush3.bf16.msra.mxu1 %v19431_v3 }
 0xa9e   : > { %14013 = vmatprep.subr.bf16.mxu1 %v19437_v20 }
 0xaa1   : > { %14014 = vmatpush3.bf16.msra.mxu1 %v19443_v44 }
 0xaa2   : > { %14015 = vmatprep.subr.bf16.mxu1 %v19449_v19 }
 0xaa5   : > { %14016 = vmatpush3.bf16.msra.mxu1 %v19455_v46 }
 0xaa6   : > { %12311 = vmatprep.subr.bf16.mxu1 %v19518_v2 }
 0xb5b   : > { %v12012_v56 = vpop.f32.mrb[176].mxu1 }
 0xb5c   : > { %v12021_v62 = vadd.f32 %v12012_v56, %v19561_v59  ;;  %v12014_v31 = vpop.f32.mrb[177].mxu1 }
 0xb5d   : > { %v12022_v52 = vadd.f32 %v12014_v31, %v19564_v43  ;;  %v12016_v57 = vpop.f32.mrb[178].mxu1 }
 0xb5e   : > { %v12029_v39 = vmul.f32 %v12025_v60, %v12021_v62  ;;  %v12023_v42 = vadd.f32 %v12016_v57, %v19570_v34  ;;  %v12018_v7 = vpop.f32.mrb[179].mxu1 }
 0xb5f   : > { %v12030_v48 = vmul.f32 %v12026_v21, %v12022_v52  ;;  %v12024_v5 = vadd.f32 %v12018_v7, %v19576_v61 }
 0xb60   : > { %v12033_v51 = vmul.f32 0.01, %v12029_v39  ;;  %v12031_v28 = vmul.f32 %v12027_v12, %v12023_v42 }
 0xb61   : > { %v12034_v32 = vmul.f32 0.01, %v12030_v48  ;;  %v12032_v6 = vmul.f32 %v12028_v17, %v12024_v5 }
 0xb62   : > { %v12037_v53 = vsub.f32 %v19481_v9, %v12033_v51  ;;  %v12035_v45 = vmul.f32 0.01, %v12031_v28 }
 0xb63   : > { %v12038_v11 = vsub.f32 %v19483_v37, %v12034_v32  ;;  %v12036_v49 = vmul.f32 0.01, %v12032_v6 }
 0xb64   : > { %v12041_v47 = vand.u32 2147483647, %v12037_v53  ;;  %v12039_v16 = vsub.f32 %v19485_v27, %v12035_v45 }
 0xb65   : > { %v12042_v55 = vand.u32 2147483647, %v12038_v11  ;;  %v12040_v4 = vsub.f32 %v19492_v36, %v12036_v49 }
 0xb66   : > { %v13910_v33 = vadd.f32 -0.0099, %v12041_v47  ;;  %v12043_v8 = vand.u32 2147483647, %v12039_v16 }
 0xb67   : > { %v13911_v26 = vadd.f32 -0.0099, %v12042_v55  ;;  %v12044_v56 = vand.u32 2147483647, %v12040_v4 }
 0xb68   : > { %v12049_v62 = vmax.f32 %v13910_v33, 0.0  ;;  %v13912_v60 = vadd.f32 -0.0099, %v12043_v8 }
 0xb69   : > { %v12050_v31 = vmax.f32 %v13911_v26, 0.0  ;;  %v13913_v52 = vadd.f32 -0.0099, %v12044_v56 }
 0xb6a   : > { %v19589_v9 = vclamps-f32 %v12049_v62, 1.0  ;;  %v12051_v21 = vmax.f32 %v13912_v60, 0.0 }
 0xb6b   : > { %v19591_v37 = vclamps-f32 %v12050_v31, 1.0  ;;  %v12052_v57 = vmax.f32 %v13913_v52, 0.0 }
 0xb6c   : > { %v19593_v27 = vclamps-f32 %v12051_v21, 1.0  ;;  %v12061_v36 = vmul.f32 %v19589_v9, %v19589_v9 }
 0xb6d   : > { %v19597_v39 = vclamps-f32 %v12052_v57, 1.0  ;;  %v12062_v42 = vmul.f32 %v19591_v37, %v19591_v37 }
 0xb6e   : > { %v12063_v12 = vmul.f32 %v19593_v27, %v19593_v27  ;;  %v12065_v7 = vmul.f32 %v12061_v36, %v19509_v23 }
 0xb6f   : > { %v12064_v48 = vmul.f32 %v19597_v39, %v19597_v39  ;;  %v12066_v5 = vmul.f32 %v12062_v42, %v19504_v29 }
 0xb70   : > { %v12067_v17 = vmul.f32 %v12063_v12, %v19500_v18  ;;  %12120 = vst [vmem:[%s19608_s21] sm:$0xff] %v12065_v7 }
 0xb71   : > { %v12068_v51 = vmul.f32 %v12064_v48, %v19506_v38  ;;  %12121 = vst [vmem:[%s19608_s21 + $0x8] sm:$0xff] %v12066_v5 }
 0xb72   : > { %12122 = vst [vmem:[%s19608_s21 + $0x10] sm:$0xff] %v12067_v17  ;;  %v12069_v32 = vpack.c.bf16 %v12067_v17, %v12065_v7 }
 0xb73   : > { %v12070_v28 = vpack.c.bf16 %v12068_v51, %v12066_v5  ;;  %12123 = vst [vmem:[%s19608_s21 + $0x18] sm:$0xff] %v12068_v51 }
 0xb75   : > { %12103 = vmatprep.mubr.bf16.mxu1 %v12070_v28  ;;  %v12192_v28 = vmul.f32 %v19591_v37, %v19504_v29 }
 0xb76   : > { %12104 = vmatmul.mubr.bf16.vlgmr.msra.gmra.mrb[180].mxu1 %v12069_v32 }
 0xb77   : > { %12312 = vmatpush1.bf16.msra.mxu1 %v19523_v15  ;;  %12343 = vmatprep.mubr.bf16.mxu1 %v19960_v10 }
 0xb78   : > { %14045 = vmatprep.subr.bf16.mxu1 %v19366_v1 }
 0xc49   : > { %v14017_v6 = vpop.f32.mrb[180].mxu1 }
 0xc4a   : > { %v14018_v53 = vpop.f32.mrb[181].mxu1 }
 0xc4b   : > { %v14019_v45 = vadd.f32 %v14018_v53, %v14017_v6  ;;  %v14020_v11 = vpop.f32.mrb[182].mxu1 }
 0xc4c   : > { %v14021_v49 = vpop.f32.mrb[183].mxu1 }
 0xc4d   : > { %v13918_v47 = vadd.f32 -1.0, %v14019_v45  ;;  %v14022_v16 = vadd.f32 %v14021_v49, %v14020_v11  ;;  %v12193_v45 = vmul.f32 %v19593_v27, %v19500_v18 }
 0xc4f   : > { %v13920_v55 = vmul.f32 -2.0, %v13918_v47  ;;  %v13919_v4 = vadd.f32 -1.0, %v14022_v16  ;;  %v12114_v1 = vmax.f32 %v13918_v47, 0.0  ;;  %v12194_v47 = vmul.f32 %v19597_v39, %v19506_v38 }
 0xc51   : > { %v12128_v33 = vmul.f32 1.442695, %v13920_v55  ;;  %v13921_v8 = vmul.f32 -2.0, %v13919_v4  ;;  %v12115_v52 = vmax.f32 %v13919_v4, 0.0  ;;  %v12116_v21 = vmul.f32 0.1, %v12114_v1 }
 0xc53   : > { %14363 = vpow2.f32 %v12128_v33  ;;  %v12130_v26 = vmul.f32 1.442695, %v13921_v8  ;;  %v12117_v57 = vmul.f32 0.1, %v12115_v52  ;;  %v19620_v42 = vadd.f32 %v12116_v21, %v11941_v63 }
 0xc54   : > { %v12191_v63 = vmul.f32 %v19589_v9, %v19509_v23 }
 0xc55   : > { %14365 = vpow2.f32 %v12130_v26  ;;  %v19624_v12 = vadd.f32 %v12117_v57, %v11942_v13 }
 0xc5d   : > { %v14364_v56 = vpop.eup %14363 }
 0xc5e   : > { %v12132_v62 = vadd.f32 1.0, %v14364_v56 }
 0xc5f   : > { %v14366_v60 = vpop.eup %14365 }
 0xc60   : > { %14367 = vrcp.f32 %v12132_v62  ;;  %v12133_v31 = vadd.f32 1.0, %v14366_v60 }
 0xc62   : > { %14369 = vrcp.f32 %v12133_v31 }
 0xc6a   : > { %v14368_v36 = vpop.eup %14367 }
 0xc6b   : > { %v12138_v48 = vmul.f32 %v14368_v36, %v19620_v42 }
 0xc6c   : > { %v14370_v7 = vpop.eup %14369 }
 0xc6d   : > { %v12139_v5 = vmul.f32 %v14370_v7, %v19624_v12 }
 0xc6f   : > { %v12140_v17 = vpack.c.bf16 %v12139_v5, %v12138_v48 }
 0xc71   : > { %13922 = vmatmul.mubr.msk.bf16.vlgmr.msra.gmra.mrb[176].mxu0 %vm11974_vm3, %v12140_v17 }
 0xc72   : > { %14024 = vmatpush3.bf16.msra.mxu0 %v19371_v25 }
 0xc73   : > { %14025 = vmatprep.subr.bf16.mxu0 %v19377_v14 }
 0xc76   : > { %14026 = vmatpush3.bf16.msra.mxu0 %v19383_v35 }
 0xc77   : > { %14027 = vmatprep.subr.bf16.mxu0 %v19389_v58 }
 0xc7a   : > { %14028 = vmatpush3.bf16.msra.mxu0 %v19395_v40 }
 0xc7b   : > { %14029 = vmatprep.subr.bf16.mxu0 %v19401_v24 }
 0xc7e   : > { %14030 = vmatpush3.bf16.msra.mxu0 %v19407_v22 }
 0xc7f   : > { %14031 = vmatprep.subr.bf16.mxu0 %v19413_v41 }
 0xc82   : > { %14032 = vmatpush3.bf16.msra.mxu0 %v19419_v0 }
 0xc83   : > { %14033 = vmatprep.subr.bf16.mxu0 %v19425_v30 }
 0xc86   : > { %14034 = vmatpush3.bf16.msra.mxu0 %v19431_v3 }
 0xc87   : > { %14035 = vmatprep.subr.bf16.mxu0 %v19437_v20 }
 0xc8a   : > { %14036 = vmatpush3.bf16.msra.mxu0 %v19443_v44 }
 0xc8b   : > { %14037 = vmatprep.subr.bf16.mxu0 %v19449_v19 }
 0xc8e   : > { %14038 = vmatpush3.bf16.msra.mxu0 %v19455_v46 }
 0xc8f   : > { %12478 = vmatprep.subr.bf16.mxu0 %v19518_v2 }
 0xd44   : > { %v12178_v50 = vpop.f32.mrb[176].mxu0 }
 0xd45   : > { %v12187_v54 = vadd.f32 %v12178_v50, %v19561_v59  ;;  %v12180_v13 = vpop.f32.mrb[177].mxu0 }
 0xd46   : > { %v12188_v51 = vadd.f32 %v12180_v13, %v19564_v43  ;;  %v12182_v32 = vpop.f32.mrb[178].mxu0 }
 0xd47   : > { %v12195_v6 = vmul.f32 %v12191_v63, %v12187_v54  ;;  %v12189_v53 = vadd.f32 %v12182_v32, %v19570_v34  ;;  %v12184_v2 = vpop.f32.mrb[179].mxu0 }
 0xd48   : > { %v12196_v11 = vmul.f32 %v12192_v28, %v12188_v51  ;;  %v12190_v49 = vadd.f32 %v12184_v2, %v19576_v61 }
 0xd49   : > { %v12199_v16 = vmul.f32 0.0099, %v12195_v6  ;;  %v12197_v55 = vmul.f32 %v12193_v45, %v12189_v53 }
 0xd4a   : > { %v12200_v4 = vmul.f32 0.0099, %v12196_v11  ;;  %v12198_v33 = vmul.f32 %v12194_v47, %v12190_v49 }
 0xd4b   : > { %v12203_v8 = vsub.f32 %v19589_v9, %v12199_v16  ;;  %v12201_v26 = vmul.f32 0.0099, %v12197_v55 }
 0xd4c   : > { %v12204_v56 = vsub.f32 %v19591_v37, %v12200_v4  ;;  %v12202_v62 = vmul.f32 0.0099, %v12198_v33 }
 0xd4d   : > { %v12207_v60 = vand.u32 2147483647, %v12203_v8  ;;  %v12205_v31 = vsub.f32 %v19593_v27, %v12201_v26 }
 0xd4e   : > { %v12208_v1 = vand.u32 2147483647, %v12204_v56  ;;  %v12206_v52 = vsub.f32 %v19597_v39, %v12202_v62 }
 0xd4f   : > { %v13923_v21 = vadd.f32 -0.009801, %v12207_v60  ;;  %v12209_v57 = vand.u32 2147483647, %v12205_v31 }
 0xd50   : > { %v13924_v36 = vadd.f32 -0.009801, %v12208_v1  ;;  %v12210_v7 = vand.u32 2147483647, %v12206_v52 }
 0xd51   : > { %v12215_v48 = vmax.f32 %v13923_v21, 0.0  ;;  %v13925_v5 = vadd.f32 -0.009801, %v12209_v57 }
 0xd52   : > { %v12216_v17 = vmax.f32 %v13924_v36, 0.0  ;;  %v13926_v50 = vadd.f32 -0.009801, %v12210_v7 }
 0xd53   : > { %v19661_v9 = vclamps-f32 %v12215_v48, 1.0  ;;  %v12217_v37 = vmax.f32 %v13925_v5, 0.0 }
 0xd54   : > { %v19663_v54 = vclamps-f32 %v12216_v17, 1.0  ;;  %v12218_v27 = vmax.f32 %v13926_v50, 0.0 }
 0xd55   : > { %v19665_v63 = vclamps-f32 %v12217_v37, 1.0  ;;  %v12227_v39 = vmul.f32 %v19661_v9, %v19661_v9 }
 0xd56   : > { %v19669_v13 = vclamps-f32 %v12218_v27, 1.0  ;;  %v12228_v51 = vmul.f32 %v19663_v54, %v19663_v54 }
 0xd57   : > { %v12229_v28 = vmul.f32 %v19665_v63, %v19665_v63  ;;  %v12231_v32 = vmul.f32 %v12227_v39, %v19509_v23 }
 0xd58   : > { %v12230_v6 = vmul.f32 %v19669_v13, %v19669_v13  ;;  %v12232_v53 = vmul.f32 %v12228_v51, %v19504_v29 }
 0xd59   : > { %v12233_v45 = vmul.f32 %v12229_v28, %v19500_v18  ;;  %13933 = vst [vmem:[%s19608_s21 + $0x20] sm:$0xff] %v12231_v32 }
 0xd5a   : > { %v12234_v2 = vmul.f32 %v12230_v6, %v19506_v38  ;;  %13934 = vst [vmem:[%s19608_s21 + $0x28] sm:$0xff] %v12232_v53 }
 0xd5b   : > { %13935 = vst [vmem:[%s19608_s21 + $0x30] sm:$0xff] %v12233_v45  ;;  %v12235_v49 = vpack.c.bf16 %v12233_v45, %v12231_v32 }
 0xd5c   : > { %v12236_v11 = vpack.c.bf16 %v12234_v2, %v12232_v53  ;;  %13936 = vst [vmem:[%s19608_s21 + $0x38] sm:$0xff] %v12234_v2 }
 0xd5e   : > { %12269 = vmatprep.mubr.bf16.mxu0 %v12236_v11 }
 0xd5f   : > { %12270 = vmatmul.mubr.bf16.vlgmr.msra.gmra.mrb[180].mxu0 %v12235_v49 }
 0xd60   : > { %12479 = vmatpush1.bf16.msra.mxu0 %v19523_v15  ;;  %12510 = vmatprep.mubr.bf16.mxu0 %v19960_v10 }
 0xe32   : > { %v14039_v47 = vpop.f32.mrb[180].mxu0 }
 0xe33   : > { %v14040_v16 = vpop.f32.mrb[181].mxu0 }
 0xe34   : > { %v14041_v55 = vadd.f32 %v14040_v16, %v14039_v47  ;;  %v14042_v4 = vpop.f32.mrb[182].mxu0 }
 0xe35   : > { %v14043_v33 = vpop.f32.mrb[183].mxu0 }
 0xe36   : > { %v13931_v8 = vadd.f32 -1.0, %v14041_v55  ;;  %v14044_v26 = vadd.f32 %v14043_v33, %v14042_v4 }
 0xe38   : > { %v13937_v56 = vmul.f32 -2.0, %v13931_v8  ;;  %v13932_v62 = vadd.f32 -1.0, %v14044_v26  ;;  %v12280_v10 = vmax.f32 %v13931_v8, 0.0 }
 0xe3a   : > { %v12295_v60 = vmul.f32 1.442695, %v13937_v56  ;;  %v13938_v31 = vmul.f32 -2.0, %v13932_v62  ;;  %v12281_v36 = vmax.f32 %v13932_v62, 0.0  ;;  %v12282_v7 = vmul.f32 0.099, %v12280_v10 }
 0xe3c   : > { %14371 = vpow2.f32 %v12295_v60  ;;  %v12297_v1 = vmul.f32 1.442695, %v13938_v31  ;;  %v12283_v48 = vmul.f32 0.099, %v12281_v36  ;;  %v19688_v17 = vadd.f32 %v12282_v7, %v19620_v42 }
 0xe3e   : > { %14373 = vpow2.f32 %v12297_v1  ;;  %v19691_v50 = vadd.f32 %v12283_v48, %v19624_v12 }
 0xe46   : > { %v14372_v52 = vpop.eup %14371 }
 0xe47   : > { %v12299_v21 = vadd.f32 1.0, %v14372_v52 }
 0xe48   : > { %v14374_v57 = vpop.eup %14373 }
 0xe49   : > { %14375 = vrcp.f32 %v12299_v21  ;;  %v12300_v15 = vadd.f32 1.0, %v14374_v57 }
 0xe4b   : > { %14377 = vrcp.f32 %v12300_v15 }
 0xe53   : > { %v14376_v5 = vpop.eup %14375 }
 0xe54   : > { %v12305_v27 = vmul.f32 %v14376_v5, %v19688_v17 }
 0xe55   : > { %v14378_v37 = vpop.eup %14377 }
 0xe56   : > { %v12306_v39 = vmul.f32 %v14378_v37, %v19691_v50 }
 0xe58   : > { %v12307_v51 = vpack.c.bf16 %v12306_v39, %v12305_v27 }
 0xe5a   : > { %13939 = vmatmul.mubr.msk.bf16.vlgmr.msra.gmra.mrb[184].mxu1 %vm11974_vm3, %v12307_v51 }
 0xe5b   : > { %14046 = vmatpush3.bf16.msra.mxu1 %v19371_v25 }
 0xe5c   : > { %14047 = vmatprep.subr.bf16.mxu1 %v19377_v14 }
 0xe5f   : > { %14048 = vmatpush3.bf16.msra.mxu1 %v19383_v35  ;;  %v12358_v35 = vmul.f32 %v19661_v9, %v19509_v23 }
 0xe60   : > { %14049 = vmatprep.subr.bf16.mxu1 %v19389_v58 }
 0xe63   : > { %14050 = vmatpush3.bf16.msra.mxu1 %v19395_v40 }
 0xe64   : > { %14051 = vmatprep.subr.bf16.mxu1 %v19401_v24  ;;  %v12359_v24 = vmul.f32 %v19663_v54, %v19504_v29 }
 0xe67   : > { %14052 = vmatpush3.bf16.msra.mxu1 %v19407_v22 }
 0xe68   : > { %14053 = vmatprep.subr.bf16.mxu1 %v19413_v41 }
 0xe6b   : > { %14054 = vmatpush3.bf16.msra.mxu1 %v19419_v0 }
 0xe6c   : > { %14055 = vmatprep.subr.bf16.mxu1 %v19425_v30  ;;  %v12360_v30 = vmul.f32 %v19665_v63, %v19500_v18 }
 0xe6f   : > { %14056 = vmatpush3.bf16.msra.mxu1 %v19431_v3 }
 0xe70   : > { %14057 = vmatprep.subr.bf16.mxu1 %v19437_v20 }
 0xe73   : > { %14058 = vmatpush3.bf16.msra.mxu1 %v19443_v44 }
 0xe74   : > { %14059 = vmatprep.subr.bf16.mxu1 %v19449_v19  ;;  %v12361_v19 = vmul.f32 %v19669_v13, %v19506_v38 }
 0xe77   : > { %14060 = vmatpush3.bf16.msra.mxu1 %v19455_v46 }
 0xf2d   : > { %v12345_v25 = vpop.f32.mrb[184].mxu1 }
 0xf2e   : > { %v12354_v14 = vadd.f32 %v12345_v25, %v19561_v59  ;;  %v12347_v58 = vpop.f32.mrb[185].mxu1 }
 0xf2f   : > { %v12355_v40 = vadd.f32 %v12347_v58, %v19564_v43  ;;  %v12349_v22 = vpop.f32.mrb[186].mxu1 }
 0xf30   : > { %v12362_v41 = vmul.f32 %v12358_v35, %v12354_v14  ;;  %v12356_v0 = vadd.f32 %v12349_v22, %v19570_v34  ;;  %v12351_v3 = vpop.f32.mrb[187].mxu1 }
 0xf31   : > { %v12363_v20 = vmul.f32 %v12359_v24, %v12355_v40  ;;  %v12357_v44 = vadd.f32 %v12351_v3, %v19576_v61 }
 0xf32   : > { %v12366_v46 = vmul.f32 0.009801, %v12362_v41  ;;  %v12364_v42 = vmul.f32 %v12360_v30, %v12356_v0 }
 0xf33   : > { %v12367_v12 = vmul.f32 0.009801, %v12363_v20  ;;  %v12365_v28 = vmul.f32 %v12361_v19, %v12357_v44 }
 0xf34   : > { %v12370_v32 = vsub.f32 %v19661_v9, %v12366_v46  ;;  %v12368_v6 = vmul.f32 0.009801, %v12364_v42 }
 0xf35   : > { %v12371_v53 = vsub.f32 %v19663_v54, %v12367_v12  ;;  %v12369_v45 = vmul.f32 0.009801, %v12365_v28 }
 0xf36   : > { %v12374_v2 = vand.u32 2147483647, %v12370_v32  ;;  %v12372_v11 = vsub.f32 %v19665_v63, %v12368_v6 }
 0xf37   : > { %v12375_v49 = vand.u32 2147483647, %v12371_v53  ;;  %v12373_v47 = vsub.f32 %v19669_v13, %v12369_v45 }
 0xf38   : > { %v13940_v16 = vadd.f32 -0.00970299, %v12374_v2  ;;  %v12376_v55 = vand.u32 2147483647, %v12372_v11 }
 0xf39   : > { %v13941_v4 = vadd.f32 -0.00970299, %v12375_v49  ;;  %v12377_v33 = vand.u32 2147483647, %v12373_v47 }
 0xf3a   : > { %v12382_v8 = vmax.f32 %v13940_v16, 0.0  ;;  %v13942_v26 = vadd.f32 -0.00970299, %v12376_v55 }
 0xf3b   : > { %v12383_v56 = vmax.f32 %v13941_v4, 0.0  ;;  %v13943_v62 = vadd.f32 -0.00970299, %v12377_v33 }
 0xf3c   : > { %v19727_v9 = vclamps-f32 %v12382_v8, 1.0  ;;  %v12384_v54 = vmax.f32 %v13942_v26, 0.0 }
 0xf3d   : > { %v19729_v60 = vclamps-f32 %v12383_v56, 1.0  ;;  %v12385_v63 = vmax.f32 %v13943_v62, 0.0 }
 0xf3e   : > { %v19731_v31 = vclamps-f32 %v12384_v54, 1.0  ;;  %v12394_v13 = vmul.f32 %v19727_v9, %v19727_v9  ;;  %v12525_v47 = vmul.f32 %v19727_v9, %v19509_v23 }
 0xf3f   : > { %v19735_v1 = vclamps-f32 %v12385_v63, 1.0  ;;  %v12395_v52 = vmul.f32 %v19729_v60, %v19729_v60 }
 0xf40   : > { %v12396_v21 = vmul.f32 %v19731_v31, %v19731_v31  ;;  %v12398_v57 = vmul.f32 %v12394_v13, %v19509_v23  ;;  %v12527_v8 = vmul.f32 %v19731_v31, %v19500_v18 }
 0xf41   : > { %v12397_v15 = vmul.f32 %v19735_v1, %v19735_v1  ;;  %v12399_v10 = vmul.f32 %v12395_v52, %v19504_v29  ;;  %v12528_v62 = vmul.f32 %v19735_v1, %v19506_v38 }
 0xf42   : > { %v12400_v36 = vmul.f32 %v12396_v21, %v19500_v18  ;;  %13950 = vst [vmem:[%s19608_s21 + $0x40] sm:$0xff] %v12398_v57 }
 0xf43   : > { %v12401_v7 = vmul.f32 %v12397_v15, %v19506_v38  ;;  %13951 = vst [vmem:[%s19608_s21 + $0x48] sm:$0xff] %v12399_v10 }
 0xf44   : > { %13952 = vst [vmem:[%s19608_s21 + $0x50] sm:$0xff] %v12400_v36  ;;  %v12402_v5 = vpack.c.bf16 %v12400_v36, %v12398_v57 }
 0xf45   : > { %v12403_v48 = vpack.c.bf16 %v12401_v7, %v12399_v10  ;;  %13953 = vst [vmem:[%s19608_s21 + $0x58] sm:$0xff] %v12401_v7 }
 0xf47   : > { %12436 = vmatprep.mubr.bf16.mxu1 %v12403_v48 }
 0xf48   : > { %12437 = vmatmul.mubr.bf16.vlgmr.msra.gmra.mrb[188].mxu1 %v12402_v5 }
0x101b   : > { %v14061_v37 = vpop.f32.mrb[188].mxu1 }
0x101c   : > { %v14062_v27 = vpop.f32.mrb[189].mxu1 }
0x101d   : > { %v14063_v39 = vadd.f32 %v14062_v27, %v14061_v37  ;;  %v14064_v51 = vpop.f32.mrb[190].mxu1 }
0x101e   : > { %v14065_v25 = vpop.f32.mrb[191].mxu1 }
0x101f   : > { %v13948_v14 = vadd.f32 -1.0, %v14063_v39  ;;  %v14066_v35 = vadd.f32 %v14065_v25, %v14064_v51 }
0x1021   : > { %v13954_v58 = vmul.f32 -2.0, %v13948_v14  ;;  %v13949_v40 = vadd.f32 -1.0, %v14066_v35  ;;  %v12447_v44 = vmax.f32 %v13948_v14, 0.0 }
0x1023   : > { %v12462_v24 = vmul.f32 1.442695, %v13954_v58  ;;  %v13955_v22 = vmul.f32 -2.0, %v13949_v40  ;;  %v12448_v19 = vmax.f32 %v13949_v40, 0.0  ;;  %v12449_v46 = vmul.f32 0.09801, %v12447_v44 }
0x1024   : > { %v12617_v44 = vld [vmem:[%s19608_s21 + $0x28] sm:$0xff] (%p14519_p4) }
0x1025   : > { %14379 = vpow2.f32 %v12462_v24  ;;  %v12464_v41 = vmul.f32 1.442695, %v13955_v22  ;;  %v12450_v42 = vmul.f32 0.09801, %v12448_v19  ;;  %v12451_v28 = vadd.f32 %v12449_v46, %v19688_v17  ;;  %12618 = vst [vmem:[%s19784_s24 + $0x48] sm:$0xff] (%p14519_p4), %v12617_v44  ;;  %v12619_v19 = vld [vmem:[%s19608_s21 + $0x30] sm:$0xff] (%p14519_p4) }
0x1026   : > { %v12526_v17 = vmul.f32 %v19729_v60, %v19504_v29  ;;  %v12621_v46 = vld [vmem:[%s19608_s21 + $0x38] sm:$0xff] (%p14519_p4)  ;;  %12620 = vst [vmem:[%s19784_s24 + $0x50] sm:$0xff] (%p14519_p4), %v12619_v19 }
0x1027   : > { %14381 = vpow2.f32 %v12464_v41  ;;  %v12452_v32 = vadd.f32 %v12450_v42, %v19691_v50  ;;  %v12623_v42 = vld [vmem:[%s19608_s21 + $0x40] sm:$0xff] (%p14519_p4)  ;;  %12622 = vst [vmem:[%s19784_s24 + $0x58] sm:$0xff] (%p14519_p4), %v12621_v46 }
0x1028   : > { %12624 = vst [vmem:[%s19784_s24 + $0x80] sm:$0xff] (%p14519_p4), %v12623_v42 }
0x102f   : > { %v14380_v0 = vpop.eup %14379 }
0x1030   : > { %v12466_v30 = vadd.f32 1.0, %v14380_v0 }
0x1031   : > { %v14382_v3 = vpop.eup %14381 }
0x1032   : > { %14383 = vrcp.f32 %v12466_v30  ;;  %v12467_v20 = vadd.f32 1.0, %v14382_v3 }
0x1034   : > { %14385 = vrcp.f32 %v12467_v20  ;;  %v12615_v20 = vld [vmem:[%s19608_s21 + $0x20] sm:$0xff] (%p14519_p4) }
0x1035   : > { %12616 = vst [vmem:[%s19784_s24 + $0x40] sm:$0xff] (%p14519_p4), %v12615_v20 }
0x103c   : > { %v14384_v12 = vpop.eup %14383 }
0x103d   : > { %v12472_v53 = vmul.f32 %v14384_v12, %v12451_v28  ;;  %v12625_v12 = vld [vmem:[%s19608_s21 + $0x48] sm:$0xff] (%p14519_p4)  ;;  %v12627_v28 = vld [vmem:[%s19608_s21 + $0x50] sm:$0xff] (%p14519_p4) }
0x103e   : > { %v14386_v6 = vpop.eup %14385  ;;  %12626 = vst [vmem:[%s19784_s24 + $0x88] sm:$0xff] (%p14519_p4), %v12625_v12  ;;  %12628 = vst [vmem:[%s19784_s24 + $0x90] sm:$0xff] (%p14519_p4), %v12627_v28 }
0x103f   : > { %v12473_v45 = vmul.f32 %v14386_v6, %v12452_v32  ;;  %v12629_v32 = vld [vmem:[%s19608_s21 + $0x58] sm:$0xff] (%p14519_p4) }
0x1040   : > { %12630 = vst [vmem:[%s19784_s24 + $0x98] sm:$0xff] (%p14519_p4), %v12629_v32 }
0x1041   : > { %v12474_v2 = vpack.c.bf16 %v12473_v45, %v12472_v53 }
0x1043   : > { %13956 = vmatmul.mubr.msk.bf16.vlgmr.msra.gmra.mrb[184].mxu0 %vm11974_vm3, %v12474_v2 }
0x1116   : > { %v12512_v11 = vpop.f32.mrb[184].mxu0 }
0x1117   : > { %v12521_v49 = vadd.f32 %v12512_v11, %v19561_v59  ;;  %v12514_v16 = vpop.f32.mrb[185].mxu0 }
0x1118   : > { %v12522_v55 = vadd.f32 %v12514_v16, %v19564_v43  ;;  %v12516_v4 = vpop.f32.mrb[186].mxu0 }
0x1119   : > { %v12529_v50 = vmul.f32 %v12525_v47, %v12521_v49  ;;  %v12523_v33 = vadd.f32 %v12516_v4, %v19570_v34  ;;  %v12518_v26 = vpop.f32.mrb[187].mxu0 }
0x111a   : > { %v12530_v56 = vmul.f32 %v12526_v17, %v12522_v55  ;;  %v12524_v59 = vadd.f32 %v12518_v26, %v19576_v61 }
0x111b   : > { %v12533_v54 = vmul.f32 0.00970299, %v12529_v50  ;;  %v12531_v63 = vmul.f32 %v12527_v8, %v12523_v33 }
0x111c   : > { %v12534_v43 = vmul.f32 0.00970299, %v12530_v56  ;;  %v12532_v13 = vmul.f32 %v12528_v62, %v12524_v59 }
0x111d   : > { %v12537_v52 = vsub.f32 %v19727_v9, %v12533_v54  ;;  %v12535_v21 = vmul.f32 0.00970299, %v12531_v63 }
0x111e   : > { %v12538_v57 = vsub.f32 %v19729_v60, %v12534_v43  ;;  %v12536_v34 = vmul.f32 0.00970299, %v12532_v13 }
0x111f   : > { %v12541_v15 = vand.u32 2147483647, %v12537_v52  ;;  %v12539_v10 = vsub.f32 %v19731_v31, %v12535_v21 }
0x1120   : > { %v12542_v36 = vand.u32 2147483647, %v12538_v57  ;;  %v12540_v7 = vsub.f32 %v19735_v1, %v12536_v34 }
0x1121   : > { %v13957_v61 = vadd.f32 -0.00960596, %v12541_v15  ;;  %v12543_v48 = vand.u32 2147483647, %v12539_v10 }
0x1122   : > { %v13958_v5 = vadd.f32 -0.00960596, %v12542_v36  ;;  %v12544_v37 = vand.u32 2147483647, %v12540_v7 }
0x1123   : > { %v12549_v27 = vmax.f32 %v13957_v61, 0.0  ;;  %v13959_v39 = vadd.f32 -0.00960596, %v12543_v48 }
0x1124   : > { %v12550_v51 = vmax.f32 %v13958_v5, 0.0  ;;  %v13960_v9 = vadd.f32 -0.00960596, %v12544_v37 }
0x1125   : > { %v13961_v25 = vclamps-f32 %v12549_v27, 1.0  ;;  %v12551_v60 = vmax.f32 %v13959_v39, 0.0 }
0x1126   : > { %v13962_v14 = vclamps-f32 %v12550_v51, 1.0  ;;  %v12552_v35 = vmax.f32 %v13960_v9, 0.0 }
0x1127   : > { %v12561_v31 = vmul.f32 %v13961_v25, %v13961_v25  ;;  %v13963_v58 = vclamps-f32 %v12551_v60, 1.0 }
0x1128   : > { %v12562_v40 = vmul.f32 %v13962_v14, %v13962_v14  ;;  %v13964_v1 = vclamps-f32 %v12552_v35, 1.0  ;;  %12590 = sbr.rel (!%p14519_p4) target bundleno = 4407 (0x1137), region = 72 }
0x1129   : > { %v12565_v24 = vmul.f32 %v12561_v31, %v19509_v23  ;;  %v12563_v22 = vmul.f32 %v13963_v58, %v13963_v58  ;;  %v12613_v23 = vld [vmem:[%s19608_s21 + $0x18] sm:$0xff] (%p14519_p4) }
0x112a   : > { %v12566_v41 = vmul.f32 %v12562_v40, %v19504_v29  ;;  %v12564_v0 = vmul.f32 %v13964_v1, %v13964_v1  ;;  %v12609_v29 = vld [vmem:[%s19608_s21 + $0x8] sm:$0xff] (%p14519_p4)  ;;  %12614 = vst [vmem:[%s19784_s24 + $0x18] sm:$0xff] (%p14519_p4), %v12613_v23 }
0x112b   : > { %13965 = vst [vmem:[%s19608_s21 + $0x60] sm:$0xff] %v12565_v24  ;;  %v12567_v30 = vmul.f32 %v12563_v22, %v19500_v18  ;;  %v12607_v18 = vld [vmem:[%s19608_s21] sm:$0xff] (%p14519_p4)  ;;  %12610 = vst [vmem:[%s19784_s24 + $0x8] sm:$0xff] (%p14519_p4), %v12609_v29 }
0x112c   : > { %13966 = vst [vmem:[%s19608_s21 + $0x68] sm:$0xff] %v12566_v41  ;;  %v12568_v3 = vmul.f32 %v12564_v0, %v19506_v38  ;;  %v12611_v38 = vld [vmem:[%s19608_s21 + $0x10] sm:$0xff] (%p14519_p4)  ;;  %12608 = vst [vmem:[%s19784_s24] sm:$0xff] (%p14519_p4), %v12607_v18 }
0x112d   : > { %13967 = vst [vmem:[%s19608_s21 + $0x70] sm:$0xff] %v12567_v30  ;;  %12612 = vst [vmem:[%s19784_s24 + $0x10] sm:$0xff] (%p14519_p4), %v12611_v38 }
0x112e   : > { %13968 = vst [vmem:[%s19608_s21 + $0x78] sm:$0xff] %v12568_v3 }
0x1132   : > { %v12631_v6 = vld [vmem:[%s19608_s21 + $0x60] sm:$0xff] }
0x1133   : > { %v12633_v53 = vld [vmem:[%s19608_s21 + $0x68] sm:$0xff]  ;;  %12632 = vst [vmem:[%s19784_s24 + $0xc0] sm:$0xff] %v12631_v6 }
0x1134   : > { %v12635_v45 = vld [vmem:[%s19608_s21 + $0x70] sm:$0xff]  ;;  %12634 = vst [vmem:[%s19784_s24 + $0xc8] sm:$0xff] %v12633_v53 }
0x1135   : > { %12636 = vst [vmem:[%s19784_s24 + $0xd0] sm:$0xff] %v12635_v45  ;;  %v12637_v2 = vld [vmem:[%s19608_s21 + $0x78] sm:$0xff] }
0x1136   : > { %12638 = vst [vmem:[%s19784_s24 + $0xd8] sm:$0xff] %v12637_v2 }
0x1137 PF: > { %p20_p9 = scmp.ge.s32.totalorder %s14509_s25, 4   ;;  %s19978_s21 = smov %s14415_s22 }
0x1138   : > { %s19979_s22 = smov %s14517_s28  ;;  %s19980_s23 = smov %s14509_s25 }
0x1139   :  { %22 = sbr.rel (!%p20_p9) target bundleno = 2 (0x2), region = 138 }

</bundles_post_ra>
